<compile_context>
chip_gen: v5e
topology: v5e:2x2
jax: 0.10.0
libtpu: 0.0.40
codegen_flags: <defaults>
</compile_context>

<pallas_src>
import functools

import jax
import jax.numpy as jnp
from jax import lax
from jax.experimental import pallas as pl
from jax.experimental.pallas import tpu as pltpu

H, W = 64, 128          # per-map occupancy grid
BORDER = 3              # corner_peaks min_distance (exclude_border)
N_THIN_MAX = 64         # thinning iteration upper bound (early exit)
N_CC_MAX = 256          # CC propagation sweep upper bound (early exit)
CC_UNROLL = 8           # sweeps per convergence check
MAX_PACK = 4            # max maps packed per grid step
SENTINEL = 1.0e9
HARRIS_K = 0.05         # skimage corner_harris default k
THRESH_REL = 0.1        # corner_peaks relative threshold
MIN_DISTANCE = 3        # corner_peaks min_distance (module default)
BREAK_RADIUS = 2        # detect_branches break_radius (module default)

assert N_CC_MAX % CC_UNROLL == 0


def _roll0(x, dy):
    """result[i, j] = x[(i + dy) % R, j]; zeroed borders make wrap == zero pad."""
    return pltpu.roll(x, (-dy) % x.shape[0], axis=0)


def _roll1(x, dx):
    """result[i, j] = x[i, (j + dx) % C]."""
    return pltpu.roll(x, (-dx) % x.shape[1], axis=1)


def _maxpool(x, r):
    """Separable (2r+1)^2 square max filter via log-composed shifts."""
    def axis_pass(v, roll):
        m = jnp.maximum(v, jnp.maximum(roll(v, 1), roll(v, -1)))          # +-1
        if r == 1:
            return m
        if r >= 3:
            m = jnp.maximum(m, jnp.maximum(roll(m, 2), roll(m, -2)))      # +-3
            return m
        return jnp.maximum(m, jnp.maximum(roll(v, 2), roll(v, -2)))       # +-2
    return axis_pass(axis_pass(x, _roll1), _roll0)


# ----------------------- host-built per-call invariants -----------------------

def _band_matrix(n, dtype):
    """Banded binomial [1 4 6 4 1]/16 smoothing matrix (n, n)."""
    i = jnp.arange(n)[:, None]
    j = jnp.arange(n)[None, :]
    d = jnp.abs(i - j)
    w = jnp.where(d == 0, 6.0, jnp.where(d == 1, 4.0, jnp.where(d == 2, 1.0, 0.0)))
    return (w * (1.0 / 16.0)).astype(dtype)


def _const_planes(bt):
    """Interior (non-border) mask and flat-index label plane for a Bt-slab."""
    rows = bt * H
    r_in = jnp.arange(rows) % H
    c = jnp.arange(W)
    rin = (r_in >= BORDER) & (r_in < H - BORDER)
    cin = (c >= BORDER) & (c < W - BORDER)
    interior = (rin[:, None] & cin[None, :]).astype(jnp.float32)
    lin = (jnp.arange(rows)[:, None] * W + c[None, :] + 1).astype(jnp.float32)
    return interior, lin


def _choose_bt(batch):
    """Pack up to MAX_PACK maps per step but keep >=2 grid steps when possible
    (so both v7x TensorCores stay busy)."""
    for bt in range(min(MAX_PACK, batch), 0, -1):
        if batch % bt == 0 and (batch // bt) % 2 == 0:
            return bt
    for bt in range(min(MAX_PACK, batch), 0, -1):
        if batch % bt == 0:
            return bt
    return 1


# --------------------------------- kernel ---------------------------------

def skeleton_map_kernel(fmap_ref, interior_ref, lin_ref, gh_ref, gw_ref,
                        skel_ref, branch_ref, corner_ref, label_ref, *, bt):
    interior = interior_ref[...]
    img = jnp.where(fmap_ref[...] > 0.5, interior, 0.0)

    # ---------------- Zhang-Suen thinning (skeletonize), early-exit ----------------
    def thin_substep(im, second):
        north = _roll0(im, -1)   # p2
        south = _roll0(im, 1)    # p6
        # Walk the ring p2 p3 p4 p5 p6 p7 p8 p9 generating lane-rolled
        # neighbours just in time; accumulate neighbour count b and the
        # 0->1 transition count a = sum(relu(next - prev)).
        ring = (
            lambda: north,               # p2
            lambda: _roll1(north, 1),    # p3
            lambda: _roll1(im, 1),       # p4
            lambda: _roll1(south, 1),    # p5
            lambda: south,               # p6
            lambda: _roll1(south, -1),   # p7
            lambda: _roll1(im, -1),      # p8
            lambda: _roll1(north, -1),   # p9
        )
        first = ring[0]()
        prev = first
        b = first
        a = jnp.zeros_like(im)
        for fn in ring[1:]:
            cur = fn()
            b = b + cur
            a = a + jnp.maximum(cur - prev, 0.0)
            prev = cur
        a = a + jnp.maximum(first - prev, 0.0)     # close the ring p9 -> p2

        east = _roll1(im, 1)   # p4 (re-rolled; XLU is idle in this VALU-bound loop)
        west = _roll1(im, -1)  # p8
        if not second:
            # p2*p4*p6 == 0 and p4*p6*p8 == 0  <=>  p4*p6*(p2+p8) == 0
            prod = east * south * (north + west)
        else:
            # p2*p4*p8 == 0 and p2*p6*p8 == 0  <=>  p2*p8*(p4+p6)
            prod = north * west * (east + south)

        cond = ((im > 0.5) & (b >= 2.0) & (b <= 6.0) & (a == 1.0) & (prod < 0.5))
        return jnp.where(cond, 0.0, im)

    def thin_cond(carry):
        i, _, changed = carry
        return jnp.logical_and(i < N_THIN_MAX, changed > 0)

    def thin_body(carry):
        i, im, _ = carry
        prev = im
        im = thin_substep(im, second=False)
        im = thin_substep(im, second=True)
        changed = (jnp.max(prev - im) > 0.0).astype(jnp.int32)   # thinning only removes
        return i + 1, im, changed

    _, skel, _ = lax.while_loop(
        thin_cond, thin_body, (jnp.int32(0), img, jnp.int32(1)))

    # ---------------- Harris corner response (corner_harris) ----------------
    ix = (_roll1(skel, 1) - _roll1(skel, -1)) * 0.5
    iy = (_roll0(skel, 1) - _roll0(skel, -1)) * 0.5
    axx, axy, ayy = ix * ix, ix * iy, iy * iy

    # Binomial smoothing on the idle MXU: gh @ [axx|axy|ayy] then per-slab @ gw.
    cat = jnp.concatenate([axx, axy, ayy], axis=1).astype(jnp.bfloat16)   # (R, 3W)
    y = jnp.dot(gh_ref[...], cat, preferred_element_type=jnp.float32)
    y = y.astype(jnp.bfloat16)
    gw = gw_ref[...]
    axx = jnp.dot(y[:, 0 * W:1 * W], gw, preferred_element_type=jnp.float32)
    axy = jnp.dot(y[:, 1 * W:2 * W], gw, preferred_element_type=jnp.float32)
    ayy = jnp.dot(y[:, 2 * W:3 * W], gw, preferred_element_type=jnp.float32)

    resp = (axx * ayy - axy * axy) - HARRIS_K * (axx + ayy) ** 2
    resp = resp * interior            # exclude_border == min_distance, per image

    # ---------------- corner_peaks: NMS + per-image relative threshold ----------------
    # TODO(synk): skimage peak_local_max returns a variable-length coordinate
    # list with plateau tie-breaking; here every tied local max becomes a
    # corner and the result is a dense binary mask.
    localmax = _maxpool(resp, MIN_DISTANCE)
    thr = jnp.concatenate(
        [jnp.zeros((H, W), jnp.float32) + jnp.max(resp[t * H:(t + 1) * H, :])
         for t in range(bt)], axis=0)
    corner = ((resp >= localmax) & (resp > THRESH_REL * thr) & (resp > 0.0)
              ).astype(jnp.float32)

    # ---------------- detect_branches: cut skeleton at corners ----------------
    corner_dil = _maxpool(corner, BREAK_RADIUS)   # (2*break_radius+1)^2 window
    branches = skel * (1.0 - corner_dil)

    # ------------- connectedComponents: 8-neighbour min propagation -------------
    # Labels are flat indices kept in f32 (exact); they never touch bf16/MXU.
    bmask = branches > 0.5
    sentinel = jnp.full(branches.shape, SENTINEL, jnp.float32)
    lab0 = jnp.where(bmask, lin_ref[...], sentinel)

    def prop_once(lab):
        # Separable 3x3 min (center included -- harmless for min propagation).
        rowmin = jnp.minimum(lab, jnp.minimum(_roll0(lab, -1), _roll0(lab, 1)))
        m = jnp.minimum(rowmin, jnp.minimum(_roll1(rowmin, -1), _roll1(rowmin, 1)))
        return jnp.where(bmask, m, sentinel)

    def cc_cond(carry):
        i, _, changed = carry
        return jnp.logical_and(i < N_CC_MAX // CC_UNROLL, changed > 0)

    def cc_body(carry):
        i, lab, _ = carry
        prev = lab
        for _ in range(CC_UNROLL):
            lab = prop_once(lab)
        changed = (jnp.max(prev - lab) > 0.0).astype(jnp.int32)  # labels only decrease
        return i + 1, lab, changed

    _, lab, _ = lax.while_loop(
        cc_cond, cc_body, (jnp.int32(0), lab0, jnp.int32(1)))

    skel_ref[...] = skel
    branch_ref[...] = branches
    corner_ref[...] = corner
    label_ref[...] = jnp.where(bmask, lab, 0.0)


# --------------------------------- wrapper ---------------------------------

def skeleton_map_forward(full_map, current_episode_id=0, step=0, pack=None):
    """Pallas equivalent of SkeletonMap.forward (visualization path omitted).

    Accepts (H, W) or (B, H, W) occupancy maps.  Returns
    (skeleton, skeleton_branches, corner_mask, labels), each matching the
    input's leading shape with trailing (H, W) float32.
    """
    del current_episode_id, step  # only used for visualization in the module
    # TODO(synk): calculate_lines / line_analyze produce data-dependent sized
    # outputs (variable corner list, per-branch vectors, n x n angle matrix)
    # with no clean Pallas equivalent; dense intermediates are returned instead.
    squeeze = full_map.ndim == 2
    if squeeze:
        full_map = full_map[None]
    B = full_map.shape[0]
    assert full_map.shape[1:] == (H, W)

    bt = pack if pack is not None else _choose_bt(B)
    assert B % bt == 0
    grid_len = B // bt
    rows = bt * H

    x = full_map.astype(jnp.float32).reshape(B * H, W)   # pack bt maps per block
    interior, lin = _const_planes(bt)
    gh = _band_matrix(rows, jnp.bfloat16)
    gw = _band_matrix(W, jnp.bfloat16)

    data_spec = pl.BlockSpec((rows, W), lambda i: (i, 0))
    const_spec = lambda shape: pl.BlockSpec(shape, lambda i: (0, 0))  # resident

    out_shapes = tuple(jax.ShapeDtypeStruct((B * H, W), jnp.float32) for _ in range(4))
    outs = pl.pallas_call(
        functools.partial(skeleton_map_kernel, bt=bt),
        out_shape=out_shapes,
        grid=(grid_len,),
        in_specs=[data_spec,
                  const_spec((rows, W)),       # interior mask
                  const_spec((rows, W)),       # flat-index label plane
                  const_spec((rows, rows)),    # row smoothing band (bf16)
                  const_spec((W, W))],         # col smoothing band (bf16)
        out_specs=(data_spec,) * 4,
        compiler_params=pltpu.CompilerParams(
            dimension_semantics=("parallel",)),   # splits steps across v7x TCs
    )(x, interior, lin, gh, gw)

    outs = tuple(o.reshape(B, H, W) for o in outs)
    if squeeze:
        outs = tuple(o[0] for o in outs)
    return outs


if __name__ == "__main__":
    key = jax.random.PRNGKey(0)
    keys = jax.random.split(key, 4)

    # Deterministic synthetic occupancy maps: overlapping corridors + noise.
    layouts = [
        [((20, 44), (10, 118)), ((8, 56), (50, 70))],
        [((10, 30), (20, 100)), ((25, 60), (80, 110))],
        [((30, 40), (5, 120)), ((5, 60), (30, 42))],
        [((15, 50), (60, 75)), ((40, 52), (10, 90))],
    ]
    maps = []
    for k, rects in zip(keys, layouts):
        m = jnp.zeros((H, W), jnp.float32)
        for (r0, r1), (c0, c1) in rects:
            m = m.at[r0:r1, c0:c1].set(1.0)
        flip = jax.random.uniform(k, (H, W)) < 0.02
        m = jnp.where(flip, 1.0 - m, m)
        maps.append(m)
    full_map = jnp.stack(maps, axis=0)   # (4, 64, 128): packs 2 maps/step, 2 steps

    skeleton, branches, corners, labels = skeleton_map_forward(
        full_map, current_episode_id=0, step=0)
    jax.block_until_ready((skeleton, branches, corners, labels))
    print("KERNEL_OK")
</pallas_src>

<mosaic_0001>
module attributes {stable_mosaic.version = 11 : i64} {
  func.func @skeleton_map_kernel(%arg0: i32, %arg1: memref<128x128xf32, #tpu.memory_space<vmem>>, %arg2: memref<128x128xf32, #tpu.memory_space<vmem>>, %arg3: memref<128x128xf32, #tpu.memory_space<vmem>>, %arg4: memref<128x128xbf16, #tpu.memory_space<vmem>>, %arg5: memref<128x128xbf16, #tpu.memory_space<vmem>>, %arg6: memref<128x128xf32, #tpu.memory_space<vmem>>, %arg7: memref<128x128xf32, #tpu.memory_space<vmem>>, %arg8: memref<128x128xf32, #tpu.memory_space<vmem>>, %arg9: memref<128x128xf32, #tpu.memory_space<vmem>>) attributes {dimension_semantics = [#tpu.dimension_semantics<parallel>], iteration_bounds = array<i64: 2>, scalar_prefetch = 0 : i64, scratch_operands = 0 : i64, tpu.core_type = #tpu.core_type<tc>, window_params = [{transform_indices = @transform_0, window_bounds = array<i64: 128, 128>}, {pipeline_mode = #tpu.pipeline_mode<synchronous>, transform_indices = @transform_1, window_bounds = array<i64: 128, 128>}, {pipeline_mode = #tpu.pipeline_mode<synchronous>, transform_indices = @transform_2, window_bounds = array<i64: 128, 128>}, {pipeline_mode = #tpu.pipeline_mode<synchronous>, transform_indices = @transform_3, window_bounds = array<i64: 128, 128>}, {pipeline_mode = #tpu.pipeline_mode<synchronous>, transform_indices = @transform_4, window_bounds = array<i64: 128, 128>}, {transform_indices = @transform_5, window_bounds = array<i64: 128, 128>}, {transform_indices = @transform_6, window_bounds = array<i64: 128, 128>}, {transform_indices = @transform_7, window_bounds = array<i64: 128, 128>}, {transform_indices = @transform_8, window_bounds = array<i64: 128, 128>}]} {
    %c0 = arith.constant 0 : index
    %c0_0 = arith.constant 0 : index
    %0 = vector.load %arg2[%c0, %c0_0] : memref<128x128xf32, #tpu.memory_space<vmem>>, vector<128x128xf32>
    %c0_1 = arith.constant 0 : index
    %c0_2 = arith.constant 0 : index
    %1 = vector.load %arg1[%c0_1, %c0_2] : memref<128x128xf32, #tpu.memory_space<vmem>>, vector<128x128xf32>
    %cst = arith.constant 5.000000e-01 : f32
    %2 = vector.broadcast %cst : f32 to vector<128x128xf32>
    %3 = arith.cmpf ogt, %1, %2 : vector<128x128xf32>
    %cst_3 = arith.constant 0.000000e+00 : f32
    %4 = vector.broadcast %cst_3 : f32 to vector<128x128xf32>
    %5 = arith.select %3, %0, %4 : vector<128x128xi1>, vector<128x128xf32>
    %c0_i32 = arith.constant 0 : i32
    %c1_i32 = arith.constant 1 : i32
    %6:3 = scf.while (%arg10 = %c0_i32, %arg11 = %5, %arg12 = %c1_i32) : (i32, vector<128x128xf32>, i32) -> (i32, vector<128x128xf32>, i32) {
      %c64_i32 = arith.constant 64 : i32
      %115 = arith.cmpi slt, %arg10, %c64_i32 : i32
      %c0_i32_54 = arith.constant 0 : i32
      %116 = arith.cmpi sgt, %arg12, %c0_i32_54 : i32
      %117 = arith.andi %115, %116 : i1
      scf.condition(%117) %arg10, %arg11, %arg12 : i32, vector<128x128xf32>, i32
    } do {
    ^bb0(%arg10: i32, %arg11: vector<128x128xf32>, %arg12: i32):
      %c1_i32_54 = arith.constant 1 : i32
      %115 = tpu.dynamic_rotate %arg11 by %c1_i32_54 dim 0 : vector<128x128xf32>, i32 -> vector<128x128xf32>
      %c127_i32_55 = arith.constant 127 : i32
      %116 = tpu.dynamic_rotate %arg11 by %c127_i32_55 dim 0 : vector<128x128xf32>, i32 -> vector<128x128xf32>
      %cst_56 = arith.constant 0.000000e+00 : f32
      %117 = vector.broadcast %cst_56 : f32 to vector<128x128xf32>
      %c127_i32_57 = arith.constant 127 : i32
      %118 = tpu.dynamic_rotate %115 by %c127_i32_57 dim 1 : vector<128x128xf32>, i32 -> vector<128x128xf32>
      %119 = arith.addf %115, %118 : vector<128x128xf32>
      %120 = arith.subf %118, %115 : vector<128x128xf32>
      %cst_58 = arith.constant 0.000000e+00 : f32
      %121 = vector.broadcast %cst_58 : f32 to vector<128x128xf32>
      %122 = arith.maximumf %120, %121 : vector<128x128xf32>
      %123 = arith.addf %117, %122 : vector<128x128xf32>
      %c127_i32_59 = arith.constant 127 : i32
      %124 = tpu.dynamic_rotate %arg11 by %c127_i32_59 dim 1 : vector<128x128xf32>, i32 -> vector<128x128xf32>
      %125 = arith.addf %119, %124 : vector<128x128xf32>
      %126 = arith.subf %124, %118 : vector<128x128xf32>
      %cst_60 = arith.constant 0.000000e+00 : f32
      %127 = vector.broadcast %cst_60 : f32 to vector<128x128xf32>
      %128 = arith.maximumf %126, %127 : vector<128x128xf32>
      %129 = arith.addf %123, %128 : vector<128x128xf32>
      %c127_i32_61 = arith.constant 127 : i32
      %130 = tpu.dynamic_rotate %116 by %c127_i32_61 dim 1 : vector<128x128xf32>, i32 -> vector<128x128xf32>
      %131 = arith.addf %125, %130 : vector<128x128xf32>
      %132 = arith.subf %130, %124 : vector<128x128xf32>
      %cst_62 = arith.constant 0.000000e+00 : f32
      %133 = vector.broadcast %cst_62 : f32 to vector<128x128xf32>
      %134 = arith.maximumf %132, %133 : vector<128x128xf32>
      %135 = arith.addf %129, %134 : vector<128x128xf32>
      %136 = arith.addf %131, %116 : vector<128x128xf32>
      %137 = arith.subf %116, %130 : vector<128x128xf32>
      %cst_63 = arith.constant 0.000000e+00 : f32
      %138 = vector.broadcast %cst_63 : f32 to vector<128x128xf32>
      %139 = arith.maximumf %137, %138 : vector<128x128xf32>
      %140 = arith.addf %135, %139 : vector<128x128xf32>
      %c1_i32_64 = arith.constant 1 : i32
      %141 = tpu.dynamic_rotate %116 by %c1_i32_64 dim 1 : vector<128x128xf32>, i32 -> vector<128x128xf32>
      %142 = arith.addf %136, %141 : vector<128x128xf32>
      %143 = arith.subf %141, %116 : vector<128x128xf32>
      %cst_65 = arith.constant 0.000000e+00 : f32
      %144 = vector.broadcast %cst_65 : f32 to vector<128x128xf32>
      %145 = arith.maximumf %143, %144 : vector<128x128xf32>
      %146 = arith.addf %140, %145 : vector<128x128xf32>
      %c1_i32_66 = arith.constant 1 : i32
      %147 = tpu.dynamic_rotate %arg11 by %c1_i32_66 dim 1 : vector<128x128xf32>, i32 -> vector<128x128xf32>
      %148 = arith.addf %142, %147 : vector<128x128xf32>
      %149 = arith.subf %147, %141 : vector<128x128xf32>
      %cst_67 = arith.constant 0.000000e+00 : f32
      %150 = vector.broadcast %cst_67 : f32 to vector<128x128xf32>
      %151 = arith.maximumf %149, %150 : vector<128x128xf32>
      %152 = arith.addf %146, %151 : vector<128x128xf32>
      %c1_i32_68 = arith.constant 1 : i32
      %153 = tpu.dynamic_rotate %115 by %c1_i32_68 dim 1 : vector<128x128xf32>, i32 -> vector<128x128xf32>
      %154 = arith.addf %148, %153 : vector<128x128xf32>
      %155 = arith.subf %153, %147 : vector<128x128xf32>
      %cst_69 = arith.constant 0.000000e+00 : f32
      %156 = vector.broadcast %cst_69 : f32 to vector<128x128xf32>
      %157 = arith.maximumf %155, %156 : vector<128x128xf32>
      %158 = arith.addf %152, %157 : vector<128x128xf32>
      %159 = arith.subf %115, %153 : vector<128x128xf32>
      %cst_70 = arith.constant 0.000000e+00 : f32
      %160 = vector.broadcast %cst_70 : f32 to vector<128x128xf32>
      %161 = arith.maximumf %159, %160 : vector<128x128xf32>
      %162 = arith.addf %158, %161 : vector<128x128xf32>
      %c127_i32_71 = arith.constant 127 : i32
      %163 = tpu.dynamic_rotate %arg11 by %c127_i32_71 dim 1 : vector<128x128xf32>, i32 -> vector<128x128xf32>
      %c1_i32_72 = arith.constant 1 : i32
      %164 = tpu.dynamic_rotate %arg11 by %c1_i32_72 dim 1 : vector<128x128xf32>, i32 -> vector<128x128xf32>
      %165 = arith.mulf %163, %116 : vector<128x128xf32>
      %166 = arith.addf %115, %164 : vector<128x128xf32>
      %167 = arith.mulf %165, %166 : vector<128x128xf32>
      %cst_73 = arith.constant 5.000000e-01 : f32
      %168 = vector.broadcast %cst_73 : f32 to vector<128x128xf32>
      %169 = arith.cmpf ogt, %arg11, %168 : vector<128x128xf32>
      %cst_74 = arith.constant 2.000000e+00 : f32
      %170 = vector.broadcast %cst_74 : f32 to vector<128x128xf32>
      %171 = arith.cmpf oge, %154, %170 : vector<128x128xf32>
      %172 = arith.andi %169, %171 : vector<128x128xi1>
      %cst_75 = arith.constant 6.000000e+00 : f32
      %173 = vector.broadcast %cst_75 : f32 to vector<128x128xf32>
      %174 = arith.cmpf ole, %154, %173 : vector<128x128xf32>
      %175 = arith.andi %172, %174 : vector<128x128xi1>
      %cst_76 = arith.constant 1.000000e+00 : f32
      %176 = vector.broadcast %cst_76 : f32 to vector<128x128xf32>
      %177 = arith.cmpf oeq, %162, %176 : vector<128x128xf32>
      %178 = arith.andi %175, %177 : vector<128x128xi1>
      %cst_77 = arith.constant 5.000000e-01 : f32
      %179 = vector.broadcast %cst_77 : f32 to vector<128x128xf32>
      %180 = arith.cmpf olt, %167, %179 : vector<128x128xf32>
      %181 = arith.andi %178, %180 : vector<128x128xi1>
      %cst_78 = arith.constant 0.000000e+00 : f32
      %182 = vector.broadcast %cst_78 : f32 to vector<128x128xf32>
      %183 = arith.select %181, %182, %arg11 : vector<128x128xi1>, vector<128x128xf32>
      %c1_i32_79 = arith.constant 1 : i32
      %184 = tpu.dynamic_rotate %183 by %c1_i32_79 dim 0 : vector<128x128xf32>, i32 -> vector<128x128xf32>
      %c127_i32_80 = arith.constant 127 : i32
      %185 = tpu.dynamic_rotate %183 by %c127_i32_80 dim 0 : vector<128x128xf32>, i32 -> vector<128x128xf32>
      %cst_81 = arith.constant 0.000000e+00 : f32
      %186 = vector.broadcast %cst_81 : f32 to vector<128x128xf32>
      %c127_i32_82 = arith.constant 127 : i32
      %187 = tpu.dynamic_rotate %184 by %c127_i32_82 dim 1 : vector<128x128xf32>, i32 -> vector<128x128xf32>
      %188 = arith.addf %184, %187 : vector<128x128xf32>
      %189 = arith.subf %187, %184 : vector<128x128xf32>
      %cst_83 = arith.constant 0.000000e+00 : f32
      %190 = vector.broadcast %cst_83 : f32 to vector<128x128xf32>
      %191 = arith.maximumf %189, %190 : vector<128x128xf32>
      %192 = arith.addf %186, %191 : vector<128x128xf32>
      %c127_i32_84 = arith.constant 127 : i32
      %193 = tpu.dynamic_rotate %183 by %c127_i32_84 dim 1 : vector<128x128xf32>, i32 -> vector<128x128xf32>
      %194 = arith.addf %188, %193 : vector<128x128xf32>
      %195 = arith.subf %193, %187 : vector<128x128xf32>
      %cst_85 = arith.constant 0.000000e+00 : f32
      %196 = vector.broadcast %cst_85 : f32 to vector<128x128xf32>
      %197 = arith.maximumf %195, %196 : vector<128x128xf32>
      %198 = arith.addf %192, %197 : vector<128x128xf32>
      %c127_i32_86 = arith.constant 127 : i32
      %199 = tpu.dynamic_rotate %185 by %c127_i32_86 dim 1 : vector<128x128xf32>, i32 -> vector<128x128xf32>
      %200 = arith.addf %194, %199 : vector<128x128xf32>
      %201 = arith.subf %199, %193 : vector<128x128xf32>
      %cst_87 = arith.constant 0.000000e+00 : f32
      %202 = vector.broadcast %cst_87 : f32 to vector<128x128xf32>
      %203 = arith.maximumf %201, %202 : vector<128x128xf32>
      %204 = arith.addf %198, %203 : vector<128x128xf32>
      %205 = arith.addf %200, %185 : vector<128x128xf32>
      %206 = arith.subf %185, %199 : vector<128x128xf32>
      %cst_88 = arith.constant 0.000000e+00 : f32
      %207 = vector.broadcast %cst_88 : f32 to vector<128x128xf32>
      %208 = arith.maximumf %206, %207 : vector<128x128xf32>
      %209 = arith.addf %204, %208 : vector<128x128xf32>
      %c1_i32_89 = arith.constant 1 : i32
      %210 = tpu.dynamic_rotate %185 by %c1_i32_89 dim 1 : vector<128x128xf32>, i32 -> vector<128x128xf32>
      %211 = arith.addf %205, %210 : vector<128x128xf32>
      %212 = arith.subf %210, %185 : vector<128x128xf32>
      %cst_90 = arith.constant 0.000000e+00 : f32
      %213 = vector.broadcast %cst_90 : f32 to vector<128x128xf32>
      %214 = arith.maximumf %212, %213 : vector<128x128xf32>
      %215 = arith.addf %209, %214 : vector<128x128xf32>
      %c1_i32_91 = arith.constant 1 : i32
      %216 = tpu.dynamic_rotate %183 by %c1_i32_91 dim 1 : vector<128x128xf32>, i32 -> vector<128x128xf32>
      %217 = arith.addf %211, %216 : vector<128x128xf32>
      %218 = arith.subf %216, %210 : vector<128x128xf32>
      %cst_92 = arith.constant 0.000000e+00 : f32
      %219 = vector.broadcast %cst_92 : f32 to vector<128x128xf32>
      %220 = arith.maximumf %218, %219 : vector<128x128xf32>
      %221 = arith.addf %215, %220 : vector<128x128xf32>
      %c1_i32_93 = arith.constant 1 : i32
      %222 = tpu.dynamic_rotate %184 by %c1_i32_93 dim 1 : vector<128x128xf32>, i32 -> vector<128x128xf32>
      %223 = arith.addf %217, %222 : vector<128x128xf32>
      %224 = arith.subf %222, %216 : vector<128x128xf32>
      %cst_94 = arith.constant 0.000000e+00 : f32
      %225 = vector.broadcast %cst_94 : f32 to vector<128x128xf32>
      %226 = arith.maximumf %224, %225 : vector<128x128xf32>
      %227 = arith.addf %221, %226 : vector<128x128xf32>
      %228 = arith.subf %184, %222 : vector<128x128xf32>
      %cst_95 = arith.constant 0.000000e+00 : f32
      %229 = vector.broadcast %cst_95 : f32 to vector<128x128xf32>
      %230 = arith.maximumf %228, %229 : vector<128x128xf32>
      %231 = arith.addf %227, %230 : vector<128x128xf32>
      %c127_i32_96 = arith.constant 127 : i32
      %232 = tpu.dynamic_rotate %183 by %c127_i32_96 dim 1 : vector<128x128xf32>, i32 -> vector<128x128xf32>
      %c1_i32_97 = arith.constant 1 : i32
      %233 = tpu.dynamic_rotate %183 by %c1_i32_97 dim 1 : vector<128x128xf32>, i32 -> vector<128x128xf32>
      %234 = arith.mulf %184, %233 : vector<128x128xf32>
      %235 = arith.addf %232, %185 : vector<128x128xf32>
      %236 = arith.mulf %234, %235 : vector<128x128xf32>
      %cst_98 = arith.constant 5.000000e-01 : f32
      %237 = vector.broadcast %cst_98 : f32 to vector<128x128xf32>
      %238 = arith.cmpf ogt, %183, %237 : vector<128x128xf32>
      %cst_99 = arith.constant 2.000000e+00 : f32
      %239 = vector.broadcast %cst_99 : f32 to vector<128x128xf32>
      %240 = arith.cmpf oge, %223, %239 : vector<128x128xf32>
      %241 = arith.andi %238, %240 : vector<128x128xi1>
      %cst_100 = arith.constant 6.000000e+00 : f32
      %242 = vector.broadcast %cst_100 : f32 to vector<128x128xf32>
      %243 = arith.cmpf ole, %223, %242 : vector<128x128xf32>
      %244 = arith.andi %241, %243 : vector<128x128xi1>
      %cst_101 = arith.constant 1.000000e+00 : f32
      %245 = vector.broadcast %cst_101 : f32 to vector<128x128xf32>
      %246 = arith.cmpf oeq, %231, %245 : vector<128x128xf32>
      %247 = arith.andi %244, %246 : vector<128x128xi1>
      %cst_102 = arith.constant 5.000000e-01 : f32
      %248 = vector.broadcast %cst_102 : f32 to vector<128x128xf32>
      %249 = arith.cmpf olt, %236, %248 : vector<128x128xf32>
      %250 = arith.andi %247, %249 : vector<128x128xi1>
      %cst_103 = arith.constant 0.000000e+00 : f32
      %251 = vector.broadcast %cst_103 : f32 to vector<128x128xf32>
      %252 = arith.select %250, %251, %183 : vector<128x128xi1>, vector<128x128xf32>
      %253 = arith.subf %arg11, %252 : vector<128x128xf32>
      %254 = vector.shape_cast %253 : vector<128x128xf32> to vector<1x128x128xf32>
      %cst_104 = arith.constant dense<0xFF800000> : vector<1xf32>
      %255 = vector.multi_reduction <maximumf>, %254, %cst_104 [1, 2] : vector<1x128x128xf32> to vector<1xf32>
      %256 = vector.shape_cast %255 : vector<1xf32> to vector<1x1x1xf32>
      %257 = vector.extract %256[0, 0, 0] : f32 from vector<1x1x1xf32>
      %cst_105 = arith.constant 0.000000e+00 : f32
      %258 = arith.cmpf ogt, %257, %cst_105 : f32
      %259 = arith.extui %258 : i1 to i32
      %c1_i32_106 = arith.constant 1 : i32
      %260 = arith.addi %arg10, %c1_i32_106 : i32
      scf.yield %260, %252, %259 : i32, vector<128x128xf32>, i32
    }
    %c127_i32 = arith.constant 127 : i32
    %7 = tpu.dynamic_rotate %6#1 by %c127_i32 dim 1 : vector<128x128xf32>, i32 -> vector<128x128xf32>
    %c1_i32_4 = arith.constant 1 : i32
    %8 = tpu.dynamic_rotate %6#1 by %c1_i32_4 dim 1 : vector<128x128xf32>, i32 -> vector<128x128xf32>
    %9 = arith.subf %7, %8 : vector<128x128xf32>
    %cst_5 = arith.constant 5.000000e-01 : f32
    %10 = vector.broadcast %cst_5 : f32 to vector<128x128xf32>
    %11 = arith.mulf %9, %10 : vector<128x128xf32>
    %c127_i32_6 = arith.constant 127 : i32
    %12 = tpu.dynamic_rotate %6#1 by %c127_i32_6 dim 0 : vector<128x128xf32>, i32 -> vector<128x128xf32>
    %c1_i32_7 = arith.constant 1 : i32
    %13 = tpu.dynamic_rotate %6#1 by %c1_i32_7 dim 0 : vector<128x128xf32>, i32 -> vector<128x128xf32>
    %14 = arith.subf %12, %13 : vector<128x128xf32>
    %cst_8 = arith.constant 5.000000e-01 : f32
    %15 = vector.broadcast %cst_8 : f32 to vector<128x128xf32>
    %16 = arith.mulf %14, %15 : vector<128x128xf32>
    %17 = arith.mulf %11, %11 : vector<128x128xf32>
    %18 = arith.mulf %11, %16 : vector<128x128xf32>
    %19 = arith.mulf %16, %16 : vector<128x128xf32>
    %20 = tpu.concatenate %17, %18, %19 in 1 : vector<128x128xf32>, vector<128x128xf32>, vector<128x128xf32> -> vector<128x384xf32>
    %21 = arith.truncf %20 : vector<128x384xf32> to vector<128x384xbf16>
    %c0_9 = arith.constant 0 : index
    %c0_10 = arith.constant 0 : index
    %22 = vector.load %arg4[%c0_9, %c0_10] : memref<128x128xbf16, #tpu.memory_space<vmem>>, vector<128x128xbf16>
    %cst_11 = arith.constant dense<0.000000e+00> : vector<128x384xf32>
    %23 = tpu.matmul %22, %21, %cst_11 {dimension_numbers = #tpu.dot_dimension_numbers<[1], [0], [0], [1], [0, 0, 1, 1], [], []>} : vector<128x128xbf16>, vector<128x384xbf16>, vector<128x384xf32> -> vector<128x384xf32>
    %24 = arith.truncf %23 : vector<128x384xf32> to vector<128x384xbf16>
    %c0_12 = arith.constant 0 : index
    %c0_13 = arith.constant 0 : index
    %25 = vector.load %arg5[%c0_12, %c0_13] : memref<128x128xbf16, #tpu.memory_space<vmem>>, vector<128x128xbf16>
    %26 = vector.extract_strided_slice %24 {offsets = [0, 0], sizes = [128, 128], strides = [1, 1]} : vector<128x384xbf16> to vector<128x128xbf16>
    %cst_14 = arith.constant dense<0.000000e+00> : vector<128x128xf32>
    %27 = tpu.matmul %26, %25, %cst_14 {dimension_numbers = #tpu.dot_dimension_numbers<[1], [0], [0], [1], [0, 0, 1, 1], [], []>} : vector<128x128xbf16>, vector<128x128xbf16>, vector<128x128xf32> -> vector<128x128xf32>
    %28 = vector.extract_strided_slice %24 {offsets = [0, 128], sizes = [128, 128], strides = [1, 1]} : vector<128x384xbf16> to vector<128x128xbf16>
    %cst_15 = arith.constant dense<0.000000e+00> : vector<128x128xf32>
    %29 = tpu.matmul %28, %25, %cst_15 {dimension_numbers = #tpu.dot_dimension_numbers<[1], [0], [0], [1], [0, 0, 1, 1], [], []>} : vector<128x128xbf16>, vector<128x128xbf16>, vector<128x128xf32> -> vector<128x128xf32>
    %30 = vector.extract_strided_slice %24 {offsets = [0, 256], sizes = [128, 128], strides = [1, 1]} : vector<128x384xbf16> to vector<128x128xbf16>
    %cst_16 = arith.constant dense<0.000000e+00> : vector<128x128xf32>
    %31 = tpu.matmul %30, %25, %cst_16 {dimension_numbers = #tpu.dot_dimension_numbers<[1], [0], [0], [1], [0, 0, 1, 1], [], []>} : vector<128x128xbf16>, vector<128x128xbf16>, vector<128x128xf32> -> vector<128x128xf32>
    %32 = arith.mulf %27, %31 : vector<128x128xf32>
    %33 = arith.mulf %29, %29 : vector<128x128xf32>
    %34 = arith.subf %32, %33 : vector<128x128xf32>
    %35 = arith.addf %27, %31 : vector<128x128xf32>
    %36 = arith.mulf %35, %35 : vector<128x128xf32>
    %cst_17 = arith.constant 5.000000e-02 : f32
    %37 = vector.broadcast %cst_17 : f32 to vector<128x128xf32>
    %38 = arith.mulf %37, %36 : vector<128x128xf32>
    %39 = arith.subf %34, %38 : vector<128x128xf32>
    %40 = arith.mulf %39, %0 : vector<128x128xf32>
    %c127_i32_18 = arith.constant 127 : i32
    %41 = tpu.dynamic_rotate %40 by %c127_i32_18 dim 1 : vector<128x128xf32>, i32 -> vector<128x128xf32>
    %c1_i32_19 = arith.constant 1 : i32
    %42 = tpu.dynamic_rotate %40 by %c1_i32_19 dim 1 : vector<128x128xf32>, i32 -> vector<128x128xf32>
    %43 = arith.maximumf %41, %42 : vector<128x128xf32>
    %44 = arith.maximumf %40, %43 : vector<128x128xf32>
    %c126_i32 = arith.constant 126 : i32
    %45 = tpu.dynamic_rotate %44 by %c126_i32 dim 1 : vector<128x128xf32>, i32 -> vector<128x128xf32>
    %c2_i32 = arith.constant 2 : i32
    %46 = tpu.dynamic_rotate %44 by %c2_i32 dim 1 : vector<128x128xf32>, i32 -> vector<128x128xf32>
    %47 = arith.maximumf %45, %46 : vector<128x128xf32>
    %48 = arith.maximumf %44, %47 : vector<128x128xf32>
    %c127_i32_20 = arith.constant 127 : i32
    %49 = tpu.dynamic_rotate %48 by %c127_i32_20 dim 0 : vector<128x128xf32>, i32 -> vector<128x128xf32>
    %c1_i32_21 = arith.constant 1 : i32
    %50 = tpu.dynamic_rotate %48 by %c1_i32_21 dim 0 : vector<128x128xf32>, i32 -> vector<128x128xf32>
    %51 = arith.maximumf %49, %50 : vector<128x128xf32>
    %52 = arith.maximumf %48, %51 : vector<128x128xf32>
    %c126_i32_22 = arith.constant 126 : i32
    %53 = tpu.dynamic_rotate %52 by %c126_i32_22 dim 0 : vector<128x128xf32>, i32 -> vector<128x128xf32>
    %c2_i32_23 = arith.constant 2 : i32
    %54 = tpu.dynamic_rotate %52 by %c2_i32_23 dim 0 : vector<128x128xf32>, i32 -> vector<128x128xf32>
    %55 = arith.maximumf %53, %54 : vector<128x128xf32>
    %56 = arith.maximumf %52, %55 : vector<128x128xf32>
    %cst_24 = arith.constant 0.000000e+00 : f32
    %57 = vector.broadcast %cst_24 : f32 to vector<64x128xf32>
    %58 = vector.extract_strided_slice %40 {offsets = [0, 0], sizes = [64, 128], strides = [1, 1]} : vector<128x128xf32> to vector<64x128xf32>
    %59 = vector.shape_cast %58 : vector<64x128xf32> to vector<1x64x128xf32>
    %cst_25 = arith.constant dense<0xFF800000> : vector<1xf32>
    %60 = vector.multi_reduction <maximumf>, %59, %cst_25 [1, 2] : vector<1x64x128xf32> to vector<1xf32>
    %61 = vector.shape_cast %60 : vector<1xf32> to vector<1x1x1xf32>
    %62 = vector.extract %61[0, 0, 0] : f32 from vector<1x1x1xf32>
    %63 = vector.broadcast %62 : f32 to vector<64x128xf32>
    %64 = arith.addf %57, %63 : vector<64x128xf32>
    %cst_26 = arith.constant 0.000000e+00 : f32
    %65 = vector.broadcast %cst_26 : f32 to vector<64x128xf32>
    %66 = vector.extract_strided_slice %40 {offsets = [64, 0], sizes = [64, 128], strides = [1, 1]} : vector<128x128xf32> to vector<64x128xf32>
    %67 = vector.shape_cast %66 : vector<64x128xf32> to vector<1x64x128xf32>
    %cst_27 = arith.constant dense<0xFF800000> : vector<1xf32>
    %68 = vector.multi_reduction <maximumf>, %67, %cst_27 [1, 2] : vector<1x64x128xf32> to vector<1xf32>
    %69 = vector.shape_cast %68 : vector<1xf32> to vector<1x1x1xf32>
    %70 = vector.extract %69[0, 0, 0] : f32 from vector<1x1x1xf32>
    %71 = vector.broadcast %70 : f32 to vector<64x128xf32>
    %72 = arith.addf %65, %71 : vector<64x128xf32>
    %73 = tpu.concatenate %64, %72 in 0 : vector<64x128xf32>, vector<64x128xf32> -> vector<128x128xf32>
    %74 = arith.cmpf oge, %40, %56 : vector<128x128xf32>
    %cst_28 = arith.constant 1.000000e-01 : f32
    %75 = vector.broadcast %cst_28 : f32 to vector<128x128xf32>
    %76 = arith.mulf %75, %73 : vector<128x128xf32>
    %77 = arith.cmpf ogt, %40, %76 : vector<128x128xf32>
    %78 = arith.andi %74, %77 : vector<128x128xi1>
    %cst_29 = arith.constant 0.000000e+00 : f32
    %79 = vector.broadcast %cst_29 : f32 to vector<128x128xf32>
    %80 = arith.cmpf ogt, %40, %79 : vector<128x128xf32>
    %81 = arith.andi %78, %80 : vector<128x128xi1>
    %82 = arith.extui %81 : vector<128x128xi1> to vector<128x128xi32>
    %83 = arith.sitofp %82 : vector<128x128xi32> to vector<128x128xf32>
    %c127_i32_30 = arith.constant 127 : i32
    %84 = tpu.dynamic_rotate %83 by %c127_i32_30 dim 1 : vector<128x128xf32>, i32 -> vector<128x128xf32>
    %c1_i32_31 = arith.constant 1 : i32
    %85 = tpu.dynamic_rotate %83 by %c1_i32_31 dim 1 : vector<128x128xf32>, i32 -> vector<128x128xf32>
    %86 = arith.maximumf %84, %85 : vector<128x128xf32>
    %87 = arith.maximumf %83, %86 : vector<128x128xf32>
    %c126_i32_32 = arith.constant 126 : i32
    %88 = tpu.dynamic_rotate %83 by %c126_i32_32 dim 1 : vector<128x128xf32>, i32 -> vector<128x128xf32>
    %c2_i32_33 = arith.constant 2 : i32
    %89 = tpu.dynamic_rotate %83 by %c2_i32_33 dim 1 : vector<128x128xf32>, i32 -> vector<128x128xf32>
    %90 = arith.maximumf %88, %89 : vector<128x128xf32>
    %91 = arith.maximumf %87, %90 : vector<128x128xf32>
    %c127_i32_34 = arith.constant 127 : i32
    %92 = tpu.dynamic_rotate %91 by %c127_i32_34 dim 0 : vector<128x128xf32>, i32 -> vector<128x128xf32>
    %c1_i32_35 = arith.constant 1 : i32
    %93 = tpu.dynamic_rotate %91 by %c1_i32_35 dim 0 : vector<128x128xf32>, i32 -> vector<128x128xf32>
    %94 = arith.maximumf %92, %93 : vector<128x128xf32>
    %95 = arith.maximumf %91, %94 : vector<128x128xf32>
    %c126_i32_36 = arith.constant 126 : i32
    %96 = tpu.dynamic_rotate %91 by %c126_i32_36 dim 0 : vector<128x128xf32>, i32 -> vector<128x128xf32>
    %c2_i32_37 = arith.constant 2 : i32
    %97 = tpu.dynamic_rotate %91 by %c2_i32_37 dim 0 : vector<128x128xf32>, i32 -> vector<128x128xf32>
    %98 = arith.maximumf %96, %97 : vector<128x128xf32>
    %99 = arith.maximumf %95, %98 : vector<128x128xf32>
    %cst_38 = arith.constant 1.000000e+00 : f32
    %100 = vector.broadcast %cst_38 : f32 to vector<128x128xf32>
    %101 = arith.subf %100, %99 : vector<128x128xf32>
    %102 = arith.mulf %6#1, %101 : vector<128x128xf32>
    %cst_39 = arith.constant 5.000000e-01 : f32
    %103 = vector.broadcast %cst_39 : f32 to vector<128x128xf32>
    %104 = arith.cmpf ogt, %102, %103 : vector<128x128xf32>
    %cst_40 = arith.constant 1.000000e+09 : f32
    %105 = vector.broadcast %cst_40 : f32 to vector<128x128xf32>
    %c0_41 = arith.constant 0 : index
    %c0_42 = arith.constant 0 : index
    %106 = vector.load %arg3[%c0_41, %c0_42] : memref<128x128xf32, #tpu.memory_space<vmem>>, vector<128x128xf32>
    %107 = arith.select %104, %106, %105 : vector<128x128xi1>, vector<128x128xf32>
    %c0_i32_43 = arith.constant 0 : i32
    %c1_i32_44 = arith.constant 1 : i32
    %108:3 = scf.while (%arg10 = %c0_i32_43, %arg11 = %107, %arg12 = %c1_i32_44) : (i32, vector<128x128xf32>, i32) -> (i32, vector<128x128xf32>, i32) {
      %c32_i32 = arith.constant 32 : i32
      %115 = arith.cmpi slt, %arg10, %c32_i32 : i32
      %c0_i32_54 = arith.constant 0 : i32
      %116 = arith.cmpi sgt, %arg12, %c0_i32_54 : i32
      %117 = arith.andi %115, %116 : i1
      scf.condition(%117) %arg10, %arg11, %arg12 : i32, vector<128x128xf32>, i32
    } do {
    ^bb0(%arg10: i32, %arg11: vector<128x128xf32>, %arg12: i32):
      %c1_i32_54 = arith.constant 1 : i32
      %115 = tpu.dynamic_rotate %arg11 by %c1_i32_54 dim 0 : vector<128x128xf32>, i32 -> vector<128x128xf32>
      %c127_i32_55 = arith.constant 127 : i32
      %116 = tpu.dynamic_rotate %arg11 by %c127_i32_55 dim 0 : vector<128x128xf32>, i32 -> vector<128x128xf32>
      %117 = arith.minimumf %115, %116 : vector<128x128xf32>
      %118 = arith.minimumf %arg11, %117 : vector<128x128xf32>
      %c1_i32_56 = arith.constant 1 : i32
      %119 = tpu.dynamic_rotate %118 by %c1_i32_56 dim 1 : vector<128x128xf32>, i32 -> vector<128x128xf32>
      %c127_i32_57 = arith.constant 127 : i32
      %120 = tpu.dynamic_rotate %118 by %c127_i32_57 dim 1 : vector<128x128xf32>, i32 -> vector<128x128xf32>
      %121 = arith.minimumf %119, %120 : vector<128x128xf32>
      %122 = arith.minimumf %118, %121 : vector<128x128xf32>
      %123 = arith.select %104, %122, %105 : vector<128x128xi1>, vector<128x128xf32>
      %c1_i32_58 = arith.constant 1 : i32
      %124 = tpu.dynamic_rotate %123 by %c1_i32_58 dim 0 : vector<128x128xf32>, i32 -> vector<128x128xf32>
      %c127_i32_59 = arith.constant 127 : i32
      %125 = tpu.dynamic_rotate %123 by %c127_i32_59 dim 0 : vector<128x128xf32>, i32 -> vector<128x128xf32>
      %126 = arith.minimumf %124, %125 : vector<128x128xf32>
      %127 = arith.minimumf %123, %126 : vector<128x128xf32>
      %c1_i32_60 = arith.constant 1 : i32
      %128 = tpu.dynamic_rotate %127 by %c1_i32_60 dim 1 : vector<128x128xf32>, i32 -> vector<128x128xf32>
      %c127_i32_61 = arith.constant 127 : i32
      %129 = tpu.dynamic_rotate %127 by %c127_i32_61 dim 1 : vector<128x128xf32>, i32 -> vector<128x128xf32>
      %130 = arith.minimumf %128, %129 : vector<128x128xf32>
      %131 = arith.minimumf %127, %130 : vector<128x128xf32>
      %132 = arith.select %104, %131, %105 : vector<128x128xi1>, vector<128x128xf32>
      %c1_i32_62 = arith.constant 1 : i32
      %133 = tpu.dynamic_rotate %132 by %c1_i32_62 dim 0 : vector<128x128xf32>, i32 -> vector<128x128xf32>
      %c127_i32_63 = arith.constant 127 : i32
      %134 = tpu.dynamic_rotate %132 by %c127_i32_63 dim 0 : vector<128x128xf32>, i32 -> vector<128x128xf32>
      %135 = arith.minimumf %133, %134 : vector<128x128xf32>
      %136 = arith.minimumf %132, %135 : vector<128x128xf32>
      %c1_i32_64 = arith.constant 1 : i32
      %137 = tpu.dynamic_rotate %136 by %c1_i32_64 dim 1 : vector<128x128xf32>, i32 -> vector<128x128xf32>
      %c127_i32_65 = arith.constant 127 : i32
      %138 = tpu.dynamic_rotate %136 by %c127_i32_65 dim 1 : vector<128x128xf32>, i32 -> vector<128x128xf32>
      %139 = arith.minimumf %137, %138 : vector<128x128xf32>
      %140 = arith.minimumf %136, %139 : vector<128x128xf32>
      %141 = arith.select %104, %140, %105 : vector<128x128xi1>, vector<128x128xf32>
      %c1_i32_66 = arith.constant 1 : i32
      %142 = tpu.dynamic_rotate %141 by %c1_i32_66 dim 0 : vector<128x128xf32>, i32 -> vector<128x128xf32>
      %c127_i32_67 = arith.constant 127 : i32
      %143 = tpu.dynamic_rotate %141 by %c127_i32_67 dim 0 : vector<128x128xf32>, i32 -> vector<128x128xf32>
      %144 = arith.minimumf %142, %143 : vector<128x128xf32>
      %145 = arith.minimumf %141, %144 : vector<128x128xf32>
      %c1_i32_68 = arith.constant 1 : i32
      %146 = tpu.dynamic_rotate %145 by %c1_i32_68 dim 1 : vector<128x128xf32>, i32 -> vector<128x128xf32>
      %c127_i32_69 = arith.constant 127 : i32
      %147 = tpu.dynamic_rotate %145 by %c127_i32_69 dim 1 : vector<128x128xf32>, i32 -> vector<128x128xf32>
      %148 = arith.minimumf %146, %147 : vector<128x128xf32>
      %149 = arith.minimumf %145, %148 : vector<128x128xf32>
      %150 = arith.select %104, %149, %105 : vector<128x128xi1>, vector<128x128xf32>
      %c1_i32_70 = arith.constant 1 : i32
      %151 = tpu.dynamic_rotate %150 by %c1_i32_70 dim 0 : vector<128x128xf32>, i32 -> vector<128x128xf32>
      %c127_i32_71 = arith.constant 127 : i32
      %152 = tpu.dynamic_rotate %150 by %c127_i32_71 dim 0 : vector<128x128xf32>, i32 -> vector<128x128xf32>
      %153 = arith.minimumf %151, %152 : vector<128x128xf32>
      %154 = arith.minimumf %150, %153 : vector<128x128xf32>
      %c1_i32_72 = arith.constant 1 : i32
      %155 = tpu.dynamic_rotate %154 by %c1_i32_72 dim 1 : vector<128x128xf32>, i32 -> vector<128x128xf32>
      %c127_i32_73 = arith.constant 127 : i32
      %156 = tpu.dynamic_rotate %154 by %c127_i32_73 dim 1 : vector<128x128xf32>, i32 -> vector<128x128xf32>
      %157 = arith.minimumf %155, %156 : vector<128x128xf32>
      %158 = arith.minimumf %154, %157 : vector<128x128xf32>
      %159 = arith.select %104, %158, %105 : vector<128x128xi1>, vector<128x128xf32>
      %c1_i32_74 = arith.constant 1 : i32
      %160 = tpu.dynamic_rotate %159 by %c1_i32_74 dim 0 : vector<128x128xf32>, i32 -> vector<128x128xf32>
      %c127_i32_75 = arith.constant 127 : i32
      %161 = tpu.dynamic_rotate %159 by %c127_i32_75 dim 0 : vector<128x128xf32>, i32 -> vector<128x128xf32>
      %162 = arith.minimumf %160, %161 : vector<128x128xf32>
      %163 = arith.minimumf %159, %162 : vector<128x128xf32>
      %c1_i32_76 = arith.constant 1 : i32
      %164 = tpu.dynamic_rotate %163 by %c1_i32_76 dim 1 : vector<128x128xf32>, i32 -> vector<128x128xf32>
      %c127_i32_77 = arith.constant 127 : i32
      %165 = tpu.dynamic_rotate %163 by %c127_i32_77 dim 1 : vector<128x128xf32>, i32 -> vector<128x128xf32>
      %166 = arith.minimumf %164, %165 : vector<128x128xf32>
      %167 = arith.minimumf %163, %166 : vector<128x128xf32>
      %168 = arith.select %104, %167, %105 : vector<128x128xi1>, vector<128x128xf32>
      %c1_i32_78 = arith.constant 1 : i32
      %169 = tpu.dynamic_rotate %168 by %c1_i32_78 dim 0 : vector<128x128xf32>, i32 -> vector<128x128xf32>
      %c127_i32_79 = arith.constant 127 : i32
      %170 = tpu.dynamic_rotate %168 by %c127_i32_79 dim 0 : vector<128x128xf32>, i32 -> vector<128x128xf32>
      %171 = arith.minimumf %169, %170 : vector<128x128xf32>
      %172 = arith.minimumf %168, %171 : vector<128x128xf32>
      %c1_i32_80 = arith.constant 1 : i32
      %173 = tpu.dynamic_rotate %172 by %c1_i32_80 dim 1 : vector<128x128xf32>, i32 -> vector<128x128xf32>
      %c127_i32_81 = arith.constant 127 : i32
      %174 = tpu.dynamic_rotate %172 by %c127_i32_81 dim 1 : vector<128x128xf32>, i32 -> vector<128x128xf32>
      %175 = arith.minimumf %173, %174 : vector<128x128xf32>
      %176 = arith.minimumf %172, %175 : vector<128x128xf32>
      %177 = arith.select %104, %176, %105 : vector<128x128xi1>, vector<128x128xf32>
      %c1_i32_82 = arith.constant 1 : i32
      %178 = tpu.dynamic_rotate %177 by %c1_i32_82 dim 0 : vector<128x128xf32>, i32 -> vector<128x128xf32>
      %c127_i32_83 = arith.constant 127 : i32
      %179 = tpu.dynamic_rotate %177 by %c127_i32_83 dim 0 : vector<128x128xf32>, i32 -> vector<128x128xf32>
      %180 = arith.minimumf %178, %179 : vector<128x128xf32>
      %181 = arith.minimumf %177, %180 : vector<128x128xf32>
      %c1_i32_84 = arith.constant 1 : i32
      %182 = tpu.dynamic_rotate %181 by %c1_i32_84 dim 1 : vector<128x128xf32>, i32 -> vector<128x128xf32>
      %c127_i32_85 = arith.constant 127 : i32
      %183 = tpu.dynamic_rotate %181 by %c127_i32_85 dim 1 : vector<128x128xf32>, i32 -> vector<128x128xf32>
      %184 = arith.minimumf %182, %183 : vector<128x128xf32>
      %185 = arith.minimumf %181, %184 : vector<128x128xf32>
      %186 = arith.select %104, %185, %105 : vector<128x128xi1>, vector<128x128xf32>
      %187 = arith.subf %arg11, %186 : vector<128x128xf32>
      %188 = vector.shape_cast %187 : vector<128x128xf32> to vector<1x128x128xf32>
      %cst_86 = arith.constant dense<0xFF800000> : vector<1xf32>
      %189 = vector.multi_reduction <maximumf>, %188, %cst_86 [1, 2] : vector<1x128x128xf32> to vector<1xf32>
      %190 = vector.shape_cast %189 : vector<1xf32> to vector<1x1x1xf32>
      %191 = vector.extract %190[0, 0, 0] : f32 from vector<1x1x1xf32>
      %cst_87 = arith.constant 0.000000e+00 : f32
      %192 = arith.cmpf ogt, %191, %cst_87 : f32
      %193 = arith.extui %192 : i1 to i32
      %c1_i32_88 = arith.constant 1 : i32
      %194 = arith.addi %arg10, %c1_i32_88 : i32
      scf.yield %194, %186, %193 : i32, vector<128x128xf32>, i32
    }
    %c0_45 = arith.constant 0 : index
    %c0_46 = arith.constant 0 : index
    %109 = vector.load %arg6[%c0_45, %c0_46] : memref<128x128xf32, #tpu.memory_space<vmem>>, vector<128x128xf32>
    tpu.vector_store %arg6[%c0_45, %c0_46], %6#1 {strides = array<i32>} : memref<128x128xf32, #tpu.memory_space<vmem>>, vector<128x128xf32>,
    %c0_47 = arith.constant 0 : index
    %c0_48 = arith.constant 0 : index
    %110 = vector.load %arg7[%c0_47, %c0_48] : memref<128x128xf32, #tpu.memory_space<vmem>>, vector<128x128xf32>
    tpu.vector_store %arg7[%c0_47, %c0_48], %102 {strides = array<i32>} : memref<128x128xf32, #tpu.memory_space<vmem>>, vector<128x128xf32>,
    %c0_49 = arith.constant 0 : index
    %c0_50 = arith.constant 0 : index
    %111 = vector.load %arg8[%c0_49, %c0_50] : memref<128x128xf32, #tpu.memory_space<vmem>>, vector<128x128xf32>
    tpu.vector_store %arg8[%c0_49, %c0_50], %83 {strides = array<i32>} : memref<128x128xf32, #tpu.memory_space<vmem>>, vector<128x128xf32>,
    %cst_51 = arith.constant 0.000000e+00 : f32
    %112 = vector.broadcast %cst_51 : f32 to vector<128x128xf32>
    %113 = arith.select %104, %108#1, %112 : vector<128x128xi1>, vector<128x128xf32>
    %c0_52 = arith.constant 0 : index
    %c0_53 = arith.constant 0 : index
    %114 = vector.load %arg9[%c0_52, %c0_53] : memref<128x128xf32, #tpu.memory_space<vmem>>, vector<128x128xf32>
    tpu.vector_store %arg9[%c0_52, %c0_53], %113 {strides = array<i32>} : memref<128x128xf32, #tpu.memory_space<vmem>>, vector<128x128xf32>,
    return
  }
  func.func @transform_0(%arg0: i32) -> (i32, i32) {
    %c0_i32 = arith.constant 0 : i32
    %c0_i32_0 = arith.constant 0 : i32
    return %arg0, %c0_i32 : i32, i32
  }
  func.func @transform_1(%arg0: i32) -> (i32, i32) {
    %c0_i32 = arith.constant 0 : i32
    %c0_i32_0 = arith.constant 0 : i32
    %c0_i32_1 = arith.constant 0 : i32
    return %c0_i32, %c0_i32_0 : i32, i32
  }
  func.func @transform_2(%arg0: i32) -> (i32, i32) {
    %c0_i32 = arith.constant 0 : i32
    %c0_i32_0 = arith.constant 0 : i32
    %c0_i32_1 = arith.constant 0 : i32
    return %c0_i32, %c0_i32_0 : i32, i32
  }
  func.func @transform_3(%arg0: i32) -> (i32, i32) {
    %c0_i32 = arith.constant 0 : i32
    %c0_i32_0 = arith.constant 0 : i32
    %c0_i32_1 = arith.constant 0 : i32
    return %c0_i32, %c0_i32_0 : i32, i32
  }
  func.func @transform_4(%arg0: i32) -> (i32, i32) {
    %c0_i32 = arith.constant 0 : i32
    %c0_i32_0 = arith.constant 0 : i32
    %c0_i32_1 = arith.constant 0 : i32
    return %c0_i32, %c0_i32_0 : i32, i32
  }
  func.func @transform_5(%arg0: i32) -> (i32, i32) {
    %c0_i32 = arith.constant 0 : i32
    %c0_i32_0 = arith.constant 0 : i32
    return %arg0, %c0_i32 : i32, i32
  }
  func.func @transform_6(%arg0: i32) -> (i32, i32) {
    %c0_i32 = arith.constant 0 : i32
    %c0_i32_0 = arith.constant 0 : i32
    return %arg0, %c0_i32 : i32, i32
  }
  func.func @transform_7(%arg0: i32) -> (i32, i32) {
    %c0_i32 = arith.constant 0 : i32
    %c0_i32_0 = arith.constant 0 : i32
    return %arg0, %c0_i32 : i32, i32
  }
  func.func @transform_8(%arg0: i32) -> (i32, i32) {
    %c0_i32 = arith.constant 0 : i32
    %c0_i32_0 = arith.constant 0 : i32
    return %arg0, %c0_i32 : i32, i32
  }
}

</mosaic_0001>

<bundles_post_ra>
// kernel: tpu_custom_call.1
= control target key start
LH: loop header
LB: loop body
LE: loop exit
PB: predicated region body
PF: predicated region fallthrough
CT: control target
= control target key end

     0   :  { %s15952_s0 = inlined_call_operand.hbm [shape: f32[256,128], index: 0, kind: input, shape index: {}]   ;;  %s15953_s1 = inlined_call_operand.hbm [shape: f32[128,128], index: 1, kind: input, shape index: {}]   ;;  %s15954_s2 = inlined_call_operand.hbm [shape: f32[128,128], index: 2, kind: input, shape index: {}]   ;;  %s15955_s3 = inlined_call_operand.hbm [shape: bf16[128,128], index: 3, kind: input, shape index: {}]   ;;  %s15956_s4 = inlined_call_operand.hbm [shape: bf16[128,128], index: 4, kind: input, shape index: {}]   ;;  %s15957_s5 = inlined_call_operand.hbm [shape: f32[256,128], index: 5, kind: output, shape index: {0}]   ;;  %s15958_s6 = inlined_call_operand.hbm [shape: f32[256,128], index: 6, kind: output, shape index: {1}]   ;;  %s15959_s7 = inlined_call_operand.hbm [shape: f32[256,128], index: 7, kind: output, shape index: {2}]   ;;  %s15960_s8 = inlined_call_operand.hbm [shape: f32[256,128], index: 8, kind: output, shape index: {3}]  }
   0x1   :  { %16388 = sst [smem:[#allocation177_spill]] %s15952_s0 }
   0x2   :  { %16389 = sst [smem:[#allocation178_spill]] %s15953_s1 }
   0x3   :  { %16390 = sst [smem:[#allocation179_spill]] %s15954_s2 }
   0x4   :  { %16391 = sst [smem:[#allocation180_spill]] %s15955_s3 }
   0x5   :  { %16392 = sst [smem:[#allocation181_spill]] %s15956_s4 }
   0x6   :  { %14 = vsyncpa [#allocation3], 0 }
   0x7   :  { %16 = vsyncpa [#allocation3 + $0x1], 0 }
   0x8   :  { %17 = vsyncpa [#allocation6], 0 }
   0x9   :  { %18 = vsyncpa [#allocation9], 0 }
   0xa   :  { %19 = vsyncpa [#allocation4], 0 }
   0xb   :  { %21 = vsyncpa [#allocation4 + $0x1], 0 }
   0xc   :  { %22 = vsyncpa [#allocation13], 0 }
   0xd   :  { %24 = vsyncpa [#allocation13 + $0x1], 0 }
   0xe   :  { %25 = vsyncpa [#allocation16], 0 }
   0xf   :  { %27 = vsyncpa [#allocation16 + $0x1], 0  ;;  %s8034_s27 = smov 0   ;;  %s8036_s28 = smov 0  }
  0x10   :  { %s8038_s29 = smov 0   ;;  %s8040_s30 = smov 0  }
  0x11 LB: > { %s8055_s9 = sadd.s32 4294967295, %s7832_s30   ;;  %s15961_s10 = sadd.s32 4294967294, %s7832_s30   ;;  %s7832_s30 = sphi %s8040_s30, %s17668_s30   ;;  %s7828_s29 = sphi %s8038_s29, %s17667_s29   ;;  %s7824_s28 = sphi %s8036_s28, %s17666_s28   ;;  %s7820_s27 = sphi %s8034_s27, %s17665_s27  }
  0x12   : > { %p53_p0 = scmp.ne.s32.totalorder %s7824_s28, %s7820_s27  ;;  %p54_p1 = scmp.eq.s32.totalorder %s8055_s9, 0 }
  0x13   : > { %p161_p2 = scmp.eq.s32.totalorder %s8055_s9, 1  ;;  %p167_p3 = scmp.eq.s32.totalorder %s15961_s10, 1 }
  0x14   : > { %p8066_p4 = por %p54_p1, %p53_p0  ;;  %p6673_p5 = scmp.ge.s32.totalorder %s7832_s30, 1 }
  0x15   : > { %p8071_p6 = por %p167_p3, %p53_p0  ;;  %p252_p7 = scmp.lt.s32.totalorder %s7832_s30, 3 }
  0x16   : > { %s16395_s1 = sld [smem:[#allocation178_spill]]  ;;  %s7970_s17 = smov [#allocation5]  }
  0x17   : > { %p8079_p8 = pnand %p6673_p5, %p252_p7  ;;  %s265_s18 = sshll.u32 %s7970_s17, 4  ;;  %s266_s18 = int_to_ptr.vmem [resolvable:$true] %s265_s18 }
  0x18   : > { %s16398_s3 = sld [smem:[#allocation180_spill]]  ;;  %s15962_s23 = smov 128  }
  0x19   : > { %p6857_p9 = pneg %p8079_p8  ;;  %s15964_s24 = smov 8  }
  0x1a   : > { %s7973_s25 = smov [#allocation8]   ;;  %s7974_s13 = smov 64  }
  0x1b   : > { %p8087_p10 = pnand %p6857_p9, %p54_p1  ;;  %s293_s26 = sshll.u32 %s7973_s25, 4  ;;  %s294_s26 = int_to_ptr.vmem [resolvable:$true] %s293_s26 }
  0x1c   : > { %s263_s15 = sshll.u32 %s16395_s1, 4  ;;  %s7975_s14 = smov 4   ;;  %s264_s15 = int_to_ptr.hbm [resolvable:$true] %s263_s15 }
  0x1d   : > { %6860 = dma.hbm_to_vmem [thread:$0]  (!%p8087_p10), %s264_s15, 2048, %s266_s18, [#allocation6], %s15962_s23, %s15962_s23, %s15964_s24  }
  0x1e   : > { %s291_s22 = sshll.u32 %s16398_s3, 4  ;;  %s16399_s2 = sld [smem:[#allocation179_spill]]  ;;  %s292_s22 = int_to_ptr.hbm [resolvable:$true] %s291_s22 }
  0x1f   : > { %6866 = dma.hbm_to_vmem [thread:$0]  (!%p8087_p10), %s292_s22, 1024, %s294_s26, [#allocation9], %s7974_s13, %s7974_s13, %s7975_s14  }
  0x20   : > { %s7976_s15 = smov [#allocation7]   ;;  %s16400_s4 = sld [smem:[#allocation181_spill]] }
  0x21   : > { %s279_s18 = sshll.u32 %s7976_s15, 4  ;;  %s16401_s22 = smov 128   ;;  %s280_s18 = int_to_ptr.vmem [resolvable:$true] %s279_s18 }
  0x22   : > { %s7977_s26 = smov [#allocation10]   ;;  %s8116_s20 = sadd.s32 1, %s7832_s30  }
  0x23   : > { %s307_s17 = sshll.u32 %s7977_s26, 4  ;;  %s40_s15 = sadd.s32 1, %s7828_s29  ;;  %s308_s17 = int_to_ptr.vmem [resolvable:$true] %s307_s17 }
  0x24   : > { %s277_s21 = sshll.u32 %s16399_s2, 4  ;;  %s37_s10 = ssub.s32 %s7832_s30, %s8116_s20  ;;  %s278_s21 = int_to_ptr.hbm [resolvable:$true] %s277_s21 }
  0x25   : > { %6863 = dma.hbm_to_vmem [thread:$0]  (!%p8087_p10), %s278_s21, 2048, %s280_s18, [#allocation6], %s16401_s22, %s16401_s22, %s15964_s24  }
  0x26   : > { %s305_s23 = sshll.u32 %s16400_s4, 4  ;;  %p47_p12 = scmp.ne.s32.totalorder %s7828_s29, %s7824_s28  ;;  %s306_s23 = int_to_ptr.hbm [resolvable:$true] %s305_s23 }
  0x27   : > { %6869 = dma.hbm_to_vmem [thread:$0]  (!%p8087_p10), %s306_s23, 1024, %s308_s17, [#allocation9], %s7974_s13, %s7974_s13, %s7975_s14  }
  0x28   : > { %p38_p13 = scmp.eq.s32.totalorder %s37_s10, 0  ;;  %p48_p0 = scmp.eq.s32.totalorder %s7832_s30, 0 }
  0x29   : > { %p8126_p3 = por %p161_p2, %p47_p12  ;;  %p6891_p5 = scmp.lt.s32.totalorder %s7832_s30, 2 }
  0x2a   : > { %s8132_s21 = scalar_select %p38_p13, %s7828_s29, %s40_s15  }
  0x2b   : > { %p49_p7 = por %p48_p0, %p47_p12  ;;  %s321_s18 = sand.u32 1, %s7828_s29  }
  0x2c   : > { %s6679_s19 = sshll.u32 %s321_s18, 7  ;;  %s6786_s23 = sshll.u32 %s7832_s30, 7 }
  0x2d   : > { %s16403_s0 = sld [smem:[#allocation177_spill]]  ;;  %s325_s17 = scalar_lea.vmem [#allocation2], %s6679_s19 }
  0x2e   : > { %s333_s24 = sshll.u32 %s325_s17, 4  ;;  %p8139_p2 = pnand %p6891_p5, %p49_p7  ;;  %s334_s24 = int_to_ptr.vmem [resolvable:$true] %s333_s24 }
  0x2f   : > { %s322_s15 = scalar_lea.sflag [#allocation3], %s321_s18 }
  0x30   : > { %p7504_p10 = pneg %p8139_p2 }
  0x33   : > { %s330_s26 = scalar_lea.hbm %s16403_s0, %s6786_s23  ;;  %s7507_s13 = scalar_lea.hbm %s16403_s0, 256 }
  0x34   : > { %s331_s10 = sshll.u32 %s330_s26, 4  ;;  %s332_s10 = int_to_ptr.hbm [resolvable:$true] %s331_s10 }
  0x35   : > { %s7500_s2 = sshra.s32 %s332_s10, 4  ;;  %s7501_s2 = int_to_ptr.hbm [resolvable:$true] %s7500_s2 }
  0x36   : > { %s7502_s3 = scalar_lea.hbm %s7501_s2, 128  ;;  %p7508_p0 = scmp.lt.s32.totalorder %s7501_s2, %s16403_s0 }
  0x37   : > { %p7503_p9 = scmp.ne.s32.totalorder %s7501_s2, %s7502_s3  ;;  %p7509_p5 = scmp.lt.s32.totalorder %s7507_s13, %s7502_s3 }
  0x39   : > { %p7505_p12 = pnand %p7504_p10, %p7503_p9  ;;  %p7510_p7 = por %p7509_p5, %p7508_p0 }
  0x3b   : > { %p7506_p13 = pneg %p7505_p12 }
  0x3d   : > { %p7511_p11 = pnand %p7510_p7, %p7506_p13 }
  0x3f   : > { %7514 = shalt.err (!%p7511_p11)
}
  0x40   : > { %s16405_s18 = smov 8   ;;  %345 = sbr.rel (%p8079_p8) target bundleno = 4015 (0xfaf), region = 40 }
  0x41   : > { %6873 = dma.hbm_to_vmem [thread:$0]  (!%p8139_p2), %s332_s10, 2048, %s334_s24, %s322_s15, %s16401_s22, %s16401_s22, %s16405_s18  }
  0x45   : > { %s8159_s17 = sand.u32 1, %s7824_s28  }
  0x46   : > { %s8162_s2 = sshll.u32 %s8159_s17, 7  ;;  %s348_s3 = scalar_lea.sflag [#allocation3], %s8159_s17 }
  0x47   : > { %s8166_s23 = scalar_lea.vmem [#allocation2], %s8162_s2 }
  0x48   : > { %7795 = dma.done.wait (%p8066_p4), %s348_s3, 2048  }
  0x49   : > { %7797 = vsyncadd (%p8066_p4), %s348_s3, 4294965248 }
  0x4a   : > { %7799 = dma.done.wait (%p54_p1), [#allocation6], 4096  }
  0x4b   : > { %7801 = vsyncadd (%p54_p1), [#allocation6], 4294963200 }
  0x4c   : > { %7803 = dma.done.wait (%p54_p1), [#allocation9], 2048  }
  0x4d   : > { %7805 = vsyncadd (%p54_p1), [#allocation9], 4294965248  ;;  %v8180_v0 = vld [vmem:[#allocation5] sm:$0xff]  ;;  %v442_v2 = vld [vmem:[%s8166_s23 + $0x8] sm:$0xff]  ;;  %s8261_s1 = scalar_lea.vmem [#allocation11], %s8162_s2  ;;  %s8264_s11 = scalar_lea.vmem [#allocation12], %s8162_s2 }
  0x4e   : > { %16406 = vst [vmem:[#allocation23_spill] sm:$0xff] %v8180_v0  ;;  %v441_v1 = vld [vmem:[%s8166_s23] sm:$0xff]  ;;  %v8184_v3 = vld [vmem:[#allocation5 + $0x8] sm:$0xff]  ;;  %v8186_v4 = vld [vmem:[#allocation5 + $0x10] sm:$0xff]  ;;  %vm458_vm1 = vcmp.gt.f32.partialorder %v442_v2, 0.5  ;;  %s8267_s16 = scalar_lea.vmem [#allocation14], %s8162_s2 }
  0x4f   : > { %16407 = vst [vmem:[#allocation24_spill] sm:$0xff] %v8184_v3  ;;  %v443_v5 = vld [vmem:[%s8166_s23 + $0x10] sm:$0xff]  ;;  %v444_v6 = vld [vmem:[%s8166_s23 + $0x18] sm:$0xff]  ;;  %v445_v7 = vld [vmem:[%s8166_s23 + $0x20] sm:$0xff]  ;;  %vm457_vm0 = vcmp.gt.f32.partialorder %v441_v1, 0.5  ;;  %v474_v32 = vsel %vm458_vm1, %v8184_v3, 0.0  }
  0x50   : > { %16408 = vst [vmem:[#allocation25_spill] sm:$0xff] %v8186_v4  ;;  %v8191_v8 = vld [vmem:[#allocation5 + $0x18] sm:$0xff]  ;;  %v8193_v9 = vld [vmem:[#allocation5 + $0x20] sm:$0xff]  ;;  %v8195_v10 = vld [vmem:[#allocation5 + $0x28] sm:$0xff]  ;;  %vm459_vm2 = vcmp.gt.f32.partialorder %v443_v5, 0.5  ;;  %vm460_vm3 = vcmp.gt.f32.partialorder %v444_v6, 0.5 }
  0x51   : > { %16409 = vst [vmem:[#allocation26_spill] sm:$0xff] %v8191_v8  ;;  %v8197_v11 = vld [vmem:[#allocation5 + $0x30] sm:$0xff]  ;;  %v446_v12 = vld [vmem:[%s8166_s23 + $0x28] sm:$0xff]  ;;  %v448_v14 = vld [vmem:[%s8166_s23 + $0x38] sm:$0xff]  ;;  %vm461_vm4 = vcmp.gt.f32.partialorder %v445_v7, 0.5  ;;  %v473_v29 = vsel %vm457_vm0, %v8180_v0, 0.0  }
  0x52   : > { %16410 = vst [vmem:[#allocation27_spill] sm:$0xff] %v8193_v9  ;;  %v447_v13 = vld [vmem:[%s8166_s23 + $0x30] sm:$0xff]  ;;  %v8202_v15 = vld [vmem:[#allocation5 + $0x38] sm:$0xff]  ;;  %v8204_v16 = vld [vmem:[#allocation5 + $0x40] sm:$0xff]  ;;  %vm462_vm5 = vcmp.gt.f32.partialorder %v446_v12, 0.5  ;;  %vm464_vm7 = vcmp.gt.f32.partialorder %v448_v14, 0.5 }
  0x53   : > { %16411 = vst [vmem:[#allocation28_spill] sm:$0xff] %v8195_v10  ;;  %v8206_v17 = vld [vmem:[#allocation5 + $0x48] sm:$0xff]  ;;  %v8208_v18 = vld [vmem:[#allocation5 + $0x50] sm:$0xff]  ;;  %v449_v19 = vld [vmem:[%s8166_s23 + $0x40] sm:$0xff]  ;;  %vm463_vm6 = vcmp.gt.f32.partialorder %v447_v13, 0.5  ;;  %v475_v33 = vsel %vm459_vm2, %v8186_v4, 0.0  }
  0x54   : > { %16412 = vst [vmem:[#allocation29_spill] sm:$0xff] %v8197_v11  ;;  %v450_v20 = vld [vmem:[%s8166_s23 + $0x48] sm:$0xff]  ;;  %v451_v21 = vld [vmem:[%s8166_s23 + $0x50] sm:$0xff]  ;;  %v8213_v22 = vld [vmem:[#allocation5 + $0x58] sm:$0xff]  ;;  %vm465_vm8 = vcmp.gt.f32.partialorder %v449_v19, 0.5  ;;  %v476_v35 = vsel %vm460_vm3, %v8191_v8, 0.0  }
  0x55   : > { %16413 = vst [vmem:[#allocation30_spill] sm:$0xff] %v8202_v15  ;;  %v8215_v23 = vld [vmem:[#allocation5 + $0x60] sm:$0xff]  ;;  %v452_v24 = vld [vmem:[%s8166_s23 + $0x58] sm:$0xff]  ;;  %v454_v26 = vld [vmem:[%s8166_s23 + $0x68] sm:$0xff]  ;;  %vm466_vm9 = vcmp.gt.f32.partialorder %v450_v20, 0.5  ;;  %vm467_vm10 = vcmp.gt.f32.partialorder %v451_v21, 0.5 }
  0x56   : > { %16414 = vst [vmem:[#allocation31_spill] sm:$0xff] %v8204_v16  ;;  %v453_v25 = vld [vmem:[%s8166_s23 + $0x60] sm:$0xff]  ;;  %v455_v27 = vld [vmem:[%s8166_s23 + $0x70] sm:$0xff]  ;;  %v456_v28 = vld [vmem:[%s8166_s23 + $0x78] sm:$0xff]  ;;  %vm468_vm11 = vcmp.gt.f32.partialorder %v452_v24, 0.5  ;;  %vm470_vm13 = vcmp.gt.f32.partialorder %v454_v26, 0.5 }
  0x57   : > { %16415 = vst [vmem:[#allocation32_spill] sm:$0xff] %v8206_v17  ;;  %vm469_vm12 = vcmp.gt.f32.partialorder %v453_v25, 0.5  ;;  %v8224_v30 = vld [vmem:[#allocation5 + $0x68] sm:$0xff]  ;;  %v8226_v31 = vld [vmem:[#allocation5 + $0x70] sm:$0xff]  ;;  %vm471_vm14 = vcmp.gt.f32.partialorder %v455_v27, 0.5  ;;  %vm472_vm15 = vcmp.gt.f32.partialorder %v456_v28, 0.5 }
  0x58   : > { %16416 = vst [vmem:[#allocation33_spill] sm:$0xff] %v8208_v18  ;;  %v8232_v34 = vld [vmem:[#allocation5 + $0x78] sm:$0xff]  ;;  %v477_v36 = vsel %vm461_vm4, %v8193_v9, 0.0   ;;  %v478_v37 = vsel %vm462_vm5, %v8195_v10, 0.0   ;;  %v479_v38 = vsel %vm463_vm6, %v8197_v11, 0.0   ;;  %v480_v39 = vsel %vm464_vm7, %v8202_v15, 0.0  }
  0x59   : > { %16417 = vst [vmem:[#allocation34_spill] sm:$0xff] %v8213_v22  ;;  %v481_v40 = vsel %vm465_vm8, %v8204_v16, 0.0   ;;  %v482_v41 = vsel %vm466_vm9, %v8206_v17, 0.0   ;;  %v483_v42 = vsel %vm467_vm10, %v8208_v18, 0.0   ;;  %v484_v43 = vsel %vm468_vm11, %v8213_v22, 0.0   ;;  %s8270_s24 = scalar_lea.vmem [#allocation15], %s8162_s2 }
  0x5a   : > { %16418 = vst [vmem:[#allocation35_spill] sm:$0xff] %v8215_v23  ;;  %v485_v44 = vsel %vm469_vm12, %v8215_v23, 0.0   ;;  %v486_v45 = vsel %vm470_vm13, %v8224_v30, 0.0   ;;  %v487_v46 = vsel %vm471_vm14, %v8226_v31, 0.0   ;;  %v488_v47 = vsel %vm472_vm15, %v8232_v34, 0.0   ;;  %s8304_s22 = smov 0  }
  0x5b   : > { %16419 = vst [vmem:[#allocation36_spill] sm:$0xff] %v8224_v30 }
  0x5c   : > { %16420 = vst [vmem:[#allocation37_spill] sm:$0xff] %v8226_v31 }
  0x5d   : > { %16421 = vst [vmem:[#allocation38_spill] sm:$0xff] %v8232_v34 }
  0x5e LB: >> { %16422 = vst [vmem:[#allocation39_spill] sm:$0xff] %v7836_v47  ;;  %v530_v48 = vlaneseq  ;;  %v515_v49 = vrot.slane %v7892_v32, 7  ;;  %v516_v50 = vrot.slane %v7888_v33, 7  ;;  %v517_v52 = vrot.slane %v7884_v35, 7  ;;  %s7978_s10 = smov 127   ;;  %s7979_s15 = smov 1   ;;  %s7900_s22 = sphi %s8304_s22, %s2480_s22   ;;  %v7896_v29 = vphi %v473_v29, %v17058_v29   ;;  %v7892_v32 = vphi %v474_v32, %v17057_v32   ;;  %v7888_v33 = vphi %v475_v33, %v17056_v33   ;;  %v7884_v35 = vphi %v476_v35, %v17055_v35   ;;  %v7880_v36 = vphi %v477_v36, %v17054_v36   ;;  %v7876_v37 = vphi %v478_v37, %v17053_v37   ;;  %v7872_v38 = vphi %v479_v38, %v17052_v38   ;;  %v7868_v39 = vphi %v480_v39, %v17051_v39   ;;  %v7864_v40 = vphi %v481_v40, %v17050_v40   ;;  %v7860_v41 = vphi %v482_v41, %v17049_v41   ;;  %v7856_v42 = vphi %v483_v42, %v17048_v42   ;;  %v7852_v43 = vphi %v484_v43, %v17047_v43   ;;  %v7848_v44 = vphi %v485_v44, %v17046_v44   ;;  %v7844_v45 = vphi %v486_v45, %v17045_v45   ;;  %v7840_v46 = vphi %v487_v46, %v17044_v46   ;;  %v7836_v47 = vphi %v488_v47, %v17043_v47  }
  0x5f   : >> { %16423 = vst [vmem:[#allocation40_spill] sm:$0xff] %v7840_v46  ;;  %v518_v53 = vrot.slane %v7880_v36, 7  ;;  %v514_v56 = vrot.slane %v7896_v29, 7  ;;  %v529_v57 = vrot.slane %v7836_v47, 7  ;;  %v519_v59 = vrot.slane %v7876_v37, 7  ;;  %s2480_s22 = sadd.s32 1, %s7900_s22  }
  0x60   : >> { %16424 = vst [vmem:[#allocation41_spill] sm:$0xff] %v7844_v45  ;;  %v8359_v51 = vshrl.u32 %v530_v48, 7  ;;  %v520_v63 = vrot.slane %v7872_v38, 7  ;;  %v521_v1 = vrot.slane %v7868_v39, 7  ;;  %v522_v2 = vrot.slane %v7864_v40, 7  ;;  %p508_p4 = scmp.lt.s32.totalorder %s2480_s22, 64 }
  0x61   : >> { %16425 = vst [vmem:[#allocation42_spill] sm:$0xff] %v7848_v44  ;;  %v523_v12 = vrot.slane %v7860_v41, 7  ;;  %v524_v13 = vrot.slane %v7856_v42, 7  ;;  %v525_v14 = vrot.slane %v7852_v43, 7  ;;  %v526_v24 = vrot.slane %v7848_v44, 7 }
  0x62   : >> { %16426 = vst [vmem:[#allocation43_spill] sm:$0xff] %v7852_v43  ;;  %vm16126_vm0 = vcmp.lt.s32.totalorder %v8359_v51, 1  ;;  %v527_v25 = vrot.slane %v7844_v45, 7  ;;  %v528_v26 = vrot.slane %v7840_v46, 7  ;;  %vm16125_vm1 = vcmp.lt.s32.totalorder %v8359_v51, 7 }
  0x63   : >> { %16427 = vst [vmem:[#allocation44_spill] sm:$0xff] %v7856_v42  ;;  %v8366_v54 = vsel %vm16126_vm0, %v515_v49, %v516_v50  ;;  %v8370_v55 = vsel %vm16126_vm0, %v517_v52, %v518_v53  ;;  %v8380_v58 = vsel %vm16126_vm0, %v529_v57, %v514_v56  ;;  %v8387_v60 = vsel %vm16126_vm0, %v516_v50, %v517_v52 }
  0x64   : >> { %16428 = vst [vmem:[#allocation45_spill] sm:$0xff] %v7860_v41  ;;  %586 = vrot.lane.b32.xlu1 %v8366_v54, %s7978_s10  ;;  %590 = vrot.lane.b32.xlu2 %v8370_v55, %s7978_s10  ;;  %v8391_v61 = vsel %vm16126_vm0, %v518_v53, %v519_v59  ;;  %v8395_v62 = vsel %vm16126_vm0, %v514_v56, %v515_v49  ;;  %v549_v50 = vrot.slane %v7896_v29, 1  ;;  %v550_v52 = vrot.slane %v7892_v32, 1 }
  0x65   : >> { %16429 = vst [vmem:[#allocation46_spill] sm:$0xff] %v7864_v40  ;;  %582 = vrot.lane.b32.xlu0 %v8380_v58, %s7978_s10  ;;  %v8408_v5 = vsel %vm16126_vm0, %v520_v63, %v521_v1  ;;  %v8412_v6 = vsel %vm16126_vm0, %v521_v1, %v522_v2  ;;  %v8416_v7 = vsel %vm16126_vm0, %v519_v59, %v520_v63  ;;  %v552_v56 = vrot.slane %v7884_v35, 1 }
  0x66   : >> { %16430 = vst [vmem:[#allocation47_spill] sm:$0xff] %v7868_v39  ;;  %v8429_v19 = vsel %vm16126_vm0, %v523_v12, %v524_v13  ;;  %v8433_v20 = vsel %vm16126_vm0, %v524_v13, %v525_v14  ;;  %v8437_v21 = vsel %vm16126_vm0, %v522_v2, %v523_v12  ;;  %v8450_v27 = vsel %vm16126_vm0, %v526_v24, %v527_v25 }
  0x67   : >> { %16431 = vst [vmem:[#allocation48_spill] sm:$0xff] %v7872_v38  ;;  %v8454_v28 = vsel %vm16126_vm0, %v527_v25, %v528_v26  ;;  %v8458_v48 = vsel %vm16126_vm0, %v525_v14, %v526_v24  ;;  %v8468_v49 = vsel %vm16126_vm0, %v528_v26, %v529_v57  ;;  %v8505_v53 = vsel %vm16125_vm1, %v549_v50, %v550_v52 }
  0x68   : >> { %16432 = vst [vmem:[#allocation49_spill] sm:$0xff] %v7876_v37  ;;  %v553_v57 = vrot.slane %v7880_v36, 1  ;;  %v551_v59 = vrot.slane %v7888_v33, 1  ;;  %v555_v12 = vrot.slane %v7872_v38, 1  ;;  %v556_v13 = vrot.slane %v7868_v39, 1 }
  0x69   : >> { %16433 = vst [vmem:[#allocation50_spill] sm:$0xff] %v7880_v36  ;;  %v554_v14 = vrot.slane %v7876_v37, 1  ;;  %v557_v34 = vrot.slane %v7864_v40, 1  ;;  %v561_v30 = vrot.slane %v7848_v44, 1  ;;  %v562_v23 = vrot.slane %v7844_v45, 1 }
  0x6a   : >> { %16434 = vst [vmem:[#allocation51_spill] sm:$0xff] %v7884_v35  ;;  %v8518_v63 = vsel %vm16125_vm1, %v552_v56, %v553_v57  ;;  %v8522_v1 = vsel %vm16125_vm1, %v551_v59, %v552_v56  ;;  %v8526_v2 = vsel %vm16125_vm1, %v550_v52, %v551_v59  ;;  %v8541_v25 = vsel %vm16125_vm1, %v555_v12, %v556_v13 }
  0x6b   : >> { %16435 = vst [vmem:[#allocation52_spill] sm:$0xff] %v7888_v33  ;;  %v8545_v26 = vsel %vm16125_vm1, %v554_v14, %v555_v12  ;;  %v8549_v52 = vsel %vm16125_vm1, %v553_v57, %v554_v14  ;;  %v558_v56 = vrot.slane %v7860_v41, 1  ;;  %v559_v59 = vrot.slane %v7856_v42, 1 }
  0x6c   : >> { %16436 = vst [vmem:[#allocation53_spill] sm:$0xff] %v7892_v32  ;;  %588 = vrot.lane.b32.xlu1 %v8387_v60, %s7978_s10  ;;  %592 = vrot.lane.b32.xlu2 %v8391_v61, %s7978_s10  ;;  %v8572_v31 = vsel %vm16125_vm1, %v556_v13, %v557_v34  ;;  %v560_v22 = vrot.slane %v7852_v43, 1  ;;  %v564_v17 = vrot.slane %v7836_v47, 1  ;;  %v563_v16 = vrot.slane %v7840_v46, 1 }
  0x6d   : >> { %16437 = vst [vmem:[#allocation54_spill] sm:$0xff] %v7896_v29  ;;  %584 = vrot.lane.b32.xlu0 %v8395_v62, %s7978_s10  ;;  %v8564_v57 = vsel %vm16125_vm1, %v558_v56, %v559_v59  ;;  %v8568_v14 = vsel %vm16125_vm1, %v557_v34, %v558_v56  ;;  %v8587_v34 = vsel %vm16125_vm1, %v561_v30, %v562_v23 }
  0x6e   : >> { %16438 = vst [vmem:[#allocation55_spill] sm:$0xff] %v8359_v51  ;;  %v8591_v13 = vsel %vm16125_vm1, %v560_v22, %v561_v30  ;;  %v8595_v18 = vsel %vm16125_vm1, %v559_v59, %v560_v22  ;;  %v8613_v22 = vsel %vm16125_vm1, %v564_v17, %v549_v50  ;;  %v8617_v59 = vsel %vm16125_vm1, %v563_v16, %v564_v17 }
  0x6f   : >> { %16439 = vst [vmem:[#allocation56_spill] sm:$0xff] %v8366_v54  ;;  %v8621_v10 = vsel %vm16125_vm1, %v562_v23, %v563_v16 }
  0x70   : >> { %16440 = vst [vmem:[#allocation57_spill] sm:$0xff] %v8370_v55 }
  0x71   : >> { %16441 = vst [vmem:[#allocation58_spill] sm:$0xff] %v8380_v58 }
  0x72   : >> { %16442 = vst [vmem:[#allocation59_spill] sm:$0xff] %v8387_v60 }
  0x73   : >> { %16443 = vst [vmem:[#allocation60_spill] sm:$0xff] %v8391_v61 }
  0x74   : >> { %16444 = vst [vmem:[#allocation61_spill] sm:$0xff] %v8395_v62  ;;  %596 = vrot.lane.b32.xlu1 %v8408_v5, %s7978_s10  ;;  %598 = vrot.lane.b32.xlu2 %v8412_v6, %s7978_s10 }
  0x75   : >> { %16445 = vst [vmem:[#allocation62_spill] sm:$0xff] %v8408_v5  ;;  %594 = vrot.lane.b32.xlu0 %v8416_v7, %s7978_s10 }
  0x76   : >> { %16446 = vst [vmem:[#allocation63_spill] sm:$0xff] %v8412_v6 }
  0x77   : >> { %16447 = vst [vmem:[#allocation64_spill] sm:$0xff] %v8416_v7 }
  0x78   : >> { %16448 = vst [vmem:[#allocation65_spill] sm:$0xff] %v8429_v19 }
  0x79   : >> { %16449 = vst [vmem:[#allocation66_spill] sm:$0xff] %v8433_v20 }
  0x7a   : >> { %16450 = vst [vmem:[#allocation67_spill] sm:$0xff] %v8437_v21 }
  0x7b   : >> { %16451 = vst [vmem:[#allocation68_spill] sm:$0xff] %v8450_v27 }
  0x7c   : >> { %602 = vrot.lane.b32.xlu1 %v8429_v19, %s7978_s10  ;;  %604 = vrot.lane.b32.xlu2 %v8433_v20, %s7978_s10  ;;  %16452 = vst [vmem:[#allocation69_spill] sm:$0xff] %v8454_v28 }
  0x7d   : >> { %600 = vrot.lane.b32.xlu0 %v8437_v21, %s7978_s10  ;;  %16453 = vst [vmem:[#allocation70_spill] sm:$0xff] %v8458_v48 }
  0x7e   : >> { %16454 = vst [vmem:[#allocation71_spill] sm:$0xff] %v8468_v49 }
  0x7f   : >> { %16455 = vst [vmem:[#allocation72_spill] sm:$0xff] %v8518_v63 }
  0x80   : >> { %16456 = vst [vmem:[#allocation73_spill] sm:$0xff] %v8522_v1 }
  0x81   : >> { %16457 = vst [vmem:[#allocation74_spill] sm:$0xff] %v8526_v2 }
  0x82   : >> { %16458 = vst [vmem:[#allocation75_spill] sm:$0xff] %v8541_v25 }
  0x83   : >> { %16459 = vst [vmem:[#allocation76_spill] sm:$0xff] %v8545_v26 }
  0x84   : >> { %608 = vrot.lane.b32.xlu1 %v8450_v27, %s7978_s10  ;;  %610 = vrot.lane.b32.xlu2 %v8454_v28, %s7978_s10  ;;  %16460 = vst [vmem:[#allocation77_spill] sm:$0xff] %v8549_v52 }
  0x85   : >> { %606 = vrot.lane.b32.xlu0 %v8458_v48, %s7978_s10  ;;  %16461 = vst [vmem:[#allocation78_spill] sm:$0xff] %v8564_v57 }
  0x86   : >> { %16462 = vst [vmem:[#allocation79_spill] sm:$0xff] %v8568_v14 }
  0x87   : >> { %16463 = vst [vmem:[#allocation80_spill] sm:$0xff] %v8572_v31 }
  0x88   : >> { %16464 = vst [vmem:[#allocation81_spill] sm:$0xff] %v8587_v34 }
  0x89   : >> { %16465 = vst [vmem:[#allocation82_spill] sm:$0xff] %v8591_v13 }
  0x8a   : >> { %16466 = vst [vmem:[#allocation83_spill] sm:$0xff] %v8595_v18 }
  0x8b   : >> { %16468 = vst [vmem:[#allocation85_spill] sm:$0xff] %v8613_v22 }
  0x8c   : >> { %678 = vrot.lane.b32.xlu1 %v7896_v29, %s7978_s10  ;;  %680 = vrot.lane.b32.xlu2 %v7892_v32, %s7978_s10  ;;  %16469 = vst [vmem:[#allocation86_spill] sm:$0xff] %v8617_v59 }
  0x8d   : >> { %612 = vrot.lane.b32.xlu0 %v8468_v49, %s7978_s10  ;;  %16470 = vst [vmem:[#allocation87_spill] sm:$0xff] %v8621_v10 }
  0x94   : >> { %684 = vrot.lane.b32.xlu1 %v7884_v35, %s7978_s10  ;;  %686 = vrot.lane.b32.xlu2 %v7880_v36, %s7978_s10 }
  0x95   : >> { %682 = vrot.lane.b32.xlu0 %v7888_v33, %s7978_s10 }
  0x9c   : >> { %690 = vrot.lane.b32.xlu1 %v7872_v38, %s7978_s10  ;;  %692 = vrot.lane.b32.xlu2 %v7868_v39, %s7978_s10 }
  0x9d   : >> { %688 = vrot.lane.b32.xlu0 %v7876_v37, %s7978_s10 }
  0xa4   : >> { %696 = vrot.lane.b32.xlu1 %v7860_v41, %s7978_s10  ;;  %698 = vrot.lane.b32.xlu2 %v7856_v42, %s7978_s10 }
  0xa5   : >> { %694 = vrot.lane.b32.xlu0 %v7864_v40, %s7978_s10 }
  0xac   : >> { %702 = vrot.lane.b32.xlu1 %v7848_v44, %s7978_s10  ;;  %704 = vrot.lane.b32.xlu2 %v7844_v45, %s7978_s10 }
  0xad   : >> { %700 = vrot.lane.b32.xlu0 %v7852_v43, %s7978_s10 }
  0xb4   : >> { %774 = vrot.lane.b32.xlu2 %v8505_v53, %s7978_s10  ;;  %708 = vrot.lane.b32.xlu1 %v7836_v47, %s7978_s10 }
  0xb5   : >> { %706 = vrot.lane.b32.xlu0 %v7840_v46, %s7978_s10 }
  0xbc   : >> { %780 = vrot.lane.b32.xlu2 %v8518_v63, %s7978_s10  ;;  %778 = vrot.lane.b32.xlu1 %v8522_v1, %s7978_s10 }
  0xbd   : >> { %776 = vrot.lane.b32.xlu0 %v8526_v2, %s7978_s10 }
  0xbe   : >> { %v8537_v24 = vpop.permute.xlu2 %590 }
  0xc4   : >> { %786 = vrot.lane.b32.xlu2 %v8541_v25, %s7978_s10  ;;  %784 = vrot.lane.b32.xlu1 %v8545_v26, %s7978_s10 }
  0xc5   : >> { %782 = vrot.lane.b32.xlu0 %v8549_v52, %s7978_s10 }
  0xc6   : >> { %v8560_v12 = vpop.permute.xlu2 %592 }
  0xcc   : >> { %792 = vrot.lane.b32.xlu2 %v8564_v57, %s7978_s10  ;;  %790 = vrot.lane.b32.xlu1 %v8568_v14, %s7978_s10 }
  0xcd   : >> { %788 = vrot.lane.b32.xlu0 %v8572_v31, %s7978_s10 }
  0xce   : >> { %v8583_v56 = vpop.permute.xlu2 %598 }
  0xd4   : >> { %798 = vrot.lane.b32.xlu2 %v8587_v34, %s7978_s10  ;;  %796 = vrot.lane.b32.xlu1 %v8591_v13, %s7978_s10 }
  0xd5   : >> { %794 = vrot.lane.b32.xlu0 %v8595_v18, %s7978_s10 }
  0xd6   : >> { %v8605_v15 = vpop.permute.xlu1 %586  ;;  %v8607_v30 = vpop.permute.xlu2 %604 }
  0xd7   : >> { %16467 = vst [vmem:[#allocation84_spill] sm:$0xff] %v8607_v30  ;;  %v8609_v11 = vpop.permute.xlu0 %582 }
  0xdc   : >> { %804 = vrot.lane.b32.xlu2 %v8613_v22, %s7978_s10  ;;  %802 = vrot.lane.b32.xlu1 %v8617_v59, %s7978_s10 }
  0xdd   : >> { %800 = vrot.lane.b32.xlu0 %v8621_v10, %s7978_s10 }
  0xde   : >> { %v8629_v9 = vpop.permute.xlu1 %588  ;;  %v8631_v50 = vpop.permute.xlu2 %610 }
  0xdf   : >> { %v8633_v8 = vpop.permute.xlu0 %584 }
  0xe4   : >> { %938 = vrot.lane.b32.xlu2 %v8522_v1, %s7979_s15  ;;  %936 = vrot.lane.b32.xlu1 %v8526_v2, %s7979_s15 }
  0xe5   : >> { %934 = vrot.lane.b32.xlu0 %v8505_v53, %s7979_s15 }
  0xe6   : >> { %v8641_v16 = vpop.permute.xlu1 %596  ;;  %v8643_v17 = vpop.permute.xlu2 %680 }
  0xe7   : >> { %v8645_v23 = vpop.permute.xlu0 %594 }
  0xec   : >> { %944 = vrot.lane.b32.xlu2 %v8545_v26, %s7979_s15  ;;  %942 = vrot.lane.b32.xlu1 %v8549_v52, %s7979_s15 }
  0xed   : >> { %940 = vrot.lane.b32.xlu0 %v8518_v63, %s7979_s15 }
  0xee   : >> { %v8653_v4 = vpop.permute.xlu1 %602  ;;  %v8655_v3 = vpop.permute.xlu2 %686 }
  0xef   : >> { %v8657_v0 = vpop.permute.xlu0 %600 }
  0xf4   : >> { %950 = vrot.lane.b32.xlu2 %v8568_v14, %s7979_s15  ;;  %948 = vrot.lane.b32.xlu1 %v8572_v31, %s7979_s15 }
  0xf5   : >> { %946 = vrot.lane.b32.xlu0 %v8541_v25, %s7979_s15 }
  0xf6   : >> { %v8665_v51 = vpop.permute.xlu1 %608  ;;  %v8667_v26 = vpop.permute.xlu2 %692 }
  0xf7   : >> { %16471 = vst [vmem:[#allocation88_spill] sm:$0xff] %v8667_v26  ;;  %v8669_v1 = vpop.permute.xlu0 %606 }
  0xfc   : >> { %956 = vrot.lane.b32.xlu2 %v8591_v13, %s7979_s15  ;;  %954 = vrot.lane.b32.xlu1 %v8595_v18, %s7979_s15 }
  0xfd   : >> { %952 = vrot.lane.b32.xlu0 %v8564_v57, %s7979_s15 }
  0xfe   : >> { %v8677_v14 = vpop.permute.xlu1 %678  ;;  %v8679_v63 = vpop.permute.xlu2 %698 }
  0xff   : >> { %v8681_v25 = vpop.permute.xlu0 %612 }
 0x104   : >> { %962 = vrot.lane.b32.xlu2 %v8617_v59, %s7979_s15  ;;  %960 = vrot.lane.b32.xlu1 %v8621_v10, %s7979_s15 }
 0x105   : >> { %958 = vrot.lane.b32.xlu0 %v8587_v34, %s7979_s15 }
 0x106   : >> { %v8689_v13 = vpop.permute.xlu1 %684  ;;  %v8691_v18 = vpop.permute.xlu2 %704 }
 0x107   : >> { %16472 = vst [vmem:[#allocation89_spill] sm:$0xff] %v8691_v18  ;;  %v8693_v57 = vpop.permute.xlu0 %682 }
 0x10c   : >> { %1032 = vrot.lane.b32.xlu2 %v7892_v32, %s7979_s15  ;;  %1030 = vrot.lane.b32.xlu1 %v7896_v29, %s7979_s15 }
 0x10d   : >> { %964 = vrot.lane.b32.xlu0 %v8613_v22, %s7979_s15 }
 0x10e   : >> { %v8701_v59 = vpop.permute.xlu1 %690  ;;  %v8703_v10 = vpop.permute.xlu2 %774 }
 0x10f   : >> { %v8705_v34 = vpop.permute.xlu0 %688 }
 0x114   : >> { %1038 = vrot.lane.b32.xlu2 %v7880_v36, %s7979_s15  ;;  %1036 = vrot.lane.b32.xlu1 %v7884_v35, %s7979_s15 }
 0x115   : >> { %1034 = vrot.lane.b32.xlu0 %v7888_v33, %s7979_s15 }
 0x116   : >> { %v8713_v32 = vpop.permute.xlu1 %696  ;;  %v8715_v29 = vpop.permute.xlu2 %780 }
 0x117   : >> { %v8717_v22 = vpop.permute.xlu0 %694 }
 0x11c   : >> { %1044 = vrot.lane.b32.xlu2 %v7868_v39, %s7979_s15  ;;  %1042 = vrot.lane.b32.xlu1 %v7872_v38, %s7979_s15 }
 0x11d   : >> { %1040 = vrot.lane.b32.xlu0 %v7876_v37, %s7979_s15 }
 0x11e   : >> { %v8725_v36 = vpop.permute.xlu1 %702  ;;  %v8727_v35 = vpop.permute.xlu2 %786 }
 0x11f   : >> { %16473 = vst [vmem:[#allocation90_spill] sm:$0xff] %v8725_v36  ;;  %v8729_v33 = vpop.permute.xlu0 %700  ;;  %v630_v36 = vsub.f32 %v8609_v11, %v8380_v58 }
 0x120   : >> { %16474 = vst [vmem:[#allocation91_spill] sm:$0xff] %v8727_v35  ;;  %v8819_v35 = vadd.f32 %v8607_v30, %v8433_v20 }
 0x121   : >> { %16475 = vst [vmem:[#allocation92_spill] sm:$0xff] %v8729_v33  ;;  %v727_v33 = vsub.f32 %v8643_v17, %v8633_v8 }
 0x122   : >> { %16493 = vst [vmem:[#allocation110_spill] sm:$0xff] %v8819_v35  ;;  %v730_v35 = vsub.f32 %v8655_v3, %v8537_v24 }
 0x124   : >> { %1050 = vrot.lane.b32.xlu2 %v7856_v42, %s7979_s15  ;;  %1048 = vrot.lane.b32.xlu1 %v7860_v41, %s7979_s15 }
 0x125   : >> { %1046 = vrot.lane.b32.xlu0 %v7864_v40, %s7979_s15 }
 0x126   : >> { %v8737_v39 = vpop.permute.xlu2 %792  ;;  %v8739_v38 = vpop.permute.xlu1 %708 }
 0x127   : >> { %16476 = vst [vmem:[#allocation93_spill] sm:$0xff] %v8737_v39  ;;  %v8741_v37 = vpop.permute.xlu0 %706  ;;  %v631_v39 = vsub.f32 %v8633_v8, %v8395_v62 }
 0x128   : >> { %16477 = vst [vmem:[#allocation94_spill] sm:$0xff] %v8739_v38  ;;  %v641_v38 = vsub.f32 %v8607_v30, %v8433_v20  ;;  %v637_v30 = vsub.f32 %v8641_v16, %v8408_v5 }
 0x129   : >> { %16478 = vst [vmem:[#allocation95_spill] sm:$0xff] %v8741_v37 }
 0x12c   : >> { %1056 = vrot.lane.b32.xlu2 %v7844_v45, %s7979_s15  ;;  %1054 = vrot.lane.b32.xlu1 %v7848_v44, %s7979_s15 }
 0x12d   : >> { %1052 = vrot.lane.b32.xlu0 %v7852_v43, %s7979_s15 }
 0x12e   : >> { %v8749_v42 = vpop.permute.xlu2 %798  ;;  %v8751_v41 = vpop.permute.xlu1 %778 }
 0x12f   : >> { %16479 = vst [vmem:[#allocation96_spill] sm:$0xff] %v8749_v42  ;;  %v8753_v40 = vpop.permute.xlu0 %776  ;;  %v618_v42 = vadd.f32 %v8537_v24, %v8370_v55 }
 0x130   : >> { %16480 = vst [vmem:[#allocation97_spill] sm:$0xff] %v8751_v41 }
 0x131   : >> { %16481 = vst [vmem:[#allocation98_spill] sm:$0xff] %v8753_v40  ;;  %v635_v40 = vsub.f32 %v8560_v12, %v8391_v61 }
 0x134   : >> { %1060 = vrot.lane.b32.xlu1 %v7836_v47, %s7979_s15  ;;  %1126 = vrot.lane.b32.xlu2 %v8380_v58, %s7979_s15  ;;  %v634_v47 = vsub.f32 %v8537_v24, %v8370_v55 }
 0x135   : >> { %1058 = vrot.lane.b32.xlu0 %v7840_v46, %s7979_s15 }
 0x136   : >> { %v8761_v45 = vpop.permute.xlu1 %784  ;;  %v8763_v44 = vpop.permute.xlu2 %804  ;;  %v650_v37 = vmax.f32 %v634_v47, 0.0 }
 0x137   : >> { %16482 = vst [vmem:[#allocation99_spill] sm:$0xff] %v8761_v45  ;;  %v8765_v43 = vpop.permute.xlu0 %782  ;;  %v632_v45 = vsub.f32 %v8605_v15, %v8366_v54 }
 0x138   : >> { %16483 = vst [vmem:[#allocation100_spill] sm:$0xff] %v8763_v44 }
 0x139   : >> { %16484 = vst [vmem:[#allocation101_spill] sm:$0xff] %v8765_v43  ;;  %v638_v43 = vsub.f32 %v8583_v56, %v8412_v6 }
 0x13b   : >> { %v8805_v47 = vmax.f32 %v638_v43, 0.0  ;;  %v644_v43 = vsub.f32 %v8631_v50, %v8454_v28 }
 0x13c   : >> { %1130 = vrot.lane.b32.xlu1 %v8366_v54, %s7979_s15  ;;  %1132 = vrot.lane.b32.xlu2 %v8387_v60, %s7979_s15 }
 0x13d   : >> { %1128 = vrot.lane.b32.xlu0 %v8395_v62, %s7979_s15  ;;  %16491 = vst [vmem:[#allocation108_spill] sm:$0xff] %v8805_v47  ;;  %v8827_v47 = vmax.f32 %v641_v38, 0.0  ;;  %v8857_v24 = vmax.f32 %v644_v43, 0.0  ;;  %v733_v43 = vsub.f32 %v8667_v26, %v8641_v16 }
 0x13e   : >> { %v8777_v46 = vpop.permute.xlu1 %790  ;;  %v8779_v44 = vpop.permute.xlu2 %938 }
 0x13f   : >> { %16485 = vst [vmem:[#allocation102_spill] sm:$0xff] %v8777_v46  ;;  %v8785_v41 = vpop.permute.xlu0 %788  ;;  %v8793_v46 = vadd.f32 %v8560_v12, %v8391_v61 }
 0x140   : >> { %16486 = vst [vmem:[#allocation103_spill] sm:$0xff] %v8779_v44  ;;  %v8795_v44 = vmax.f32 %v635_v40, 0.0  ;;  %v8813_v40 = vadd.f32 %v8605_v15, %v8366_v54  ;;  %v8831_v54 = vadd.f32 %v8609_v11, %v8380_v58 }
 0x141   : >> { %16487 = vst [vmem:[#allocation104_spill] sm:$0xff] %v8785_v41  ;;  %v8803_v41 = vadd.f32 %v8583_v56, %v8412_v6 }
 0x142   : >> { %16488 = vst [vmem:[#allocation105_spill] sm:$0xff] %v8793_v46  ;;  %v633_v46 = vsub.f32 %v8629_v9, %v8387_v60 }
 0x143   : >> { %16489 = vst [vmem:[#allocation106_spill] sm:$0xff] %v8795_v44  ;;  %v8815_v44 = vmax.f32 %v632_v45, 0.0  ;;  %v615_v45 = vadd.f32 %v8633_v8, %v8395_v62  ;;  %v8849_v8 = vadd.f32 %v8629_v9, %v8387_v60  ;;  %v8863_v62 = vmul.f32 %v8643_v17, %v8526_v2 }
 0x144   : >> { %16490 = vst [vmem:[#allocation107_spill] sm:$0xff] %v8803_v41  ;;  %1136 = vrot.lane.b32.xlu1 %v8391_v61, %s7979_s15  ;;  %1138 = vrot.lane.b32.xlu2 %v8416_v7, %s7979_s15  ;;  %v647_v41 = vmax.f32 %v631_v39, 0.0  ;;  %v743_v61 = vmax.f32 %v727_v33, 0.0  ;;  %v8851_v39 = vmax.f32 %v633_v46, 0.0  ;;  %v8855_v33 = vadd.f32 %v8631_v50, %v8454_v28 }
 0x145   : >> { %16492 = vst [vmem:[#allocation109_spill] sm:$0xff] %v8815_v44  ;;  %v636_v44 = vsub.f32 %v8645_v23, %v8416_v7  ;;  %1134 = vrot.lane.b32.xlu0 %v8370_v55, %s7979_s15  ;;  %v621_v55 = vadd.f32 %v8641_v16, %v8408_v5  ;;  %v746_v46 = vmax.f32 %v730_v35, 0.0  ;;  %v624_v35 = vadd.f32 %v8653_v4, %v8429_v19 }
 0x146   : >> { %16494 = vst [vmem:[#allocation111_spill] sm:$0xff] %v8827_v47  ;;  %v8843_v38 = vpop.permute.xlu1 %796  ;;  %v8845_v58 = vpop.permute.xlu2 %944  ;;  %v646_v47 = vmax.f32 %v630_v36, 0.0  ;;  %v640_v36 = vsub.f32 %v8653_v4, %v8429_v19  ;;  %v8882_v2 = vadd.f32 %v743_v61, %v647_v41  ;;  %v643_v16 = vsub.f32 %v8665_v51, %v8450_v27 }
 0x147   : >> { %16495 = vst [vmem:[#allocation112_spill] sm:$0xff] %v8843_v38  ;;  %v8867_v60 = vpop.permute.xlu0 %794  ;;  %v8874_v38 = vadd.f32 %v8643_v17, %v615_v45  ;;  %v736_v41 = vsub.f32 %v8679_v63, %v8653_v4  ;;  %v8899_v61 = vadd.f32 %v8655_v3, %v618_v42  ;;  %v627_v4 = vadd.f32 %v8665_v51, %v8450_v27 }
 0x148   : >> { %16496 = vst [vmem:[#allocation113_spill] sm:$0xff] %v8845_v58  ;;  %v639_v58 = vsub.f32 %v8657_v0, %v8437_v21  ;;  %v656_v45 = vmax.f32 %v640_v36, 0.0  ;;  %v749_v36 = vmax.f32 %v733_v43, 0.0  ;;  %v8917_v42 = vmul.f32 %v8667_v26, %v8572_v31 }
 0x149   : >> { %16497 = vst [vmem:[#allocation114_spill] sm:$0xff] %v8855_v33  ;;  %v8878_v33 = vadd.f32 %v8645_v23, %v8416_v7  ;;  %v8907_v7 = vadd.f32 %v8657_v0, %v8437_v21 }
 0x14a   : >> { %16498 = vst [vmem:[#allocation115_spill] sm:$0xff] %v8857_v24  ;;  %v653_v24 = vmax.f32 %v637_v30, 0.0  ;;  %v726_v30 = vsub.f32 %v8677_v14, %v8609_v11  ;;  %v8909_v11 = vmax.f32 %v639_v58, 0.0 }
 0x14b   : >> { %16499 = vst [vmem:[#allocation116_spill] sm:$0xff] %v8863_v62  ;;  %v8880_v62 = vmax.f32 %v636_v44, 0.0  ;;  %v642_v44 = vsub.f32 %v8669_v1, %v8458_v48 }
 0x14c   : >> { %16500 = vst [vmem:[#allocation117_spill] sm:$0xff] %v8867_v60  ;;  %v8888_v60 = vmul.f32 %v8655_v3, %v8549_v52  ;;  %1142 = vrot.lane.b32.xlu1 %v8412_v6, %s7979_s15  ;;  %1144 = vrot.lane.b32.xlu2 %v8437_v21, %s7979_s15  ;;  %v729_v6 = vsub.f32 %v8689_v13, %v8629_v9  ;;  %v742_v43 = vmax.f32 %v726_v30, 0.0  ;;  %v16509_v30 = vld [vmem:[#allocation83_spill] sm:$0xff] }
 0x14d   : >> { %16503 = vst [vmem:[#allocation120_spill] sm:$0xff] %v8917_v42  ;;  %v8922_v52 = vadd.f32 %v8667_v26, %v621_v55  ;;  %1140 = vrot.lane.b32.xlu0 %v8408_v5, %s7979_s15  ;;  %v645_v21 = vsub.f32 %v8681_v25, %v8468_v49  ;;  %v739_v42 = vsub.f32 %v8691_v18, %v8665_v51  ;;  %v8938_v55 = vmax.f32 %v642_v44, 0.0 }
 0x14e   : >> { %16501 = vst [vmem:[#allocation118_spill] sm:$0xff] %v8888_v60  ;;  %v8911_v60 = vadd.f32 %v746_v46, %v650_v37  ;;  %v8926_v58 = vpop.permute.xlu2 %950  ;;  %v8928_v37 = vpop.permute.xlu1 %802  ;;  %v659_v46 = vmax.f32 %v643_v16, 0.0  ;;  %v8936_v9 = vadd.f32 %v8669_v1, %v8458_v48  ;;  %v728_v5 = vsub.f32 %v8693_v57, %v8605_v15 }
 0x14f   : >> { %16504 = vst [vmem:[#allocation121_spill] sm:$0xff] %v8922_v52  ;;  %v752_v52 = vmax.f32 %v736_v41, 0.0  ;;  %v8946_v16 = vmul.f32 %v8677_v14, %v8505_v53  ;;  %v822_v51 = vsub.f32 %v8703_v10, %v8677_v14  ;;  %v8958_v44 = vadd.f32 %v8681_v25, %v8468_v49 }
 0x150   : >> { %16502 = vst [vmem:[#allocation119_spill] sm:$0xff] %v8911_v60  ;;  %v8954_v60 = vadd.f32 %v749_v36, %v653_v24  ;;  %v745_v15 = vmax.f32 %v729_v6, 0.0  ;;  %v710_v41 = vadd.f32 %v8677_v14, %v8831_v54  ;;  %v758_v31 = vadd.f32 %v742_v43, %v646_v47  ;;  %v16512_v24 = vld [vmem:[#allocation72_spill] sm:$0xff] }
 0x151   : >> { %16505 = vst [vmem:[#allocation122_spill] sm:$0xff] %v8926_v58  ;;  %v8942_v58 = vpop.permute.xlu0 %800  ;;  %v8971_v36 = vmul.f32 %v8689_v13, %v16512_v24  ;;  %v731_v6 = vsub.f32 %v8705_v34, %v8560_v12  ;;  %v8975_v26 = vadd.f32 %v752_v52, %v656_v45  ;;  %v838_v54 = vmax.f32 %v822_v51, 0.0 }
 0x152   : >> { %16506 = vst [vmem:[#allocation123_spill] sm:$0xff] %v8928_v37  ;;  %v8950_v37 = vmul.f32 %v8679_v63, %v16509_v30  ;;  %v755_v30 = vmax.f32 %v739_v42, 0.0  ;;  %v825_v14 = vsub.f32 %v8715_v29, %v8689_v13  ;;  %v886_v12 = vsub.f32 %v8505_v53, %v8703_v10 }
 0x153   : >> { %16507 = vst [vmem:[#allocation124_spill] sm:$0xff] %v8942_v58  ;;  %v8963_v58 = vadd.f32 %v8679_v63, %v624_v35  ;;  %v761_v47 = vadd.f32 %v745_v15, %v8851_v39  ;;  %v8997_v35 = vadd.f32 %v8693_v57, %v8813_v40  ;;  %v735_v42 = vsub.f32 %v8713_v32, %v8657_v0  ;;  %v16518_v39 = vld [vmem:[#allocation75_spill] sm:$0xff] }
 0x154   : >> { %16508 = vst [vmem:[#allocation125_spill] sm:$0xff] %v8946_v16  ;;  %v8965_v16 = vmax.f32 %v645_v21, 0.0  ;;  %1148 = vrot.lane.b32.xlu1 %v8433_v20, %s7979_s15  ;;  %1150 = vrot.lane.b32.xlu2 %v8458_v48, %s7979_s15  ;;  %v713_v21 = vadd.f32 %v8689_v13, %v8849_v8  ;;  %v9008_v43 = vadd.f32 %v755_v30, %v659_v46  ;;  %v747_v40 = vmax.f32 %v731_v6, 0.0  ;;  %v16520_v20 = vld [vmem:[#allocation109_spill] sm:$0xff]  ;;  %v16522_v46 = vld [vmem:[#allocation91_spill] sm:$0xff] }
 0x155   : >> { %16510 = vst [vmem:[#allocation126_spill] sm:$0xff] %v8950_v37  ;;  %v732_v37 = vsub.f32 %v8701_v59, %v8645_v23  ;;  %v16515_v23 = vld [vmem:[#allocation73_spill] sm:$0xff]  ;;  %1146 = vrot.lane.b32.xlu0 %v8429_v19, %s7979_s15  ;;  %v9012_v51 = vmul.f32 %v8701_v59, %v16518_v39  ;;  %v734_v15 = vsub.f32 %v8717_v22, %v8583_v56  ;;  %v16529_v19 = vld [vmem:[#allocation92_spill] sm:$0xff] }
 0x156   : >> { %16511 = vst [vmem:[#allocation127_spill] sm:$0xff] %v8954_v60  ;;  %v744_v60 = vmax.f32 %v728_v5, 0.0  ;;  %v8986_v5 = vadd.f32 %v8691_v18, %v627_v4  ;;  %v8990_v52 = vmul.f32 %v8693_v57, %v16515_v23  ;;  %v9001_v13 = vpop.permute.xlu2 %956  ;;  %v9003_v8 = vpop.permute.xlu1 %936  ;;  %v806_v4 = vadd.f32 %v8703_v10, %v710_v41 }
 0x157   : >> { %16513 = vst [vmem:[#allocation128_spill] sm:$0xff] %v8971_v36  ;;  %v748_v45 = vmax.f32 %v732_v37, 0.0  ;;  %v854_v37 = vadd.f32 %v838_v54, %v758_v31  ;;  %v841_v10 = vmax.f32 %v825_v14, 0.0  ;;  %v716_v0 = vadd.f32 %v8701_v59, %v8878_v33  ;;  %v16523_v36 = vld [vmem:[#allocation76_spill] sm:$0xff] }
 0x158   : >> { %16514 = vst [vmem:[#allocation129_spill] sm:$0xff] %v8986_v5  ;;  %v9017_v48 = vadd.f32 %v744_v60, %v16520_v20  ;;  %v828_v30 = vsub.f32 %v16522_v46, %v8701_v59  ;;  %v902_v41 = vmax.f32 %v886_v12, 0.0  ;;  %v9027_v6 = vmul.f32 %v8705_v34, %v16523_v36  ;;  %v16525_v60 = vld [vmem:[#allocation105_spill] sm:$0xff]  ;;  %v16527_v12 = vld [vmem:[#allocation90_spill] sm:$0xff] }
 0x159   : >> { %16516 = vst [vmem:[#allocation73_spill] sm:$0xff] %v8990_v52  ;;  %v9019_v52 = vpop.permute.xlu0 %934  ;;  %v889_v56 = vsub.f32 %v16512_v24, %v8715_v29  ;;  %v9033_v20 = vadd.f32 %v8705_v34, %v16525_v60  ;;  %v751_v31 = vmax.f32 %v735_v42, 0.0  ;;  %v809_v54 = vadd.f32 %v8715_v29, %v713_v21  ;;  %v16530_v5 = vld [vmem:[#allocation106_spill] sm:$0xff]  ;;  %v16534_v42 = vld [vmem:[#allocation79_spill] sm:$0xff] }
 0x15a   : >> { %16517 = vst [vmem:[#allocation130_spill] sm:$0xff] %v9008_v43  ;;  %v764_v33 = vadd.f32 %v748_v45, %v8880_v62  ;;  %v9038_v14 = vadd.f32 %v806_v4, %v8505_v53  ;;  %v750_v59 = vmax.f32 %v734_v15, 0.0  ;;  %v16531_v29 = vld [vmem:[#allocation78_spill] sm:$0xff]  ;;  %v857_v21 = vadd.f32 %v841_v10, %v761_v47 }
 0x15b   : >> { %16519 = vst [vmem:[#allocation131_spill] sm:$0xff] %v9012_v51  ;;  %v738_v51 = vsub.f32 %v16527_v12, %v8669_v1  ;;  %v9053_v62 = vmul.f32 %v8713_v32, %v16531_v29  ;;  %v844_v45 = vmax.f32 %v828_v30, 0.0  ;;  %v9055_v4 = vadd.f32 %v902_v41, %v854_v37  ;;  %v16539_v30 = vld [vmem:[#allocation93_spill] sm:$0xff] }
 0x15c   : >> { %16521 = vst [vmem:[#allocation109_spill] sm:$0xff] %v9019_v52  ;;  %v9045_v52 = vadd.f32 %v747_v40, %v16530_v5  ;;  %1154 = vrot.lane.b32.xlu1 %v8454_v28, %s7979_s15  ;;  %1156 = vrot.lane.b32.xlu2 %v8468_v49, %s7979_s15  ;;  %v905_v1 = vmax.f32 %v889_v56, 0.0  ;;  %v9059_v15 = vmul.f32 %v8717_v22, %v16534_v42  ;;  %v16536_v40 = vld [vmem:[#allocation107_spill] sm:$0xff] }
 0x15d   : >> { %16524 = vst [vmem:[#allocation91_spill] sm:$0xff] %v9027_v6  ;;  %v16528_v6 = vld [vmem:[#allocation84_spill] sm:$0xff]  ;;  %v719_v5 = vadd.f32 %v8713_v32, %v8907_v7  ;;  %1152 = vrot.lane.b32.xlu0 %v8450_v27, %s7979_s15  ;;  %v892_v37 = vsub.f32 %v16518_v39, %v16522_v46  ;;  %v767_v10 = vadd.f32 %v751_v31, %v8909_v11  ;;  %v754_v56 = vmax.f32 %v738_v51, 0.0 }
 0x15e   : >> { %16526 = vst [vmem:[#allocation76_spill] sm:$0xff] %v9038_v14  ;;  %v737_v43 = vsub.f32 %v16529_v19, %v16528_v6  ;;  %v9065_v6 = vadd.f32 %v8717_v22, %v16536_v40  ;;  %v9069_v60 = vpop.permute.xlu2 %962  ;;  %v9071_v47 = vpop.permute.xlu1 %942  ;;  %v831_v41 = vsub.f32 %v16539_v30, %v8713_v32  ;;  %v9079_v7 = vadd.f32 %v809_v54, %v16512_v24  ;;  %v16541_v27 = vld [vmem:[#allocation108_spill] sm:$0xff]  ;;  %v16546_v54 = vld [vmem:[#allocation82_spill] sm:$0xff]  ;;  %v16553_v14 = vld [vmem:[#allocation111_spill] sm:$0xff] }
 0x15f   : >> { %16532 = vst [vmem:[#allocation105_spill] sm:$0xff] %v9053_v62  ;;  %v812_v40 = vadd.f32 %v16522_v46, %v716_v0  ;;  %v9083_v49 = vadd.f32 %v750_v59, %v16541_v27  ;;  %v16543_v62 = vld [vmem:[#allocation81_spill] sm:$0xff]  ;;  %v860_v11 = vadd.f32 %v844_v45, %v764_v33  ;;  %v722_v32 = vadd.f32 %v16527_v12, %v8936_v9  ;;  %v16549_v46 = vld [vmem:[#allocation95_spill] sm:$0xff]  ;;  %v16550_v45 = vld [vmem:[#allocation96_spill] sm:$0xff] }
 0x160   : >> { %16533 = vst [vmem:[#allocation90_spill] sm:$0xff] %v9055_v4  ;;  %v753_v28 = vmax.f32 %v737_v43, 0.0  ;;  %v9089_v4 = vmul.f32 %v16527_v12, %v16543_v62  ;;  %v9093_v31 = vadd.f32 %v905_v1, %v857_v21  ;;  %v9097_v51 = vmul.f32 %v16529_v19, %v16546_v54  ;;  %v16548_v43 = vld [vmem:[#allocation94_spill] sm:$0xff] }
 0x161   : >> { %16535 = vst [vmem:[#allocation84_spill] sm:$0xff] %v9059_v15  ;;  %v9085_v15 = vpop.permute.xlu0 %940  ;;  %v895_v27 = vsub.f32 %v16531_v29, %v16539_v30  ;;  %v741_v0 = vsub.f32 %v16548_v43, %v8681_v25  ;;  %v740_v59 = vsub.f32 %v16549_v46, %v8631_v50  ;;  %v847_v33 = vmax.f32 %v831_v41, 0.0  ;;  %v16551_v21 = vld [vmem:[#allocation110_spill] sm:$0xff] }
 0x162   : >> { %16537 = vst [vmem:[#allocation92_spill] sm:$0xff] %v9069_v60  ;;  %v834_v9 = vsub.f32 %v16550_v45, %v16527_v12  ;;  %v9109_v1 = vadd.f32 %v16529_v19, %v16551_v21  ;;  %v9118_v25 = vadd.f32 %v812_v40, %v16518_v39  ;;  %v815_v50 = vadd.f32 %v16539_v30, %v719_v5  ;;  %v16557_v41 = vld [vmem:[#allocation98_spill] sm:$0xff] }
 0x163   : >> { %16538 = vst [vmem:[#allocation106_spill] sm:$0xff] %v9071_v47  ;;  %v823_v21 = vsub.f32 %v16557_v41, %v8643_v17  ;;  %v863_v5 = vadd.f32 %v847_v33, %v767_v10  ;;  %v16564_v33 = vld [vmem:[#allocation99_spill] sm:$0xff] }
 0x164   : >> { %16540 = vst [vmem:[#allocation78_spill] sm:$0xff] %v9079_v7  ;;  %v850_v30 = vmax.f32 %v834_v9, 0.0  ;;  %v827_v9 = vsub.f32 %v16564_v33, %v8705_v34 }
 0x165   : >> { %16542 = vst [vmem:[#allocation79_spill] sm:$0xff] %v9085_v15  ;;  %v9115_v15 = vadd.f32 %v753_v28, %v16553_v14  ;;  %v725_v28 = vadd.f32 %v16548_v43, %v8958_v44  ;;  %v16562_v44 = vld [vmem:[#allocation114_spill] sm:$0xff]  ;;  %v839_v10 = vmax.f32 %v823_v21, 0.0 }
 0x166   : >> { %16544 = vst [vmem:[#allocation107_spill] sm:$0xff] %v9089_v4  ;;  %v908_v4 = vmax.f32 %v892_v37, 0.0  ;;  %v16555_v37 = vld [vmem:[#allocation85_spill] sm:$0xff]  ;;  %v9131_v14 = vpop.permute.xlu2 %1032  ;;  %v9133_v40 = vpop.permute.xlu1 %948 }
 0x167   : >> { %16545 = vst [vmem:[#allocation93_spill] sm:$0xff] %v9093_v31  ;;  %v16552_v31 = vld [vmem:[#allocation97_spill] sm:$0xff]  ;;  %v9123_v12 = vmul.f32 %v16548_v43, %v16555_v37 }
 0x168   : >> { %16547 = vst [vmem:[#allocation108_spill] sm:$0xff] %v9097_v51  ;;  %v770_v51 = vadd.f32 %v754_v56, %v8938_v55  ;;  %v824_v7 = vsub.f32 %v16552_v31, %v8693_v57  ;;  %v9127_v24 = vadd.f32 %v908_v4, %v860_v11  ;;  %v911_v55 = vmax.f32 %v895_v27, 0.0  ;;  %v16561_v27 = vld [vmem:[#allocation74_spill] sm:$0xff] }
 0x169   : >> { %16554 = vst [vmem:[#allocation81_spill] sm:$0xff] %v9118_v25  ;;  %v757_v56 = vmax.f32 %v741_v0, 0.0  ;;  %v756_v57 = vmax.f32 %v740_v59, 0.0  ;;  %v888_v17 = vsub.f32 %v16515_v23, %v16552_v31  ;;  %v808_v4 = vadd.f32 %v16552_v31, %v8997_v35  ;;  %v16565_v25 = vld [vmem:[#allocation100_spill] sm:$0xff] }
 0x16a   : >> { %16556 = vst [vmem:[#allocation82_spill] sm:$0xff] %v9123_v12  ;;  %v898_v12 = vsub.f32 %v16543_v62, %v16550_v45  ;;  %v840_v11 = vmax.f32 %v824_v7, 0.0  ;;  %v887_v0 = vsub.f32 %v16561_v27, %v16557_v41  ;;  %v9145_v59 = vadd.f32 %v16549_v46, %v16562_v44  ;;  %v16567_v44 = vld [vmem:[#allocation115_spill] sm:$0xff] }
 0x16b   : >> { %16558 = vst [vmem:[#allocation94_spill] sm:$0xff] %v9127_v24  ;;  %v9147_v24 = vpop.permute.xlu0 %946  ;;  %v837_v39 = vsub.f32 %v16565_v25, %v16548_v43  ;;  %v818_v35 = vadd.f32 %v16550_v45, %v722_v32  ;;  %v807_v7 = vadd.f32 %v16557_v41, %v8874_v38  ;;  %v773_v31 = vadd.f32 %v757_v56, %v8965_v16 }
 0x16c   : >> { %16559 = vst [vmem:[#allocation96_spill] sm:$0xff] %v9131_v14  ;;  %v9161_v14 = vadd.f32 %v756_v57, %v16567_v44  ;;  %v866_v21 = vadd.f32 %v850_v30, %v770_v51  ;;  %v904_v47 = vmax.f32 %v888_v17, 0.0  ;;  %v9163_v34 = vadd.f32 %v911_v55, %v863_v5  ;;  %v16572_v5 = vld [vmem:[#allocation104_spill] sm:$0xff] }
 0x16d   : >> { %16560 = vst [vmem:[#allocation110_spill] sm:$0xff] %v9133_v40  ;;  %v9154_v40 = vadd.f32 %v815_v50, %v16531_v29  ;;  %v856_v43 = vadd.f32 %v840_v11, %v9017_v48  ;;  %v903_v60 = vmax.f32 %v887_v0, 0.0  ;;  %v16568_v50 = vld [vmem:[#allocation101_spill] sm:$0xff]  ;;  %v872_v32 = vadd.f32 %v808_v4, %v16515_v23 }
 0x16e   : >> { %16563 = vst [vmem:[#allocation97_spill] sm:$0xff] %v9147_v24  ;;  %v914_v24 = vmax.f32 %v898_v12, 0.0  ;;  %v855_v38 = vadd.f32 %v839_v10, %v8882_v2  ;;  %v843_v45 = vmax.f32 %v827_v9, 0.0  ;;  %v891_v16 = vsub.f32 %v16523_v36, %v16564_v33  ;;  %v9179_v55 = vpop.permute.xlu2 %1038  ;;  %v16573_v0 = vld [vmem:[#allocation77_spill] sm:$0xff] }
 0x16f   : >> { %16566 = vst [vmem:[#allocation111_spill] sm:$0xff] %v9154_v40  ;;  %v826_v40 = vsub.f32 %v16568_v50, %v8655_v3  ;;  %v853_v41 = vmax.f32 %v837_v39, 0.0  ;;  %v811_v51 = vadd.f32 %v16564_v33, %v9033_v20  ;;  %v901_v12 = vsub.f32 %v16555_v37, %v16565_v25  ;;  %v9181_v3 = vpop.permute.xlu1 %954  ;;  %v16570_v39 = vld [vmem:[#allocation102_spill] sm:$0xff]  ;;  %v16571_v20 = vld [vmem:[#allocation88_spill] sm:$0xff] }
 0x170   : >> { %v9177_v48 = vadd.f32 %v807_v7, %v16561_v27  ;;  %16569 = vst [vmem:[#allocation85_spill] sm:$0xff] %v9179_v55  ;;  %v9184_v2 = vadd.f32 %v818_v35, %v16543_v62  ;;  %v810_v56 = vadd.f32 %v16568_v50, %v8899_v61  ;;  %v830_v57 = vsub.f32 %v16570_v39, %v8717_v22 }
 0x171   : >> { %v829_v30 = vsub.f32 %v16572_v5, %v16571_v20  ;;  %v9192_v17 = vadd.f32 %v914_v24, %v866_v21  ;;  %v821_v4 = vadd.f32 %v16565_v25, %v725_v28  ;;  %v842_v11 = vmax.f32 %v826_v40, 0.0  ;;  %v16574_v21 = vld [vmem:[#allocation103_spill] sm:$0xff] }
 0x172   : >> { %v890_v10 = vsub.f32 %v16573_v0, %v16568_v50  ;;  %v920_v33 = vadd.f32 %v904_v47, %v856_v43  ;;  %v859_v35 = vadd.f32 %v843_v45, %v9045_v52  ;;  %v907_v61 = vmax.f32 %v891_v16, 0.0  ;;  %v16575_v47 = vld [vmem:[#allocation80_spill] sm:$0xff] }
 0x173   : >> { %v9197_v9 = vpop.permute.xlu0 %952  ;;  %v869_v7 = vadd.f32 %v853_v41, %v773_v31  ;;  %v9200_v44 = vadd.f32 %v903_v60, %v855_v38  ;;  %v917_v22 = vmax.f32 %v901_v12, 0.0  ;;  %v894_v24 = vsub.f32 %v16534_v42, %v16570_v39  ;;  %v16576_v31 = vld [vmem:[#allocation119_spill] sm:$0xff]  ;;  %v16579_v41 = vld [vmem:[#allocation121_spill] sm:$0xff]  ;;  %v16580_v12 = vld [vmem:[#allocation112_spill] sm:$0xff] }
 0x174   : >> { %v984_v25 = vsub.f32 %v16574_v21, %v16515_v23  ;;  %v875_v28 = vadd.f32 %v811_v51, %v16523_v36  ;;  %v846_v40 = vmax.f32 %v830_v57, 0.0  ;;  %v845_v50 = vmax.f32 %v829_v30, 0.0 }
 0x175   : >> { %v893_v43 = vsub.f32 %v16575_v47, %v16572_v5  ;;  %v9210_v52 = vadd.f32 %v810_v56, %v16573_v0  ;;  %v858_v60 = vadd.f32 %v842_v11, %v16576_v31  ;;  %v906_v38 = vmax.f32 %v890_v10, 0.0  ;;  %v16582_v10 = vld [vmem:[#allocation117_spill] sm:$0xff] }
 0x176   : >> { %v814_v45 = vadd.f32 %v16570_v39, %v9065_v6  ;;  %v9216_v16 = vadd.f32 %v821_v4, %v16555_v37  ;;  %v9218_v23 = vadd.f32 %v917_v22, %v869_v7  ;;  %v813_v51 = vadd.f32 %v16572_v5, %v16579_v41  ;;  %v9229_v39 = vpop.permute.xlu2 %1044  ;;  %v16583_v22 = vld [vmem:[#allocation127_spill] sm:$0xff] }
 0x177   : >> { %v833_v57 = vsub.f32 %v16580_v12, %v16529_v19  ;;  %v923_v20 = vadd.f32 %v907_v61, %v859_v35  ;;  %v910_v56 = vmax.f32 %v894_v24, 0.0  ;;  %v9225_v30 = vadd.f32 %v16574_v21, %v872_v32  ;;  %v9231_v4 = vpop.permute.xlu1 %960  ;;  %v16584_v19 = vld [vmem:[#allocation113_spill] sm:$0xff]  ;;  %v16585_v24 = vld [vmem:[#allocation123_spill] sm:$0xff] }
 0x178   : >> { %16577 = vst [vmem:[#allocation98_spill] sm:$0xff] %v9216_v16  ;;  %v1000_v11 = vmax.f32 %v984_v25, 0.0  ;;  %v832_v6 = vsub.f32 %v16582_v10, %v8679_v63  ;;  %v862_v7 = vadd.f32 %v846_v40, %v9083_v49  ;;  %v861_v5 = vadd.f32 %v845_v50, %v16583_v22  ;;  %v16586_v50 = vld [vmem:[#allocation124_spill] sm:$0xff]  ;;  %v16602_v16 = vld [vmem:[#allocation79_spill] sm:$0xff] }
 0x179   : >> { %16578 = vst [vmem:[#allocation74_spill] sm:$0xff] %v9218_v23  ;;  %v909_v31 = vmax.f32 %v893_v43, 0.0  ;;  %v987_v35 = vsub.f32 %v16584_v19, %v16523_v36  ;;  %v897_v32 = vsub.f32 %v16546_v54, %v16580_v12  ;;  %v878_v61 = vadd.f32 %v814_v45, %v16534_v42 }
 0x17a   : >> { %16581 = vst [vmem:[#allocation114_spill] sm:$0xff] %v9225_v30  ;;  %v836_v63 = vsub.f32 %v16585_v24, %v16549_v46  ;;  %v9242_v25 = vadd.f32 %v906_v38, %v858_v60  ;;  %v817_v49 = vadd.f32 %v16580_v12, %v9109_v1  ;;  %v849_v40 = vmax.f32 %v833_v57, 0.0  ;;  %v16588_v60 = vld [vmem:[#allocation83_spill] sm:$0xff] }
 0x17b   : >> { %v9244_v41 = vpop.permute.xlu0 %958  ;;  %v835_v43 = vsub.f32 %v16586_v50, %v8691_v18  ;;  %v9251_v36 = vadd.f32 %v813_v51, %v16575_v47  ;;  %v9253_v22 = vadd.f32 %v1000_v11, %v920_v33  ;;  %v816_v45 = vadd.f32 %v16582_v10, %v8963_v58  ;;  %v16590_v51 = vld [vmem:[#allocation122_spill] sm:$0xff] }
 0x17c   : >> { %v848_v46 = vmax.f32 %v832_v6, 0.0  ;;  %v896_v38 = vsub.f32 %v16588_v60, %v16582_v10  ;;  %v9260_v30 = vadd.f32 %v16584_v19, %v875_v28  ;;  %v1003_v1 = vmax.f32 %v987_v35, 0.0  ;;  %v16591_v11 = vld [vmem:[#allocation86_spill] sm:$0xff]  ;;  %v16592_v10 = vld [vmem:[#allocation87_spill] sm:$0xff]  ;;  %v16601_v19 = vld [vmem:[#allocation72_spill] sm:$0xff] }
 0x17d   : >> { %16587 = vst [vmem:[#allocation99_spill] sm:$0xff] %v9253_v22  ;;  %v926_v12 = vadd.f32 %v910_v56, %v862_v7  ;;  %v9262_v57 = vadd.f32 %v909_v31, %v861_v5  ;;  %v913_v18 = vmax.f32 %v897_v32, 0.0  ;;  %v990_v23 = vsub.f32 %v16590_v51, %v16534_v42 }
 0x17e   : >> { %16589 = vst [vmem:[#allocation100_spill] sm:$0xff] %v9260_v30  ;;  %v852_v33 = vmax.f32 %v836_v63, 0.0  ;;  %v900_v22 = vsub.f32 %v16591_v11, %v16585_v24  ;;  %v865_v58 = vadd.f32 %v849_v40, %v9115_v15  ;;  %v851_v6 = vmax.f32 %v835_v43, 0.0  ;;  %v9278_v31 = vpop.permute.xlu2 %1050  ;;  %v16596_v40 = vld [vmem:[#allocation129_spill] sm:$0xff] }
 0x17f   : >> { %v899_v21 = vsub.f32 %v16592_v10, %v16586_v50  ;;  %v881_v28 = vadd.f32 %v817_v49, %v16546_v54  ;;  %v864_v56 = vadd.f32 %v848_v46, %v8975_v26  ;;  %v912_v7 = vmax.f32 %v896_v38, 0.0  ;;  %16593 = vst [vmem:[#allocation115_spill] sm:$0xff] %v9278_v31  ;;  %v9280_v35 = vpop.permute.xlu1 %1030  ;;  %v16595_v26 = vld [vmem:[#allocation109_spill] sm:$0xff]  ;;  %v16598_v38 = vld [vmem:[#allocation130_spill] sm:$0xff] }
 0x180   : >> { %v820_v5 = vadd.f32 %v16585_v24, %v9145_v59  ;;  %v9276_v42 = vadd.f32 %v816_v45, %v16588_v60  ;;  %v9282_v15 = vadd.f32 %v1003_v1, %v923_v20  ;;  %v993_v32 = vsub.f32 %v9001_v13, %v16546_v54 }
 0x181   : >> { %v983_v63 = vsub.f32 %v9003_v8, %v16561_v27  ;;  %v982_v46 = vsub.f32 %v16595_v26, %v8505_v53  ;;  %v1006_v49 = vmax.f32 %v990_v23, 0.0  ;;  %v868_v59 = vadd.f32 %v852_v33, %v9161_v14  ;;  %v16599_v53 = vld [vmem:[#allocation92_spill] sm:$0xff]  ;;  %v16600_v14 = vld [vmem:[#allocation106_spill] sm:$0xff] }
 0x182   : >> { %16594 = vst [vmem:[#allocation101_spill] sm:$0xff] %v9282_v15  ;;  %v916_v24 = vmax.f32 %v900_v22, 0.0  ;;  %v819_v43 = vadd.f32 %v16586_v50, %v16596_v40  ;;  %v9296_v20 = vadd.f32 %v16590_v51, %v878_v61  ;;  %v867_v54 = vadd.f32 %v851_v6, %v16598_v38  ;;  %v16609_v38 = vld [vmem:[#allocation90_spill] sm:$0xff] }
 0x183   : >> { %v9293_v45 = vpop.permute.xlu0 %964  ;;  %v915_v1 = vmax.f32 %v899_v21, 0.0  ;;  %v929_v15 = vadd.f32 %v913_v18, %v865_v58  ;;  %v884_v27 = vadd.f32 %v820_v5, %v16591_v11  ;;  %v996_v23 = vsub.f32 %v16599_v53, %v16591_v11 }
 0x184   : >> { %16597 = vst [vmem:[#allocation102_spill] sm:$0xff] %v9296_v20  ;;  %v986_v22 = vsub.f32 %v16600_v14, %v16573_v0  ;;  %v928_v33 = vadd.f32 %v912_v7, %v864_v56  ;;  %v1009_v30 = vmax.f32 %v993_v32, 0.0  ;;  %v999_v50 = vmax.f32 %v983_v63, 0.0  ;;  %v16603_v0 = vld [vmem:[#allocation96_spill] sm:$0xff]  ;;  %v16604_v7 = vld [vmem:[#allocation110_spill] sm:$0xff] }
 0x185   : >> { %v998_v40 = vmax.f32 %v982_v46, 0.0  ;;  %v985_v61 = vsub.f32 %v16602_v16, %v16601_v19  ;;  %v9306_v20 = vadd.f32 %v1006_v49, %v926_v12  ;;  %v932_v6 = vadd.f32 %v916_v24, %v868_v59  ;;  %v16605_v19 = vld [vmem:[#allocation76_spill] sm:$0xff]  ;;  %v16607_v49 = vld [vmem:[#allocation97_spill] sm:$0xff] }
 0x186   : >> { %v9309_v18 = vadd.f32 %v9001_v13, %v881_v28  ;;  %v883_v21 = vadd.f32 %v819_v43, %v16592_v10  ;;  %v967_v58 = vadd.f32 %v9003_v8, %v9177_v48  ;;  %v1079_v56 = vsub.f32 %v16603_v0, %v9003_v8  ;;  %v16606_v28 = vld [vmem:[#allocation75_spill] sm:$0xff]  ;;  %v9324_v24 = vpop.permute.xlu2 %1056 }
 0x187   : >> { %v989_v5 = vsub.f32 %v16604_v7, %v16575_v47  ;;  %v9318_v32 = vadd.f32 %v915_v1, %v867_v54  ;;  %v966_v12 = vadd.f32 %v16595_v26, %v16605_v19  ;;  %v1012_v63 = vmax.f32 %v996_v23, 0.0  ;;  %16608 = vst [vmem:[#allocation88_spill] sm:$0xff] %v9324_v24  ;;  %v9326_v43 = vpop.permute.xlu1 %1036 }
 0x188   : >> { %v1002_v46 = vmax.f32 %v986_v22, 0.0  ;;  %v988_v59 = vsub.f32 %v16607_v49, %v16606_v28  ;;  %v9328_v48 = vadd.f32 %v1009_v30, %v929_v15  ;;  %v1015_v8 = vadd.f32 %v999_v50, %v9200_v44  ;;  %v16611_v22 = vld [vmem:[#allocation61_spill] sm:$0xff] }
 0x189   : >> { %v1014_v47 = vadd.f32 %v998_v40, %v16609_v38  ;;  %v1001_v54 = vmax.f32 %v985_v61, 0.0  ;;  %v9333_v1 = vadd.f32 %v16599_v53, %v884_v27  ;;  %v970_v23 = vadd.f32 %v16600_v14, %v9210_v52  ;;  %v16613_v40 = vld [vmem:[#allocation78_spill] sm:$0xff] }
 0x18a   : >> { %v1287_v19 = vadd.f32 %v16603_v0, %v16611_v22  ;;  %v992_v28 = vsub.f32 %v9181_v3, %v16588_v60  ;;  %v1095_v30 = vmax.f32 %v1079_v56, 0.0  ;;  %v1005_v15 = vmax.f32 %v989_v5, 0.0 }
 0x18b   : >> { %16610 = vst [vmem:[#allocation104_spill] sm:$0xff] %v9333_v1  ;;  %v9341_v11 = vpop.permute.xlu0 %1034  ;;  %v1082_v44 = vsub.f32 %v9179_v55, %v16600_v14  ;;  %v991_v27 = vsub.f32 %v9197_v9, %v16531_v29  ;;  %v9347_v50 = vadd.f32 %v1012_v63, %v932_v6  ;;  %v1018_v52 = vadd.f32 %v1002_v46, %v9242_v25  ;;  %v16614_v1 = vld [vmem:[#allocation93_spill] sm:$0xff]  ;;  %v16615_v29 = vld [vmem:[#allocation116_spill] sm:$0xff] }
 0x18c   : >> { %v969_v61 = vadd.f32 %v16602_v16, %v16613_v40  ;;  %v1004_v38 = vmax.f32 %v988_v59, 0.0  ;;  %v9353_v60 = vadd.f32 %v1001_v54, %v16614_v1  ;;  %v973_v56 = vadd.f32 %v16604_v7, %v9251_v36  ;;  %v16616_v25 = vld [vmem:[#allocation81_spill] sm:$0xff] }
 0x18d   : >> { %16612 = vst [vmem:[#allocation77_spill] sm:$0xff] %v9347_v50  ;;  %v1078_v14 = vsub.f32 %v9280_v35, %v16595_v26  ;;  %v9360_v5 = vadd.f32 %v16603_v0, %v967_v58  ;;  %v9363_v6 = vmul.f32 %v1287_v19, %v16615_v29  ;;  %v9367_v63 = vadd.f32 %v16607_v49, %v16616_v25  ;;  %v16617_v46 = vld [vmem:[#allocation57_spill] sm:$0xff]  ;;  %v16619_v26 = vld [vmem:[#allocation94_spill] sm:$0xff] }
 0x18e   : >> { %v1290_v59 = vadd.f32 %v9179_v55, %v16617_v46  ;;  %v1008_v54 = vmax.f32 %v992_v28, 0.0  ;;  %v1021_v1 = vadd.f32 %v1005_v15, %v9262_v57  ;;  %v1098_v36 = vmax.f32 %v1082_v44, 0.0  ;;  %v1127_v28 = vpop.permute.xlu2 %1126  ;;  %v16621_v44 = vld [vmem:[#allocation118_spill] sm:$0xff] }
 0x18f   : >> { %v1007_v40 = vmax.f32 %v991_v27, 0.0  ;;  %v9372_v50 = vadd.f32 %v1095_v30, %v1015_v8  ;;  %v9375_v58 = vadd.f32 %v1004_v38, %v16619_v26  ;;  %v976_v19 = vadd.f32 %v9181_v3, %v9276_v42  ;;  %v9383_v46 = vpop.permute.xlu1 %1042  ;;  %v16624_v26 = vld [vmem:[#allocation62_spill] sm:$0xff] }
 0x190   : >> { %v1085_v29 = vsub.f32 %v9229_v39, %v16604_v7  ;;  %v995_v25 = vsub.f32 %v9231_v4, %v16592_v10  ;;  %v994_v57 = vsub.f32 %v9244_v41, %v16543_v62  ;;  %v1094_v8 = vmax.f32 %v1078_v14, 0.0  ;;  %v16623_v7 = vld [vmem:[#allocation111_spill] sm:$0xff] }
 0x191   : >> { %16618 = vst [vmem:[#allocation80_spill] sm:$0xff] %v9372_v50  ;;  %v1174_v30 = vsub.f32 %v1127_v28, %v9280_v35  ;;  %v9389_v15 = vadd.f32 %v9179_v55, %v970_v23  ;;  %v9392_v42 = vmul.f32 %v1290_v59, %v16621_v44  ;;  %v1024_v27 = vadd.f32 %v1008_v54, %v928_v33  ;;  %v16625_v14 = vld [vmem:[#allocation54_spill] sm:$0xff] }
 0x192   : >> { %v9396_v38 = vadd.f32 %v9197_v9, %v16623_v7  ;;  %v1293_v10 = vadd.f32 %v9229_v39, %v16624_v26  ;;  %v9403_v62 = vadd.f32 %v1007_v40, %v9163_v34  ;;  %vm1318_vm2 = vcmp.gt.f32.partialorder %v16625_v14, 0.5  ;;  %v16627_v34 = vld [vmem:[#allocation120_spill] sm:$0xff] }
 0x193   : >> { %16620 = vst [vmem:[#allocation119_spill] sm:$0xff] %v9389_v15  ;;  %v9400_v50 = vpop.permute.xlu0 %1040  ;;  %v1190_v23 = vmax.f32 %v1174_v30, 0.0  ;;  %v9406_v55 = vadd.f32 %v1098_v36, %v1018_v52  ;;  %v1101_v59 = vmax.f32 %v1085_v29, 0.0  ;;  %v979_v33 = vadd.f32 %v9231_v4, %v883_v21  ;;  %v16626_v15 = vld [vmem:[#allocation58_spill] sm:$0xff] }
 0x194   : >> { %16622 = vst [vmem:[#allocation121_spill] sm:$0xff] %v9392_v42  ;;  %v1011_v54 = vmax.f32 %v995_v25, 0.0  ;;  %v1081_v44 = vsub.f32 %v9326_v43, %v16602_v16  ;;  %v1010_v7 = vmax.f32 %v994_v57, 0.0  ;;  %v1062_v26 = vadd.f32 %v9280_v35, %v966_v12  ;;  %v16629_v57 = vld [vmem:[#allocation51_spill] sm:$0xff] }
 0x195   : >> { %v1110_v42 = vadd.f32 %v1094_v8, %v1014_v47  ;;  %v1222_v22 = vsub.f32 %v16626_v15, %v1127_v28  ;;  %v9414_v40 = vmul.f32 %v1293_v10, %v16627_v34  ;;  %v9418_v52 = vadd.f32 %v9244_v41, %v9184_v2 }
 0x196   : >> { %v1088_v21 = vsub.f32 %v9278_v31, %v9181_v3  ;;  %v9423_v36 = vadd.f32 %v9229_v39, %v973_v56  ;;  %v1286_v16 = vadd.f32 %v9280_v35, %v16626_v15  ;;  %v997_v12 = vsub.f32 %v9293_v45, %v16555_v37  ;;  %v1133_v3 = vpop.permute.xlu2 %1132  ;;  %v16631_v35 = vld [vmem:[#allocation65_spill] sm:$0xff] }
 0x197   : >> { %16628 = vst [vmem:[#allocation112_spill] sm:$0xff] %v9414_v40  ;;  %v1158_v47 = vadd.f32 %v1127_v28, %v1062_v26  ;;  %v1206_v29 = vadd.f32 %v1190_v23, %v1110_v42  ;;  %v9430_v10 = vadd.f32 %v1011_v54, %v9318_v32  ;;  %v1097_v25 = vmax.f32 %v1081_v44, 0.0  ;;  %v9432_v2 = vpop.permute.xlu1 %1048  ;;  %v16633_v26 = vld [vmem:[#allocation59_spill] sm:$0xff] }
 0x198   : >> { %vm1321_vm3 = vcmp.gt.f32.partialorder %v16629_v57, 0.5  ;;  %v9435_v8 = vadd.f32 %v1101_v59, %v1021_v1  ;;  %v9438_v56 = vadd.f32 %v1010_v7, %v9192_v17  ;;  %v1296_v30 = vadd.f32 %v9278_v31, %v16631_v35  ;;  %v16634_v1 = vld [vmem:[#allocation125_spill] sm:$0xff] }
 0x199   : >> { %v1238_v37 = vmax.f32 %v1222_v22, 0.0  ;;  %v9443_v28 = vadd.f32 %v9278_v31, %v976_v19  ;;  %v1104_v32 = vmax.f32 %v1088_v21, 0.0  ;;  %v1065_v15 = vadd.f32 %v9326_v43, %v969_v61  ;;  %v16635_v21 = vld [vmem:[#allocation126_spill] sm:$0xff] }
 0x19a   : >> { %16630 = vst [vmem:[#allocation117_spill] sm:$0xff] %v9435_v8  ;;  %v1177_v42 = vsub.f32 %v1133_v3, %v9326_v43  ;;  %v1225_v23 = vsub.f32 %v16633_v26, %v1133_v3  ;;  %v1302_v59 = vmul.f32 %v1286_v16, %v16634_v1  ;;  %v1013_v17 = vmax.f32 %v997_v12, 0.0  ;;  %v16673_v31 = vld [vmem:[#allocation102_spill] sm:$0xff] }
 0x19b   : >> { %16632 = vst [vmem:[#allocation127_spill] sm:$0xff] %v9443_v28  ;;  %v9448_v54 = vpop.permute.xlu0 %1046  ;;  %v1254_v44 = vadd.f32 %v1238_v37, %v1206_v29  ;;  %vm1334_vm4 = vcmp.ge.f32.partialorder %v1158_v47, 2.0  ;;  %v1084_v22 = vsub.f32 %v9383_v46, %v16607_v49  ;;  %v1113_v19 = vadd.f32 %v1097_v25, %v9353_v60  ;;  %v16637_v28 = vld [vmem:[#allocation98_spill] sm:$0xff]  ;;  %v16638_v29 = vld [vmem:[#allocation103_spill] sm:$0xff] }
 0x19c   : >> { %v1161_v7 = vadd.f32 %v1133_v3, %v1065_v15  ;;  %v1193_v34 = vmax.f32 %v1177_v42, 0.0  ;;  %v9455_v61 = vmul.f32 %v1296_v30, %v16635_v21  ;;  %v9459_v35 = vadd.f32 %v9293_v45, %v16637_v28  ;;  %vm9469_vm5 = vmand %vm1318_vm2, %vm1334_vm4  ;;  %v16641_v30 = vld [vmem:[#allocation74_spill] sm:$0xff]  ;;  %v16644_v21 = vld [vmem:[#allocation128_spill] sm:$0xff] }
 0x19d   : >> { %v1091_v16 = vsub.f32 %v9324_v24, %v9231_v4  ;;  %v1289_v12 = vadd.f32 %v9326_v43, %v16633_v26  ;;  %v1080_v49 = vsub.f32 %v9341_v11, %v16638_v29  ;;  %vm1366_vm6 = vcmp.le.f32.partialorder %v1158_v47, 6.0  ;;  %v16651_v60 = vld [vmem:[#allocation114_spill] sm:$0xff] }
 0x19e   : >> { %16636 = vst [vmem:[#allocation123_spill] sm:$0xff] %v9455_v61  ;;  %v1209_v25 = vadd.f32 %v1193_v34, %v1113_v19  ;;  %v1241_v3 = vmax.f32 %v1225_v23, 0.0  ;;  %vm1430_vm7 = vcmp.lt.f32.partialorder %v1302_v59, 0.5  ;;  %v9474_v37 = vadd.f32 %v1013_v17, %v16641_v30  ;;  %v1139_v42 = vpop.permute.xlu2 %1138  ;;  %v16645_v23 = vld [vmem:[#allocation56_spill] sm:$0xff]  ;;  %vm1382_vm10 = vmand %vm9469_vm5, %vm1366_vm6  ;;  %v16658_v59 = vld [vmem:[#allocation131_spill] sm:$0xff] }
 0x19f   : >> { %vm1398_vm8 = vcmp.eq.f32.partialorder %v1254_v44, 1.0  ;;  %v9476_v4 = vadd.f32 %v1104_v32, %v1024_v27  ;;  %v1100_v43 = vmax.f32 %v1084_v22, 0.0  ;;  %vm1337_vm9 = vcmp.ge.f32.partialorder %v1161_v7, 2.0  ;;  %v9478_v15 = vpop.permute.xlu1 %1054  ;;  %v16646_v27 = vld [vmem:[#allocation113_spill] sm:$0xff]  ;;  %v16647_v22 = vld [vmem:[#allocation64_spill] sm:$0xff] }
 0x1a0   : >> { %v1257_v28 = vadd.f32 %v1241_v3, %v1209_v25  ;;  %v9481_v26 = vadd.f32 %v9324_v24, %v979_v33  ;;  %v1107_v1 = vmax.f32 %v1091_v16, 0.0  ;;  %v1305_v19 = vmul.f32 %v1289_v12, %v16644_v21  ;;  %vm9494_vm11 = vmand %vm1382_vm10, %vm1398_vm8  ;;  %v16650_v16 = vld [vmem:[#allocation48_spill] sm:$0xff]  ;;  %v16652_v3 = vld [vmem:[#allocation60_spill] sm:$0xff] }
 0x1a1   : >> { %16642 = vst [vmem:[#allocation124_spill] sm:$0xff] %v9476_v4  ;;  %v1288_v34 = vadd.f32 %v9341_v11, %v16645_v23  ;;  %v1083_v32 = vsub.f32 %v9400_v50, %v16646_v27  ;;  %v1096_v17 = vmax.f32 %v1080_v49, 0.0  ;;  %v1292_v29 = vadd.f32 %v9383_v46, %v16647_v22  ;;  %vm1353_vm13 = vmand %vm1321_vm3, %vm1337_vm9  ;;  %v16672_v4 = vld [vmem:[#allocation45_spill] sm:$0xff] }
 0x1a2   : >> { %16643 = vst [vmem:[#allocation83_spill] sm:$0xff] %v9481_v26  ;;  %vm1324_vm12 = vcmp.gt.f32.partialorder %v16650_v16, 0.5  ;;  %v1180_v12 = vsub.f32 %v1139_v42, %v9383_v46  ;;  %v9504_v25 = vadd.f32 %v9341_v11, %v16651_v60  ;;  %v1291_v49 = vadd.f32 %v9400_v50, %v16652_v3  ;;  %v16653_v26 = vld [vmem:[#allocation73_spill] sm:$0xff]  ;;  %vm9523_vm4 = vmand %vm9494_vm11, %vm1430_vm7 }
 0x1a3   : >> { %v9500_v47 = vpop.permute.xlu0 %1052  ;;  %v1087_v44 = vsub.f32 %v9432_v2, %v9197_v9  ;;  %vm1369_vm14 = vcmp.le.f32.partialorder %v1161_v7, 6.0  ;;  %v1068_v30 = vadd.f32 %v9383_v46, %v9367_v63  ;;  %vm1401_vm15 = vcmp.eq.f32.partialorder %v1257_v28, 1.0 }
 0x1a4   : >> { %v1116_v21 = vadd.f32 %v1100_v43, %v9375_v58  ;;  %v1196_v27 = vmax.f32 %v1180_v12, 0.0  ;;  %v1228_v60 = vsub.f32 %v16647_v22, %v1139_v42  ;;  %vm1433_vm2 = vcmp.lt.f32.partialorder %v1305_v19, 0.5  ;;  %vm1385_vm3 = vmand %vm1353_vm13, %vm1369_vm14  ;;  %v16656_v43 = vld [vmem:[#allocation99_spill] sm:$0xff] }
 0x1a5   : >> { %v9518_v61 = vmul.f32 %v1288_v34, %v16653_v26  ;;  %v1099_v7 = vmax.f32 %v1083_v32, 0.0  ;;  %v1086_v63 = vsub.f32 %v9448_v54, %v16590_v51  ;;  %v1164_v46 = vadd.f32 %v1139_v42, %v1068_v30  ;;  %v16659_v12 = vld [vmem:[#allocation67_spill] sm:$0xff]  ;;  %vm1417_vm5 = vmand %vm1385_vm3, %vm1401_vm15 }
 0x1a6   : >> { %v1212_v58 = vadd.f32 %v1196_v27, %v1116_v21  ;;  %v9530_v22 = vadd.f32 %v1096_v17, %v16656_v43  ;;  %v9533_v26 = vadd.f32 %v1107_v1, %v9430_v10  ;;  %v9536_v34 = vmul.f32 %v1292_v29, %v16658_v59  ;;  %v16660_v42 = vld [vmem:[#allocation91_spill] sm:$0xff]  ;;  %v1145_v29 = vpop.permute.xlu2 %1144  ;;  %v16662_v21 = vld [vmem:[#allocation100_spill] sm:$0xff]  ;;  %v16664_v27 = vld [vmem:[#allocation101_spill] sm:$0xff] }
 0x1a7   : >> { %v1103_v33 = vmax.f32 %v1087_v44, 0.0  ;;  %v1295_v24 = vadd.f32 %v9432_v2, %v16659_v12  ;;  %v1090_v51 = vsub.f32 %v9478_v15, %v9244_v41  ;;  %v9544_v32 = vmul.f32 %v1291_v49, %v16660_v42  ;;  %v16661_v17 = vld [vmem:[#allocation63_spill] sm:$0xff]  ;;  %v9548_v1 = vpop.permute.xlu1 %1060  ;;  %vm9565_vm6 = vmand %vm1417_vm5, %vm1433_vm2 }
 0x1a8   : >> { %16657 = vst [vmem:[#allocation122_spill] sm:$0xff] %v9533_v26  ;;  %v1294_v30 = vadd.f32 %v9448_v54, %v16661_v17  ;;  %v1244_v10 = vmax.f32 %v1228_v60, 0.0  ;;  %v9552_v44 = vadd.f32 %v9400_v50, %v16662_v21  ;;  %v9557_v28 = vsel %vm9523_vm4, 0.0, %v16625_v14  ;;  %v16676_v60 = vld [vmem:[#allocation53_spill] sm:$0xff] }
 0x1a9   : >> { %16663 = vst [vmem:[#allocation109_spill] sm:$0xff] %v9557_v28  ;;  %v1102_v41 = vmax.f32 %v1086_v63, 0.0  ;;  %v1089_v49 = vsub.f32 %v9500_v47, %v9001_v13  ;;  %v9562_v43 = vadd.f32 %v1099_v7, %v16664_v27  ;;  %vm1340_vm7 = vcmp.ge.f32.partialorder %v1164_v46, 2.0  ;;  %v16667_v63 = vld [vmem:[#allocation52_spill] sm:$0xff]  ;;  %v16669_v27 = vld [vmem:[#allocation70_spill] sm:$0xff] }
 0x1aa   : >> { %v1260_v59 = vadd.f32 %v1244_v10, %v1212_v58  ;;  %v1071_v42 = vadd.f32 %v9432_v2, %v9396_v38  ;;  %v1183_v9 = vsub.f32 %v1145_v29, %v9432_v2  ;;  %vm1320_vm8 = vcmp.gt.f32.partialorder %v16667_v63, 0.5  ;;  %v16668_v13 = vld [vmem:[#allocation105_spill] sm:$0xff]  ;;  %v16670_v10 = vld [vmem:[#allocation84_spill] sm:$0xff]  ;;  %v16671_v38 = vld [vmem:[#allocation66_spill] sm:$0xff] }
 0x1ab   : >> { %v9572_v21 = vpop.permute.xlu0 %1058  ;;  %vm1436_vm9 = vcmp.lt.f32.partialorder %v9536_v34, 0.5  ;;  %v9577_v7 = vmul.f32 %v1295_v24, %v16668_v13  ;;  %v1106_v19 = vmax.f32 %v1090_v51, 0.0  ;;  %v1298_v14 = vadd.f32 %v9478_v15, %v16669_v27  ;;  %vm1356_vm11 = vmand %vm1324_vm12, %vm1340_vm7  ;;  %v16677_v24 = vld [vmem:[#allocation107_spill] sm:$0xff]  ;;  %v16696_v34 = vld [vmem:[#allocation39_spill] sm:$0xff] }
 0x1ac   : >> { %v1119_v58 = vadd.f32 %v1103_v33, %v9403_v62  ;;  %v9583_v26 = vmul.f32 %v1294_v30, %v16670_v10  ;;  %v1297_v2 = vadd.f32 %v9500_v47, %v16671_v38  ;;  %vm1327_vm10 = vcmp.gt.f32.partialorder %v16672_v4, 0.5  ;;  %v16675_v30 = vld [vmem:[#allocation71_spill] sm:$0xff] }
 0x1ad   : >> { %v9590_v40 = vadd.f32 %v9448_v54, %v16673_v31  ;;  %v9596_v51 = vsel %vm9565_vm6, 0.0, %v16629_v57  ;;  %vm1372_vm13 = vcmp.le.f32.partialorder %v1164_v46, 6.0  ;;  %v1105_v62 = vmax.f32 %v1089_v49, 0.0 }
 0x1ae   : >> { %16674 = vst [vmem:[#allocation129_spill] sm:$0xff] %v9596_v51  ;;  %v9602_v33 = vadd.f32 %v1102_v41, %v9306_v20  ;;  %vm1404_vm14 = vcmp.eq.f32.partialorder %v1260_v59, 1.0  ;;  %v1093_v31 = vsub.f32 %v9548_v1, %v9293_v45  ;;  %v1301_v13 = vadd.f32 %v9548_v1, %v16675_v30  ;;  %vm1388_vm12 = vmand %vm1356_vm11, %vm1372_vm13  ;;  %v16678_v41 = vld [vmem:[#allocation108_spill] sm:$0xff]  ;;  %v9623_v8 = vpop.permute.xlu2 %1150 }
 0x1af   : >> { %v1199_v10 = vmax.f32 %v1183_v9, 0.0  ;;  %vm1319_vm15 = vcmp.gt.f32.partialorder %v16676_v60, 0.5  ;;  %v9610_v57 = vmul.f32 %v1298_v14, %v16677_v24  ;;  %v9612_v38 = vadd.f32 %v1145_v29, %v1071_v42  ;;  %v1131_v9 = vpop.permute.xlu1 %1130  ;;  %vm9631_vm2 = vmand %vm1388_vm12, %vm1404_vm14  ;;  %v16682_v24 = vld [vmem:[#allocation82_spill] sm:$0xff] }
 0x1b0   : >> { %v1074_v46 = vadd.f32 %v9478_v15, %v9418_v52  ;;  %v9617_v20 = vadd.f32 %v1106_v19, %v9438_v56  ;;  %v9620_v45 = vmul.f32 %v1297_v2, %v16678_v41  ;;  %v1231_v49 = vsub.f32 %v16659_v12, %v1145_v29  ;;  %v16681_v29 = vld [vmem:[#allocation42_spill] sm:$0xff]  ;;  %vm9653_vm7 = vmand %vm9631_vm2, %vm1436_vm9  ;;  %v16689_v52 = vld [vmem:[#allocation61_spill] sm:$0xff] }
 0x1b1   : >> { %v9627_v14 = vadd.f32 %v9500_v47, %v9309_v18  ;;  %v1160_v56 = vadd.f32 %v1131_v9, %v9504_v25  ;;  %v1176_v19 = vsub.f32 %v1131_v9, %v9341_v11  ;;  %v1224_v12 = vsub.f32 %v16645_v23, %v1131_v9 }
 0x1b2   : >> { %vm1330_vm4 = vcmp.gt.f32.partialorder %v16681_v29, 0.5  ;;  %v9640_v2 = vadd.f32 %v1105_v62, %v9328_v48  ;;  %vm1432_vm3 = vcmp.lt.f32.partialorder %v9518_v61, 0.5  ;;  %v1109_v18 = vmax.f32 %v1093_v31, 0.0 }
 0x1b3   : >> { %v9644_v59 = vmul.f32 %v1301_v13, %v16682_v24  ;;  %v1215_v41 = vadd.f32 %v1199_v10, %v1119_v58  ;;  %v1129_v42 = vpop.permute.xlu0 %1128  ;;  %v1077_v25 = vadd.f32 %v9548_v1, %v9459_v35  ;;  %vm1343_vm5 = vcmp.ge.f32.partialorder %v9612_v38, 2.0 }
 0x1b4   : >> { %v1192_v11 = vmax.f32 %v1176_v19, 0.0  ;;  %v1240_v23 = vmax.f32 %v1224_v12, 0.0  ;;  %vm1336_vm6 = vcmp.ge.f32.partialorder %v1160_v56, 2.0  ;;  %v1247_v62 = vmax.f32 %v1231_v49, 0.0  ;;  %v16687_v49 = vld [vmem:[#allocation49_spill] sm:$0xff] }
 0x1b5   : >> { %vm1375_vm11 = vcmp.le.f32.partialorder %v9612_v38, 6.0  ;;  %v9659_v58 = vadd.f32 %v9623_v8, %v1074_v46  ;;  %v1186_v35 = vsub.f32 %v9623_v8, %v9478_v15  ;;  %vm9666_vm13 = vmand %vm1320_vm8, %vm1336_vm6  ;;  %vm1368_vm9 = vcmp.le.f32.partialorder %v1160_v56, 6.0 }
 0x1b6   : >> { %v1208_v31 = vadd.f32 %v1192_v11, %v9530_v22  ;;  %v1159_v13 = vadd.f32 %v1129_v42, %v9360_v5  ;;  %v1175_v10 = vsub.f32 %v1129_v42, %v16603_v0  ;;  %vm1323_vm14 = vcmp.gt.f32.partialorder %v16687_v49, 0.5  ;;  %v16688_v22 = vld [vmem:[#allocation69_spill] sm:$0xff]  ;;  %vm9687_vm8 = vmand %vm1327_vm10, %vm1343_vm5 }
 0x1b7   : >> { %vm1431_vm12 = vcmp.lt.f32.partialorder %v9363_v6, 0.5  ;;  %v9674_v46 = vadd.f32 %v1247_v62, %v1215_v41  ;;  %v1092_v15 = vsub.f32 %v9572_v21, %v16599_v53  ;;  %v9680_v9 = vadd.f32 %v9572_v21, %v16688_v22  ;;  %vm1384_vm6 = vmand %vm9666_vm13, %vm1368_vm9  ;;  %v1137_v62 = vpop.permute.xlu1 %1136  ;;  %v16761_v53 = vld [vmem:[#allocation86_spill] sm:$0xff] }
 0x1b8   : >> { %v1223_v19 = vsub.f32 %v16689_v52, %v1129_v42  ;;  %v1256_v5 = vadd.f32 %v1240_v23, %v1208_v31  ;;  %v1234_v12 = vsub.f32 %v16669_v27, %v9623_v8  ;;  %v1191_v24 = vmax.f32 %v1175_v10, 0.0  ;;  %v1157_v23 = vpop.permute.xlu2 %1156  ;;  %v16693_v31 = vld [vmem:[#allocation80_spill] sm:$0xff] }
 0x1b9   : >> { %vm1335_vm2 = vcmp.ge.f32.partialorder %v1159_v13, 2.0  ;;  %v9696_v41 = vsel %vm9653_vm7, 0.0, %v16650_v16  ;;  %v1202_v42 = vmax.f32 %v1186_v35, 0.0  ;;  %vm1346_vm10 = vcmp.ge.f32.partialorder %v9659_v58, 2.0 }
 0x1ba   : >> { %16692 = vst [vmem:[#allocation130_spill] sm:$0xff] %v9696_v41  ;;  %v1239_v11 = vmax.f32 %v1223_v19, 0.0  ;;  %vm1400_vm5 = vcmp.eq.f32.partialorder %v1256_v5, 1.0  ;;  %v1207_v8 = vadd.f32 %v1191_v24, %v16693_v31  ;;  %vm9705_vm1 = vmand %vm1319_vm15, %vm1335_vm2  ;;  %v1163_v56 = vadd.f32 %v1137_v62, %v9552_v44  ;;  %v16705_v31 = vld [vmem:[#allocation57_spill] sm:$0xff] }
 0x1bb   : >> { %v1179_v48 = vsub.f32 %v1137_v62, %v9400_v50  ;;  %vm1435_vm13 = vcmp.lt.f32.partialorder %v9544_v32, 0.5  ;;  %vm1416_vm9 = vmand %vm1384_vm6, %vm1400_vm5  ;;  %vm1367_vm0 = vcmp.le.f32.partialorder %v1159_v13, 6.0  ;;  %v1227_v35 = vsub.f32 %v16652_v3, %v1137_v62  ;;  %v1135_v19 = vpop.permute.xlu0 %1134 }
 0x1bc   : >> { %v1125_v10 = vadd.f32 %v1109_v18, %v9474_v37  ;;  %v1189_v52 = vsub.f32 %v1157_v23, %v9548_v1  ;;  %vm9720_vm15 = vmand %vm9687_vm8, %vm1375_vm11  ;;  %vm1407_vm2 = vcmp.eq.f32.partialorder %v9674_v46, 1.0  ;;  %v1250_v50 = vmax.f32 %v1234_v12, 0.0  ;;  %v16701_v12 = vld [vmem:[#allocation50_spill] sm:$0xff] }
 0x1bd   : >> { %vm1448_vm6 = vmand %vm1416_vm9, %vm1432_vm3  ;;  %v1255_v3 = vadd.f32 %v1239_v11, %v1207_v8  ;;  %v1195_v5 = vmax.f32 %v1179_v48, 0.0  ;;  %v1243_v1 = vmax.f32 %v1227_v35, 0.0  ;;  %v1173_v38 = vadd.f32 %v1157_v23, %v1077_v25 }
 0x1be   : >> { %vm9731_vm5 = vmand %vm1330_vm4, %vm1346_vm10  ;;  %v1205_v18 = vmax.f32 %v1189_v52, 0.0  ;;  %v1237_v0 = vsub.f32 %v16675_v30, %v1157_v23  ;;  %v1218_v24 = vadd.f32 %v1202_v42, %v9617_v20  ;;  %vm1339_vm8 = vcmp.ge.f32.partialorder %v1163_v56, 2.0  ;;  %v16703_v20 = vld [vmem:[#allocation119_spill] sm:$0xff]  ;;  %v16704_v42 = vld [vmem:[#allocation85_spill] sm:$0xff] }
 0x1bf   : >> { %vm1383_vm3 = vmand %vm9705_vm1, %vm1367_vm0  ;;  %vm1399_vm11 = vcmp.eq.f32.partialorder %v1255_v3, 1.0  ;;  %v1211_v61 = vadd.f32 %v1195_v5, %v9562_v43  ;;  %v9743_v11 = vsel %vm1448_vm6, 0.0, %v16667_v63  ;;  %vm1371_vm9 = vcmp.le.f32.partialorder %v1163_v56, 6.0  ;;  %v1143_v56 = vpop.permute.xlu1 %1142 }
 0x1c0   : >> { %16702 = vst [vmem:[#allocation92_spill] sm:$0xff] %v9743_v11  ;;  %vm1415_vm10 = vmand %vm1383_vm3, %vm1399_vm11  ;;  %v1221_v25 = vadd.f32 %v1205_v18, %v1125_v10  ;;  %v1253_v62 = vmax.f32 %v1237_v0, 0.0  ;;  %v1162_v13 = vadd.f32 %v1135_v19, %v16703_v20  ;;  %v1178_v23 = vsub.f32 %v1135_v19, %v16704_v42  ;;  %v16707_v10 = vld [vmem:[#allocation121_spill] sm:$0xff]  ;;  %v16732_v0 = vld [vmem:[#allocation115_spill] sm:$0xff] }
 0x1c1   : >> { %vm1447_vm7 = vmand %vm1415_vm10, %vm1431_vm12  ;;  %v1259_v30 = vadd.f32 %v1243_v1, %v1211_v61  ;;  %v1226_v43 = vsub.f32 %v16705_v31, %v1135_v19  ;;  %vm1378_vm0 = vcmp.le.f32.partialorder %v9659_v58, 6.0  ;;  %vm1349_vm6 = vcmp.ge.f32.partialorder %v1173_v38, 2.0  ;;  %v16720_v61 = vld [vmem:[#allocation62_spill] sm:$0xff]  ;;  %v16725_v31 = vld [vmem:[#allocation117_spill] sm:$0xff] }
 0x1c2   : >> { %v9752_v8 = vsel %vm1447_vm7, 0.0, %v16676_v60  ;;  %vm1355_vm1 = vmand %vm1323_vm14, %vm1339_vm8  ;;  %v1269_v27 = vadd.f32 %v1253_v62, %v1221_v25  ;;  %v1194_v6 = vmax.f32 %v1178_v23, 0.0  ;;  %v1480_v35 = vrot.slane %v9743_v11, 7 }
 0x1c3   : >> { %16706 = vst [vmem:[#allocation106_spill] sm:$0xff] %v9752_v8  ;;  %vm1387_vm3 = vmand %vm1355_vm1, %vm1371_vm9  ;;  %vm1403_vm12 = vcmp.eq.f32.partialorder %v1259_v30, 1.0  ;;  %v1242_v48 = vmax.f32 %v1226_v43, 0.0  ;;  %vm1434_vm11 = vcmp.lt.f32.partialorder %v16707_v10, 0.5  ;;  %vm1381_vm4 = vcmp.le.f32.partialorder %v1173_v38, 6.0  ;;  %v1141_v5 = vpop.permute.xlu0 %1140  ;;  %v16721_v38 = vld [vmem:[#allocation46_spill] sm:$0xff] }
 0x1c4   : >> { %vm1419_vm10 = vmand %vm1387_vm3, %vm1403_vm12  ;;  %v1182_v52 = vsub.f32 %v1143_v56, %v9448_v54  ;;  %v1230_v19 = vsub.f32 %v16661_v17, %v1143_v56  ;;  %v1479_v3 = vrot.slane %v9752_v8, 7  ;;  %v1266_v1 = vadd.f32 %v1250_v50, %v1218_v24  ;;  %v16731_v10 = vld [vmem:[#allocation47_spill] sm:$0xff] }
 0x1c5   : >> { %vm9765_vm14 = vmand %vm9731_vm5, %vm1378_vm0  ;;  %vm1413_vm8 = vcmp.eq.f32.partialorder %v1269_v27, 1.0  ;;  %v1210_v54 = vadd.f32 %v1194_v6, %v9406_v55  ;;  %vm1338_vm9 = vcmp.ge.f32.partialorder %v1162_v13, 2.0  ;;  %vm16714_vm5 = vcmp.gt.f32.partialorder %v16696_v34, 0.5  ;;  %v16716_v55 = vld [vmem:[#allocation55_spill] sm:$0xff] }
 0x1c6   : >> { %vm9771_vm7 = vmand %vm1419_vm10, %vm1435_vm13  ;;  %v1166_v32 = vadd.f32 %v1143_v56, %v9590_v40  ;;  %v1198_v58 = vmax.f32 %v1182_v52, 0.0  ;;  %v1246_v50 = vmax.f32 %v1230_v19, 0.0  ;;  %v16715_v37 = vrot.slane %v9557_v28, 7  ;;  %v16726_v56 = vld [vmem:[#allocation66_spill] sm:$0xff] }
 0x1c7   : >> { %vm9780_vm1 = vmand %vm9720_vm15, %vm1407_vm2  ;;  %vm16717_vm13 = vcmp.lt.s32.totalorder %v16716_v55, 1  ;;  %v1258_v46 = vadd.f32 %v1242_v48, %v1210_v54  ;;  %v1181_v40 = vsub.f32 %v1141_v5, %v9229_v39  ;;  %v1229_v25 = vsub.f32 %v16720_v61, %v1141_v5  ;;  %v1149_v23 = vpop.permute.xlu1 %1148  ;;  %v16727_v48 = vld [vmem:[#allocation112_spill] sm:$0xff] }
 0x1c8   : >> { %vm1365_vm0 = vmand %vm16714_vm5, %vm1349_vm6  ;;  %v9792_v24 = vsel %vm16717_vm13, %v16715_v37, %v1479_v3  ;;  %vm1439_vm2 = vcmp.lt.f32.partialorder %v9577_v7, 0.5  ;;  %vm1370_vm10 = vcmp.le.f32.partialorder %v1162_v13, 6.0  ;;  %vm1326_vm5 = vcmp.gt.f32.partialorder %v16721_v38, 0.5 }
 0x1c9   : >> { %vm1397_vm3 = vmand %vm1365_vm0, %vm1381_vm4  ;;  %1544 = vrot.lane.b32.xlu1 %v9792_v24, %s7978_s10  ;;  %vm1445_vm4 = vcmp.lt.f32.partialorder %v9644_v59, 0.5  ;;  %v1214_v62 = vadd.f32 %v1198_v58, %v9602_v33  ;;  %v9816_v39 = vsel %vm9771_vm7, 0.0, %v16687_v49  ;;  %v1197_v30 = vmax.f32 %v1181_v40, 0.0 }
 0x1ca   : >> { %vm16718_vm15 = vmmov %vm16717_vm13  ;;  %16722 = vst [vmem:[#allocation79_spill] sm:$0xff] %v9816_v39  ;;  %vm1402_vm13 = vcmp.eq.f32.partialorder %v1258_v46, 1.0  ;;  %v1245_v20 = vmax.f32 %v1229_v25, 0.0  ;;  %v1165_v42 = vadd.f32 %v1141_v5, %v9423_v36  ;;  %vm1342_vm7 = vcmp.ge.f32.partialorder %v1166_v32, 2.0 }
 0x1cb   : >> { %v9801_v44 = vsel %vm16718_vm15, %v1479_v3, %v1480_v35  ;;  %vm1429_vm12 = vmand %vm1397_vm3, %vm1413_vm8  ;;  %vm1410_vm15 = vcmp.eq.f32.partialorder %v1266_v1, 1.0  ;;  %vm16724_vm8 = vcmp.gt.f32.partialorder %v16701_v12, 0.5  ;;  %v1262_v33 = vadd.f32 %v1246_v50, %v1214_v62  ;;  %v1147_v13 = vpop.permute.xlu0 %1146  ;;  %v16733_v50 = vld [vmem:[#allocation65_spill] sm:$0xff]  ;;  %v16745_v62 = vld [vmem:[#allocation127_spill] sm:$0xff] }
 0x1cc   : >> { %16719 = vst [vmem:[#allocation72_spill] sm:$0xff] %v9801_v44  ;;  %1546 = vrot.lane.b32.xlu2 %v9801_v44, %s7978_s10  ;;  %vm1461_vm0 = vmand %vm1429_vm12, %vm1445_vm4  ;;  %v1213_v43 = vadd.f32 %v1197_v30, %v16725_v31  ;;  %v1185_v27 = vsub.f32 %v1149_v23, %v9500_v47  ;;  %v1233_v6 = vsub.f32 %v16726_v56, %v1149_v23  ;;  %vm1437_vm4 = vcmp.lt.f32.partialorder %v16727_v48, 0.5  ;;  %v16747_v31 = vld [vmem:[#allocation104_spill] sm:$0xff] }
 0x1cd   : >> { %v9819_v59 = vsel %vm1461_vm0, 0.0, %v16696_v34  ;;  %vm1354_vm3 = vmand %vm16724_vm8, %vm1338_vm9  ;;  %v1108_v52 = vmax.f32 %v1092_v15, 0.0  ;;  %vm1374_vm12 = vcmp.le.f32.partialorder %v1166_v32, 6.0  ;;  %v1483_v36 = vrot.slane %v9816_v39, 7 }
 0x1ce   : >> { %16723 = vst [vmem:[#allocation96_spill] sm:$0xff] %v9819_v59  ;;  %vm1386_vm6 = vmand %vm1354_vm3, %vm1370_vm10  ;;  %v1493_v19 = vrot.slane %v9819_v59, 7  ;;  %vm1406_vm0 = vcmp.eq.f32.partialorder %v1262_v33, 1.0  ;;  %v1261_v47 = vadd.f32 %v1245_v20, %v1213_v43  ;;  %v1201_v3 = vmax.f32 %v1185_v27, 0.0  ;;  %v16746_v20 = vld [vmem:[#allocation124_spill] sm:$0xff] }
 0x1cf   : >> { %vm1418_vm9 = vmand %vm1386_vm6, %vm1402_vm13  ;;  %v1249_v5 = vmax.f32 %v1233_v6, 0.0  ;;  %vm1341_vm13 = vcmp.ge.f32.partialorder %v1165_v42, 2.0  ;;  %v1184_v54 = vsub.f32 %v1147_v13, %v16732_v0  ;;  %v1169_v1 = vadd.f32 %v1149_v23, %v9627_v14  ;;  %v1155_v23 = vpop.permute.xlu1 %1154  ;;  %v16748_v27 = vld [vmem:[#allocation43_spill] sm:$0xff] }
 0x1d0   : >> { %vm1450_vm10 = vmand %vm1418_vm9, %vm1434_vm11  ;;  %vm1325_vm11 = vcmp.gt.f32.partialorder %v16731_v10, 0.5  ;;  %v1217_v18 = vadd.f32 %v1201_v3, %v9640_v2  ;;  %v1232_v37 = vsub.f32 %v16733_v50, %v1147_v13  ;;  %vm1405_vm9 = vcmp.eq.f32.partialorder %v1261_v47, 1.0  ;;  %v16772_v2 = vld [vmem:[#allocation41_spill] sm:$0xff] }
 0x1d1   : >> { %vm9841_vm8 = vmand %vm9765_vm14, %vm1410_vm15  ;;  %v9846_v15 = vsel %vm1450_vm10, 0.0, %v16701_v12  ;;  %vm1442_vm14 = vcmp.lt.f32.partialorder %v9610_v57, 0.5  ;;  %vm1441_vm15 = vcmp.lt.f32.partialorder %v9620_v45, 0.5  ;;  %v1200_v46 = vmax.f32 %v1184_v54, 0.0 }
 0x1d2   : >> { %16730 = vst [vmem:[#allocation110_spill] sm:$0xff] %v9846_v15  ;;  %vm1358_vm6 = vmand %vm1326_vm5, %vm1342_vm7  ;;  %v1482_v58 = vrot.slane %v9846_v15, 7  ;;  %vm1373_vm7 = vcmp.le.f32.partialorder %v1165_v42, 6.0  ;;  %v16734_v32 = vrot.slane %v9557_v28, 7  ;;  %v1265_v40 = vadd.f32 %v1249_v5, %v1217_v18 }
 0x1d3   : >> { %vm1390_vm3 = vmand %vm1358_vm6, %vm1374_vm12  ;;  %vm16735_vm12 = vcmp.lt.s32.totalorder %v16716_v55, 1  ;;  %v16740_v61 = vrot.slane %v9596_v51, 7  ;;  %v1248_v17 = vmax.f32 %v1232_v37, 0.0  ;;  %v1168_v30 = vadd.f32 %v1147_v13, %v16745_v62  ;;  %v16749_v13 = vld [vmem:[#allocation77_spill] sm:$0xff]  ;;  %v1153_v54 = vpop.permute.xlu0 %1152 }
 0x1d4   : >> { %vm1422_vm5 = vmand %vm1390_vm3, %vm1406_vm0  ;;  %v9867_v14 = vsel %vm16735_vm12, %v1493_v19, %v16734_v32  ;;  %vm16739_vm0 = vcmp.lt.f32.partialorder %v9583_v26, 0.5  ;;  %v1216_v33 = vadd.f32 %v1200_v46, %v16746_v20  ;;  %v1076_v43 = vadd.f32 %v9572_v21, %v16747_v31  ;;  %v16753_v46 = vld [vmem:[#allocation68_spill] sm:$0xff]  ;;  %v16764_v31 = vld [vmem:[#allocation122_spill] sm:$0xff] }
 0x1d5   : >> { %16736 = vst [vmem:[#allocation76_spill] sm:$0xff] %v9867_v14  ;;  %vm9873_vm10 = vmand %vm9780_vm1, %vm1439_vm2  ;;  %1542 = vrot.lane.b32.xlu0 %v9867_v14, %s7978_s10  ;;  %v1188_v56 = vsub.f32 %v1155_v23, %v9572_v21  ;;  %v1236_v6 = vsub.f32 %v16688_v22, %v1155_v23  ;;  %v1124_v5 = vadd.f32 %v1108_v52, %v16749_v13  ;;  %v1484_v0 = vrot.slane %v9696_v41, 7  ;;  %v16751_v22 = vld [vmem:[#allocation44_spill] sm:$0xff]  ;;  %v16752_v52 = vld [vmem:[#allocation88_spill] sm:$0xff] }
 0x1d6   : >> { %vm1454_vm6 = vmand %vm1422_vm5, %vm16739_vm0  ;;  %vm1329_vm5 = vcmp.gt.f32.partialorder %v16748_v27, 0.5  ;;  %vm1345_vm0 = vcmp.ge.f32.partialorder %v1169_v1, 2.0  ;;  %v1264_v3 = vadd.f32 %v1248_v17, %v1216_v33  ;;  %v1187_v47 = vsub.f32 %v1153_v54, %v16752_v52  ;;  %v16762_v33 = vld [vmem:[#allocation95_spill] sm:$0xff] }
 0x1d7   : >> { %vm16741_vm3 = vmmov %vm16735_vm12  ;;  %v9894_v26 = vsel %vm1454_vm6, 0.0, %v16721_v38  ;;  %v1204_v42 = vmax.f32 %v1188_v56, 0.0  ;;  %v1252_v18 = vmax.f32 %v1236_v6, 0.0  ;;  %v1172_v48 = vadd.f32 %v1155_v23, %v1076_v43  ;;  %v16765_v56 = vld [vmem:[#allocation123_spill] sm:$0xff]  ;;  %v16766_v6 = vld [vmem:[#allocation40_spill] sm:$0xff] }
 0x1d8   : >> { %v9883_v25 = vsel %vm16741_vm3, %v16740_v61, %v1482_v58  ;;  %vm16742_vm12 = vmmov %vm16741_vm3  ;;  %16744 = vst [vmem:[#allocation97_spill] sm:$0xff] %v9894_v26  ;;  %vm1328_vm3 = vcmp.gt.f32.partialorder %v16751_v22, 0.5  ;;  %v1235_v32 = vsub.f32 %v16753_v46, %v1153_v54  ;;  %v1284_v23 = vmul.f32 %v16762_v33, %v16761_v53  ;;  %v16767_v13 = vld [vmem:[#allocation83_spill] sm:$0xff] }
 0x1d9   : >> { %v9889_v7 = vsel %vm16742_vm12, %v1482_v58, %v1483_v36  ;;  %vm1357_vm1 = vmand %vm1325_vm11, %vm1341_vm13  ;;  %1550 = vrot.lane.b32.xlu1 %v9883_v25, %s7978_s10  ;;  %vm1377_vm13 = vcmp.le.f32.partialorder %v1169_v1, 6.0  ;;  %v1486_v58 = vrot.slane %v9894_v26, 7  ;;  %vm1344_vm12 = vcmp.ge.f32.partialorder %v1168_v30, 2.0 }
 0x1da   : >> { %16743 = vst [vmem:[#allocation75_spill] sm:$0xff] %v9889_v7  ;;  %1552 = vrot.lane.b32.xlu2 %v9889_v7, %s7978_s10  ;;  %vm1389_vm2 = vmand %vm1357_vm1, %vm1373_vm7  ;;  %vm1409_vm7 = vcmp.eq.f32.partialorder %v1265_v40, 1.0  ;;  %v1220_v50 = vadd.f32 %v1204_v42, %v1124_v5  ;;  %v1203_v40 = vmax.f32 %v1187_v47, 0.0  ;;  %v1251_v57 = vmax.f32 %v1235_v32, 0.0 }
 0x1db   : >> { %vm1421_vm11 = vmand %vm1389_vm2, %vm1405_vm9  ;;  %vm1376_vm2 = vcmp.le.f32.partialorder %v1168_v30, 6.0  ;;  %v1171_v5 = vadd.f32 %v1153_v54, %v16767_v13  ;;  %v1299_v42 = vadd.f32 %v16752_v52, %v16753_v46  ;;  %v1316_v47 = vmul.f32 %v9680_v9, %v1284_v23  ;;  %v16770_v54 = vld [vmem:[#allocation89_spill] sm:$0xff] }
 0x1dc   : >> { %vm1453_vm6 = vmand %vm1421_vm11, %vm1437_vm4  ;;  %vm1408_vm11 = vcmp.eq.f32.partialorder %v1264_v3, 1.0  ;;  %v1268_v62 = vadd.f32 %v1252_v18, %v1220_v50  ;;  %v1219_v43 = vadd.f32 %v1203_v40, %v16764_v31  ;;  %v9980_v18 = vsel %vm9873_vm10, 0.0, %v16672_v4 }
 0x1dd   : >> { %v9918_v21 = vsel %vm1453_vm6, 0.0, %v16731_v10  ;;  %vm1361_vm9 = vmand %vm1329_vm5, %vm1345_vm0  ;;  %vm16754_vm5 = vcmp.lt.s32.totalorder %v16716_v55, 1  ;;  %16768 = vst [vmem:[#allocation81_spill] sm:$0xff] %v9980_v18  ;;  %vm1331_vm10 = vcmp.gt.f32.partialorder %v16772_v2, 0.5  ;;  %v1487_v9 = vrot.slane %v9980_v18, 7 }
 0x1de   : >> { %16750 = vst [vmem:[#allocation90_spill] sm:$0xff] %v9918_v21  ;;  %vm1393_vm1 = vmand %vm1361_vm9, %vm1377_vm13  ;;  %v1485_v37 = vrot.slane %v9918_v21, 7  ;;  %v9934_v17 = vsel %vm16754_vm5, %v1480_v35, %v16740_v61  ;;  %vm1332_vm9 = vcmp.gt.f32.partialorder %v16766_v6, 0.5  ;;  %v1267_v30 = vadd.f32 %v1251_v57, %v1219_v43 }
 0x1df   : >> { %vm1425_vm4 = vmand %vm1393_vm1, %vm1409_vm7  ;;  %1548 = vrot.lane.b32.xlu0 %v9934_v17, %s7978_s10  ;;  %vm1348_vm1 = vcmp.ge.f32.partialorder %v1172_v48, 2.0 }
 0x1e0   : >> { %vm9940_vm0 = vmand %vm9841_vm8, %vm1442_vm14  ;;  %vm1440_vm14 = vcmp.lt.f32.partialorder %v16765_v56, 0.5  ;;  %v1510_v56 = vrot.slane %v9557_v28, 1 }
 0x1e1   : >> { %vm1457_vm13 = vmand %vm1425_vm4, %vm1441_vm15 }
 0x1e2   : >> { %vm16757_vm6 = vmmov %vm16754_vm5  ;;  %v9961_v45 = vsel %vm1457_vm13, 0.0, %v16748_v27 }
 0x1e3   : >> { %v9948_v20 = vsel %vm16757_vm6, %v1484_v0, %v1485_v37  ;;  %vm16759_vm7 = vmmov %vm16754_vm5  ;;  %16763 = vst [vmem:[#allocation116_spill] sm:$0xff] %v9961_v45  ;;  %v1489_v50 = vrot.slane %v9961_v45, 7  ;;  %vm1347_vm6 = vcmp.ge.f32.partialorder %v1171_v5, 2.0 }
 0x1e4   : >> { %16758 = vst [vmem:[#allocation78_spill] sm:$0xff] %v9948_v20  ;;  %v9954_v35 = vsel %vm16759_vm7, %v1485_v37, %v1486_v58  ;;  %vm1360_vm8 = vmand %vm1328_vm3, %vm1344_vm12  ;;  %1556 = vrot.lane.b32.xlu1 %v9948_v20, %s7978_s10  ;;  %vm1380_vm12 = vcmp.le.f32.partialorder %v1172_v48, 6.0  ;;  %v16769_v37 = vld [vmem:[#allocation87_spill] sm:$0xff] }
 0x1e5   : >> { %16760 = vst [vmem:[#allocation93_spill] sm:$0xff] %v9954_v35  ;;  %1558 = vrot.lane.b32.xlu2 %v9954_v35, %s7978_s10  ;;  %vm1392_vm15 = vmand %vm1360_vm8, %vm1376_vm2  ;;  %vm1412_vm2 = vcmp.eq.f32.partialorder %v1268_v62, 1.0  ;;  %v1283_v32 = vmul.f32 %v16770_v54, %v16769_v37  ;;  %vm1379_vm8 = vcmp.le.f32.partialorder %v1171_v5, 6.0  ;;  %v1514_v5 = vrot.slane %v9846_v15, 1 }
 0x1e6   : >> { %vm1424_vm3 = vmand %vm1392_vm15, %vm1408_vm11  ;;  %vm1444_vm11 = vcmp.lt.f32.partialorder %v1316_v47, 0.5  ;;  %v1513_v47 = vrot.slane %v9596_v51, 1  ;;  %v1517_v54 = vrot.slane %v9918_v21, 1 }
 0x1e7   : >> { %vm1456_vm4 = vmand %vm1424_vm3, %vm1440_vm14  ;;  %v1315_v48 = vmul.f32 %v1299_v42, %v1283_v32  ;;  %vm16773_vm14 = vcmp.lt.s32.totalorder %v16716_v55, 1  ;;  %v1512_v42 = vrot.slane %v9743_v11, 1  ;;  %v1515_v32 = vrot.slane %v9816_v39, 1 }
 0x1e8   : >> { %v9988_v52 = vsel %vm1456_vm4, 0.0, %v16751_v22  ;;  %vm1364_vm5 = vmand %vm1332_vm9, %vm1348_vm1  ;;  %v9997_v46 = vsel %vm16773_vm14, %v1483_v36, %v1484_v0  ;;  %vm1411_vm9 = vcmp.eq.f32.partialorder %v1267_v30, 1.0  ;;  %v10021_v36 = vsel %vm9940_vm0, 0.0, %v16681_v29 }
 0x1e9   : >> { %16771 = vst [vmem:[#allocation94_spill] sm:$0xff] %v9988_v52  ;;  %vm1396_vm13 = vmand %vm1364_vm5, %vm1380_vm12  ;;  %v1488_v3 = vrot.slane %v9988_v52, 7  ;;  %1554 = vrot.lane.b32.xlu0 %v9997_v46, %s7978_s10  ;;  %v1490_v53 = vrot.slane %v10021_v36, 7  ;;  %v1522_v22 = vrot.slane %v10021_v36, 1 }
 0x1ea   : >> { %vm1428_vm7 = vmand %vm1396_vm13, %vm1412_vm2  ;;  %16774 = vst [vmem:[#allocation118_spill] sm:$0xff] %v9997_v46  ;;  %vm1443_vm2 = vcmp.lt.f32.partialorder %v1315_v48, 0.5 }
 0x1eb   : >> { %vm1460_vm15 = vmand %vm1428_vm7, %vm1444_vm11  ;;  %16780 = vst [vmem:[#allocation59_spill] sm:$0xff] %v10021_v36 }
 0x1ec   : >> { %vm16775_vm1 = vmmov %vm16773_vm14  ;;  %v10010_v62 = vsel %vm1460_vm15, 0.0, %v16766_v6 }
 0x1ed   : >> { %v10001_v40 = vsel %vm16775_vm1, %v1487_v9, %v1488_v3  ;;  %vm16777_vm3 = vmmov %vm16775_vm1  ;;  %16779 = vst [vmem:[#allocation120_spill] sm:$0xff] %v10010_v62  ;;  %v1492_v0 = vrot.slane %v10010_v62, 7  ;;  %v1524_v38 = vrot.slane %v10010_v62, 1 }
 0x1ee   : >> { %16776 = vst [vmem:[#allocation111_spill] sm:$0xff] %v10001_v40  ;;  %v10005_v61 = vsel %vm16777_vm3, %v1488_v3, %v1489_v50  ;;  %vm1363_vm12 = vmand %vm1331_vm10, %vm1347_vm6  ;;  %1562 = vrot.lane.b32.xlu1 %v10001_v40, %s7978_s10 }
 0x1ef   : >> { %16778 = vst [vmem:[#allocation58_spill] sm:$0xff] %v10005_v61  ;;  %1564 = vrot.lane.b32.xlu2 %v10005_v61, %s7978_s10  ;;  %vm1395_vm4 = vmand %vm1363_vm12, %vm1379_vm8  ;;  %vm16792_vm8 = vcmp.lt.s32.totalorder %v16716_v55, 7 }
 0x1f0   : >> { %vm1427_vm5 = vmand %vm1395_vm4, %vm1411_vm9 }
 0x1f1   : >> { %vm1459_vm13 = vmand %vm1427_vm5, %vm1443_vm2 }
 0x1f2   : >> { %v10025_v57 = vsel %vm1459_vm13, 0.0, %v16772_v2  ;;  %vm16782_vm10 = vmmov %vm16775_vm1 }
 0x1f3   : >> { %16781 = vst [vmem:[#allocation125_spill] sm:$0xff] %v10025_v57  ;;  %v1491_v33 = vrot.slane %v10025_v57, 7  ;;  %v10033_v23 = vsel %vm16782_vm10, %v1486_v58, %v1487_v9  ;;  %vm16784_vm0 = vmmov %vm16775_vm1  ;;  %v1516_v9 = vrot.slane %v9696_v41, 1 }
 0x1f4   : >> { %16783 = vst [vmem:[#allocation126_spill] sm:$0xff] %v10033_v23  ;;  %vm16786_vm6 = vmmov %vm16784_vm0  ;;  %1560 = vrot.lane.b32.xlu0 %v10033_v23, %s7978_s10 }
 0x1f5   : >> { %v10037_v1 = vsel %vm16784_vm0, %v1490_v53, %v1491_v33  ;;  %v10041_v31 = vsel %vm16786_vm6, %v1491_v33, %v1492_v0  ;;  %vm16788_vm11 = vmmov %vm16784_vm0  ;;  %v1520_v33 = vrot.slane %v9988_v52, 1 }
 0x1f6   : >> { %16785 = vst [vmem:[#allocation98_spill] sm:$0xff] %v10037_v1  ;;  %1568 = vrot.lane.b32.xlu1 %v10037_v1, %s7978_s10  ;;  %v10051_v58 = vsel %vm16788_vm11, %v1489_v50, %v1490_v53  ;;  %vm16790_vm7 = vmmov %vm16784_vm0 }
 0x1f7   : >> { %16787 = vst [vmem:[#allocation103_spill] sm:$0xff] %v10041_v31  ;;  %1570 = vrot.lane.b32.xlu2 %v10041_v31, %s7978_s10  ;;  %v10063_v43 = vsel %vm16790_vm7, %v1492_v0, %v1493_v19  ;;  %v1511_v19 = vrot.slane %v9752_v8, 1  ;;  %vm16793_vm14 = vmmov %vm16792_vm8 }
 0x1f8   : >> { %16789 = vst [vmem:[#allocation74_spill] sm:$0xff] %v10051_v58  ;;  %v10106_v30 = vsel %vm16793_vm14, %v1513_v47, %v1514_v5  ;;  %vm16794_vm15 = vmmov %vm16792_vm8 }
 0x1f9   : >> { %16791 = vst [vmem:[#allocation128_spill] sm:$0xff] %v10063_v43  ;;  %v10093_v13 = vsel %vm16792_vm8, %v1510_v56, %v1511_v19  ;;  %v10110_v50 = vsel %vm16794_vm15, %v1512_v42, %v1513_v47  ;;  %vm16796_vm9 = vmmov %vm16792_vm8 }
 0x1fa   : >> { %16795 = vst [vmem:[#allocation56_spill] sm:$0xff] %v10110_v50  ;;  %v10125_v3 = vsel %vm16796_vm9, %v1511_v19, %v1512_v42  ;;  %vm16797_vm1 = vmmov %vm16792_vm8  ;;  %v1518_v19 = vrot.slane %v9894_v26, 1  ;;  %v1519_v42 = vrot.slane %v9980_v18, 1 }
 0x1fb   : >> { %v10129_v48 = vsel %vm16797_vm1, %v1516_v9, %v1517_v54  ;;  %vm16798_vm3 = vmmov %vm16797_vm1 }
 0x1fc   : >> { %1566 = vrot.lane.b32.xlu0 %v10051_v58, %s7978_s10  ;;  %v10133_v0 = vsel %vm16798_vm3, %v1515_v32, %v1516_v9  ;;  %vm16800_vm12 = vmmov %vm16797_vm1 }
 0x1fd   : >> { %16799 = vst [vmem:[#allocation113_spill] sm:$0xff] %v10133_v0  ;;  %v10148_v47 = vsel %vm16800_vm12, %v1514_v5, %v1515_v32  ;;  %vm16802_vm4 = vmmov %vm16797_vm1  ;;  %v1523_v5 = vrot.slane %v10025_v57, 1  ;;  %v1521_v32 = vrot.slane %v9961_v45, 1 }
 0x1fe   : >> { %1638 = vrot.lane.b32.xlu1 %v9557_v28, %s7978_s10  ;;  %16801 = vst [vmem:[#allocation64_spill] sm:$0xff] %v10148_v47  ;;  %v10152_v9 = vsel %vm16802_vm4, %v1519_v42, %v1520_v33  ;;  %vm16804_vm2 = vmmov %vm16797_vm1 }
 0x1ff   : >> { %1640 = vrot.lane.b32.xlu2 %v9752_v8, %s7978_s10  ;;  %16803 = vst [vmem:[#allocation114_spill] sm:$0xff] %v10152_v9  ;;  %v10156_v2 = vsel %vm16804_vm2, %v1518_v19, %v1519_v42  ;;  %vm16806_vm5 = vmmov %vm16797_vm1 }
 0x200   : >> { %16805 = vst [vmem:[#allocation60_spill] sm:$0xff] %v10156_v2  ;;  %v10171_v42 = vsel %vm16806_vm5, %v1517_v54, %v1518_v19  ;;  %vm16808_vm13 = vmmov %vm16797_vm1  ;;  %v1525_v19 = vrot.slane %v9819_v59, 1 }
 0x201   : >> { %16807 = vst [vmem:[#allocation73_spill] sm:$0xff] %v10171_v42  ;;  %v10175_v34 = vsel %vm16808_vm13, %v1522_v22, %v1523_v5  ;;  %vm16810_vm10 = vmmov %vm16797_vm1 }
 0x202   : >> { %16809 = vst [vmem:[#allocation99_spill] sm:$0xff] %v10175_v34  ;;  %v10179_v27 = vsel %vm16810_vm10, %v1521_v32, %v1522_v22  ;;  %vm16812_vm0 = vmmov %vm16797_vm1 }
 0x203   : >> { %16811 = vst [vmem:[#allocation131_spill] sm:$0xff] %v10179_v27  ;;  %v10195_v22 = vsel %vm16812_vm0, %v1520_v33, %v1521_v32  ;;  %vm16814_vm6 = vmmov %vm16812_vm0 }
 0x204   : >> { %1572 = vrot.lane.b32.xlu0 %v10063_v43, %s7978_s10  ;;  %16813 = vst [vmem:[#allocation67_spill] sm:$0xff] %v10195_v22  ;;  %v10199_v4 = vsel %vm16814_vm6, %v1525_v19, %v1510_v56  ;;  %vm16815_vm11 = vmmov %vm16812_vm0 }
 0x205   : >> { %v10203_v49 = vsel %vm16815_vm11, %v1524_v38, %v1525_v19  ;;  %vm16817_vm7 = vmmov %vm16812_vm0 }
 0x206   : >> { %1644 = vrot.lane.b32.xlu1 %v9596_v51, %s7978_s10  ;;  %v10217_v56 = vsel %vm16817_vm7, %v1523_v5, %v1524_v38 }
 0x207   : >> { %1646 = vrot.lane.b32.xlu2 %v9846_v15, %s7978_s10 }
 0x20c   : >> { %1642 = vrot.lane.b32.xlu0 %v9743_v11, %s7978_s10 }
 0x20e   : >> { %1650 = vrot.lane.b32.xlu1 %v9696_v41, %s7978_s10 }
 0x20f   : >> { %1652 = vrot.lane.b32.xlu2 %v9918_v21, %s7978_s10 }
 0x214   : >> { %1648 = vrot.lane.b32.xlu0 %v9816_v39, %s7978_s10 }
 0x216   : >> { %1656 = vrot.lane.b32.xlu1 %v9980_v18, %s7978_s10 }
 0x217   : >> { %1658 = vrot.lane.b32.xlu2 %v9988_v52, %s7978_s10 }
 0x21c   : >> { %1654 = vrot.lane.b32.xlu0 %v9894_v26, %s7978_s10 }
 0x21e   : >> { %1662 = vrot.lane.b32.xlu1 %v10021_v36, %s7978_s10 }
 0x21f   : >> { %1664 = vrot.lane.b32.xlu2 %v10025_v57, %s7978_s10 }
 0x224   : >> { %1660 = vrot.lane.b32.xlu0 %v9961_v45, %s7978_s10 }
 0x226   : >> { %1668 = vrot.lane.b32.xlu1 %v9819_v59, %s7978_s10  ;;  %v10118_v37 = vpop.permute.xlu2 %1546 }
 0x227   : >> { %1734 = vrot.lane.b32.xlu2 %v10093_v13, %s7978_s10 }
 0x22c   : >> { %1666 = vrot.lane.b32.xlu0 %v10010_v62, %s7978_s10 }
 0x22e   : >> { %1738 = vrot.lane.b32.xlu1 %v10110_v50, %s7978_s10 }
 0x22f   : >> { %1740 = vrot.lane.b32.xlu2 %v10106_v30, %s7978_s10 }
 0x234   : >> { %1736 = vrot.lane.b32.xlu0 %v10125_v3, %s7978_s10  ;;  %v10141_v53 = vpop.permute.xlu2 %1552 }
 0x236   : >> { %1744 = vrot.lane.b32.xlu1 %v10133_v0, %s7978_s10 }
 0x237   : >> { %1746 = vrot.lane.b32.xlu2 %v10129_v48, %s7978_s10 }
 0x23b   : >> { %v10187_v29 = vpop.permute.xlu1 %1544 }
 0x23c   : >> { %1742 = vrot.lane.b32.xlu0 %v10148_v47, %s7978_s10 }
 0x23e   : >> { %1750 = vrot.lane.b32.xlu1 %v10156_v2, %s7978_s10 }
 0x23f   : >> { %1752 = vrot.lane.b32.xlu2 %v10152_v9, %s7978_s10  ;;  %v10164_v6 = vpop.permute.xlu2 %1558 }
 0x244   : >> { %1748 = vrot.lane.b32.xlu0 %v10171_v42, %s7978_s10 }
 0x246   : >> { %1756 = vrot.lane.b32.xlu1 %v10179_v27, %s7978_s10 }
 0x247   : >> { %1758 = vrot.lane.b32.xlu2 %v10175_v34, %s7978_s10  ;;  %v1543_v63 = vpop.permute.xlu0 %1542 }
 0x248   : >> { %v1590_v1 = vsub.f32 %v1543_v63, %v9867_v14  ;;  %v1574_v31 = vadd.f32 %v1543_v63, %v9867_v14 }
 0x249   : >> { %v10189_v54 = vpop.permute.xlu2 %1564 }
 0x24b   : >> { %v10211_v33 = vpop.permute.xlu1 %1550 }
 0x24c   : >> { %1754 = vrot.lane.b32.xlu0 %v10195_v22, %s7978_s10 }
 0x24e   : >> { %1762 = vrot.lane.b32.xlu1 %v10203_v49, %s7978_s10 }
 0x24f   : >> { %1764 = vrot.lane.b32.xlu2 %v10199_v4, %s7978_s10 }
 0x251   : >> { %v10213_v32 = vpop.permute.xlu2 %1570  ;;  %v1549_v19 = vpop.permute.xlu0 %1548 }
 0x252   : >> { %16816 = vst [vmem:[#allocation91_spill] sm:$0xff] %v10213_v32 }
 0x254   : >> { %1760 = vrot.lane.b32.xlu0 %v10217_v56, %s7978_s10 }
 0x256   : >> { %1896 = vrot.lane.b32.xlu1 %v10125_v3, %s7979_s15  ;;  %v10225_v16 = vpop.permute.xlu1 %1556 }
 0x257   : >> { %1898 = vrot.lane.b32.xlu2 %v10110_v50, %s7979_s15  ;;  %16818 = vst [vmem:[#allocation63_spill] sm:$0xff] %v10225_v16 }
 0x259   : >> { %v10227_v10 = vpop.permute.xlu2 %1640 }
 0x25b   : >> { %v1555_v55 = vpop.permute.xlu0 %1554 }
 0x25c   : >> { %1894 = vrot.lane.b32.xlu0 %v10093_v13, %s7979_s15 }
 0x25e   : >> { %1902 = vrot.lane.b32.xlu1 %v10148_v47, %s7979_s15 }
 0x25f   : >> { %1904 = vrot.lane.b32.xlu2 %v10133_v0, %s7979_s15 }
 0x260   : >> { %v10235_v38 = vpop.permute.xlu1 %1562 }
 0x261   : >> { %16819 = vst [vmem:[#allocation100_spill] sm:$0xff] %v10235_v38  ;;  %v10237_v5 = vpop.permute.xlu2 %1646 }
 0x264   : >> { %1900 = vrot.lane.b32.xlu0 %v10106_v30, %s7979_s15 }
 0x266   : >> { %1908 = vrot.lane.b32.xlu1 %v10171_v42, %s7979_s15  ;;  %v10245_v12 = vpop.permute.xlu0 %1560  ;;  %v1606_v42 = vmax.f32 %v1590_v1, 0.0 }
 0x267   : >> { %1910 = vrot.lane.b32.xlu2 %v10156_v2, %s7979_s15 }
 0x268   : >> { %v10247_v60 = vpop.permute.xlu1 %1568 }
 0x269   : >> { %16820 = vst [vmem:[#allocation101_spill] sm:$0xff] %v10247_v60  ;;  %v10249_v59 = vpop.permute.xlu2 %1652 }
 0x26a   : >> { %16821 = vst [vmem:[#allocation105_spill] sm:$0xff] %v10249_v59 }
 0x26c   : >> { %1906 = vrot.lane.b32.xlu0 %v10129_v48, %s7979_s15 }
 0x26e   : >> { %1914 = vrot.lane.b32.xlu1 %v10195_v22, %s7979_s15  ;;  %v10258_v36 = vpop.permute.xlu0 %1566 }
 0x26f   : >> { %1916 = vrot.lane.b32.xlu2 %v10179_v27, %s7979_s15  ;;  %v1593_v27 = vsub.f32 %v1549_v19, %v9934_v17 }
 0x270   : >> { %v10261_v32 = vpop.permute.xlu1 %1638 }
 0x271   : >> { %16822 = vst [vmem:[#allocation70_spill] sm:$0xff] %v10261_v32  ;;  %v10263_v60 = vpop.permute.xlu2 %1658  ;;  %v1686_v40 = vsub.f32 %v10261_v32, %v1543_v63  ;;  %v1670_v38 = vadd.f32 %v10261_v32, %v1574_v31  ;;  %v1577_v63 = vadd.f32 %v1549_v19, %v9934_v17  ;;  %v1609_v31 = vmax.f32 %v1593_v27, 0.0 }
 0x272   : >> { %16823 = vst [vmem:[#allocation84_spill] sm:$0xff] %v10263_v60 }
 0x273   : >> { %v1702_v57 = vmax.f32 %v1686_v40, 0.0 }
 0x274   : >> { %1912 = vrot.lane.b32.xlu0 %v10152_v9, %s7979_s15 }
 0x275   : >> { %v1718_v22 = vadd.f32 %v1702_v57, %v1606_v42 }
 0x276   : >> { %1992 = vrot.lane.b32.xlu1 %v9752_v8, %s7979_s15  ;;  %v10274_v62 = vpop.permute.xlu0 %1572  ;;  %v1596_v8 = vsub.f32 %v1555_v55, %v9997_v46 }
 0x277   : >> { %1994 = vrot.lane.b32.xlu2 %v9743_v11, %s7979_s15 }
 0x278   : >> { %v10277_v60 = vpop.permute.xlu1 %1644 }
 0x279   : >> { %16824 = vst [vmem:[#allocation102_spill] sm:$0xff] %v10277_v60  ;;  %v10279_v1 = vpop.permute.xlu2 %1664  ;;  %v1689_v40 = vsub.f32 %v10277_v60, %v1549_v19  ;;  %v1673_v57 = vadd.f32 %v10277_v60, %v1577_v63  ;;  %v1580_v19 = vadd.f32 %v1555_v55, %v9997_v46 }
 0x27a   : >> { %16825 = vst [vmem:[#allocation71_spill] sm:$0xff] %v10279_v1 }
 0x27b   : >> { %v1705_v42 = vmax.f32 %v1689_v40, 0.0 }
 0x27c   : >> { %1990 = vrot.lane.b32.xlu0 %v9557_v28, %s7979_s15  ;;  %v1612_v28 = vmax.f32 %v1596_v8, 0.0 }
 0x27d   : >> { %v1721_v11 = vadd.f32 %v1705_v42, %v1609_v31 }
 0x27e   : >> { %1998 = vrot.lane.b32.xlu1 %v9846_v15, %s7979_s15  ;;  %v10290_v59 = vpop.permute.xlu0 %1642 }
 0x27f   : >> { %2000 = vrot.lane.b32.xlu2 %v9816_v39, %s7979_s15  ;;  %16826 = vst [vmem:[#allocation107_spill] sm:$0xff] %v10290_v59 }
 0x280   : >> { %v10293_v1 = vpop.permute.xlu1 %1650 }
 0x281   : >> { %16827 = vst [vmem:[#allocation108_spill] sm:$0xff] %v10293_v1  ;;  %v1735_v27 = vpop.permute.xlu2 %1734  ;;  %v1692_v63 = vsub.f32 %v10293_v1, %v1555_v55  ;;  %v1676_v39 = vadd.f32 %v10293_v1, %v1580_v19  ;;  %v1599_v55 = vsub.f32 %v10245_v12, %v10033_v23 }
 0x282   : >> { %v10296_v40 = vadd.f32 %v1735_v27, %v1670_v38  ;;  %v1782_v31 = vsub.f32 %v1735_v27, %v10261_v32  ;;  %v1846_v42 = vsub.f32 %v10093_v13, %v1735_v27 }
 0x283   : >> { %v1708_v15 = vmax.f32 %v1692_v63, 0.0 }
 0x284   : >> { %v1798_v16 = vmax.f32 %v1782_v31, 0.0  ;;  %v1862_v47 = vmax.f32 %v1846_v42, 0.0  ;;  %1996 = vrot.lane.b32.xlu0 %v9596_v51, %s7979_s15 }
 0x285   : >> { %v1724_v46 = vadd.f32 %v1708_v15, %v1612_v28 }
 0x286   : >> { %v1814_v2 = vadd.f32 %v1798_v16, %v1718_v22  ;;  %2004 = vrot.lane.b32.xlu1 %v9918_v21, %s7979_s15  ;;  %v10311_v8 = vpop.permute.xlu0 %1648  ;;  %v1583_v16 = vadd.f32 %v10245_v12, %v10033_v23 }
 0x287   : >> { %1918 = vrot.lane.b32.xlu2 %v10175_v34, %s7979_s15  ;;  %16828 = vst [vmem:[#allocation82_spill] sm:$0xff] %v10311_v8 }
 0x288   : >> { %v10309_v38 = vadd.f32 %v1862_v47, %v1814_v2  ;;  %v10315_v22 = vpop.permute.xlu1 %1656  ;;  %v1615_v47 = vmax.f32 %v1599_v55, 0.0 }
 0x289   : >> { %16829 = vst [vmem:[#allocation69_spill] sm:$0xff] %v10315_v22  ;;  %v1741_v19 = vpop.permute.xlu2 %1740  ;;  %v1695_v28 = vsub.f32 %v10315_v22, %v10245_v12  ;;  %v1679_v2 = vadd.f32 %v10315_v22, %v1583_v16  ;;  %v1602_v12 = vsub.f32 %v10258_v36, %v10051_v58 }
 0x28a   : >> { %v10319_v15 = vadd.f32 %v1741_v19, %v1673_v57  ;;  %v1785_v27 = vsub.f32 %v1741_v19, %v10277_v60  ;;  %v1849_v63 = vsub.f32 %v10106_v30, %v1741_v19 }
 0x28b   : >> { %v1711_v31 = vmax.f32 %v1695_v28, 0.0 }
 0x28c   : >> { %v1801_v42 = vmax.f32 %v1785_v27, 0.0  ;;  %v1865_v21 = vmax.f32 %v1849_v63, 0.0  ;;  %2002 = vrot.lane.b32.xlu0 %v9696_v41, %s7979_s15 }
 0x28d   : >> { %v1727_v32 = vadd.f32 %v1711_v31, %v1615_v47 }
 0x28e   : >> { %v1817_v51 = vadd.f32 %v1801_v42, %v1721_v11  ;;  %1922 = vrot.lane.b32.xlu1 %v10203_v49, %s7979_s15  ;;  %v10334_v55 = vpop.permute.xlu0 %1654  ;;  %v1586_v11 = vadd.f32 %v10258_v36, %v10051_v58 }
 0x28f   : >> { %1924 = vrot.lane.b32.xlu2 %v10199_v4, %s7979_s15  ;;  %16831 = vst [vmem:[#allocation80_spill] sm:$0xff] %v10334_v55 }
 0x290   : >> { %v10332_v57 = vadd.f32 %v1865_v21, %v1817_v51  ;;  %v10338_v16 = vpop.permute.xlu1 %1662  ;;  %v1618_v21 = vmax.f32 %v1602_v12, 0.0 }
 0x291   : >> { %16832 = vst [vmem:[#allocation119_spill] sm:$0xff] %v10338_v16  ;;  %v1747_v19 = vpop.permute.xlu2 %1746  ;;  %v1698_v28 = vsub.f32 %v10338_v16, %v10258_v36  ;;  %v1682_v51 = vadd.f32 %v10338_v16, %v1586_v11 }
 0x292   : >> { %16830 = vst [vmem:[#allocation61_spill] sm:$0xff] %v10332_v57  ;;  %v10342_v27 = vadd.f32 %v1747_v19, %v1676_v39  ;;  %v1788_v63 = vsub.f32 %v1747_v19, %v10293_v1  ;;  %v1852_v47 = vsub.f32 %v10129_v48, %v1747_v19  ;;  %v1605_v39 = vsub.f32 %v10274_v62, %v10063_v43 }
 0x293   : >> { %v1714_v31 = vmax.f32 %v1698_v28, 0.0 }
 0x294   : >> { %16833 = vst [vmem:[#allocation85_spill] sm:$0xff] %v10342_v27  ;;  %v1804_v42 = vmax.f32 %v1788_v63, 0.0  ;;  %v1868_v60 = vmax.f32 %v1852_v47, 0.0  ;;  %1920 = vrot.lane.b32.xlu0 %v10217_v56, %s7979_s15 }
 0x295   : >> { %v1730_v57 = vadd.f32 %v1714_v31, %v1618_v21 }
 0x296   : >> { %v1820_v41 = vadd.f32 %v1804_v42, %v1724_v46  ;;  %2008 = vrot.lane.b32.xlu1 %v9980_v18, %s7979_s15  ;;  %v10357_v12 = vpop.permute.xlu0 %1660  ;;  %v1589_v46 = vadd.f32 %v10274_v62, %v10063_v43 }
 0x297   : >> { %2010 = vrot.lane.b32.xlu2 %v9988_v52, %s7979_s15  ;;  %16835 = vst [vmem:[#allocation121_spill] sm:$0xff] %v10357_v12  ;;  %v1688_v52 = vsub.f32 %v10290_v59, %v10118_v37 }
 0x298   : >> { %v10355_v36 = vadd.f32 %v1868_v60, %v1820_v41  ;;  %v10361_v19 = vpop.permute.xlu1 %1668  ;;  %v1621_v41 = vmax.f32 %v1605_v39, 0.0  ;;  %v1595_v39 = vsub.f32 %v10141_v53, %v9889_v7 }
 0x299   : >> { %v1753_v11 = vpop.permute.xlu2 %1752  ;;  %16836 = vst [vmem:[#allocation62_spill] sm:$0xff] %v10361_v19  ;;  %v1701_v21 = vsub.f32 %v10361_v19, %v10274_v62  ;;  %v10370_v60 = vadd.f32 %v10361_v19, %v1589_v46  ;;  %v1592_v62 = vsub.f32 %v10118_v37, %v9801_v44 }
 0x29a   : >> { %16834 = vst [vmem:[#allocation57_spill] sm:$0xff] %v10355_v36  ;;  %v10363_v28 = vadd.f32 %v1753_v11, %v1679_v2  ;;  %v1791_v63 = vsub.f32 %v1753_v11, %v10315_v22  ;;  %v1855_v47 = vsub.f32 %v10152_v9, %v1753_v11  ;;  %v1576_v2 = vadd.f32 %v10118_v37, %v9801_v44 }
 0x29b   : >> { %v1717_v42 = vmax.f32 %v1701_v21, 0.0  ;;  %v1598_v37 = vsub.f32 %v10164_v6, %v9954_v35  ;;  %v1591_v21 = vsub.f32 %v10187_v29, %v9792_v24  ;;  %v1611_v9 = vmax.f32 %v1595_v39, 0.0 }
 0x29c   : >> { %16837 = vst [vmem:[#allocation117_spill] sm:$0xff] %v10363_v28  ;;  %v1807_v31 = vmax.f32 %v1791_v63, 0.0  ;;  %v1871_v1 = vmax.f32 %v1855_v47, 0.0  ;;  %2006 = vrot.lane.b32.xlu0 %v9894_v26, %s7979_s15  ;;  %v1672_v63 = vadd.f32 %v10290_v59, %v1576_v2  ;;  %v1608_v2 = vmax.f32 %v1592_v62, 0.0 }
 0x29d   : >> { %v10378_v11 = vadd.f32 %v1717_v42, %v1621_v41  ;;  %v1704_v41 = vmax.f32 %v1688_v52, 0.0  ;;  %v1607_v36 = vmax.f32 %v1591_v21, 0.0 }
 0x29e   : >> { %v1823_v18 = vadd.f32 %v1807_v31, %v1727_v32  ;;  %2086 = vrot.lane.b32.xlu1 %v9867_v14, %s7979_s15  ;;  %v1687_v32 = vsub.f32 %v10227_v10, %v10187_v29  ;;  %v10393_v47 = vpop.permute.xlu0 %1666  ;;  %v1579_v14 = vadd.f32 %v10141_v53, %v9889_v7 }
 0x29f   : >> { %2088 = vrot.lane.b32.xlu2 %v9792_v24, %s7979_s15  ;;  %16839 = vst [vmem:[#allocation112_spill] sm:$0xff] %v10393_v47  ;;  %v1720_v62 = vadd.f32 %v1704_v41, %v1608_v2 }
 0x2a0   : >> { %v10390_v46 = vadd.f32 %v1871_v1, %v1823_v18  ;;  %v1739_v42 = vpop.permute.xlu1 %1738  ;;  %v1703_v52 = vmax.f32 %v1687_v32, 0.0 }
 0x2a1   : >> { %v1759_v31 = vpop.permute.xlu2 %1758  ;;  %v10403_v1 = vadd.f32 %v1739_v42, %v1672_v63  ;;  %v1848_v28 = vsub.f32 %v10110_v50, %v1739_v42  ;;  %v1575_v63 = vadd.f32 %v10187_v29, %v9792_v24 }
 0x2a2   : >> { %16838 = vst [vmem:[#allocation66_spill] sm:$0xff] %v10390_v46  ;;  %v10399_v26 = vadd.f32 %v1759_v31, %v1682_v51  ;;  %v1794_v22 = vsub.f32 %v1759_v31, %v10338_v16  ;;  %v1858_v18 = vsub.f32 %v10175_v34, %v1759_v31  ;;  %v1784_v46 = vsub.f32 %v1739_v42, %v10290_v59 }
 0x2a3   : >> { %v1691_v51 = vsub.f32 %v10311_v8, %v10141_v53  ;;  %v1582_v16 = vadd.f32 %v10164_v6, %v9954_v35  ;;  %v10415_v34 = vmax.f32 %v1598_v37, 0.0  ;;  %v1594_v53 = vsub.f32 %v10211_v33, %v9883_v25 }
 0x2a4   : >> { %16840 = vst [vmem:[#allocation115_spill] sm:$0xff] %v10399_v26  ;;  %v1810_v26 = vmax.f32 %v1794_v22, 0.0  ;;  %v1800_v31 = vmax.f32 %v1784_v46, 0.0  ;;  %v1874_v27 = vmax.f32 %v1858_v18, 0.0  ;;  %2012 = vrot.lane.b32.xlu0 %v9961_v45, %s7979_s15  ;;  %v1864_v39 = vmax.f32 %v1848_v28, 0.0 }
 0x2a5   : >> { %v1671_v29 = vadd.f32 %v10227_v10, %v1575_v63  ;;  %v1707_v32 = vmax.f32 %v1691_v51, 0.0  ;;  %v1610_v45 = vmax.f32 %v1594_v53, 0.0 }
 0x2a6   : >> { %v1826_v59 = vadd.f32 %v1810_v26, %v1730_v57  ;;  %v1816_v22 = vadd.f32 %v1800_v31, %v1720_v62  ;;  %2092 = vrot.lane.b32.xlu1 %v9934_v17, %s7979_s15  ;;  %v1675_v26 = vadd.f32 %v10311_v8, %v1579_v14  ;;  %v1719_v57 = vadd.f32 %v1703_v52, %v1607_v36  ;;  %v1737_v37 = vpop.permute.xlu0 %1736 }
 0x2a7   : >> { %2094 = vrot.lane.b32.xlu2 %v9883_v25, %s7979_s15  ;;  %v10431_v28 = vadd.f32 %v1737_v37, %v1671_v29  ;;  %v1783_v18 = vsub.f32 %v1737_v37, %v10227_v10  ;;  %v1847_v2 = vsub.f32 %v10125_v3, %v1737_v37  ;;  %v1578_v31 = vadd.f32 %v10211_v33, %v9883_v25 }
 0x2a8   : >> { %v10426_v46 = vadd.f32 %v1874_v27, %v1826_v59  ;;  %v10429_v21 = vadd.f32 %v1864_v39, %v1816_v22  ;;  %v1745_v41 = vpop.permute.xlu1 %1744  ;;  %v1690_v27 = vsub.f32 %v10237_v5, %v10211_v33  ;;  %v1694_v22 = vsub.f32 %v10334_v55, %v10164_v6 }
 0x2a9   : >> { %v1765_v42 = vpop.permute.xlu2 %1764  ;;  %v10435_v62 = vadd.f32 %v1745_v41, %v1675_v26  ;;  %v1787_v51 = vsub.f32 %v1745_v41, %v10311_v8  ;;  %v1851_v59 = vsub.f32 %v10133_v0, %v1745_v41  ;;  %v1799_v63 = vmax.f32 %v1783_v18, 0.0 }
 0x2aa   : >> { %16841 = vst [vmem:[#allocation65_spill] sm:$0xff] %v10426_v46  ;;  %v10440_v14 = vadd.f32 %v1765_v42, %v10370_v60  ;;  %v1797_v36 = vsub.f32 %v1765_v42, %v10361_v19  ;;  %v1861_v52 = vsub.f32 %v10199_v4, %v1765_v42  ;;  %v1723_v39 = vadd.f32 %v1707_v32, %v1611_v9  ;;  %v16842_v32 = vld [vmem:[#allocation118_spill] sm:$0xff] }
 0x2ab   : >> { %v1803_v29 = vmax.f32 %v1787_v51, 0.0  ;;  %v1601_v60 = vsub.f32 %v10189_v54, %v10005_v61  ;;  %v1815_v37 = vadd.f32 %v1799_v63, %v1719_v57  ;;  %v1863_v41 = vmax.f32 %v1847_v2, 0.0 }
 0x2ac   : >> { %v1813_v26 = vmax.f32 %v1797_v36, 0.0  ;;  %v1867_v19 = vmax.f32 %v1851_v59, 0.0  ;;  %2090 = vrot.lane.b32.xlu0 %v9801_v44, %s7979_s15  ;;  %v1674_v42 = vadd.f32 %v10237_v5, %v1578_v31  ;;  %v1706_v33 = vmax.f32 %v1690_v27, 0.0  ;;  %v16844_v31 = vld [vmem:[#allocation64_spill] sm:$0xff] }
 0x2ad   : >> { %v1819_v46 = vadd.f32 %v1803_v29, %v1723_v39  ;;  %v1877_v6 = vmax.f32 %v1861_v52, 0.0  ;;  %v10456_v9 = vadd.f32 %v1863_v41, %v1815_v37  ;;  %v1710_v53 = vmax.f32 %v1694_v22, 0.0  ;;  %v16848_v29 = vld [vmem:[#allocation63_spill] sm:$0xff] }
 0x2ae   : >> { %v1829_v18 = vadd.f32 %v1813_v26, %v10378_v11  ;;  %2098 = vrot.lane.b32.xlu1 %v16842_v32, %s7979_s15  ;;  %v1678_v2 = vadd.f32 %v10334_v55, %v1582_v16  ;;  %v1832_v51 = vadd.f32 %v10403_v1, %v10110_v50  ;;  %v1743_v59 = vpop.permute.xlu0 %1742  ;;  %v16846_v16 = vld [vmem:[#allocation60_spill] sm:$0xff]  ;;  %v16849_v26 = vld [vmem:[#allocation105_spill] sm:$0xff] }
 0x2af   : >> { %2100 = vrot.lane.b32.xlu2 %v9948_v20, %s7979_s15  ;;  %v10462_v57 = vadd.f32 %v1867_v19, %v1819_v46  ;;  %v10471_v52 = vadd.f32 %v1743_v59, %v1674_v42  ;;  %v1786_v63 = vsub.f32 %v1743_v59, %v10237_v5  ;;  %v1850_v39 = vsub.f32 %v16844_v31, %v1743_v59 }
 0x2b0   : >> { %v10467_v27 = vadd.f32 %v1877_v6, %v1829_v18  ;;  %v1751_v11 = vpop.permute.xlu1 %1750  ;;  %v1693_v37 = vsub.f32 %v16849_v26, %v16848_v29  ;;  %v1722_v42 = vadd.f32 %v1706_v33, %v1610_v45  ;;  %v1581_v6 = vadd.f32 %v16848_v29, %v9948_v20 }
 0x2b1   : >> { %v10469_v36 = vpop.permute.xlu2 %1898  ;;  %v10475_v22 = vadd.f32 %v1751_v11, %v1678_v2  ;;  %v1790_v19 = vsub.f32 %v1751_v11, %v10334_v55  ;;  %v1854_v46 = vsub.f32 %v16846_v16, %v1751_v11  ;;  %v1802_v18 = vmax.f32 %v1786_v63, 0.0 }
 0x2b2   : >> { %16843 = vst [vmem:[#allocation127_spill] sm:$0xff] %v10467_v27  ;;  %v10480_v1 = vadd.f32 %v10469_v36, %v1832_v51  ;;  %v1944_v41 = vsub.f32 %v10469_v36, %v10110_v50  ;;  %v1697_v2 = vsub.f32 %v10357_v12, %v10189_v54  ;;  %v1726_v59 = vadd.f32 %v1710_v53, %v10415_v34  ;;  %v16850_v53 = vld [vmem:[#allocation120_spill] sm:$0xff] }
 0x2b3   : >> { %16845 = vst [vmem:[#allocation124_spill] sm:$0xff] %v10475_v22  ;;  %v1806_v11 = vmax.f32 %v1790_v19, 0.0  ;;  %v1597_v51 = vsub.f32 %v16848_v29, %v9948_v20  ;;  %v1866_v44 = vmax.f32 %v1850_v39, 0.0  ;;  %v1585_v22 = vadd.f32 %v10189_v54, %v10005_v61  ;;  %v16851_v39 = vld [vmem:[#allocation125_spill] sm:$0xff] }
 0x2b4   : >> { %16847 = vst [vmem:[#allocation104_spill] sm:$0xff] %v10480_v1  ;;  %v1960_v27 = vmax.f32 %v1944_v41, 0.0  ;;  %v1818_v1 = vadd.f32 %v1802_v18, %v1722_v42  ;;  %v1617_v45 = vmax.f32 %v1601_v60, 0.0  ;;  %v1870_v63 = vmax.f32 %v1854_v46, 0.0  ;;  %2096 = vrot.lane.b32.xlu0 %v9889_v7, %s7979_s15  ;;  %v16853_v42 = vld [vmem:[#allocation73_spill] sm:$0xff] }
 0x2b5   : >> { %v1822_v33 = vadd.f32 %v1806_v11, %v1726_v59  ;;  %v1709_v55 = vmax.f32 %v1693_v37, 0.0  ;;  %v1677_v54 = vadd.f32 %v16849_v26, %v1581_v6  ;;  %v1713_v60 = vmax.f32 %v1697_v2, 0.0  ;;  %v16855_v59 = vld [vmem:[#allocation131_spill] sm:$0xff] }
 0x2b6   : >> { %v10498_v8 = vadd.f32 %v1960_v27, %v10429_v21  ;;  %v10500_v34 = vadd.f32 %v1866_v44, %v1818_v1  ;;  %2016 = vrot.lane.b32.xlu1 %v16851_v39, %s7979_s15  ;;  %v1681_v46 = vadd.f32 %v10357_v12, %v1585_v22  ;;  %v1835_v29 = vadd.f32 %v10435_v62, %v10133_v0  ;;  %v1749_v21 = vpop.permute.xlu0 %1748  ;;  %v16857_v62 = vld [vmem:[#allocation100_spill] sm:$0xff] }
 0x2b7   : >> { %2018 = vrot.lane.b32.xlu2 %v16850_v53, %s7979_s15  ;;  %v10507_v19 = vadd.f32 %v1870_v63, %v1822_v33  ;;  %v1613_v27 = vmax.f32 %v1597_v51, 0.0  ;;  %v10514_v37 = vadd.f32 %v1749_v21, %v1677_v54  ;;  %v1789_v41 = vsub.f32 %v1749_v21, %v16849_v26  ;;  %v16858_v51 = vld [vmem:[#allocation84_spill] sm:$0xff]  ;;  %v16859_v53 = vld [vmem:[#allocation111_spill] sm:$0xff] }
 0x2b8   : >> { %v1757_v44 = vpop.permute.xlu1 %1756  ;;  %v1853_v18 = vsub.f32 %v16853_v42, %v1749_v21  ;;  %v1696_v33 = vsub.f32 %v16858_v51, %v16857_v62  ;;  %v1584_v21 = vadd.f32 %v16857_v62, %v16859_v53 }
 0x2b9   : >> { %16852 = vst [vmem:[#allocation77_spill] sm:$0xff] %v10507_v19  ;;  %v10512_v1 = vpop.permute.xlu2 %1904  ;;  %v10518_v6 = vadd.f32 %v1757_v44, %v1681_v46  ;;  %v1793_v2 = vsub.f32 %v1757_v44, %v10357_v12  ;;  %v1857_v22 = vsub.f32 %v16855_v59, %v1757_v44  ;;  %v1725_v54 = vadd.f32 %v1709_v55, %v1613_v27  ;;  %v16860_v46 = vld [vmem:[#allocation91_spill] sm:$0xff] }
 0x2ba   : >> { %v10523_v11 = vadd.f32 %v10512_v1, %v1835_v29  ;;  %v1947_v63 = vsub.f32 %v10512_v1, %v10133_v0  ;;  %v1805_v39 = vmax.f32 %v1789_v41, 0.0  ;;  %v1700_v19 = vsub.f32 %v10393_v47, %v16860_v46  ;;  %v16861_v59 = vld [vmem:[#allocation103_spill] sm:$0xff] }
 0x2bb   : >> { %16854 = vst [vmem:[#allocation88_spill] sm:$0xff] %v10518_v6  ;;  %v1729_v6 = vadd.f32 %v1713_v60, %v1617_v45  ;;  %v1809_v7 = vmax.f32 %v1793_v2, 0.0  ;;  %v1600_v29 = vsub.f32 %v16857_v62, %v16859_v53  ;;  %v1869_v12 = vmax.f32 %v1853_v18, 0.0  ;;  %v16862_v0 = vld [vmem:[#allocation59_spill] sm:$0xff] }
 0x2bc   : >> { %16856 = vst [vmem:[#allocation68_spill] sm:$0xff] %v10523_v11  ;;  %v1963_v44 = vmax.f32 %v1947_v63, 0.0  ;;  %v1821_v11 = vadd.f32 %v1805_v39, %v1725_v54  ;;  %v1588_v16 = vadd.f32 %v16860_v46, %v16861_v59  ;;  %v1604_v55 = vsub.f32 %v16860_v46, %v16861_v59  ;;  %2014 = vrot.lane.b32.xlu0 %v16862_v0, %s7979_s15 }
 0x2bd   : >> { %v1825_v27 = vadd.f32 %v1809_v7, %v1729_v6  ;;  %v1873_v41 = vmax.f32 %v1857_v22, 0.0  ;;  %v1712_v50 = vmax.f32 %v1696_v33, 0.0  ;;  %v1680_v39 = vadd.f32 %v16858_v51, %v1584_v21  ;;  %v16865_v33 = vld [vmem:[#allocation67_spill] sm:$0xff]  ;;  %v16866_v21 = vld [vmem:[#allocation101_spill] sm:$0xff] }
 0x2be   : >> { %v10542_v45 = vadd.f32 %v1963_v44, %v10462_v57  ;;  %v10544_v60 = vadd.f32 %v1869_v12, %v1821_v11  ;;  %2102 = vrot.lane.b32.xlu1 %v9954_v35, %s7979_s15  ;;  %v1716_v18 = vmax.f32 %v1700_v19, 0.0  ;;  %v1684_v6 = vadd.f32 %v10393_v47, %v1588_v16  ;;  %v1755_v2 = vpop.permute.xlu0 %1754  ;;  %v16867_v44 = vld [vmem:[#allocation71_spill] sm:$0xff] }
 0x2bf   : >> { %2104 = vrot.lane.b32.xlu2 %v10033_v23, %s7979_s15  ;;  %v10551_v7 = vadd.f32 %v1873_v41, %v1825_v27  ;;  %v1616_v22 = vmax.f32 %v1600_v29, 0.0  ;;  %v10556_v12 = vadd.f32 %v1755_v2, %v1680_v39  ;;  %v1792_v11 = vsub.f32 %v1755_v2, %v16858_v51  ;;  %v16868_v39 = vld [vmem:[#allocation98_spill] sm:$0xff] }
 0x2c0   : >> { %v1763_v57 = vpop.permute.xlu1 %1762  ;;  %v1856_v63 = vsub.f32 %v16865_v33, %v1755_v2  ;;  %v1620_v54 = vmax.f32 %v1604_v55, 0.0  ;;  %v1699_v27 = vsub.f32 %v16867_v44, %v16866_v21  ;;  %v1587_v23 = vadd.f32 %v16866_v21, %v16868_v39 }
 0x2c1   : >> { %16863 = vst [vmem:[#allocation86_spill] sm:$0xff] %v10551_v7  ;;  %v10554_v62 = vpop.permute.xlu2 %1910  ;;  %v10560_v46 = vadd.f32 %v1763_v57, %v1684_v6  ;;  %v1796_v19 = vsub.f32 %v1763_v57, %v10393_v47  ;;  %v1860_v16 = vsub.f32 %v10203_v49, %v1763_v57  ;;  %v1728_v29 = vadd.f32 %v1712_v50, %v1616_v22  ;;  %v16869_v47 = vld [vmem:[#allocation96_spill] sm:$0xff] }
 0x2c2   : >> { %16864 = vst [vmem:[#allocation95_spill] sm:$0xff] %v10554_v62  ;;  %v1808_v41 = vmax.f32 %v1792_v11, 0.0  ;;  %v1732_v0 = vadd.f32 %v1716_v18, %v1620_v54  ;;  %v1603_v2 = vsub.f32 %v16866_v21, %v16868_v39  ;;  %v1872_v6 = vmax.f32 %v1856_v63, 0.0 }
 0x2c3   : >> { %v1812_v35 = vmax.f32 %v1796_v19, 0.0  ;;  %v1876_v62 = vmax.f32 %v1860_v16, 0.0  ;;  %v1715_v51 = vmax.f32 %v1699_v27, 0.0  ;;  %v1683_v50 = vadd.f32 %v16867_v44, %v1587_v23 }
 0x2c4   : >> { %v1824_v55 = vadd.f32 %v1808_v41, %v1728_v29  ;;  %2020 = vrot.lane.b32.xlu0 %v16869_v47, %s7979_s15  ;;  %v1619_v22 = vmax.f32 %v1603_v2, 0.0  ;;  %v1834_v2 = vadd.f32 %v10471_v52, %v16844_v31 }
 0x2c5   : >> { %v1828_v7 = vadd.f32 %v1812_v35, %v1732_v0  ;;  %v1831_v35 = vadd.f32 %v10431_v28, %v10125_v3 }
 0x2c6   : >> { %v10572_v20 = vadd.f32 %v1872_v6, %v1824_v55  ;;  %2108 = vrot.lane.b32.xlu1 %v10005_v61, %s7979_s15  ;;  %v1761_v0 = vpop.permute.xlu0 %1760 }
 0x2c7   : >> { %2110 = vrot.lane.b32.xlu2 %v10051_v58, %s7979_s15  ;;  %v10579_v18 = vadd.f32 %v1876_v62, %v1828_v7  ;;  %v10587_v63 = vadd.f32 %v1761_v0, %v1683_v50  ;;  %v1795_v54 = vsub.f32 %v1761_v0, %v16867_v44  ;;  %v1859_v19 = vsub.f32 %v10217_v56, %v1761_v0  ;;  %v16879_v58 = vld [vmem:[#allocation117_spill] sm:$0xff] }
 0x2c8   : >> { %v10585_v11 = vpop.permute.xlu1 %1896  ;;  %v1731_v7 = vadd.f32 %v1715_v51, %v1619_v22  ;;  %v1830_v51 = vadd.f32 %v10296_v40, %v10093_v13  ;;  %v1840_v44 = vadd.f32 %v10556_v12, %v16865_v33 }
 0x2c9   : >> { %16870 = vst [vmem:[#allocation122_spill] sm:$0xff] %v10579_v18  ;;  %v10583_v57 = vpop.permute.xlu2 %1916  ;;  %v10592_v21 = vadd.f32 %v10585_v11, %v1831_v35  ;;  %v1943_v23 = vsub.f32 %v10585_v11, %v10125_v3  ;;  %v1811_v28 = vmax.f32 %v1795_v54, 0.0  ;;  %v1875_v16 = vmax.f32 %v1859_v19, 0.0 }
 0x2cb   : >> { %v1959_v62 = vmax.f32 %v1943_v23, 0.0  ;;  %v1827_v27 = vadd.f32 %v1811_v28, %v1731_v7  ;;  %v1833_v23 = vadd.f32 %v10319_v15, %v10106_v30  ;;  %v1837_v7 = vadd.f32 %v10514_v37, %v16853_v42 }
 0x2cc   : >> { %2106 = vrot.lane.b32.xlu0 %v16859_v53, %s7979_s15 }
 0x2cd   : >> { %v10597_v29 = vadd.f32 %v1959_v62, %v10456_v9  ;;  %v10601_v41 = vadd.f32 %v1875_v16, %v1827_v27 }
 0x2ce   : >> { %2114 = vrot.lane.b32.xlu1 %v16861_v59, %s7979_s15  ;;  %v10611_v55 = vpop.permute.xlu0 %1894 }
 0x2cf   : >> { %16871 = vst [vmem:[#allocation123_spill] sm:$0xff] %v10601_v41  ;;  %2116 = vrot.lane.b32.xlu2 %v10063_v43, %s7979_s15  ;;  %v1926_v50 = vadd.f32 %v10611_v55, %v1830_v51  ;;  %v1942_v35 = vsub.f32 %v10611_v55, %v10093_v13 }
 0x2d0   : >> { %v10615_v6 = vpop.permute.xlu1 %1902 }
 0x2d1   : >> { %v10613_v9 = vpop.permute.xlu2 %1994  ;;  %v10621_v0 = vadd.f32 %v10615_v6, %v1834_v2  ;;  %v1946_v40 = vsub.f32 %v10615_v6, %v16844_v31  ;;  %v1958_v22 = vmax.f32 %v1942_v35, 0.0 }
 0x2d2   : >> { %v2040_v62 = vsub.f32 %v10613_v9, %v10469_v36  ;;  %v16872_v36 = vld [vmem:[#allocation61_spill] sm:$0xff] }
 0x2d3   : >> { %v1962_v54 = vmax.f32 %v1946_v40, 0.0  ;;  %v1974_v52 = vadd.f32 %v1958_v22, %v10309_v38 }
 0x2d4   : >> { %2112 = vrot.lane.b32.xlu0 %v16868_v39, %s7979_s15  ;;  %v2056_v35 = vmax.f32 %v2040_v62, 0.0 }
 0x2d5   : >> { %v1978_v19 = vadd.f32 %v1962_v54, %v10500_v34  ;;  %v16873_v54 = vld [vmem:[#allocation85_spill] sm:$0xff] }
 0x2d6   : >> { %v10633_v28 = vpop.permute.xlu0 %1900 }
 0x2d7   : >> { %v10642_v38 = vadd.f32 %v10633_v28, %v1833_v23  ;;  %v1945_v34 = vsub.f32 %v10633_v28, %v10106_v30  ;;  %v1836_v23 = vadd.f32 %v16873_v54, %v10129_v48 }
 0x2d8   : >> { %v10639_v16 = vpop.permute.xlu1 %1908 }
 0x2d9   : >> { %v10637_v27 = vpop.permute.xlu2 %2000  ;;  %v10647_v15 = vadd.f32 %v10639_v16, %v1837_v7  ;;  %v1949_v37 = vsub.f32 %v10639_v16, %v16853_v42  ;;  %v1961_v51 = vmax.f32 %v1945_v34, 0.0 }
 0x2da   : >> { %v2043_v39 = vsub.f32 %v10637_v27, %v10512_v1  ;;  %v16877_v1 = vld [vmem:[#allocation57_spill] sm:$0xff] }
 0x2db   : >> { %v1965_v2 = vmax.f32 %v1949_v37, 0.0  ;;  %v10652_v40 = vadd.f32 %v1961_v51, %v16872_v36  ;;  %v10673_v51 = vadd.f32 %v2056_v35, %v10498_v8  ;;  %v1845_v8 = vadd.f32 %v10440_v14, %v10199_v4 }
 0x2dc   : >> { %v2059_v41 = vmax.f32 %v2043_v39, 0.0 }
 0x2dd   : >> { %v10655_v22 = vadd.f32 %v1965_v2, %v10544_v60  ;;  %16875 = vst [vmem:[#allocation87_spill] sm:$0xff] %v10673_v51 }
 0x2de   : >> { %v10661_v7 = vpop.permute.xlu0 %1906 }
 0x2df   : >> { %v10668_v37 = vadd.f32 %v10661_v7, %v1836_v23  ;;  %v1948_v60 = vsub.f32 %v10661_v7, %v10129_v48  ;;  %v16878_v23 = vld [vmem:[#allocation114_spill] sm:$0xff] }
 0x2e0   : >> { %v1915_v62 = vpop.permute.xlu1 %1914  ;;  %v1839_v61 = vadd.f32 %v16879_v58, %v16878_v23 }
 0x2e1   : >> { %v10665_v34 = vpop.permute.xlu2 %1918  ;;  %v10675_v2 = vadd.f32 %v1915_v62, %v1840_v44  ;;  %v1952_v12 = vsub.f32 %v1915_v62, %v16865_v33  ;;  %v1964_v36 = vmax.f32 %v1948_v60, 0.0 }
 0x2e2   : >> { %16874 = vst [vmem:[#allocation83_spill] sm:$0xff] %v10665_v34 }
 0x2e3   : >> { %16876 = vst [vmem:[#allocation89_spill] sm:$0xff] %v10675_v2  ;;  %v1968_v54 = vmax.f32 %v1952_v12, 0.0  ;;  %v10679_v47 = vadd.f32 %v1964_v36, %v16877_v1  ;;  %v16884_v1 = vld [vmem:[#allocation66_spill] sm:$0xff] }
 0x2e4   : >> { %v16885_v2 = vld [vmem:[#allocation70_spill] sm:$0xff] }
 0x2e5   : >> { %v10682_v43 = vadd.f32 %v1968_v54, %v10572_v20  ;;  %v10698_v20 = vadd.f32 %v2059_v41, %v10542_v45  ;;  %v2246_v45 = vadd.f32 %v16885_v2, %v10093_v13 }
 0x2e6   : >> { %v10688_v35 = vpop.permute.xlu0 %1912 }
 0x2e7   : >> { %v10693_v60 = vadd.f32 %v10688_v35, %v1839_v61  ;;  %v1951_v39 = vsub.f32 %v10688_v35, %v16878_v23  ;;  %16882 = vst [vmem:[#allocation63_spill] sm:$0xff] %v10698_v20 }
 0x2e8   : >> { %v1993_v59 = vpop.permute.xlu1 %1992 }
 0x2e9   : >> { %v10690_v44 = vpop.permute.xlu2 %1924  ;;  %16881 = vst [vmem:[#allocation64_spill] sm:$0xff] %v10693_v60  ;;  %v2039_v58 = vsub.f32 %v1993_v59, %v10585_v11  ;;  %v1967_v14 = vmax.f32 %v1951_v39, 0.0  ;;  %v2023_v36 = vadd.f32 %v1993_v59, %v10592_v21  ;;  %v16886_v39 = vld [vmem:[#allocation76_spill] sm:$0xff] }
 0x2ea   : >> { %16880 = vst [vmem:[#allocation118_spill] sm:$0xff] %v10690_v44  ;;  %v10701_v12 = vadd.f32 %v10690_v44, %v1845_v8 }
 0x2eb   : >> { %v2055_v54 = vmax.f32 %v2039_v58, 0.0  ;;  %v10706_v51 = vadd.f32 %v1967_v14, %v16884_v1 }
 0x2ec   : >> { %16883 = vst [vmem:[#allocation105_spill] sm:$0xff] %v10701_v12 }
 0x2ed   : >> { %v2071_v61 = vadd.f32 %v2055_v54, %v10597_v29 }
 0x2ee   : >> { %v10709_v18 = vpop.permute.xlu0 %1990 }
 0x2ef   : >> { %v2038_v11 = vsub.f32 %v10709_v18, %v10611_v55  ;;  %v2230_v21 = vmul.f32 %v10709_v18, %v16886_v39  ;;  %v10720_v58 = vadd.f32 %v10709_v18, %v1926_v50  ;;  %v16887_v55 = vld [vmem:[#allocation102_spill] sm:$0xff] }
 0x2f0   : >> { %v1999_v8 = vpop.permute.xlu1 %1998  ;;  %v2249_v53 = vadd.f32 %v16887_v55, %v10106_v30  ;;  %v2231_v30 = vmul.f32 %v1993_v59, %v9792_v24 }
 0x2f1   : >> { %v10713_v41 = vpop.permute.xlu2 %2010  ;;  %v2042_v14 = vsub.f32 %v1999_v8, %v10615_v6  ;;  %v2054_v29 = vmax.f32 %v2038_v11, 0.0  ;;  %v10723_v54 = vmul.f32 %v2246_v45, %v2230_v21  ;;  %v2026_v1 = vadd.f32 %v1999_v8, %v10621_v0 }
 0x2f2   : >> { %v2048_v60 = vsub.f32 %v10713_v41, %v1915_v62 }
 0x2f3   : >> { %v2058_v13 = vmax.f32 %v2042_v14, 0.0  ;;  %v10726_v2 = vadd.f32 %v2054_v29, %v1974_v52 }
 0x2f5   : >> { %v2074_v12 = vadd.f32 %v2058_v13, %v1978_v19 }
 0x2f6   : >> { %v10728_v20 = vpop.permute.xlu0 %1996 }
 0x2f7   : >> { %v2041_v6 = vsub.f32 %v10728_v20, %v10633_v28  ;;  %v2233_v0 = vmul.f32 %v10728_v20, %v9934_v17  ;;  %v2247_v28 = vadd.f32 %v10227_v10, %v10125_v3  ;;  %v10751_v55 = vadd.f32 %v10728_v20, %v10642_v38  ;;  %v16889_v10 = vld [vmem:[#allocation108_spill] sm:$0xff] }
 0x2f8   : >> { %v10733_v39 = vpop.permute.xlu1 %2004  ;;  %v2252_v3 = vadd.f32 %v16889_v10, %v10129_v48 }
 0x2f9   : >> { %v2089_v50 = vpop.permute.xlu2 %2088  ;;  %v2045_v11 = vsub.f32 %v10733_v39, %v10639_v16  ;;  %v2057_v21 = vmax.f32 %v2041_v6, 0.0  ;;  %v10743_v62 = vmul.f32 %v2249_v53, %v2233_v0  ;;  %v2029_v14 = vadd.f32 %v10733_v39, %v10647_v15  ;;  %v16888_v16 = vld [vmem:[#allocation106_spill] sm:$0xff] }
 0x2fa   : >> { %v2119_v45 = vadd.f32 %v2089_v50, %v2023_v36  ;;  %v2135_v52 = vsub.f32 %v2089_v50, %v1993_v59  ;;  %v2183_v19 = vsub.f32 %v9792_v24, %v2089_v50  ;;  %v2064_v36 = vmax.f32 %v2048_v60, 0.0 }
 0x2fb   : >> { %v2061_v13 = vmax.f32 %v2045_v11, 0.0  ;;  %vm2279_vm14 = vcmp.gt.f32.partialorder %v16888_v16, 0.5  ;;  %v2263_v53 = vmul.f32 %v2247_v28, %v2231_v30  ;;  %v10758_v50 = vadd.f32 %v2057_v21, %v10652_v40  ;;  %v16952_v30 = vld [vmem:[#allocation89_spill] sm:$0xff] }
 0x2fc   : >> { %v2151_v29 = vmax.f32 %v2135_v52, 0.0  ;;  %vm2295_vm8 = vcmp.ge.f32.partialorder %v2119_v45, 2.0  ;;  %v2199_v59 = vmax.f32 %v2183_v19, 0.0  ;;  %vm2327_vm9 = vcmp.le.f32.partialorder %v2119_v45, 6.0 }
 0x2fd   : >> { %vm2311_vm15 = vmand %vm2279_vm14, %vm2295_vm8  ;;  %v10755_v15 = vadd.f32 %v2061_v13, %v10655_v22  ;;  %v10773_v40 = vadd.f32 %v2064_v36, %v10682_v43  ;;  %vm2391_vm12 = vcmp.lt.f32.partialorder %v2263_v53, 0.5  ;;  %v2234_v11 = vmul.f32 %v1999_v8, %v9883_v25 }
 0x2fe   : >> { %v2167_v24 = vadd.f32 %v2151_v29, %v2071_v61  ;;  %v10762_v6 = vpop.permute.xlu0 %2002  ;;  %v1844_v61 = vadd.f32 %v10560_v46, %v10203_v49  ;;  %vm2343_vm1 = vmand %vm2311_vm15, %vm2327_vm9  ;;  %v16894_v29 = vld [vmem:[#allocation110_spill] sm:$0xff]  ;;  %v1843_v36 = vadd.f32 %v10587_v63, %v10217_v56 }
 0x2ff   : >> { %v2044_v45 = vsub.f32 %v10762_v6, %v10661_v7  ;;  %v2236_v22 = vmul.f32 %v10762_v6, %v16842_v32  ;;  %16890 = vst [vmem:[#allocation73_spill] sm:$0xff] %v10773_v40  ;;  %vm2282_vm13 = vcmp.gt.f32.partialorder %v16894_v29, 0.5  ;;  %v16923_v40 = vld [vmem:[#allocation72_spill] sm:$0xff] }
 0x300   : >> { %v2215_v60 = vadd.f32 %v2199_v59, %v2167_v24  ;;  %v10764_v0 = vpop.permute.xlu1 %1922  ;;  %v10795_v59 = vadd.f32 %v10762_v6, %v10668_v37 }
 0x301   : >> { %v2095_v38 = vpop.permute.xlu2 %2094  ;;  %v10778_v46 = vadd.f32 %v10764_v0, %v1844_v61  ;;  %v10780_v7 = vmul.f32 %v2252_v3, %v2236_v22  ;;  %v2060_v21 = vmax.f32 %v2044_v45, 0.0  ;;  %v16900_v45 = vld [vmem:[#allocation56_spill] sm:$0xff]  ;;  %v16901_v22 = vld [vmem:[#allocation107_spill] sm:$0xff] }
 0x302   : >> { %vm2359_vm3 = vcmp.eq.f32.partialorder %v2215_v60, 1.0  ;;  %v2122_v48 = vadd.f32 %v2095_v38, %v2026_v1  ;;  %v2138_v52 = vsub.f32 %v2095_v38, %v1999_v8  ;;  %v2186_v19 = vsub.f32 %v9883_v25, %v2095_v38  ;;  %v16897_v60 = vld [vmem:[#allocation78_spill] sm:$0xff] }
 0x303   : >> { %vm2375_vm4 = vmand %vm2343_vm1, %vm2359_vm3  ;;  %16891 = vst [vmem:[#allocation100_spill] sm:$0xff] %v10778_v46  ;;  %v2250_v1 = vadd.f32 %v10237_v5, %v16844_v31  ;;  %v10798_v53 = vadd.f32 %v2060_v21, %v10679_v47  ;;  %v2253_v5 = vadd.f32 %v16849_v26, %v16853_v42  ;;  %v16895_v31 = vld [vmem:[#allocation90_spill] sm:$0xff]  ;;  %v16898_v47 = vld [vmem:[#allocation84_spill] sm:$0xff]  ;;  %v2237_v26 = vmul.f32 %v10733_v39, %v16897_v60 }
 0x304   : >> { %vm10782_vm2 = vmand %vm2375_vm4, %vm2391_vm12  ;;  %v2154_v43 = vmax.f32 %v2138_v52, 0.0  ;;  %vm2298_vm5 = vcmp.ge.f32.partialorder %v2122_v48, 2.0  ;;  %v2202_v25 = vmax.f32 %v2186_v19, 0.0  ;;  %vm2330_vm0 = vcmp.le.f32.partialorder %v2122_v48, 6.0  ;;  %v16903_v52 = vld [vmem:[#allocation95_spill] sm:$0xff]  ;;  %v16927_v46 = vld [vmem:[#allocation77_spill] sm:$0xff] }
 0x305   : >> { %v2266_v8 = vmul.f32 %v2250_v1, %v2234_v11  ;;  %vm2314_vm10 = vmand %vm2282_vm13, %vm2298_vm5  ;;  %vm2285_vm6 = vcmp.gt.f32.partialorder %v16895_v31, 0.5  ;;  %v10812_v61 = vadd.f32 %v16898_v47, %v16865_v33  ;;  %v2248_v48 = vadd.f32 %v16901_v22, %v16900_v45  ;;  %v16908_v1 = vld [vmem:[#allocation82_spill] sm:$0xff] }
 0x306   : >> { %v2170_v28 = vadd.f32 %v2154_v43, %v2074_v12  ;;  %v10791_v24 = vpop.permute.xlu0 %1920  ;;  %vm2346_vm11 = vmand %vm2314_vm10, %vm2330_vm0  ;;  %v16906_v43 = vld [vmem:[#allocation69_spill] sm:$0xff] }
 0x307   : >> { %v10806_v63 = vadd.f32 %v10791_v24, %v1843_v36  ;;  %16899 = vst [vmem:[#allocation67_spill] sm:$0xff] %v10812_v61  ;;  %vm2394_vm8 = vcmp.lt.f32.partialorder %v2266_v8, 0.5  ;;  %v10828_v21 = vadd.f32 %v16906_v43, %v16878_v23  ;;  %v16910_v36 = vld [vmem:[#allocation99_spill] sm:$0xff]  ;;  %v16914_v23 = vld [vmem:[#allocation121_spill] sm:$0xff]  ;;  %v2269_v43 = vmul.f32 %v2253_v5, %v2237_v26  ;;  %v16922_v61 = vld [vmem:[#allocation124_spill] sm:$0xff] }
 0x308   : >> { %v2218_v13 = vadd.f32 %v2202_v25, %v2170_v28  ;;  %v10803_v10 = vpop.permute.xlu1 %2008  ;;  %v1954_v5 = vsub.f32 %v10665_v34, %v16910_v36 }
 0x309   : >> { %v2101_v12 = vpop.permute.xlu2 %2100  ;;  %16896 = vst [vmem:[#allocation91_spill] sm:$0xff] %v10806_v63  ;;  %v2047_v42 = vsub.f32 %v10803_v10, %v10688_v35  ;;  %v16909_v35 = vld [vmem:[#allocation131_spill] sm:$0xff]  ;;  %vm2397_vm13 = vcmp.lt.f32.partialorder %v2269_v43, 0.5 }
 0x30a   : >> { %vm2362_vm7 = vcmp.eq.f32.partialorder %v2218_v13, 1.0  ;;  %v2125_v3 = vadd.f32 %v2101_v12, %v2029_v14  ;;  %v2141_v37 = vsub.f32 %v2101_v12, %v10733_v39  ;;  %v2189_v38 = vsub.f32 %v16897_v60, %v2101_v12  ;;  %v16902_v14 = vld [vmem:[#allocation60_spill] sm:$0xff]  ;;  %v16907_v39 = vld [vmem:[#allocation113_spill] sm:$0xff]  ;;  %v16911_v13 = vld [vmem:[#allocation119_spill] sm:$0xff] }
 0x30b   : >> { %vm2378_vm14 = vmand %vm2346_vm11, %vm2362_vm7  ;;  %v1950_v19 = vsub.f32 %v16903_v52, %v16902_v14  ;;  %v2251_v28 = vadd.f32 %v16908_v1, %v16907_v39  ;;  %v1953_v25 = vsub.f32 %v10583_v57, %v16909_v35  ;;  %v2063_v8 = vmax.f32 %v2047_v42, 0.0  ;;  %v16913_v60 = vld [vmem:[#allocation80_spill] sm:$0xff]  ;;  %v16918_v39 = vld [vmem:[#allocation109_spill] sm:$0xff] }
 0x30c   : >> { %vm10822_vm15 = vmand %vm2378_vm14, %vm2394_vm8  ;;  %v2157_v33 = vmax.f32 %v2141_v37, 0.0  ;;  %vm2301_vm9 = vcmp.ge.f32.partialorder %v2125_v3, 2.0  ;;  %v10836_v12 = vadd.f32 %v16911_v13, %v16910_v36  ;;  %v10840_v47 = vadd.f32 %v16913_v60, %v16902_v14  ;;  %v16921_v60 = vld [vmem:[#allocation112_spill] sm:$0xff]  ;;  %v16928_v42 = vld [vmem:[#allocation115_spill] sm:$0xff] }
 0x30d   : >> { %v2205_v45 = vmax.f32 %v2189_v38, 0.0  ;;  %v10845_v22 = vadd.f32 %v16914_v23, %v16909_v35  ;;  %vm10849_vm1 = vmand %vm2285_vm6, %vm2301_vm9  ;;  %vm2333_vm3 = vcmp.le.f32.partialorder %v2125_v3, 6.0  ;;  %vm2278_vm12 = vcmp.gt.f32.partialorder %v16918_v39, 0.5 }
 0x30e   : >> { %16912 = vst [vmem:[#allocation101_spill] sm:$0xff] %v10836_v12  ;;  %v2173_v37 = vadd.f32 %v2157_v33, %v10755_v15  ;;  %v10855_v1 = vadd.f32 %v2063_v8, %v10706_v51  ;;  %v16919_v15 = vld [vmem:[#allocation62_spill] sm:$0xff]  ;;  %v1966_v33 = vmax.f32 %v1950_v19, 0.0  ;;  %v10863_v13 = vpop.permute.xlu0 %2006  ;;  %v10867_v23 = vadd.f32 %v16921_v60, %v10203_v49  ;;  %vm2349_vm4 = vmand %vm10849_vm1, %vm2333_vm3  ;;  %v16926_v60 = vld [vmem:[#allocation76_spill] sm:$0xff] }
 0x30f   : >> { %16915 = vst [vmem:[#allocation61_spill] sm:$0xff] %v10845_v22  ;;  %v10859_v38 = vadd.f32 %v16919_v15, %v10199_v4  ;;  %v1838_v63 = vadd.f32 %v16922_v61, %v16902_v14  ;;  %v1969_v51 = vmax.f32 %v1953_v25, 0.0  ;;  %v1957_v8 = vsub.f32 %v10690_v44, %v10199_v4  ;;  %v16925_v14 = vld [vmem:[#allocation88_spill] sm:$0xff] }
 0x310   : >> { %v2221_v26 = vadd.f32 %v2205_v45, %v2173_v37  ;;  %v2087_v19 = vpop.permute.xlu1 %2086  ;;  %v16924_v37 = vld [vmem:[#allocation75_spill] sm:$0xff]  ;;  %v1841_v25 = vadd.f32 %v16925_v14, %v16909_v35  ;;  %v10891_v3 = vadd.f32 %v1966_v33, %v16927_v46  ;;  %v1970_v22 = vmax.f32 %v1954_v5, 0.0 }
 0x311   : >> { %16920 = vst [vmem:[#allocation85_spill] sm:$0xff] %v10859_v38  ;;  %v10873_v15 = vpop.permute.xlu2 %2018  ;;  %v2232_v38 = vmul.f32 %v10613_v9, %v16923_v40  ;;  %v2235_v45 = vmul.f32 %v10637_v27, %v16924_v37  ;;  %v2118_v61 = vadd.f32 %v2087_v19, %v10720_v58  ;;  %v2134_v4 = vsub.f32 %v2087_v19, %v10709_v18  ;;  %v16978_v58 = vld [vmem:[#allocation74_spill] sm:$0xff] }
 0x312   : >> { %vm2365_vm5 = vcmp.eq.f32.partialorder %v2221_v26, 1.0  ;;  %v2182_v44 = vsub.f32 %v16926_v60, %v2087_v19  ;;  %v10888_v12 = vadd.f32 %v16903_v52, %v1838_v63  ;;  %v1842_v26 = vadd.f32 %v16928_v42, %v16910_v36  ;;  %v16931_v19 = vld [vmem:[#allocation81_spill] sm:$0xff]  ;;  %v16932_v63 = vld [vmem:[#allocation86_spill] sm:$0xff]  ;;  %v16933_v36 = vld [vmem:[#allocation104_spill] sm:$0xff] }
 0x313   : >> { %vm2381_vm10 = vmand %vm2349_vm4, %vm2365_vm5  ;;  %v10900_v35 = vadd.f32 %v10583_v57, %v1841_v25  ;;  %v1973_v18 = vmax.f32 %v1957_v8, 0.0  ;;  %v2150_v43 = vmax.f32 %v2134_v4, 0.0  ;;  %vm2294_vm6 = vcmp.ge.f32.partialorder %v2118_v61, 2.0  ;;  %v16935_v4 = vld [vmem:[#allocation129_spill] sm:$0xff]  ;;  %v16936_v42 = vld [vmem:[#allocation68_spill] sm:$0xff] }
 0x314   : >> { %vm10895_vm0 = vmand %vm2381_vm10, %vm2397_vm13  ;;  %vm2287_vm11 = vcmp.gt.f32.partialorder %v16931_v19, 0.5  ;;  %v10904_v14 = vadd.f32 %v1969_v51, %v16932_v63  ;;  %v10906_v46 = vmul.f32 %v2248_v48, %v2232_v38  ;;  %v10908_v33 = vmul.f32 %v2251_v28, %v2235_v45  ;;  %v16937_v48 = vld [vmem:[#allocation65_spill] sm:$0xff] }
 0x315   : >> { %v10912_v5 = vadd.f32 %v10613_v9, %v16933_v36  ;;  %v10915_v60 = vadd.f32 %v10665_v34, %v1842_v26  ;;  %v2166_v8 = vadd.f32 %v2150_v43, %v10726_v2  ;;  %v2198_v25 = vmax.f32 %v2182_v44, 0.0  ;;  %vm10930_vm8 = vmand %vm2278_vm12, %vm2294_vm6  ;;  %v16941_v44 = vld [vmem:[#allocation64_spill] sm:$0xff]  ;;  %v16942_v43 = vld [vmem:[#allocation127_spill] sm:$0xff] }
 0x316   : >> { %vm2281_vm7 = vcmp.gt.f32.partialorder %v16935_v4, 0.5  ;;  %v10921_v51 = vadd.f32 %v10637_v27, %v16936_v42  ;;  %v10924_v38 = vadd.f32 %v1970_v22, %v16937_v48  ;;  %v1956_v28 = vsub.f32 %v10764_v0, %v10203_v49  ;;  %v10936_v26 = vpop.permute.xlu0 %2012  ;;  %v16943_v22 = vld [vmem:[#allocation111_spill] sm:$0xff]  ;;  %v16945_v34 = vld [vmem:[#allocation126_spill] sm:$0xff] }
 0x317   : >> { %16934 = vst [vmem:[#allocation57_spill] sm:$0xff] %v10915_v60  ;;  %vm2326_vm14 = vcmp.le.f32.partialorder %v2118_v61, 6.0  ;;  %v2031_v2 = vadd.f32 %v10803_v10, %v16941_v44  ;;  %v10939_v63 = vadd.f32 %v1973_v18, %v16942_v43  ;;  %v10943_v36 = vmul.f32 %v10713_v41, %v16943_v22 }
 0x318   : >> { %16938 = vst [vmem:[#allocation114_spill] sm:$0xff] %v10924_v38  ;;  %vm2390_vm9 = vcmp.lt.f32.partialorder %v10723_v54, 0.5  ;;  %v2214_v49 = vadd.f32 %v2198_v25, %v2166_v8  ;;  %v2093_v48 = vpop.permute.xlu1 %2092  ;;  %v2239_v18 = vmul.f32 %v10803_v10, %v16945_v34  ;;  %vm2342_vm1 = vmand %vm10930_vm8, %vm2326_vm14  ;;  %v1972_v25 = vmax.f32 %v1956_v28, 0.0 }
 0x319   : >> { %16944 = vst [vmem:[#allocation117_spill] sm:$0xff] %v10943_v36  ;;  %v2105_v42 = vpop.permute.xlu2 %2104  ;;  %v2121_v44 = vadd.f32 %v2093_v48, %v10751_v55  ;;  %v2137_v43 = vsub.f32 %v2093_v48, %v10728_v20  ;;  %v2185_v8 = vsub.f32 %v9934_v17, %v2093_v48  ;;  %v10960_v55 = vsel %vm10782_vm2, 0.0, %v16888_v16   ;;  %v16951_v16 = vld [vmem:[#allocation130_spill] sm:$0xff] }
 0x31a   : >> { %v2127_v38 = vadd.f32 %v2105_v42, %v2031_v2  ;;  %v2143_v61 = vsub.f32 %v2105_v42, %v10803_v10  ;;  %v2191_v60 = vsub.f32 %v16945_v34, %v2105_v42  ;;  %vm2358_vm3 = vcmp.eq.f32.partialorder %v2214_v49, 1.0  ;;  %16946 = vst [vmem:[#allocation132_spill] sm:$0xff] %v10960_v55 }
 0x31b   : >> { %v1955_v2 = vsub.f32 %v10791_v24, %v10217_v56  ;;  %vm2374_vm12 = vmand %vm2342_vm1, %vm2358_vm3  ;;  %vm2393_vm5 = vcmp.lt.f32.partialorder %v10743_v62, 0.5  ;;  %v2153_v17 = vmax.f32 %v2137_v43, 0.0  ;;  %vm2297_vm10 = vcmp.ge.f32.partialorder %v2121_v44, 2.0 }
 0x31c   : >> { %v2159_v36 = vmax.f32 %v2143_v61, 0.0  ;;  %vm2303_vm4 = vcmp.ge.f32.partialorder %v2127_v38, 2.0  ;;  %vm10965_vm13 = vmand %vm2374_vm12, %vm2390_vm9  ;;  %v2207_v10 = vmax.f32 %v2191_v60, 0.0  ;;  %vm2335_vm2 = vcmp.le.f32.partialorder %v2127_v38, 6.0 }
 0x31d   : >> { %vm10972_vm6 = vmand %vm2287_vm11, %vm2303_vm4  ;;  %vm2284_vm8 = vcmp.gt.f32.partialorder %v16951_v16, 0.5  ;;  %v10979_v54 = vadd.f32 %v10713_v41, %v16952_v30  ;;  %v2271_v45 = vmul.f32 %v10828_v21, %v2239_v18  ;;  %v2169_v49 = vadd.f32 %v2153_v17, %v10758_v50  ;;  %v16955_v30 = vld [vmem:[#allocation92_spill] sm:$0xff] }
 0x31e   : >> { %v2175_v20 = vadd.f32 %v2159_v36, %v10855_v1  ;;  %v2201_v42 = vmax.f32 %v2185_v8, 0.0  ;;  %vm2329_vm14 = vcmp.le.f32.partialorder %v2121_v44, 6.0  ;;  %v16953_v1 = vld [vmem:[#allocation53_spill] sm:$0xff]  ;;  %v10988_v61 = vmax.f32 %v1955_v2, 0.0  ;;  %vm2313_vm11 = vmand %vm2281_vm7, %vm2297_vm10  ;;  %v2091_v21 = vpop.permute.xlu0 %2090 }
 0x31f   : >> { %v2439_v60 = vsub.f32 %v16953_v1, %v10960_v55  ;;  %v16954_v36 = vld [vmem:[#allocation122_spill] sm:$0xff]  ;;  %vm2280_vm9 = vcmp.gt.f32.partialorder %v16955_v30, 0.5  ;;  %vm2351_vm1 = vmand %vm10972_vm6, %vm2335_vm2  ;;  %v2184_v2 = vsub.f32 %v16923_v40, %v2091_v21  ;;  %v2120_v38 = vadd.f32 %v2091_v21, %v10912_v5  ;;  %v17005_v1 = vld [vmem:[#allocation105_spill] sm:$0xff] }
 0x320   : >> { %v10986_v48 = vadd.f32 %v1972_v25, %v16954_v36  ;;  %v2223_v43 = vadd.f32 %v2207_v10, %v2175_v20  ;;  %v10997_v36 = vsel %vm10822_vm15, 0.0, %v16894_v29   ;;  %v2217_v18 = vadd.f32 %v2201_v42, %v2169_v49  ;;  %v2099_v8 = vpop.permute.xlu1 %2098  ;;  %vm11005_vm7 = vmand %vm2313_vm11, %vm2329_vm14  ;;  %v16960_v20 = vld [vmem:[#allocation93_spill] sm:$0xff]  ;;  %v16968_v42 = vld [vmem:[#allocation79_spill] sm:$0xff] }
 0x321   : >> { %16956 = vst [vmem:[#allocation133_spill] sm:$0xff] %v10997_v36  ;;  %v16957_v50 = vmov %v10997_v36  ;;  %v2136_v25 = vsub.f32 %v2091_v21, %v10613_v9  ;;  %v2124_v11 = vadd.f32 %v2099_v8, %v10795_v59  ;;  %v2140_v29 = vsub.f32 %v2099_v8, %v10762_v6  ;;  %v16969_v36 = vld [vmem:[#allocation103_spill] sm:$0xff] }
 0x322   : >> { %vm2367_vm3 = vcmp.eq.f32.partialorder %v2223_v43, 1.0  ;;  %vm2396_vm15 = vcmp.lt.f32.partialorder %v10780_v7, 0.5  ;;  %vm2399_vm12 = vcmp.lt.f32.partialorder %v2271_v45, 0.5  ;;  %vm2361_vm10 = vcmp.eq.f32.partialorder %v2217_v18, 1.0 }
 0x323   : >> { %vm2383_vm4 = vmand %vm2351_vm1, %vm2367_vm3  ;;  %v2188_v9 = vsub.f32 %v16842_v32, %v2099_v8  ;;  %v2152_v40 = vmax.f32 %v2136_v25, 0.0  ;;  %v2046_v44 = vsub.f32 %v10863_v13, %v16903_v52  ;;  %v2238_v10 = vmul.f32 %v10863_v13, %v16960_v20  ;;  %v16965_v32 = vld [vmem:[#allocation87_spill] sm:$0xff] }
 0x324   : >> { %vm11018_vm6 = vmand %vm2383_vm4, %vm2399_vm12  ;;  %v2156_v6 = vmax.f32 %v2140_v29, 0.0  ;;  %vm2300_vm2 = vcmp.ge.f32.partialorder %v2124_v11, 2.0  ;;  %vm2392_vm14 = vcmp.lt.f32.partialorder %v10906_v46, 0.5  ;;  %v11026_v29 = vsel %vm10965_vm13, 0.0, %v16918_v39   ;;  %v16987_v46 = vld [vmem:[#allocation100_spill] sm:$0xff] }
 0x325   : >> { %16963 = vst [vmem:[#allocation134_spill] sm:$0xff] %v11026_v29  ;;  %v16964_v5 = vmov %v11026_v29  ;;  %vm2377_vm11 = vmand %vm11005_vm7, %vm2361_vm10  ;;  %vm2332_vm1 = vcmp.le.f32.partialorder %v2124_v11, 6.0  ;;  %v2168_v52 = vadd.f32 %v2152_v40, %v16965_v32  ;;  %v2200_v28 = vmax.f32 %v2184_v2, 0.0 }
 0x326   : >> { %v2052_v45 = vsub.f32 %v10873_v15, %v10764_v0  ;;  %vm11035_vm3 = vmand %vm2377_vm11, %vm2393_vm5  ;;  %v2172_v34 = vadd.f32 %v2156_v6, %v10798_v53  ;;  %v2204_v39 = vmax.f32 %v2188_v9, 0.0  ;;  %vm2296_vm13 = vcmp.ge.f32.partialorder %v2120_v38, 2.0  ;;  %v16970_v0 = vld [vmem:[#allocation50_spill] sm:$0xff]  ;;  %v11060_v9 = vpop.permute.xlu2 %2110 }
 0x327   : >> { %vm2283_vm12 = vcmp.gt.f32.partialorder %v16968_v42, 0.5  ;;  %v2244_v43 = vmul.f32 %v10873_v15, %v16969_v36  ;;  %v2049_v21 = vsub.f32 %v10936_v26, %v10583_v57  ;;  %vm2316_vm7 = vmand %vm2284_vm8, %vm2300_vm2  ;;  %v2216_v62 = vadd.f32 %v2200_v28, %v2168_v52  ;;  %v16971_v53 = vld [vmem:[#allocation54_spill] sm:$0xff]  ;;  %v2097_v57 = vpop.permute.xlu0 %2096 }
 0x328   : >> { %vm2328_vm5 = vcmp.le.f32.partialorder %v2120_v38, 6.0  ;;  %v2442_v18 = vsub.f32 %v16970_v0, %v16957_v50  ;;  %v2438_v8 = vsub.f32 %v16971_v53, %v16964_v5  ;;  %v2062_v25 = vmax.f32 %v2046_v44, 0.0  ;;  %vm11053_vm4 = vmand %vm2316_vm7, %vm2332_vm1  ;;  %v11065_v40 = vpop.permute.xlu1 %2016 }
 0x329   : >> { %v2220_v2 = vadd.f32 %v2204_v39, %v2172_v34  ;;  %v11058_v29 = vmul.f32 %v10840_v47, %v2238_v10  ;;  %vm2312_vm8 = vmand %vm2280_vm9, %vm2296_vm13  ;;  %v2123_v44 = vadd.f32 %v2097_v57, %v10921_v51  ;;  %v2139_v11 = vsub.f32 %v2097_v57, %v10637_v27  ;;  %v16976_v47 = vld [vmem:[#allocation58_spill] sm:$0xff] }
 0x32a   : >> { %v2187_v6 = vsub.f32 %v16924_v37, %v2097_v57  ;;  %vm2395_vm10 = vcmp.lt.f32.partialorder %v10908_v33, 0.5  ;;  %v11074_v39 = vsel %vm10895_vm0, 0.0, %v16895_v31   ;;  %v2241_v32 = vmul.f32 %v10936_v26, %v16976_v47  ;;  %vm2344_vm9 = vmand %vm2312_vm8, %vm2328_vm5  ;;  %v16994_v33 = vld [vmem:[#allocation49_spill] sm:$0xff] }
 0x32b   : >> { %16974 = vst [vmem:[#allocation135_spill] sm:$0xff] %v11074_v39  ;;  %v16975_v10 = vmov %v11074_v39  ;;  %vm2364_vm2 = vcmp.eq.f32.partialorder %v2220_v2, 1.0  ;;  %vm2360_vm11 = vcmp.eq.f32.partialorder %v2216_v62, 1.0  ;;  %v11079_v52 = vmax.f32 %v2052_v45, 0.0  ;;  %v16981_v39 = vld [vmem:[#allocation63_spill] sm:$0xff] }
 0x32c   : >> { %v11082_v27 = vmul.f32 %v10867_v23, %v2244_v43  ;;  %v2065_v37 = vmax.f32 %v2049_v21, 0.0  ;;  %vm2380_vm1 = vmand %vm11053_vm4, %vm2364_vm2  ;;  %v2155_v51 = vmax.f32 %v2139_v11, 0.0  ;;  %v11089_v31 = vsel %vm11035_vm3, 0.0, %v16935_v4   ;;  %v16979_v23 = vld [vmem:[#allocation47_spill] sm:$0xff]  ;;  %v16982_v43 = vld [vmem:[#allocation97_spill] sm:$0xff] }
 0x32d   : >> { %16977 = vst [vmem:[#allocation136_spill] sm:$0xff] %v11089_v31  ;;  %v2194_v38 = vsub.f32 %v16978_v58, %v11060_v9  ;;  %vm2412_vm0 = vmand %vm2380_vm1, %vm2396_vm15  ;;  %vm2299_vm13 = vcmp.ge.f32.partialorder %v2123_v44, 2.0  ;;  %v11095_v28 = vmax.f32 %v2438_v8, %v2442_v18  ;;  %v2445_v45 = vsub.f32 %v16979_v23, %v16975_v10  ;;  %v16983_v21 = vld [vmem:[#allocation61_spill] sm:$0xff]  ;;  %v16985_v18 = vld [vmem:[#allocation51_spill] sm:$0xff] }
 0x32e   : >> { %v11100_v34 = vsel %vm2412_vm0, 0.0, %v16951_v16   ;;  %vm2376_vm7 = vmand %vm2344_vm9, %vm2360_vm11  ;;  %v2171_v49 = vadd.f32 %v2155_v51, %v16981_v39  ;;  %v2203_v4 = vmax.f32 %v2187_v6, 0.0  ;;  %vm2286_vm3 = vcmp.gt.f32.partialorder %v16982_v43, 0.5  ;;  %v16984_v16 = vld [vmem:[#allocation59_spill] sm:$0xff]  ;;  %v16989_v6 = vld [vmem:[#allocation57_spill] sm:$0xff] }
 0x32f   : >> { %16980 = vst [vmem:[#allocation137_spill] sm:$0xff] %v11100_v34  ;;  %v11105_v62 = vmul.f32 %v16983_v21, %v2241_v32  ;;  %vm2408_vm15 = vmand %vm2376_vm7, %vm2392_vm14  ;;  %vm2331_vm5 = vcmp.le.f32.partialorder %v2123_v44, 6.0  ;;  %v2030_v7 = vadd.f32 %v10863_v13, %v10888_v12  ;;  %v2078_v0 = vadd.f32 %v2062_v25, %v10891_v3  ;;  %v16988_v3 = vld [vmem:[#allocation48_spill] sm:$0xff]  ;;  %v2015_v57 = vpop.permute.xlu0 %2014  ;;  %v16990_v51 = vld [vmem:[#allocation83_spill] sm:$0xff] }
 0x330   : >> { %vm2290_vm4 = vcmp.gt.f32.partialorder %v16984_v16, 0.5  ;;  %v2441_v53 = vsub.f32 %v16985_v18, %v11089_v31  ;;  %v11116_v8 = vsel %vm2408_vm15, 0.0, %v16955_v30   ;;  %v2219_v2 = vadd.f32 %v2203_v4, %v2171_v49  ;;  %vm2315_vm8 = vmand %vm2283_vm12, %vm2299_vm13  ;;  %v2103_v44 = vpop.permute.xlu1 %2102 }
 0x331   : >> { %16986 = vst [vmem:[#allocation138_spill] sm:$0xff] %v11116_v8  ;;  %v11123_v17 = vadd.f32 %v10873_v15, %v16987_v46  ;;  %v2210_v12 = vmax.f32 %v2194_v38, 0.0  ;;  %v2444_v25 = vsub.f32 %v16988_v3, %v11100_v34  ;;  %v2033_v11 = vadd.f32 %v10936_v26, %v10900_v35  ;;  %vm2347_vm14 = vmand %vm2315_vm8, %vm2331_vm5  ;;  %v16991_v38 = vld [vmem:[#allocation52_spill] sm:$0xff]  ;;  %v2117_v46 = vpop.permute.xlu2 %2116 }
 0x332   : >> { %v11130_v30 = vadd.f32 %v2065_v37, %v10904_v14  ;;  %vm2363_vm2 = vcmp.eq.f32.partialorder %v2219_v2, 1.0  ;;  %v2034_v32 = vadd.f32 %v2015_v57, %v16989_v6  ;;  %v2050_v23 = vsub.f32 %v2015_v57, %v16990_v51 }
 0x333   : >> { %v2146_v39 = vsub.f32 %v11060_v9, %v2015_v57  ;;  %v2440_v49 = vsub.f32 %v16991_v38, %v11116_v8  ;;  %vm2379_vm12 = vmand %vm2347_vm14, %vm2363_vm2  ;;  %v2126_v4 = vadd.f32 %v2103_v44, %v2030_v7  ;;  %v2142_v21 = vsub.f32 %v2103_v44, %v10863_v13  ;;  %v17003_v38 = vld [vmem:[#allocation128_spill] sm:$0xff] }
 0x334   : >> { %v2190_v35 = vsub.f32 %v16960_v20, %v2103_v44  ;;  %vm2398_vm9 = vcmp.lt.f32.partialorder %v11058_v29, 0.5  ;;  %vm2411_vm11 = vmand %vm2379_vm12, %vm2395_vm10  ;;  %v2066_v14 = vmax.f32 %v2050_v23, 0.0  ;;  %v2130_v37 = vadd.f32 %v11060_v9, %v2034_v32  ;;  %v16995_v9 = vld [vmem:[#allocation114_spill] sm:$0xff] }
 0x335   : >> { %v2242_v18 = vmul.f32 %v2015_v57, %v16978_v58  ;;  %v11144_v2 = vmax.f32 %v2441_v53, %v2445_v45  ;;  %v11149_v7 = vsel %vm11018_vm6, 0.0, %v16931_v19   ;;  %v11152_v13 = vsel %vm2411_vm11, 0.0, %v16968_v42   ;;  %v16998_v19 = vld [vmem:[#allocation116_spill] sm:$0xff]  ;;  %v16999_v57 = vld [vmem:[#allocation101_spill] sm:$0xff]  ;;  %v17002_v23 = vld [vmem:[#allocation45_spill] sm:$0xff] }
 0x336   : >> { %16992 = vst [vmem:[#allocation139_spill] sm:$0xff] %v11149_v7  ;;  %v2158_v20 = vmax.f32 %v2142_v21, 0.0  ;;  %vm2302_vm1 = vcmp.ge.f32.partialorder %v2126_v4, 2.0  ;;  %v2443_v3 = vsub.f32 %v16994_v33, %v11152_v13  ;;  %v2206_v44 = vmax.f32 %v2190_v35, 0.0  ;;  %v17004_v35 = vld [vmem:[#allocation96_spill] sm:$0xff]  ;;  %v17006_v33 = vld [vmem:[#allocation118_spill] sm:$0xff] }
 0x337   : >> { %16993 = vst [vmem:[#allocation140_spill] sm:$0xff] %v11152_v13  ;;  %v2082_v6 = vadd.f32 %v2066_v14, %v16995_v9  ;;  %v2162_v58 = vmax.f32 %v2146_v39, 0.0  ;;  %vm11159_vm10 = vmand %vm2286_vm3, %vm2302_vm1  ;;  %vm2334_vm6 = vcmp.le.f32.partialorder %v2126_v4, 6.0  ;;  %vm2306_vm0 = vcmp.ge.f32.partialorder %v2130_v37, 2.0  ;;  %v2021_v14 = vpop.permute.xlu0 %2020 }
 0x338   : >> { %v2174_v45 = vadd.f32 %v2158_v20, %v2078_v0  ;;  %vm2289_vm13 = vcmp.gt.f32.partialorder %v16998_v19, 0.5  ;;  %v11164_v42 = vmax.f32 %v2440_v49, %v2444_v25  ;;  %v2274_v32 = vmul.f32 %v16999_v57, %v2242_v18  ;;  %vm11169_vm7 = vmand %vm2290_vm4, %vm2306_vm0  ;;  %v2109_v20 = vpop.permute.xlu1 %2108  ;;  %v17011_v57 = vld [vmem:[#allocation120_spill] sm:$0xff] }
 0x339   : >> { %v2178_v53 = vadd.f32 %v2162_v58, %v2082_v6  ;;  %vm2338_vm15 = vcmp.le.f32.partialorder %v2130_v37, 6.0  ;;  %v2455_v0 = vmax.f32 %v2439_v60, %v2443_v3  ;;  %v2447_v39 = vsub.f32 %v17002_v23, %v11149_v7  ;;  %vm2350_vm5 = vmand %vm11159_vm10, %vm2334_vm6 }
 0x33a   : >> { %v2051_v25 = vsub.f32 %v11065_v40, %v10791_v24  ;;  %v2197_v49 = vsub.f32 %v17003_v38, %v2117_v46  ;;  %v2222_v21 = vadd.f32 %v2206_v44, %v2174_v45  ;;  %vm2293_vm3 = vcmp.gt.f32.partialorder %v17004_v35, 0.5  ;;  %vm11190_vm8 = vmand %vm11169_vm7, %vm2338_vm15 }
 0x33b   : >> { %v2226_v18 = vadd.f32 %v2210_v12, %v2178_v53  ;;  %v2037_v60 = vadd.f32 %v2021_v14, %v17005_v1  ;;  %v2053_v3 = vsub.f32 %v2021_v14, %v17006_v33  ;;  %v2149_v9 = vsub.f32 %v2117_v46, %v2021_v14 }
 0x33c   : >> { %vm2366_vm4 = vcmp.eq.f32.partialorder %v2222_v21, 1.0  ;;  %v2129_v44 = vadd.f32 %v2109_v20, %v2033_v11  ;;  %v2145_v4 = vsub.f32 %v2109_v20, %v10936_v26  ;;  %v2193_v6 = vsub.f32 %v16976_v47, %v2109_v20 }
 0x33d   : >> { %vm2401_vm14 = vcmp.lt.f32.partialorder %v11105_v62, 0.5  ;;  %vm2382_vm2 = vmand %vm2350_vm5, %vm2366_vm4  ;;  %vm2370_vm12 = vcmp.eq.f32.partialorder %v2226_v18, 1.0  ;;  %vm2402_vm11 = vcmp.lt.f32.partialorder %v2274_v32, 0.5  ;;  %v2069_v12 = vmax.f32 %v2053_v3, 0.0 }
 0x33e   : >> { %v2133_v58 = vadd.f32 %v2117_v46, %v2037_v60  ;;  %vm2414_vm1 = vmand %vm2382_vm2, %vm2398_vm9  ;;  %v2161_v37 = vmax.f32 %v2145_v4, 0.0  ;;  %v2209_v45 = vmax.f32 %v2193_v6, 0.0  ;;  %vm2305_vm10 = vcmp.ge.f32.partialorder %v2129_v44, 2.0  ;;  %v17010_v46 = vld [vmem:[#allocation46_spill] sm:$0xff] }
 0x33f   : >> { %v2165_v59 = vmax.f32 %v2149_v9, 0.0  ;;  %v11200_v11 = vsel %vm2414_vm1, 0.0, %v16982_v43   ;;  %vm2386_vm6 = vmand %vm11190_vm8, %vm2370_vm12  ;;  %vm2337_vm0 = vcmp.le.f32.partialorder %v2129_v44, 6.0  ;;  %v2085_v26 = vadd.f32 %v2069_v12, %v10939_v63  ;;  %v17017_v60 = vld [vmem:[#allocation42_spill] sm:$0xff]  ;;  %v17023_v44 = vld [vmem:[#allocation43_spill] sm:$0xff] }
 0x340   : >> { %17009 = vst [vmem:[#allocation141_spill] sm:$0xff] %v11200_v11  ;;  %v2245_v47 = vmul.f32 %v2021_v14, %v17003_v38  ;;  %v2446_v53 = vsub.f32 %v17010_v46, %v11200_v11  ;;  %vm2418_vm7 = vmand %vm2386_vm6, %vm2402_vm11  ;;  %v2177_v29 = vadd.f32 %v2161_v37, %v11130_v30  ;;  %vm2309_vm9 = vcmp.ge.f32.partialorder %v2133_v58, 2.0  ;;  %v17015_v30 = vld [vmem:[#allocation85_spill] sm:$0xff]  ;;  %v2115_v18 = vpop.permute.xlu1 %2114 }
 0x341   : >> { %vm2292_vm15 = vcmp.gt.f32.partialorder %v17011_v57, 0.5  ;;  %v11210_v32 = vmax.f32 %v2455_v0, %v2447_v39  ;;  %v2213_v43 = vmax.f32 %v2197_v49, 0.0  ;;  %v11213_v51 = vsel %vm2418_vm7, 0.0, %v16984_v16   ;;  %vm2321_vm5 = vmand %vm2289_vm13, %vm2305_vm10  ;;  %v17016_v39 = vld [vmem:[#allocation94_spill] sm:$0xff]  ;;  %v2107_v16 = vpop.permute.xlu0 %2106 }
 0x342   : >> { %17012 = vst [vmem:[#allocation142_spill] sm:$0xff] %v11213_v51  ;;  %v2181_v63 = vadd.f32 %v2165_v59, %v2085_v26  ;;  %vm2341_vm4 = vcmp.le.f32.partialorder %v2133_v58, 6.0  ;;  %v2225_v23 = vadd.f32 %v2209_v45, %v2177_v29  ;;  %vm11219_vm8 = vmand %vm2321_vm5, %vm2337_vm0  ;;  %v2277_v21 = vmul.f32 %v17015_v30, %v2245_v47  ;;  %v17026_v58 = vld [vmem:[#allocation91_spill] sm:$0xff]  ;;  %v17027_v45 = vld [vmem:[#allocation117_spill] sm:$0xff] }
 0x343   : >> { %v2084_v0 = vadd.f32 %v11079_v52, %v10986_v48  ;;  %vm2288_vm2 = vcmp.gt.f32.partialorder %v17016_v39, 0.5  ;;  %v2458_v49 = vmax.f32 %v11095_v28, %v2446_v53  ;;  %vm2325_vm13 = vmand %vm2293_vm3, %vm2309_vm9  ;;  %v2128_v20 = vadd.f32 %v2107_v16, %v10979_v54  ;;  %v17028_v59 = vld [vmem:[#allocation67_spill] sm:$0xff]  ;;  %v17029_v29 = vld [vmem:[#allocation39_spill] sm:$0xff] }
 0x344   : >> { %v2229_v14 = vadd.f32 %v2213_v43, %v2181_v63  ;;  %v2144_v1 = vsub.f32 %v2107_v16, %v10713_v41  ;;  %v2450_v33 = vsub.f32 %v17017_v60, %v11213_v51  ;;  %vm2369_vm12 = vcmp.eq.f32.partialorder %v2225_v23, 1.0  ;;  %vm11236_vm11 = vmand %vm2325_vm13, %vm2341_vm4  ;;  %v17031_v30 = vld [vmem:[#allocation98_spill] sm:$0xff] }
 0x345   : >> { %v2132_v52 = vadd.f32 %v2115_v18, %v11123_v17  ;;  %v2148_v28 = vsub.f32 %v2115_v18, %v10873_v15  ;;  %v2196_v3 = vsub.f32 %v16969_v36, %v2115_v18  ;;  %v2067_v9 = vmax.f32 %v2051_v25, 0.0  ;;  %vm2385_vm3 = vmand %vm11219_vm8, %vm2369_vm12  ;;  %v17022_v36 = vld [vmem:[#allocation73_spill] sm:$0xff] }
 0x346   : >> { %vm2373_vm1 = vcmp.eq.f32.partialorder %v2229_v14, 1.0  ;;  %v2160_v41 = vmax.f32 %v2144_v1, 0.0  ;;  %v2192_v54 = vsub.f32 %v16943_v22, %v2107_v16  ;;  %vm2417_vm10 = vmand %vm2385_vm3, %vm2401_vm14  ;;  %vm2405_vm6 = vcmp.lt.f32.partialorder %v2277_v21, 0.5 }
 0x347   : >> { %v2164_v24 = vmax.f32 %v2148_v28, 0.0  ;;  %vm2308_vm0 = vcmp.ge.f32.partialorder %v2132_v52, 2.0  ;;  %vm2304_vm7 = vcmp.ge.f32.partialorder %v2128_v20, 2.0  ;;  %v11249_v43 = vsel %vm2417_vm10, 0.0, %v16998_v19   ;;  %vm2389_vm9 = vmand %vm11236_vm11, %vm2373_vm1 }
 0x348   : >> { %17020 = vst [vmem:[#allocation143_spill] sm:$0xff] %v11249_v43  ;;  %v17021_v15 = vmov %v11249_v43  ;;  %vm2340_vm5 = vcmp.le.f32.partialorder %v2132_v52, 6.0  ;;  %v2176_v17 = vadd.f32 %v2160_v41, %v17022_v36  ;;  %v2208_v25 = vmax.f32 %v2192_v54, 0.0  ;;  %vm2421_vm4 = vmand %vm2389_vm9, %vm2405_vm6  ;;  %v17038_v52 = vld [vmem:[#allocation40_spill] sm:$0xff] }
 0x349   : >> { %v2449_v22 = vsub.f32 %v17023_v44, %v17021_v15  ;;  %v2180_v62 = vadd.f32 %v2164_v24, %v2084_v0  ;;  %v2212_v4 = vmax.f32 %v2196_v3, 0.0  ;;  %v2462_v6 = vmax.f32 %v2458_v49, %v2450_v33  ;;  %vm2324_vm14 = vmand %vm2292_vm15, %vm2308_vm0  ;;  %v2113_v53 = vpop.permute.xlu0 %2112  ;;  %v17032_v49 = vld [vmem:[#allocation71_spill] sm:$0xff] }
 0x34a   : >> { %v11257_v47 = vsel %vm2421_vm4, 0.0, %v17004_v35   ;;  %v2224_v19 = vadd.f32 %v2208_v25, %v2176_v17  ;;  %vm2336_vm8 = vcmp.le.f32.partialorder %v2128_v20, 6.0  ;;  %v2035_v37 = vadd.f32 %v11065_v40, %v17026_v58  ;;  %vm2356_vm13 = vmand %vm2324_vm14, %vm2340_vm5  ;;  %v17033_v20 = vld [vmem:[#allocation125_spill] sm:$0xff] }
 0x34b   : >> { %17024 = vst [vmem:[#allocation144_spill] sm:$0xff] %v11257_v47  ;;  %v17025_v12 = vmov %v11257_v47  ;;  %v2272_v26 = vmul.f32 %v17028_v59, %v17027_v45  ;;  %v2228_v46 = vadd.f32 %v2212_v4, %v2180_v62  ;;  %v2461_v35 = vmax.f32 %v11144_v2, %v2449_v22  ;;  %v17030_v47 = vld [vmem:[#allocation123_spill] sm:$0xff]  ;;  %vm2320_vm15 = vmand %vm2288_vm2, %vm2304_vm7 }
 0x34c   : >> { %v2453_v43 = vsub.f32 %v17029_v29, %v17025_v12  ;;  %v1987_v63 = vadd.f32 %v10988_v61, %v17030_v47  ;;  %v2131_v23 = vadd.f32 %v2113_v53, %v2035_v37  ;;  %v2147_v38 = vsub.f32 %v2113_v53, %v11065_v40  ;;  %vm2352_vm11 = vmand %vm2320_vm15, %vm2336_vm8 }
 0x34d   : >> { %v2195_v21 = vsub.f32 %v17031_v30, %v2113_v53  ;;  %v2243_v0 = vmul.f32 %v11065_v40, %v17031_v30  ;;  %vm2372_vm12 = vcmp.eq.f32.partialorder %v2228_v46, 1.0  ;;  %vm2368_vm3 = vcmp.eq.f32.partialorder %v2224_v19, 1.0 }
 0x34e   : >> { %v2465_v2 = vmax.f32 %v2461_v35, %v2453_v43  ;;  %vm2388_vm1 = vmand %vm2356_vm13, %vm2372_vm12  ;;  %vm2404_vm10 = vcmp.lt.f32.partialorder %v11082_v27, 0.5  ;;  %v2083_v61 = vadd.f32 %v2067_v9, %v1987_v63  ;;  %v2163_v16 = vmax.f32 %v2147_v38, 0.0  ;;  %v17041_v9 = vld [vmem:[#allocation41_spill] sm:$0xff] }
 0x34f   : >> { %v2259_v14 = vadd.f32 %v17032_v49, %v10217_v56  ;;  %vm2420_vm2 = vmand %vm2388_vm1, %vm2404_vm10  ;;  %vm2307_vm6 = vcmp.ge.f32.partialorder %v2131_v23, 2.0  ;;  %vm2400_vm0 = vcmp.lt.f32.partialorder %v2272_v26, 0.5  ;;  %v2211_v1 = vmax.f32 %v2195_v21, 0.0  ;;  %v17037_v56 = vld [vmem:[#allocation44_spill] sm:$0xff] }
 0x350   : >> { %vm2384_vm7 = vmand %vm2352_vm11, %vm2368_vm3  ;;  %v2179_v18 = vadd.f32 %v2163_v16, %v2083_v61  ;;  %vm2291_vm5 = vcmp.gt.f32.partialorder %v17033_v20, 0.5  ;;  %vm2339_vm4 = vcmp.le.f32.partialorder %v2131_v23, 6.0  ;;  %v11284_v46 = vsel %vm2420_vm2, 0.0, %v17011_v57  }
 0x351   : >> { %v2275_v40 = vmul.f32 %v2259_v14, %v2243_v0  ;;  %vm2416_vm9 = vmand %vm2384_vm7, %vm2400_vm0  ;;  %17034 = vst [vmem:[#allocation145_spill] sm:$0xff] %v11284_v46  ;;  %v17035_v60 = vmov %v11284_v46  ;;  %v17043_v47 = vmov %v17025_v12  ;;  %v17047_v43 = vmov %v17021_v15 }
 0x352   : >> { %v11287_v27 = vsel %vm2416_vm9, 0.0, %v17016_v39   ;;  %v2227_v33 = vadd.f32 %v2211_v1, %v2179_v18  ;;  %vm2323_vm14 = vmand %vm2291_vm5, %vm2307_vm6  ;;  %v2452_v28 = vsub.f32 %v17038_v52, %v17035_v60  ;;  %v17044_v46 = vmov %v17035_v60 }
 0x353   : >> { %17036 = vst [vmem:[#allocation146_spill] sm:$0xff] %v11287_v27  ;;  %v2448_v48 = vsub.f32 %v17037_v56, %v11287_v27  ;;  %vm2355_vm8 = vmand %vm2323_vm14, %vm2339_vm4  ;;  %vm2403_vm15 = vcmp.lt.f32.partialorder %v2275_v40, 0.5  ;;  %v17050_v40 = vmov %v11200_v11  ;;  %v17052_v38 = vmov %v11100_v34 }
 0x354   : >> { %vm2371_vm13 = vcmp.eq.f32.partialorder %v2227_v33, 1.0  ;;  %v17053_v37 = vmov %v11152_v13  ;;  %v17055_v35 = vmov %v11089_v31  ;;  %v17056_v33 = vmov %v11116_v8 }
 0x355   : >> { %vm2387_vm12 = vmand %vm2355_vm8, %vm2371_vm13  ;;  %v2460_v3 = vmax.f32 %v11164_v42, %v2448_v48  ;;  %v17058_v29 = vmov %v16964_v5 }
 0x356   : >> { %vm2419_vm11 = vmand %vm2387_vm12, %vm2403_vm15 }
 0x357   : >> { %v11295_v45 = vsel %vm2419_vm11, 0.0, %v17033_v20   ;;  %v2464_v39 = vmax.f32 %v2460_v3, %v2452_v28 }
 0x358   : >> { %17039 = vst [vmem:[#allocation147_spill] sm:$0xff] %v11295_v45  ;;  %v17040_v57 = vmov %v11295_v45 }
 0x359   : >> { %v2451_v41 = vsub.f32 %v17041_v9, %v17040_v57  ;;  %v2467_v54 = vmax.f32 %v2464_v39, %v2465_v2  ;;  %v17045_v45 = vmov %v17040_v57  ;;  %v17051_v39 = vmov %v16975_v10 }
 0x35b   : >> { %v2463_v24 = vmax.f32 %v11210_v32, %v2451_v41  ;;  %v17049_v41 = vmov %v11149_v7  ;;  %v17057_v32 = vmov %v10960_v55 }
 0x35d   : >> { %v2466_v36 = vmax.f32 %v2462_v6, %v2463_v24 }
 0x35f   : >> { %v2468_v17 = vmax.f32 %v2466_v36, %v2467_v54  ;;  %v17054_v36 = vmov %v16957_v50 }
 0x361   : >> { %2469 = vmax.xlane.f32.xlu0 %v2468_v17 }
 0x3d4   : >> { %v2470_v25 = vpop.xlane.xlu0 %2469 }
 0x3d5   : >> { %v2471_v44 = vrot.slane %v2470_v25, 4 }
 0x3d7   : >> { %v2472_v22 = vmax.f32 %v2470_v25, %v2471_v44  ;;  %v17046_v44 = vmov %v11213_v51 }
 0x3d9   : >> { %v2473_v62 = vrot.slane %v2472_v22, 2 }
 0x3db   : >> { %v2474_v42 = vmax.f32 %v2472_v22, %v2473_v62 }
 0x3dd   : >> { %v2475_v4 = vrot.slane %v2474_v42, 1 }
 0x3df   : >> { %v2476_v19 = vmax.f32 %v2474_v42, %v2475_v4  ;;  %v17048_v42 = vmov %v11287_v27 }
 0x3e1   : >> { %6823 = vpush %v2476_v19 }
 0x412   : >> { %s6824_s19 = spop %6823 }
 0x413   : >> { %p2478_p1 = scmp.gt.f32.partialorder %s6824_s19, 0.0 }
 0x415   : >> { %p11301_p8 = pnand %p2478_p1, %p508_p4 }
 0x416   : > { %s7980_s14 = smov (%p11301_p8), 1   ;;  %s7981_s26 = smov (%p11301_p8), 127   ;;  %v2591_v58 = vrot.slane (%p11301_p8), %v17035_v60, 1  ;;  %v2592_v37 = vrot.slane (%p11301_p8), %v17025_v12, 1  ;;  %v2625_v45 = vrot.slane (%p11301_p8), %v17040_v57, 7  ;;  %v2626_v59 = vrot.slane (%p11301_p8), %v17035_v60, 7 }
 0x417   : > { %513 = sbr.rel (!%p11301_p8) target bundleno = 94 (0x5e), region = 164  ;;  %2541 = vrot.lane.b32.xlu1 (%p11301_p8), %v17035_v60, %s7980_s14  ;;  %2509 = vrot.lane.b32.xlu0 (%p11301_p8), %v17035_v60, %s7981_s26  ;;  %v2577_v26 = vrot.slane (%p11301_p8), %v16964_v5, 1  ;;  %v2627_v46 = vrot.slane (%p11301_p8), %v17025_v12, 7  ;;  %v17059_v43 = vld [vmem:[#allocation55_spill] sm:$0xff] (%p11301_p8)  ;;  %v2590_v30 = vrot.slane (%p11301_p8), %v17040_v57, 1  ;;  %v2624_v21 = vrot.slane (%p11301_p8), %v11213_v51, 7 }
 0x418   : > { %2505 = vrot.lane.b32.xlu2 (%p11301_p8), %v11213_v51, %s7981_s26  ;;  %vm17060_vm3 = vcmp.lt.s32.totalorder (%p11301_p8), %v17059_v43, 7  ;;  %vm17061_vm1 = vcmp.lt.s32.totalorder (%p11301_p8), %v17059_v43, 1  ;;  %v2589_v0 = vrot.slane (%p11301_p8), %v11213_v51, 1  ;;  %v2623_v2 = vrot.slane (%p11301_p8), %v17021_v15, 7  ;;  %s7982_s18 = smov (%p11301_p8), 2   ;;  %s7983_s2 = smov (%p11301_p8), 126  }
 0x419   : > { %v2596_v35 = vsel (%p11301_p8), %vm17060_vm3, %v2591_v58, %v2592_v37  ;;  %v2630_v47 = vsel (%p11301_p8), %vm17061_vm1, %v2625_v45, %v2626_v59  ;;  %vm17062_vm10 = vmmov (%p11301_p8), %vm17060_vm3  ;;  %v2587_v41 = vrot.slane (%p11301_p8), %v11287_v27, 1  ;;  %v2588_v54 = vrot.slane (%p11301_p8), %v17021_v15, 1  ;;  %s12894_s22 = smov (%p11301_p8), 0  }
 0x41a   : > { %v2611_v63 = vsel (%p11301_p8), %vm17062_vm10, %v2592_v37, %v2577_v26  ;;  %vm17063_vm2 = vmmov (%p11301_p8), %vm17061_vm1  ;;  %v2659_v61 = vsub.f32 (%p11301_p8), %v2596_v35, %v2630_v47  ;;  %v2621_v24 = vrot.slane (%p11301_p8), %v11149_v7, 7  ;;  %v2622_v36 = vrot.slane (%p11301_p8), %v11287_v27, 7 }
 0x41b   : > { %v2629_v23 = vsel (%p11301_p8), %vm17063_vm2, %v2626_v59, %v2627_v46  ;;  %vm17064_vm6 = vmmov (%p11301_p8), %vm17060_vm3 }
 0x41c   : > { %v2660_v49 = vsub.f32 %v2611_v63, %v2629_v23  ;;  %v2597_v1 = vsel %vm17064_vm6, %v2590_v30, %v2591_v58  ;;  %vm17065_vm0 = vmmov %vm17061_vm1  ;;  %v11453_v56 = vmul.f32 0.5, %v2659_v61 }
 0x41d   : > { %v2631_v40 = vsel %vm17065_vm0, %v2624_v21, %v2625_v45  ;;  %vm17066_vm7 = vmmov %vm17060_vm3 }
 0x41e   : > { %v2598_v20 = vsel %vm17066_vm7, %v2589_v0, %v2590_v30  ;;  %vm17067_vm9 = vmmov %vm17065_vm0  ;;  %v11455_v52 = vmul.f32 0.5, %v2660_v49  ;;  %v2658_v39 = vsub.f32 %v2597_v1, %v2631_v40 }
 0x41f   : > { %2543 = vrot.lane.b32.xlu1 %v17025_v12, %s7980_s14  ;;  %2511 = vrot.lane.b32.xlu0 %v17025_v12, %s7981_s26  ;;  %v2632_v33 = vsel %vm17067_vm9, %v2623_v2, %v2624_v21  ;;  %vm17068_vm5 = vmmov %vm17060_vm3 }
 0x420   : > { %2507 = vrot.lane.b32.xlu2 %v17040_v57, %s7981_s26  ;;  %v2657_v9 = vsub.f32 %v2598_v20, %v2632_v33  ;;  %v11463_v19 = vmul.f32 0.5, %v2658_v39  ;;  %v2600_v45 = vsel %vm17068_vm5, %v2587_v41, %v2588_v54  ;;  %vm17069_vm4 = vmmov %vm17065_vm0  ;;  %v2585_v39 = vrot.slane %v11200_v11, 1 }
 0x421   : > { %v2634_v59 = vsel %vm17069_vm4, %v2621_v24, %v2622_v36  ;;  %vm17070_vm14 = vmmov %vm17060_vm3 }
 0x422   : > { %v11475_v35 = vmul.f32 0.5, %v2657_v9  ;;  %vm17071_vm8 = vmmov %vm17065_vm0  ;;  %v2655_v21 = vsub.f32 %v2600_v45, %v2634_v59  ;;  %v2586_v9 = vrot.slane %v11149_v7, 1 }
 0x423   : > { %v2633_v63 = vsel %vm17071_vm8, %v2622_v36, %v2623_v2  ;;  %vm17072_vm13 = vmmov %vm17060_vm3 }
 0x424   : > { %v11481_v20 = vmul.f32 0.5, %v2655_v21  ;;  %vm17073_vm15 = vmmov %vm17065_vm0 }
 0x425   : > { %vm17074_vm12 = vmmov %vm17060_vm3 }
 0x426   : > { %v2601_v59 = vsel %vm17074_vm12, %v2586_v9, %v2587_v41  ;;  %vm17075_vm11 = vmmov %vm17065_vm0 }
 0x427   : > { %2539 = vrot.lane.b32.xlu1 %v17040_v57, %s7980_s14  ;;  %2537 = vrot.lane.b32.xlu0 %v11213_v51, %s7980_s14  ;;  %vm17076_vm1 = vmmov %vm17065_vm0 }
 0x428   : > { %2501 = vrot.lane.b32.xlu2 %v11287_v27, %s7981_s26  ;;  %vm17077_vm10 = vmmov %vm17060_vm3 }
 0x429   : > { %vm17078_vm2 = vmmov %vm17065_vm0 }
 0x42a   : > { %vm17079_vm6 = vmmov %vm17060_vm3 }
 0x42b   : > { %vm17080_vm7 = vmmov %vm17060_vm3 }
 0x42c   : > { %vm17081_vm9 = vmmov %vm17065_vm0 }
 0x42d   : > { %vm17082_vm5 = vmmov %vm17060_vm3 }
 0x42e   : > { %vm17083_vm4 = vmmov %vm17065_vm0 }
 0x42f   : > { %2533 = vrot.lane.b32.xlu1 %v11287_v27, %s7980_s14  ;;  %2503 = vrot.lane.b32.xlu0 %v17021_v15, %s7981_s26  ;;  %vm17085_vm8 = vmmov %vm17065_vm0 }
 0x430   : > { %2535 = vrot.lane.b32.xlu2 %v17021_v15, %s7980_s14  ;;  %vm17088_vm12 = vmmov %vm17060_vm3 }
 0x437   : > { %2499 = vrot.lane.b32.xlu1 %v11149_v7, %s7981_s26  ;;  %2497 = vrot.lane.b32.xlu0 %v11200_v11, %s7981_s26 }
 0x438   : > { %2529 = vrot.lane.b32.xlu2 %v11200_v11, %s7980_s14 }
 0x43f   : > { %2493 = vrot.lane.b32.xlu1 %v11100_v34, %s7981_s26  ;;  %2531 = vrot.lane.b32.xlu0 %v11149_v7, %s7980_s14 }
 0x440   : > { %2495 = vrot.lane.b32.xlu2 %v16975_v10, %s7981_s26 }
 0x447   : > { %2527 = vrot.lane.b32.xlu1 %v16975_v10, %s7980_s14  ;;  %2525 = vrot.lane.b32.xlu0 %v11100_v34, %s7980_s14 }
 0x448   : > { %2489 = vrot.lane.b32.xlu2 %v16957_v50, %s7981_s26 }
 0x44f   : > { %2521 = vrot.lane.b32.xlu1 %v16957_v50, %s7980_s14  ;;  %2491 = vrot.lane.b32.xlu0 %v11152_v13, %s7981_s26 }
 0x450   : > { %2523 = vrot.lane.b32.xlu2 %v11152_v13, %s7980_s14 }
 0x457   : > { %2487 = vrot.lane.b32.xlu1 %v11089_v31, %s7981_s26  ;;  %2485 = vrot.lane.b32.xlu0 %v11116_v8, %s7981_s26 }
 0x458   : > { %2517 = vrot.lane.b32.xlu2 %v11116_v8, %s7980_s14 }
 0x45f   : > { %2481 = vrot.lane.b32.xlu1 %v16964_v5, %s7981_s26  ;;  %2519 = vrot.lane.b32.xlu0 %v11089_v31, %s7980_s14 }
 0x460   : > { %2483 = vrot.lane.b32.xlu2 %v10960_v55, %s7981_s26 }
 0x467   : > { %2515 = vrot.lane.b32.xlu1 %v10960_v55, %s7980_s14  ;;  %2513 = vrot.lane.b32.xlu0 %v16964_v5, %s7980_s14 }
 0x472   : > { %v2506_v32 = vpop.permute.xlu2 %2505 }
 0x47a   : > { %v2508_v6 = vpop.permute.xlu2 %2507 }
 0x482   : > { %v11439_v38 = vpop.permute.xlu2 %2501 }
 0x489   : > { %v2542_v53 = vpop.permute.xlu1 %2541  ;;  %v2510_v29 = vpop.permute.xlu0 %2509 }
 0x48a   : > { %v2559_v16 = vsub.f32 %v2510_v29, %v2542_v53  ;;  %v2536_v62 = vpop.permute.xlu2 %2535  ;;  %v2599_v53 = vsel %vm17070_vm14, %v2588_v54, %v2589_v0  ;;  %vm17084_vm14 = vmmov %vm17060_vm3 }
 0x48b   : > { %v2656_v61 = vsub.f32 %v2599_v53, %v2633_v63  ;;  %v2583_v63 = vrot.slane %v11100_v34, 1 }
 0x48c   : > { %v2575_v48 = vmul.f32 0.5, %v2559_v16 }
 0x48d   : > { %v11484_v33 = vmul.f32 0.5, %v2656_v61 }
 0x48e   : > { %v2691_v17 = vmul.f32 %v2575_v48, %v2575_v48  ;;  %v2707_v25 = vmul.f32 %v11453_v56, %v2575_v48 }
 0x491   : > { %v2544_v14 = vpop.permute.xlu1 %2543  ;;  %v2512_v18 = vpop.permute.xlu0 %2511 }
 0x492   : > { %v2560_v28 = vsub.f32 %v2512_v18, %v2544_v14 }
 0x494   : > { %v2576_v3 = vmul.f32 0.5, %v2560_v28 }
 0x496   : > { %v2692_v44 = vmul.f32 %v2576_v3, %v2576_v3  ;;  %v2708_v22 = vmul.f32 %v11455_v52, %v2576_v3 }
 0x498   : > { %v2746_v42 = vpack.c.bf16 %v2692_v44, %v2691_v17  ;;  %v2747_v4 = vpack.c.bf16 %v2708_v22, %v2707_v25  ;;  %v2620_v44 = vrot.slane %v11200_v11, 7 }
 0x499   : > { %v2540_v58 = vpop.permute.xlu1 %2539  ;;  %v2538_v37 = vpop.permute.xlu0 %2537 }
 0x49a   : > { %v2558_v29 = vsub.f32 %v2508_v6, %v2540_v58  ;;  %v2557_v47 = vsub.f32 %v2506_v32, %v2538_v37  ;;  %2813 = vmatpush.bf16.msra.mxu0 %v2746_v42  ;;  %6807 = vmatpush.bf16.msra.mxu2 %v2746_v42  ;;  %v2530_v32 = vpop.permute.xlu2 %2529  ;;  %v2602_v58 = vsel %vm17072_vm13, %v2585_v39, %v2586_v9  ;;  %v2615_v9 = vrot.slane %v11089_v31, 7  ;;  %vm17086_vm13 = vmmov %vm17060_vm3 }
 0x49b   : > { %2862 = vmatpush.bf16.msra.mxu1 %v2747_v4  ;;  %6815 = vmatpush.bf16.msra.mxu3 %v2747_v4  ;;  %v2635_v53 = vsel %vm17075_vm11, %v2620_v44, %v2621_v24  ;;  %vm17089_vm11 = vmmov %vm17065_vm0 }
 0x49c   : > { %v2574_v23 = vmul.f32 0.5, %v2558_v29  ;;  %v2573_v30 = vmul.f32 0.5, %v2557_v47  ;;  %v2584_v29 = vrot.slane %v16975_v10, 1  ;;  %v2618_v47 = vrot.slane %v11100_v34, 7 }
 0x49d   : > { %v2654_v61 = vsub.f32 %v2601_v59, %v2635_v53 }
 0x49e   : > { %v2690_v16 = vmul.f32 %v2574_v23, %v2574_v23  ;;  %v2706_v49 = vmul.f32 %v11463_v19, %v2574_v23  ;;  %v2689_v14 = vmul.f32 %v2573_v30, %v2573_v30  ;;  %v2705_v6 = vmul.f32 %v11475_v35, %v2573_v30 }
 0x49f   : > { %v2617_v23 = vrot.slane %v11152_v13, 7  ;;  %v2603_v41 = vsel %vm17060_vm3, %v2584_v29, %v2585_v39  ;;  %v2604_v24 = vsel %vm17077_vm10, %v2583_v63, %v2584_v29  ;;  %v2582_v39 = vrot.slane %v11152_v13, 1  ;;  %vm17107_vm10 = vmmov %vm17065_vm0 }
 0x4a0   : > { %v2743_v0 = vpack.c.bf16 %v2690_v16, %v2689_v14  ;;  %v2744_v18 = vpack.c.bf16 %v2706_v49, %v2705_v6 }
 0x4a1   : > { %v2534_v1 = vpop.permute.xlu1 %2533  ;;  %v2504_v40 = vpop.permute.xlu0 %2503  ;;  %v2638_v6 = vsel %vm17078_vm2, %v2617_v23, %v2618_v47  ;;  %v2605_v59 = vsel %vm17080_vm7, %v2582_v39, %v2583_v63  ;;  %vm17108_vm2 = vmmov %vm17060_vm3  ;;  %vm3763_vm7 = vcmp.lt.s32.totalorder %v17059_v43, 6 }
 0x4a2   : > { %v2555_v2 = vsub.f32 %v11439_v38, %v2534_v1  ;;  %v2556_v48 = vsub.f32 %v2504_v40, %v2536_v62  ;;  %2814 = vmatpush.bf16.msra.mxu0 %v2743_v0  ;;  %6808 = vmatpush.bf16.msra.mxu2 %v2743_v0  ;;  %v2619_v38 = vrot.slane %v16975_v10, 7  ;;  %v2496_v45 = vpop.permute.xlu2 %2495  ;;  %v11518_v1 = vmul.f32 0.5, %v2654_v61 }
 0x4a3   : > { %2863 = vmatpush.bf16.msra.mxu1 %v2744_v18  ;;  %6816 = vmatpush.bf16.msra.mxu3 %v2744_v18 }
 0x4a4   : > { %v2571_v28 = vmul.f32 0.5, %v2555_v2  ;;  %v2572_v3 = vmul.f32 0.5, %v2556_v48  ;;  %v2636_v37 = vsel %vm17073_vm15, %v2619_v38, %v2620_v44  ;;  %v2637_v14 = vsel %vm17076_vm1, %v2618_v47, %v2619_v38  ;;  %vm17087_vm15 = vmmov %vm17065_vm0 }
 0x4a5   : > { %v2653_v30 = vsub.f32 %v2602_v58, %v2636_v37  ;;  %v2652_v2 = vsub.f32 %v2603_v41, %v2637_v14  ;;  %v2651_v48 = vsub.f32 %v2604_v24, %v2638_v6  ;;  %vm17106_vm1 = vmmov %vm17065_vm0 }
 0x4a6   : > { %v2687_v54 = vmul.f32 %v2571_v28, %v2571_v28  ;;  %v2703_v36 = vmul.f32 %v11481_v20, %v2571_v28  ;;  %v2688_v17 = vmul.f32 %v2572_v3, %v2572_v3  ;;  %v2704_v25 = vmul.f32 %v11484_v33, %v2572_v3 }
 0x4a7   : > { %v11516_v0 = vmul.f32 0.5, %v2653_v30  ;;  %v2581_v3 = vrot.slane %v16957_v50, 1  ;;  %v11538_v29 = vmul.f32 0.5, %v2651_v48 }
 0x4a8   : > { %v2740_v22 = vpack.c.bf16 %v2688_v17, %v2687_v54  ;;  %v2741_v62 = vpack.c.bf16 %v2704_v25, %v2703_v36  ;;  %v2616_v54 = vrot.slane %v16957_v50, 7 }
 0x4a9   : > { %v2500_v42 = vpop.permute.xlu1 %2499  ;;  %v2498_v4 = vpop.permute.xlu0 %2497  ;;  %v2606_v58 = vsel %vm17079_vm6, %v2581_v3, %v2582_v39  ;;  %vm17109_vm6 = vmmov %vm17108_vm2 }
 0x4aa   : > { %2815 = vmatpush.bf16.msra.mxu0 %v2740_v22  ;;  %6809 = vmatpush.bf16.msra.mxu2 %v2740_v22  ;;  %v2553_v21 = vsub.f32 %v2498_v4, %v2530_v32  ;;  %v2490_v28 = vpop.permute.xlu2 %2489  ;;  %v2640_v37 = vsel %vm17065_vm0, %v2615_v9, %v2616_v54  ;;  %v2639_v30 = vsel %vm17081_vm9, %v2616_v54, %v2617_v23  ;;  %vm3796_vm9 = vcmp.lt.s32.totalorder %v17059_v43, 2 }
 0x4ab   : > { %2864 = vmatpush.bf16.msra.mxu1 %v2741_v62  ;;  %6817 = vmatpush.bf16.msra.mxu3 %v2741_v62  ;;  %v11526_v62 = vmul.f32 0.5, %v2652_v2  ;;  %v2650_v41 = vsub.f32 %v2605_v59, %v2639_v30  ;;  %v11564_v59 = vmul.f32 %v11475_v35, %v11475_v35 }
 0x4ac   : > { %v2569_v18 = vmul.f32 0.5, %v2553_v21 }
 0x4ad   : > { %v11546_v48 = vmul.f32 0.5, %v2650_v41 }
 0x4ae   : > { %v2685_v36 = vmul.f32 %v2569_v18, %v2569_v18  ;;  %v2701_v17 = vmul.f32 %v11516_v0, %v2569_v18 }
 0x4b1   : > { %v2494_v16 = vpop.permute.xlu1 %2493  ;;  %v2532_v49 = vpop.permute.xlu0 %2531 }
 0x4b2   : > { %v2554_v32 = vsub.f32 %v2500_v42, %v2532_v49  ;;  %v2649_v49 = vsub.f32 %v2606_v58, %v2640_v37  ;;  %v2524_v63 = vpop.permute.xlu2 %2523  ;;  %v11556_v58 = vmul.f32 %v11453_v56, %v11453_v56  ;;  %v11560_v37 = vmul.f32 %v11455_v52, %v11455_v52 }
 0x4b4   : > { %v2570_v40 = vmul.f32 0.5, %v2554_v32  ;;  %v11544_v2 = vmul.f32 0.5, %v2649_v49  ;;  %v2748_v49 = vpack.c.bf16 %v11560_v37, %v11556_v58 }
 0x4b6   : > { %v2686_v25 = vmul.f32 %v2570_v40, %v2570_v40  ;;  %v2702_v38 = vmul.f32 %v11518_v1, %v2570_v40 }
 0x4b8   : > { %v2737_v44 = vpack.c.bf16 %v2686_v25, %v2685_v36  ;;  %v2738_v22 = vpack.c.bf16 %v2702_v38, %v2701_v17  ;;  %v2579_v17 = vrot.slane %v11116_v8, 1  ;;  %v2580_v25 = vrot.slane %v11089_v31, 1 }
 0x4b9   : > { %v2528_v42 = vpop.permute.xlu1 %2527  ;;  %v2526_v4 = vpop.permute.xlu0 %2525  ;;  %v2613_v38 = vrot.slane %v10960_v55, 7 }
 0x4ba   : > { %v2552_v53 = vsub.f32 %v2496_v45, %v2528_v42  ;;  %v2551_v47 = vsub.f32 %v2494_v16, %v2526_v4  ;;  %2816 = vmatpush.bf16.msra.mxu0 %v2737_v44  ;;  %6810 = vmatpush.bf16.msra.mxu2 %v2737_v44  ;;  %v2614_v44 = vrot.slane %v11116_v8, 7  ;;  %v2518_v41 = vpop.permute.xlu2 %2517 }
 0x4bb   : > { %2865 = vmatpush.bf16.msra.mxu1 %v2738_v22  ;;  %6818 = vmatpush.bf16.msra.mxu3 %v2738_v22 }
 0x4bc   : > { %v2568_v21 = vmul.f32 0.5, %v2552_v53  ;;  %v2567_v61 = vmul.f32 0.5, %v2551_v47  ;;  %v11568_v53 = vmul.f32 %v11463_v19, %v11463_v19  ;;  %v2642_v35 = vsel %vm17083_vm4, %v2613_v38, %v2614_v44  ;;  %vm17111_vm4 = vmmov %vm17108_vm2 }
 0x4bd   : > { %v2607_v19 = vsel %vm17084_vm14, %v2580_v25, %v2581_v3  ;;  %vm17112_vm14 = vmmov %vm17065_vm0 }
 0x4be   : > { %v2684_v14 = vmul.f32 %v2568_v21, %v2568_v21  ;;  %v2700_v24 = vmul.f32 %v11526_v62, %v2568_v21  ;;  %v2683_v6 = vmul.f32 %v2567_v61, %v2567_v61  ;;  %v2699_v45 = vmul.f32 %v11538_v29, %v2567_v61 }
 0x4bf   : > { %v2608_v61 = vsel %vm17082_vm5, %v2579_v17, %v2580_v25  ;;  %v2745_v52 = vpack.c.bf16 %v11568_v53, %v11564_v59  ;;  %v2713_v59 = vmul.f32 %v11544_v2, %v11544_v2  ;;  %v2714_v53 = vmul.f32 %v11546_v48, %v11546_v48  ;;  %vm17110_vm5 = vmmov %vm17065_vm0 }
 0x4c0   : > { %v2734_v18 = vpack.c.bf16 %v2684_v14, %v2683_v6  ;;  %v2735_v16 = vpack.c.bf16 %v2700_v24, %v2699_v45  ;;  %v2641_v14 = vsel %vm17085_vm8, %v2614_v44, %v2615_v9  ;;  %v2647_v24 = vsub.f32 %v2608_v61, %v2642_v35  ;;  %vm17113_vm8 = vmmov %vm17108_vm2 }
 0x4c1   : > { %v2522_v32 = vpop.permute.xlu1 %2521  ;;  %v2492_v40 = vpop.permute.xlu0 %2491  ;;  %v2648_v45 = vsub.f32 %v2607_v19, %v2641_v14 }
 0x4c2   : > { %v2549_v23 = vsub.f32 %v2490_v28, %v2522_v32  ;;  %v2550_v39 = vsub.f32 %v2492_v40, %v2524_v63  ;;  %2817 = vmatpush.bf16.msra.mxu0 %v2734_v18  ;;  %6811 = vmatpush.bf16.msra.mxu2 %v2734_v18  ;;  %v2578_v63 = vrot.slane %v10960_v55, 1  ;;  %v2612_v18 = vrot.slane %v16964_v5, 7  ;;  %v2484_v37 = vpop.permute.xlu2 %2483 }
 0x4c3   : > { %2866 = vmatpush.bf16.msra.mxu1 %v2735_v16  ;;  %6819 = vmatpush.bf16.msra.mxu3 %v2735_v16  ;;  %v11588_v16 = vmul.f32 0.5, %v2647_v24 }
 0x4c4   : > { %v2565_v54 = vmul.f32 0.5, %v2549_v23  ;;  %v2566_v36 = vmul.f32 0.5, %v2550_v39  ;;  %v11590_v23 = vmul.f32 0.5, %v2648_v45  ;;  %v2609_v39 = vsel %vm17086_vm13, %v2578_v63, %v2579_v17  ;;  %vm17114_vm13 = vmmov %vm17108_vm2 }
 0x4c5   : > { %v2644_v25 = vsel %vm17089_vm11, %v2627_v46, %v2612_v18 }
 0x4c6   : > { %v2681_v22 = vmul.f32 %v2565_v54, %v2565_v54  ;;  %v2697_v28 = vmul.f32 %v11544_v2, %v2565_v54  ;;  %v2682_v42 = vmul.f32 %v2566_v36, %v2566_v36  ;;  %v2698_v4 = vmul.f32 %v11546_v48, %v2566_v36 }
 0x4c7   : > { %v2643_v54 = vsel %vm17087_vm15, %v2612_v18, %v2613_v38  ;;  %v2610_v36 = vsel %vm17088_vm12, %v2577_v26, %v2578_v63  ;;  %v2719_v38 = vmul.f32 %v11481_v20, %v11481_v20  ;;  %v2720_v26 = vmul.f32 %v11484_v33, %v11484_v33  ;;  %vm17115_vm15 = vmmov %vm17065_vm0 }
 0x4c8   : > { %v2731_v47 = vpack.c.bf16 %v2682_v42, %v2681_v22  ;;  %v2732_v30 = vpack.c.bf16 %v2698_v4, %v2697_v28  ;;  %v2646_v42 = vsub.f32 %v2609_v39, %v2643_v54  ;;  %v2645_v17 = vsub.f32 %v2610_v36, %v2644_v25 }
 0x4c9   : > { %v2488_v21 = vpop.permute.xlu1 %2487  ;;  %v2486_v56 = vpop.permute.xlu0 %2485  ;;  %v2718_v39 = vmul.f32 %v11518_v1, %v11518_v1  ;;  %v2716_v54 = vmul.f32 %v11526_v62, %v11526_v62  ;;  %v2733_v1 = vpack.c.bf16 %v2714_v53, %v2713_v59  ;;  %v2711_v62 = vmul.f32 %v11588_v16, %v11588_v16 }
 0x4ca   : > { %2818 = vmatpush.bf16.msra.mxu0 %v2731_v47  ;;  %6812 = vmatpush.bf16.msra.mxu2 %v2731_v47  ;;  %v2547_v6 = vsub.f32 %v2486_v56, %v2518_v41  ;;  %v2662_v56 = vmul.f32 0.5, %v2646_v42  ;;  %v2661_v35 = vmul.f32 0.5, %v2645_v17  ;;  %v11641_v42 = vld [vmem:[#allocation8 + $0x38] sm:$0xff]  ;;  %v6801_v17 = vld [vmem:[#allocation10 + $0x30] sm:$0xff] }
 0x4cb   : > { %2867 = vmatpush.bf16.msra.mxu1 %v2732_v30  ;;  %6820 = vmatpush.bf16.msra.mxu3 %v2732_v30 }
 0x4cc   : > { %v2563_v32 = vmul.f32 0.5, %v2547_v6  ;;  %v2709_v48 = vmul.f32 %v2661_v35, %v2661_v35  ;;  %v2710_v25 = vmul.f32 %v2662_v56, %v2662_v56 }
 0x4ce   : > { %v2679_v22 = vmul.f32 %v2563_v32, %v2563_v32  ;;  %v2695_v28 = vmul.f32 %v11588_v16, %v2563_v32  ;;  %v6787_v32 = vld [vmem:[#allocation8] sm:$0xff]  ;;  %v6790_v16 = vld [vmem:[#allocation8 + $0x18] sm:$0xff] }
 0x4d1   : > { %v2482_v40 = vpop.permute.xlu1 %2481  ;;  %v2520_v3 = vpop.permute.xlu0 %2519 }
 0x4d2   : > { %v2548_v9 = vsub.f32 %v2488_v21, %v2520_v3  ;;  %v2742_v21 = vpack.c.bf16 %v2720_v26, %v2719_v38  ;;  %v11610_v3 = vld [vmem:[#allocation8 + $0x20] sm:$0xff]  ;;  %v6798_v38 = vld [vmem:[#allocation10 + $0x18] sm:$0xff]  ;;  %v6797_v26 = vld [vmem:[#allocation10 + $0x10] sm:$0xff] }
 0x4d4   : > { %v2564_v44 = vmul.f32 0.5, %v2548_v9 }
 0x4d6   : > { %v2680_v4 = vmul.f32 %v2564_v44, %v2564_v44  ;;  %v2696_v58 = vmul.f32 %v11590_v23, %v2564_v44  ;;  %v2727_v44 = vpack.c.bf16 %v2710_v25, %v2709_v48 }
 0x4d8   : > { %v2728_v47 = vpack.c.bf16 %v2680_v4, %v2679_v22  ;;  %v2729_v30 = vpack.c.bf16 %v2696_v58, %v2695_v28  ;;  %v6789_v22 = vld [vmem:[#allocation8 + $0x10] sm:$0xff]  ;;  %v6800_v4 = vld [vmem:[#allocation10 + $0x28] sm:$0xff]  ;;  %v6799_v58 = vld [vmem:[#allocation10 + $0x20] sm:$0xff] }
 0x4d9   : > { %v2516_v46 = vpop.permute.xlu1 %2515  ;;  %v2514_v61 = vpop.permute.xlu0 %2513  ;;  %v11637_v28 = vld [vmem:[#allocation8 + $0x30] sm:$0xff] }
 0x4da   : > { %v2546_v41 = vsub.f32 %v2484_v37, %v2516_v46  ;;  %v2545_v19 = vsub.f32 %v2482_v40, %v2514_v61  ;;  %2819 = vmatpush.bf16.msra.mxu0 %v2728_v47  ;;  %6813 = vmatpush.bf16.msra.mxu2 %v2728_v47  ;;  %v2717_v40 = vmul.f32 %v11516_v0, %v11516_v0  ;;  %v6788_v0 = vld [vmem:[#allocation8 + $0x8] sm:$0xff]  ;;  %v6795_v47 = vld [vmem:[#allocation10] sm:$0xff] }
 0x4db   : > { %2868 = vmatpush.bf16.msra.mxu1 %v2729_v30  ;;  %6821 = vmatpush.bf16.msra.mxu3 %v2729_v30  ;;  %v6796_v37 = vld [vmem:[#allocation10 + $0x8] sm:$0xff] }
 0x4dc   : > { %v2562_v14 = vmul.f32 0.5, %v2546_v41  ;;  %v2561_v24 = vmul.f32 0.5, %v2545_v19  ;;  %v2739_v9 = vpack.c.bf16 %v2718_v39, %v2717_v40 }
 0x4de   : > { %v2678_v20 = vmul.f32 %v2562_v14, %v2562_v14  ;;  %v2694_v6 = vmul.f32 %v2662_v56, %v2562_v14  ;;  %v2677_v45 = vmul.f32 %v2561_v24, %v2561_v24  ;;  %v2693_v33 = vmul.f32 %v2661_v35, %v2561_v24 }
 0x4e0   : > { %v2725_v63 = vpack.c.bf16 %v2678_v20, %v2677_v45  ;;  %v2726_v18 = vpack.c.bf16 %v2694_v6, %v2693_v33 }
 0x4e2   : > { %2820 = vmatpush.bf16.msra.mxu0 %v2725_v63  ;;  %6814 = vmatpush.bf16.msra.mxu2 %v2725_v63 }
 0x4e3   : > { %2869 = vmatpush.bf16.msra.mxu1 %v2726_v18  ;;  %6822 = vmatpush.bf16.msra.mxu3 %v2726_v18 }
 0x4e5   : > { %2821 = vmatmul.bf16.vlgmr.msra.gmra.mxu0 %v6787_v32  ;;  %2841 = vmatmul.bf16.vlgmr.msra.gmra.mxu2 %v11610_v3 }
 0x4e6   : > { %2911 = vmatpush.bf16.msrb.mxu2 %v2748_v49  ;;  %2870 = vmatmul.bf16.vlgmr.msra.gmra.mxu1 %v6787_v32  ;;  %v2715_v49 = vmul.f32 %v11538_v29, %v11538_v29  ;;  %v2712_v29 = vmul.f32 %v11590_v23, %v11590_v23  ;;  %v6802_v23 = vld [vmem:[#allocation10 + $0x38] sm:$0xff] }
 0x4e7   : > { %2890 = vmatmul.bf16.vlgmr.msra.gmra.mxu3 %v11610_v3  ;;  %3185 = vmatpush.bf16.msrb.mxu0 %v6802_v23 }
 0x4e8   : > { %v2736_v36 = vpack.c.bf16 %v2716_v54, %v2715_v49  ;;  %v2730_v2 = vpack.c.bf16 %v2712_v29, %v2711_v62  ;;  %3104 = vmatpush.bf16.msrb.mxu3 %v6802_v23  ;;  %3282 = vmatpush.bf16.msrb.mxu1 %v6802_v23 }
 0x4ea   : > { %2912 = vmatpush.bf16.msrb.mxu2 %v2745_v52  ;;  %v11629_v52 = vld [vmem:[#allocation8 + $0x28] sm:$0xff] }
 0x4eb   : > { %3186 = vmatpush.bf16.msrb.mxu0 %v6801_v17 }
 0x4ec   : > { %3105 = vmatpush.bf16.msrb.mxu3 %v6801_v17  ;;  %3283 = vmatpush.bf16.msrb.mxu1 %v6801_v17 }
 0x4ee   : > { %2913 = vmatpush.bf16.msrb.mxu2 %v2742_v21 }
 0x4ef   : > { %3187 = vmatpush.bf16.msrb.mxu0 %v6800_v4 }
 0x4f0   : > { %3106 = vmatpush.bf16.msrb.mxu3 %v6800_v4  ;;  %3284 = vmatpush.bf16.msrb.mxu1 %v6800_v4 }
 0x4f2   : > { %2914 = vmatpush.bf16.msrb.mxu2 %v2739_v9 }
 0x4f3   : > { %3188 = vmatpush.bf16.msrb.mxu0 %v6799_v58 }
 0x4f4   : > { %3107 = vmatpush.bf16.msrb.mxu3 %v6799_v58  ;;  %3285 = vmatpush.bf16.msrb.mxu1 %v6799_v58 }
 0x4f5   : > { %2826 = vmatmul.bf16.gmra.mxu0 %v6788_v0  ;;  %2846 = vmatmul.bf16.gmra.mxu2 %v11629_v52 }
 0x4f6   : > { %2915 = vmatpush.bf16.msrb.mxu2 %v2736_v36  ;;  %2875 = vmatmul.bf16.gmra.mxu1 %v6788_v0 }
 0x4f7   : > { %2895 = vmatmul.bf16.gmra.mxu3 %v11629_v52  ;;  %3189 = vmatpush.bf16.msrb.mxu0 %v6798_v38 }
 0x4f8   : > { %3108 = vmatpush.bf16.msrb.mxu3 %v6798_v38  ;;  %3286 = vmatpush.bf16.msrb.mxu1 %v6798_v38 }
 0x4fa   : > { %2916 = vmatpush.bf16.msrb.mxu2 %v2733_v1 }
 0x4fb   : > { %3190 = vmatpush.bf16.msrb.mxu0 %v6797_v26 }
 0x4fc   : > { %3109 = vmatpush.bf16.msrb.mxu3 %v6797_v26  ;;  %3287 = vmatpush.bf16.msrb.mxu1 %v6797_v26 }
 0x4fe   : > { %2917 = vmatpush.bf16.msrb.mxu2 %v2730_v2 }
 0x4ff   : > { %3191 = vmatpush.bf16.msrb.mxu0 %v6796_v37 }
 0x500   : > { %3110 = vmatpush.bf16.msrb.mxu3 %v6796_v37  ;;  %3288 = vmatpush.bf16.msrb.mxu1 %v6796_v37 }
 0x502   : > { %2918 = vmatpush.bf16.msrb.mxu2 %v2727_v44 }
 0x503   : > { %3192 = vmatpush.bf16.msrb.mxu0 %v6795_v47 }
 0x504   : > { %3111 = vmatpush.bf16.msrb.mxu3 %v6795_v47  ;;  %3289 = vmatpush.bf16.msrb.mxu1 %v6795_v47 }
 0x505   : > { %2831 = vmatmul.bf16.gmra.mxu0 %v6789_v22  ;;  %2851 = vmatmul.bf16.gmra.mxu2 %v11637_v28 }
 0x506   : > { %2880 = vmatmul.bf16.gmra.mxu1 %v6789_v22 }
 0x507   : > { %2900 = vmatmul.bf16.gmra.mxu3 %v11637_v28 }
 0x515   : > { %2836 = vmatmul.bf16.gmra.mxu0 %v6790_v16  ;;  %2856 = vmatmul.bf16.gmra.mxu2 %v11641_v42 }
 0x516   : > { %2885 = vmatmul.bf16.gmra.mxu1 %v6790_v16 }
 0x517   : > { %2905 = vmatmul.bf16.gmra.mxu3 %v11641_v42 }
 0x525   : > { %2919 = vmatmul.bf16.vlgmr.msrb.gmra.mxu2 %v6787_v32 }
 0x535   : > { %2924 = vmatmul.bf16.gmra.mxu2 %v6788_v0 }
 0x545   : > { %2929 = vmatmul.bf16.gmra.mxu2 %v6789_v22 }
 0x555   : > { %2934 = vmatmul.bf16.gmra.mxu2 %v6790_v16 }
 0x562   : > { %v2822_v30 = vpop.f32.mrf.mxu0 }
 0x563   : > { %v2871_v21 = vpop.f32.mrf.mxu1 }
 0x564   : > { %v2960_v46 = vpack.c.bf16 %v2871_v21, %v2822_v30 }
 0x565   : > { %2939 = vmatmul.bf16.gmra.mxu2 %v11610_v3 }
 0x566   : > { %v3024_v35 = vunpack.c.l.b16 %v2960_v46  ;;  %v3153_v19 = vunpack.c.h.b16 %v2960_v46 }
 0x568   : > { %v11646_v61 = vpop.f32.mrf.mxu2 }
 0x56a   : > { %v2824_v56 = vpop.f32.mrf.mxu0  ;;  %v2891_v4 = vpop.f32.mrf.mxu3 }
 0x56b   : > { %v2873_v41 = vpop.f32.mrf.mxu1 }
 0x56c   : > { %v2962_v14 = vpack.c.bf16 %v2873_v41, %v2824_v56 }
 0x56e   : > { %v3025_v24 = vunpack.c.l.b16 %v2962_v14  ;;  %v3154_v20 = vunpack.c.h.b16 %v2962_v14 }
 0x570   : > { %v2844_v6 = vpop.f32.mrf.mxu2  ;;  %v3040_v45 = vpack.c.b16 %v3025_v24, %v3024_v35  ;;  %v3169_v33 = vpack.c.b16 %v3154_v20, %v3153_v19 }
 0x572   : > { %3112 = vmatmul.bf16.vlgmr.msrb.gmra.mxu3 %v3040_v45  ;;  %3193 = vmatmul.bf16.vlgmr.msrb.gmra.mxu0 %v3169_v33  ;;  %v2827_v63 = vpop.f32.mrf.mxu0  ;;  %v2893_v21 = vpop.f32.mrf.mxu3 }
 0x573   : > { %v2876_v18 = vpop.f32.mrf.mxu1 }
 0x574   : > { %v2964_v32 = vpack.c.bf16 %v2876_v18, %v2827_v63  ;;  %v2978_v18 = vpack.c.bf16 %v2893_v21, %v2844_v6 }
 0x575   : > { %2944 = vmatmul.bf16.gmra.mxu2 %v11629_v52 }
 0x576   : > { %v3026_v9 = vunpack.c.l.b16 %v2964_v32  ;;  %v3155_v49 = vunpack.c.h.b16 %v2964_v32  ;;  %v2976_v32 = vpack.c.bf16 %v2891_v4, %v11646_v61 }
 0x578   : > { %v11649_v3 = vpop.f32.mrf.mxu2 }
 0x57a   : > { %v2829_v40 = vpop.f32.mrf.mxu0  ;;  %v2896_v63 = vpop.f32.mrf.mxu3 }
 0x57b   : > { %v2878_v39 = vpop.f32.mrf.mxu1  ;;  %v2980_v61 = vpack.c.bf16 %v2896_v63, %v11649_v3 }
 0x57c   : > { %v2966_v54 = vpack.c.bf16 %v2878_v39, %v2829_v40  ;;  %v3033_v40 = vunpack.c.l.b16 %v2978_v18  ;;  %v3162_v39 = vunpack.c.h.b16 %v2978_v18 }
 0x57e   : > { %v3027_v36 = vunpack.c.l.b16 %v2966_v54  ;;  %v3156_v59 = vunpack.c.h.b16 %v2966_v54  ;;  %v3161_v54 = vunpack.c.h.b16 %v2976_v32 }
 0x580   : > { %v2849_v53 = vpop.f32.mrf.mxu2  ;;  %v3041_v0 = vpack.c.b16 %v3027_v36, %v3026_v9  ;;  %v3170_v1 = vpack.c.b16 %v3156_v59, %v3155_v49  ;;  %v3032_v49 = vunpack.c.l.b16 %v2976_v32 }
 0x582   : > { %3117 = vmatmul.bf16.gmra.mxu3 %v3041_v0  ;;  %3198 = vmatmul.bf16.gmra.mxu0 %v3170_v1  ;;  %v2832_v62 = vpop.f32.mrf.mxu0  ;;  %v2898_v9 = vpop.f32.mrf.mxu3  ;;  %v3044_v0 = vpack.c.b16 %v3033_v40, %v3032_v49  ;;  %v3173_v1 = vpack.c.b16 %v3162_v39, %v3161_v54 }
 0x583   : > { %v2881_v29 = vpop.f32.mrf.mxu1  ;;  %v2982_v6 = vpack.c.bf16 %v2898_v9, %v2849_v53 }
 0x584   : > { %v2968_v52 = vpack.c.bf16 %v2881_v29, %v2832_v62 }
 0x585   : > { %2949 = vmatmul.bf16.gmra.mxu2 %v11637_v28 }
 0x586   : > { %v3028_v44 = vunpack.c.l.b16 %v2968_v52  ;;  %v3157_v22 = vunpack.c.h.b16 %v2968_v52 }
 0x588   : > { %v11652_v2 = vpop.f32.mrf.mxu2 }
 0x58a   : > { %v2834_v48 = vpop.f32.mrf.mxu0 }
 0x58b   : > { %v2883_v25 = vpop.f32.mrf.mxu1 }
 0x58c   : > { %v2970_v16 = vpack.c.bf16 %v2883_v25, %v2834_v48  ;;  %v2901_v25 = vpop.f32.mrf.mxu3 }
 0x58d   : > { %v2984_v3 = vpack.c.bf16 %v2901_v25, %v11652_v2 }
 0x58e   : > { %v3029_v23 = vunpack.c.l.b16 %v2970_v16  ;;  %v3158_v17 = vunpack.c.h.b16 %v2970_v16  ;;  %v3164_v16 = vunpack.c.h.b16 %v2982_v6 }
 0x590   : > { %v11654_v58 = vpop.f32.mrf.mxu2  ;;  %v3042_v38 = vpack.c.b16 %v3029_v23, %v3028_v44  ;;  %v3171_v26 = vpack.c.b16 %v3158_v17, %v3157_v22  ;;  %v3035_v22 = vunpack.c.l.b16 %v2982_v6  ;;  %v3034_v23 = vunpack.c.l.b16 %v2980_v61 }
 0x591   : > { %v3163_v17 = vunpack.c.h.b16 %v2980_v61 }
 0x592   : > { %3122 = vmatmul.bf16.gmra.mxu3 %v3042_v38  ;;  %3203 = vmatmul.bf16.gmra.mxu0 %v3171_v26  ;;  %v2837_v37 = vpop.f32.mrf.mxu0  ;;  %v3045_v26 = vpack.c.b16 %v3035_v22, %v3034_v23 }
 0x593   : > { %v2886_v47 = vpop.f32.mrf.mxu1 }
 0x594   : > { %v2972_v28 = vpack.c.bf16 %v2886_v47, %v2837_v37  ;;  %v3174_v37 = vpack.c.b16 %v3164_v16, %v3163_v17  ;;  %v2903_v47 = vpop.f32.mrf.mxu3 }
 0x595   : > { %2954 = vmatmul.bf16.gmra.mxu2 %v11641_v42  ;;  %v2986_v53 = vpack.c.bf16 %v2903_v47, %v11654_v58 }
 0x596   : > { %v3030_v41 = vunpack.c.l.b16 %v2972_v28  ;;  %v3159_v35 = vunpack.c.h.b16 %v2972_v28 }
 0x598   : > { %v11657_v30 = vpop.f32.mrf.mxu2 }
 0x59a   : > { %v2839_v46 = vpop.f32.mrf.mxu0 }
 0x59b   : > { %v2888_v56 = vpop.f32.mrf.mxu1 }
 0x59c   : > { %v2974_v19 = vpack.c.bf16 %v2888_v56, %v2839_v46 }
 0x59e   : > { %v3031_v14 = vunpack.c.l.b16 %v2974_v19  ;;  %v3160_v24 = vunpack.c.h.b16 %v2974_v19  ;;  %v3037_v19 = vunpack.c.l.b16 %v2986_v53 }
 0x5a0   : > { %v11659_v20 = vpop.f32.mrf.mxu2  ;;  %v3043_v45 = vpack.c.b16 %v3031_v14, %v3030_v41  ;;  %v3172_v33 = vpack.c.b16 %v3160_v24, %v3159_v35  ;;  %v2906_v35 = vpop.f32.mrf.mxu3  ;;  %v3166_v14 = vunpack.c.h.b16 %v2986_v53  ;;  %v3036_v24 = vunpack.c.l.b16 %v2984_v3 }
 0x5a1   : > { %v2988_v54 = vpack.c.bf16 %v2906_v35, %v11657_v30 }
 0x5a2   : > { %3127 = vmatmul.bf16.gmra.mxu3 %v3043_v45  ;;  %3208 = vmatmul.bf16.gmra.mxu0 %v3172_v33  ;;  %v3165_v45 = vunpack.c.h.b16 %v2984_v3  ;;  %v3046_v18 = vpack.c.b16 %v3037_v19, %v3036_v24 }
 0x5a8   : > { %v2920_v42 = vpop.f32.mrf.mxu2  ;;  %v2908_v9 = vpop.f32.mrf.mxu3 }
 0x5a9   : > { %v2961_v36 = vpack.c.bf16 %v2920_v42, %v2920_v42  ;;  %v3175_v42 = vpack.c.b16 %v3166_v14, %v3165_v45  ;;  %v2990_v58 = vpack.c.bf16 %v2908_v9, %v11659_v20 }
 0x5ab   : > { %v3250_v29 = vunpack.c.l.b16 %v2961_v36  ;;  %v3039_v36 = vunpack.c.l.b16 %v2990_v58 }
 0x5b0   : > { %v2922_v59 = vpop.f32.mrf.mxu2 }
 0x5b1   : > { %v2963_v62 = vpack.c.bf16 %v2922_v59, %v2922_v59  ;;  %v3168_v59 = vunpack.c.h.b16 %v2990_v58 }
 0x5b2   : > { %3132 = vmatmul.bf16.gmra.mxu3 %v3044_v0  ;;  %3213 = vmatmul.bf16.gmra.mxu0 %v3173_v1  ;;  %v3038_v0 = vunpack.c.l.b16 %v2988_v54  ;;  %v3167_v1 = vunpack.c.h.b16 %v2988_v54 }
 0x5b3   : > { %v3251_v52 = vunpack.c.l.b16 %v2963_v62 }
 0x5b5   : > { %v3266_v48 = vpack.c.b16 %v3251_v52, %v3250_v29  ;;  %v3047_v52 = vpack.c.b16 %v3039_v36, %v3038_v0 }
 0x5b7   : > { %3290 = vmatmul.bf16.vlgmr.msrb.gmra.mxu1 %v3266_v48  ;;  %v3176_v48 = vpack.c.b16 %v3168_v59, %v3167_v1 }
 0x5b8   : > { %v2925_v44 = vpop.f32.mrf.mxu2 }
 0x5b9   : > { %v2965_v4 = vpack.c.bf16 %v2925_v44, %v2925_v44 }
 0x5bb   : > { %v3252_v21 = vunpack.c.l.b16 %v2965_v4 }
 0x5c0   : > { %v2927_v38 = vpop.f32.mrf.mxu2 }
 0x5c1   : > { %v2967_v28 = vpack.c.bf16 %v2927_v38, %v2927_v38 }
 0x5c2   : > { %3137 = vmatmul.bf16.gmra.mxu3 %v3045_v26  ;;  %3218 = vmatmul.bf16.gmra.mxu0 %v3174_v37 }
 0x5c3   : > { %v3253_v46 = vunpack.c.l.b16 %v2967_v28 }
 0x5c5   : > { %v3267_v56 = vpack.c.b16 %v3253_v46, %v3252_v21 }
 0x5c7   : > { %3295 = vmatmul.bf16.gmra.mxu1 %v3267_v56 }
 0x5c8   : > { %v2930_v41 = vpop.f32.mrf.mxu2 }
 0x5c9   : > { %v2969_v33 = vpack.c.bf16 %v2930_v41, %v2930_v41 }
 0x5cb   : > { %v3254_v40 = vunpack.c.l.b16 %v2969_v33 }
 0x5d0   : > { %v2932_v63 = vpop.f32.mrf.mxu2 }
 0x5d1   : > { %v2971_v32 = vpack.c.bf16 %v2932_v63, %v2932_v63 }
 0x5d2   : > { %3142 = vmatmul.bf16.gmra.mxu3 %v3046_v18  ;;  %3223 = vmatmul.bf16.gmra.mxu0 %v3175_v42 }
 0x5d3   : > { %v3255_v39 = vunpack.c.l.b16 %v2971_v32 }
 0x5d5   : > { %v3268_v49 = vpack.c.b16 %v3255_v39, %v3254_v40 }
 0x5d7   : > { %3300 = vmatmul.bf16.gmra.mxu1 %v3268_v49 }
 0x5d8   : > { %v2935_v2 = vpop.f32.mrf.mxu2 }
 0x5d9   : > { %v2973_v62 = vpack.c.bf16 %v2935_v2, %v2935_v2 }
 0x5db   : > { %v3256_v6 = vunpack.c.l.b16 %v2973_v62 }
 0x5e0   : > { %v2937_v29 = vpop.f32.mrf.mxu2 }
 0x5e1   : > { %v2975_v25 = vpack.c.bf16 %v2937_v29, %v2937_v29 }
 0x5e2   : > { %3147 = vmatmul.bf16.gmra.mxu3 %v3047_v52  ;;  %3228 = vmatmul.bf16.gmra.mxu0 %v3176_v48 }
 0x5e3   : > { %v3257_v44 = vunpack.c.l.b16 %v2975_v25 }
 0x5e5   : > { %v3269_v61 = vpack.c.b16 %v3257_v44, %v3256_v6  ;;  %v17090_v44 = vld [vmem:[#allocation23_spill] sm:$0xff] }
 0x5e7   : > { %3305 = vmatmul.bf16.gmra.mxu1 %v3269_v61 }
 0x5e8   : > { %v2940_v22 = vpop.f32.mrf.mxu2 }
 0x5e9   : > { %v2977_v20 = vpack.c.bf16 %v2940_v22, %v2940_v22 }
 0x5eb   : > { %v3258_v30 = vunpack.c.l.b16 %v2977_v20 }
 0x5ef   : > { %v3194_v45 = vpop.f32.mrf.mxu0 }
 0x5f0   : > { %v2942_v16 = vpop.f32.mrf.mxu2  ;;  %v3347_v62 = vmul.f32 %v3194_v45, %v3194_v45  ;;  %v17092_v45 = vld [vmem:[#allocation25_spill] sm:$0xff] }
 0x5f1   : > { %v2979_v23 = vpack.c.bf16 %v2942_v16, %v2942_v16 }
 0x5f3   : > { %v3259_v17 = vunpack.c.l.b16 %v2979_v23 }
 0x5f5   : > { %v3270_v4 = vpack.c.b16 %v3259_v17, %v3258_v30  ;;  %v3113_v24 = vpop.f32.mrf.mxu3 }
 0x5f7   : > { %3310 = vmatmul.bf16.gmra.mxu1 %v3270_v4  ;;  %v3196_v40 = vpop.f32.mrf.mxu0 }
 0x5f8   : > { %v2945_v38 = vpop.f32.mrf.mxu2  ;;  %v3348_v23 = vmul.f32 %v3196_v40, %v3196_v40 }
 0x5f9   : > { %v2981_v26 = vpack.c.bf16 %v2945_v38, %v2945_v38 }
 0x5fb   : > { %v3260_v28 = vunpack.c.l.b16 %v2981_v26 }
 0x5fd   : > { %v3115_v18 = vpop.f32.mrf.mxu3 }
 0x5ff   : > { %v3199_v2 = vpop.f32.mrf.mxu0 }
 0x600   : > { %v2947_v37 = vpop.f32.mrf.mxu2 }
 0x601   : > { %v2983_v47 = vpack.c.bf16 %v2947_v37, %v2947_v37 }
 0x603   : > { %v3261_v21 = vunpack.c.l.b16 %v2983_v47  ;;  %v17091_v47 = vld [vmem:[#allocation24_spill] sm:$0xff] }
 0x605   : > { %v3271_v46 = vpack.c.b16 %v3261_v21, %v3260_v28  ;;  %v3118_v58 = vpop.f32.mrf.mxu3 }
 0x607   : > { %3315 = vmatmul.bf16.gmra.mxu1 %v3271_v46  ;;  %v3201_v1 = vpop.f32.mrf.mxu0 }
 0x608   : > { %v2950_v56 = vpop.f32.mrf.mxu2 }
 0x609   : > { %v2985_v53 = vpack.c.bf16 %v2950_v56, %v2950_v56  ;;  %v3349_v56 = vmul.f32 %v3199_v2, %v3199_v2 }
 0x60b   : > { %v3262_v35 = vunpack.c.l.b16 %v2985_v53 }
 0x60d   : > { %v3120_v54 = vpop.f32.mrf.mxu3 }
 0x60f   : > { %v3204_v17 = vpop.f32.mrf.mxu0 }
 0x610   : > { %v2952_v41 = vpop.f32.mrf.mxu2 }
 0x611   : > { %v2987_v3 = vpack.c.bf16 %v2952_v41, %v2952_v41 }
 0x613   : > { %v3263_v19 = vunpack.c.l.b16 %v2987_v3 }
 0x615   : > { %v3272_v14 = vpack.c.b16 %v3263_v19, %v3262_v35  ;;  %v3123_v16 = vpop.f32.mrf.mxu3 }
 0x617   : > { %3320 = vmatmul.bf16.gmra.mxu1 %v3272_v14  ;;  %v3206_v19 = vpop.f32.mrf.mxu0 }
 0x618   : > { %v2955_v33 = vpop.f32.mrf.mxu2 }
 0x619   : > { %v2989_v63 = vpack.c.bf16 %v2955_v33, %v2955_v33 }
 0x61b   : > { %v3264_v39 = vunpack.c.l.b16 %v2989_v63 }
 0x61d   : > { %v3125_v41 = vpop.f32.mrf.mxu3 }
 0x620   : > { %v2957_v42 = vpop.f32.mrf.mxu2 }
 0x621   : > { %v2991_v32 = vpack.c.bf16 %v2957_v42, %v2957_v42  ;;  %v3350_v42 = vmul.f32 %v3201_v1, %v3201_v1 }
 0x623   : > { %v3265_v9 = vunpack.c.l.b16 %v2991_v32 }
 0x625   : > { %v3273_v49 = vpack.c.b16 %v3265_v9, %v3264_v39  ;;  %v3128_v9 = vpop.f32.mrf.mxu3 }
 0x627   : > { %3325 = vmatmul.bf16.gmra.mxu1 %v3273_v49 }
 0x634   : > { %v3291_v36 = vpop.f32.mrf.mxu1 }
 0x635   : > { %v3331_v59 = vmul.f32 %v3291_v36, %v3113_v24  ;;  %v3379_v0 = vadd.f32 %v3291_v36, %v3113_v24  ;;  %v17093_v36 = vld [vmem:[#allocation26_spill] sm:$0xff] }
 0x637   : > { %v3395_v29 = vmul.f32 %v3379_v0, %v3379_v0  ;;  %v3363_v52 = vsub.f32 %v3331_v59, %v3347_v62 }
 0x639   : > { %v3411_v48 = vmul.f32 0.05, %v3395_v29 }
 0x63b   : > { %v3427_v25 = vsub.f32 %v3363_v52, %v3411_v48 }
 0x63c   : > { %v3293_v6 = vpop.f32.mrf.mxu1 }
 0x63d   : > { %v11668_v61 = vmul.f32 %v3427_v25, %v17090_v44  ;;  %v3332_v22 = vmul.f32 %v3293_v6, %v3115_v18  ;;  %v3380_v20 = vadd.f32 %v3293_v6, %v3115_v18  ;;  %v3130_v25 = vpop.f32.mrf.mxu3  ;;  %v17094_v44 = vld [vmem:[#allocation27_spill] sm:$0xff] }
 0x63f   : > { %v3396_v30 = vmul.f32 %v3380_v20, %v3380_v20  ;;  %3491 = vrot.lane.b32.xlu0 %v11668_v61, %s7980_s14  ;;  %3459 = vrot.lane.b32.xlu2 %v11668_v61, %s7981_s26  ;;  %v3364_v4 = vsub.f32 %v3332_v22, %v3348_v23 }
 0x641   : > { %v3412_v38 = vmul.f32 0.05, %v3396_v30 }
 0x643   : > { %v3428_v26 = vsub.f32 %v3364_v4, %v3412_v38 }
 0x644   : > { %v3296_v37 = vpop.f32.mrf.mxu1 }
 0x645   : > { %v11675_v28 = vmul.f32 %v3428_v26, %v17091_v47  ;;  %v3333_v21 = vmul.f32 %v3296_v37, %v3118_v58  ;;  %v3381_v46 = vadd.f32 %v3296_v37, %v3118_v58  ;;  %v3209_v58 = vpop.f32.mrf.mxu0  ;;  %v17095_v47 = vld [vmem:[#allocation28_spill] sm:$0xff] }
 0x647   : > { %v3397_v53 = vmul.f32 %v3381_v46, %v3381_v46  ;;  %3493 = vrot.lane.b32.xlu1 %v11675_v28, %s7980_s14  ;;  %3461 = vrot.lane.b32.xlu0 %v11675_v28, %s7981_s26  ;;  %v3365_v3 = vsub.f32 %v3333_v21, %v3349_v56 }
 0x649   : > { %v3413_v35 = vmul.f32 0.05, %v3397_v53  ;;  %v3133_v53 = vpop.f32.mrf.mxu3 }
 0x64b   : > { %v3429_v14 = vsub.f32 %v3365_v3, %v3413_v35 }
 0x64c   : > { %v3298_v24 = vpop.f32.mrf.mxu1 }
 0x64d   : > { %v11682_v33 = vmul.f32 %v3429_v14, %v17092_v45  ;;  %v3334_v63 = vmul.f32 %v3298_v24, %v3120_v54  ;;  %v3382_v18 = vadd.f32 %v3298_v24, %v3120_v54  ;;  %v3351_v54 = vmul.f32 %v3204_v17, %v3204_v17  ;;  %v3211_v30 = vpop.f32.mrf.mxu0 }
 0x64f   : > { %v3398_v32 = vmul.f32 %v3382_v18, %v3382_v18  ;;  %3495 = vrot.lane.b32.xlu2 %v11682_v33, %s7980_s14  ;;  %3463 = vrot.lane.b32.xlu1 %v11682_v33, %s7981_s26  ;;  %v3366_v40 = vsub.f32 %v3334_v63, %v3350_v42  ;;  %v17096_v63 = vld [vmem:[#allocation29_spill] sm:$0xff] }
 0x651   : > { %v3414_v39 = vmul.f32 0.05, %v3398_v32 }
 0x653   : > { %v3430_v49 = vsub.f32 %v3366_v40, %v3414_v39  ;;  %v3354_v40 = vmul.f32 %v3211_v30, %v3211_v30 }
 0x654   : > { %v3301_v2 = vpop.f32.mrf.mxu1 }
 0x655   : > { %v11689_v59 = vmul.f32 %v3430_v49, %v17093_v36  ;;  %v3335_v0 = vmul.f32 %v3301_v2, %v3123_v16  ;;  %v3383_v62 = vadd.f32 %v3301_v2, %v3123_v16  ;;  %v3352_v16 = vmul.f32 %v3206_v19, %v3206_v19  ;;  %v3214_v35 = vpop.f32.mrf.mxu0 }
 0x657   : > { %v3399_v1 = vmul.f32 %v3383_v62, %v3383_v62  ;;  %3497 = vrot.lane.b32.xlu0 %v11689_v59, %s7980_s14  ;;  %3465 = vrot.lane.b32.xlu2 %v11689_v59, %s7981_s26  ;;  %v3367_v29 = vsub.f32 %v3335_v0, %v3351_v54  ;;  %v17097_v62 = vld [vmem:[#allocation30_spill] sm:$0xff] }
 0x659   : > { %v3415_v52 = vmul.f32 0.05, %v3399_v1 }
 0x65b   : > { %v3431_v48 = vsub.f32 %v3367_v29, %v3415_v52  ;;  %v3355_v52 = vmul.f32 %v3214_v35, %v3214_v35 }
 0x65c   : > { %v3303_v6 = vpop.f32.mrf.mxu1 }
 0x65d   : > { %v11696_v22 = vmul.f32 %v3431_v48, %v17094_v44  ;;  %v3336_v20 = vmul.f32 %v3303_v6, %v3125_v41  ;;  %v3384_v23 = vadd.f32 %v3303_v6, %v3125_v41  ;;  %v3353_v41 = vmul.f32 %v3209_v58, %v3209_v58  ;;  %v3216_v2 = vpop.f32.mrf.mxu0 }
 0x65f   : > { %v3400_v17 = vmul.f32 %v3384_v23, %v3384_v23  ;;  %3499 = vrot.lane.b32.xlu1 %v11696_v22, %s7980_s14  ;;  %3467 = vrot.lane.b32.xlu0 %v11696_v22, %s7981_s26  ;;  %v3368_v4 = vsub.f32 %v3336_v20, %v3352_v16  ;;  %v17098_v16 = vld [vmem:[#allocation31_spill] sm:$0xff] }
 0x661   : > { %v3416_v38 = vmul.f32 0.05, %v3400_v17 }
 0x663   : > { %v3432_v26 = vsub.f32 %v3368_v4, %v3416_v38 }
 0x664   : > { %v3306_v37 = vpop.f32.mrf.mxu1 }
 0x665   : > { %v11703_v21 = vmul.f32 %v3432_v26, %v17095_v47  ;;  %v3337_v46 = vmul.f32 %v3306_v37, %v3128_v9  ;;  %v3385_v56 = vadd.f32 %v3306_v37, %v3128_v9  ;;  %v3135_v9 = vpop.f32.mrf.mxu3  ;;  %v3219_v23 = vpop.f32.mrf.mxu0  ;;  %v3356_v26 = vmul.f32 %v3216_v2, %v3216_v2 }
 0x667   : > { %v3401_v3 = vmul.f32 %v3385_v56, %v3385_v56  ;;  %3501 = vrot.lane.b32.xlu2 %v11703_v21, %s7980_s14  ;;  %3469 = vrot.lane.b32.xlu1 %v11703_v21, %s7981_s26  ;;  %v3369_v19 = vsub.f32 %v3337_v46, %v3353_v41 }
 0x669   : > { %v3417_v14 = vmul.f32 0.05, %v3401_v3  ;;  %v17099_v3 = vld [vmem:[#allocation32_spill] sm:$0xff] }
 0x66b   : > { %v3433_v24 = vsub.f32 %v3369_v19, %v3417_v14 }
 0x66c   : > { %v3308_v45 = vpop.f32.mrf.mxu1 }
 0x66d   : > { %v11710_v18 = vmul.f32 %v3433_v24, %v17096_v63  ;;  %v3338_v42 = vmul.f32 %v3308_v45, %v3130_v25  ;;  %v3386_v32 = vadd.f32 %v3308_v45, %v3130_v25  ;;  %v3138_v44 = vpop.f32.mrf.mxu3  ;;  %v3221_v24 = vpop.f32.mrf.mxu0  ;;  %v3357_v45 = vmul.f32 %v3219_v23, %v3219_v23 }
 0x66f   : > { %v3402_v39 = vmul.f32 %v3386_v32, %v3386_v32  ;;  %3503 = vrot.lane.b32.xlu0 %v11710_v18, %s7980_s14  ;;  %3471 = vrot.lane.b32.xlu2 %v11710_v18, %s7981_s26  ;;  %v3370_v49 = vsub.f32 %v3338_v42, %v3354_v40 }
 0x671   : > { %v3418_v58 = vmul.f32 0.05, %v3402_v39 }
 0x673   : > { %v3434_v36 = vsub.f32 %v3370_v49, %v3418_v58 }
 0x674   : > { %v3311_v0 = vpop.f32.mrf.mxu1 }
 0x675   : > { %v11717_v54 = vmul.f32 %v3434_v36, %v17097_v62  ;;  %v3339_v1 = vmul.f32 %v3311_v0, %v3133_v53  ;;  %v3387_v29 = vadd.f32 %v3311_v0, %v3133_v53  ;;  %v3140_v53 = vpop.f32.mrf.mxu3  ;;  %v3358_v0 = vmul.f32 %v3221_v24, %v3221_v24 }
 0x677   : > { %v3403_v48 = vmul.f32 %v3387_v29, %v3387_v29  ;;  %3505 = vrot.lane.b32.xlu1 %v11717_v54, %s7980_s14  ;;  %3473 = vrot.lane.b32.xlu0 %v11717_v54, %s7981_s26  ;;  %v3371_v25 = vsub.f32 %v3339_v1, %v3355_v52  ;;  %v3224_v1 = vpop.f32.mrf.mxu0 }
 0x679   : > { %v3419_v6 = vmul.f32 0.05, %v3403_v48 }
 0x67b   : > { %v3435_v20 = vsub.f32 %v3371_v25, %v3419_v6  ;;  %v17101_v6 = vld [vmem:[#allocation34_spill] sm:$0xff] }
 0x67c   : > { %v3313_v30 = vpop.f32.mrf.mxu1 }
 0x67d   : > { %v11724_v17 = vmul.f32 %v3435_v20, %v17098_v16  ;;  %v3340_v4 = vmul.f32 %v3313_v30, %v3135_v9  ;;  %v3388_v38 = vadd.f32 %v3313_v30, %v3135_v9  ;;  %v17100_v9 = vld [vmem:[#allocation33_spill] sm:$0xff]  ;;  %v3143_v36 = vpop.f32.mrf.mxu3  ;;  %v3359_v30 = vmul.f32 %v3224_v1, %v3224_v1  ;;  %v17103_v1 = vld [vmem:[#allocation36_spill] sm:$0xff] }
 0x67f   : > { %v3404_v37 = vmul.f32 %v3388_v38, %v3388_v38  ;;  %3507 = vrot.lane.b32.xlu2 %v11724_v17, %s7980_s14  ;;  %3475 = vrot.lane.b32.xlu1 %v11724_v17, %s7981_s26  ;;  %v3372_v47 = vsub.f32 %v3340_v4, %v3356_v26  ;;  %v3848_v4 = vmax.f32 %v11689_v59, %v11717_v54 }
 0x681   : > { %v3420_v46 = vmul.f32 0.05, %v3404_v37 }
 0x683   : > { %v3436_v56 = vsub.f32 %v3372_v47, %v3420_v46  ;;  %v3846_v47 = vmax.f32 %v11675_v28, %v11703_v21  ;;  %v3847_v46 = vmax.f32 %v11682_v33, %v11710_v18 }
 0x684   : > { %v3316_v41 = vpop.f32.mrf.mxu1 }
 0x685   : > { %v11731_v35 = vmul.f32 %v3436_v56, %v17099_v3  ;;  %v3341_v19 = vmul.f32 %v3316_v41, %v3138_v44  ;;  %v3389_v14 = vadd.f32 %v3316_v41, %v3138_v44  ;;  %v3145_v38 = vpop.f32.mrf.mxu3  ;;  %v3226_v56 = vpop.f32.mrf.mxu0  ;;  %v3845_v41 = vmax.f32 %v11668_v61, %v11696_v22 }
 0x686   : > { %v3850_v3 = vmax.f32 %v3847_v46, %v3848_v4 }
 0x687   : > { %v3405_v63 = vmul.f32 %v3389_v14, %v3389_v14  ;;  %3477 = vrot.lane.b32.xlu2 %v11731_v35, %s7981_s26  ;;  %v3373_v42 = vsub.f32 %v3341_v19, %v3357_v45  ;;  %v17102_v14 = vld [vmem:[#allocation35_spill] sm:$0xff] }
 0x689   : > { %v3421_v32 = vmul.f32 0.05, %v3405_v63 }
 0x68b   : > { %v3437_v40 = vsub.f32 %v3373_v42, %v3421_v32  ;;  %v3849_v42 = vmax.f32 %v3845_v41, %v3846_v47  ;;  %v3360_v32 = vmul.f32 %v3226_v56, %v3226_v56 }
 0x68c   : > { %v3318_v39 = vpop.f32.mrf.mxu1 }
 0x68d   : > { %v11736_v49 = vmul.f32 %v3437_v40, %v17100_v9  ;;  %v3342_v58 = vmul.f32 %v3318_v39, %v3140_v53  ;;  %v3390_v2 = vadd.f32 %v3318_v39, %v3140_v53  ;;  %v3851_v39 = vmax.f32 %v3849_v42, %v3850_v3 }
 0x68f   : > { %v3406_v62 = vmul.f32 %v3390_v2, %v3390_v2  ;;  %3511 = vrot.lane.b32.xlu1 %v11736_v49, %s7980_s14  ;;  %v3374_v29 = vsub.f32 %v3342_v58, %v3358_v0  ;;  %v3148_v2 = vpop.f32.mrf.mxu3  ;;  %v3229_v0 = vpop.f32.mrf.mxu0 }
 0x691   : > { %v3422_v52 = vmul.f32 0.05, %v3406_v62 }
 0x693   : > { %v3438_v48 = vsub.f32 %v3374_v29, %v3422_v52 }
 0x694   : > { %v3321_v25 = vpop.f32.mrf.mxu1 }
 0x695   : > { %v11741_v44 = vmul.f32 %v3438_v48, %v17101_v6  ;;  %v3343_v20 = vmul.f32 %v3321_v25, %v3143_v36  ;;  %v3391_v23 = vadd.f32 %v3321_v25, %v3143_v36  ;;  %v3361_v25 = vmul.f32 %v3229_v0, %v3229_v0 }
 0x697   : > { %v3407_v16 = vmul.f32 %v3391_v23, %v3391_v23  ;;  %3513 = vrot.lane.b32.xlu2 %v11741_v44, %s7980_s14  ;;  %3481 = vrot.lane.b32.xlu1 %v11741_v44, %s7981_s26  ;;  %v3375_v26 = vsub.f32 %v3343_v20, %v3359_v30 }
 0x699   : > { %v3423_v37 = vmul.f32 0.05, %v3407_v16  ;;  %v3150_v16 = vpop.f32.mrf.mxu3  ;;  %v3460_v47 = vpop.permute.xlu2 %3459 }
 0x69b   : > { %v3439_v53 = vsub.f32 %v3375_v26, %v3423_v37 }
 0x69c   : > { %v3323_v19 = vpop.f32.mrf.mxu1 }
 0x69d   : > { %v11756_v24 = vmul.f32 %v3439_v53, %v17102_v14  ;;  %v3344_v45 = vmul.f32 %v3323_v19, %v3145_v38  ;;  %v3392_v63 = vadd.f32 %v3323_v19, %v3145_v38  ;;  %v17104_v38 = vld [vmem:[#allocation37_spill] sm:$0xff]  ;;  %v3231_v53 = vpop.f32.mrf.mxu0 }
 0x69e   : > { %v3362_v14 = vmul.f32 %v3231_v53, %v3231_v53 }
 0x69f   : > { %v3408_v40 = vmul.f32 %v3392_v63, %v3392_v63  ;;  %3483 = vrot.lane.b32.xlu2 %v11756_v24, %s7981_s26  ;;  %v3376_v9 = vsub.f32 %v3344_v45, %v3360_v32 }
 0x6a1   : > { %v3424_v58 = vmul.f32 0.05, %v3408_v40  ;;  %3852 = vmax.xlane.f32.xlu0 %v3851_v39  ;;  %v17105_v40 = vld [vmem:[#allocation38_spill] sm:$0xff] }
 0x6a3   : > { %v3440_v36 = vsub.f32 %v3376_v9, %v3424_v58 }
 0x6a4   : > { %v3326_v62 = vpop.f32.mrf.mxu1 }
 0x6a5   : > { %v11761_v29 = vmul.f32 %v3440_v36, %v17103_v1  ;;  %v3345_v52 = vmul.f32 %v3326_v62, %v3148_v2  ;;  %v3393_v48 = vadd.f32 %v3326_v62, %v3148_v2 }
 0x6a7   : > { %v3409_v6 = vmul.f32 %v3393_v48, %v3393_v48  ;;  %3517 = vrot.lane.b32.xlu1 %v11761_v29, %s7980_s14  ;;  %v3377_v20 = vsub.f32 %v3345_v52, %v3361_v25 }
 0x6a9   : > { %v3425_v23 = vmul.f32 0.05, %v3409_v6  ;;  %v3496_v32 = vpop.permute.xlu2 %3495 }
 0x6ab   : > { %v3441_v30 = vsub.f32 %v3377_v20, %v3425_v23 }
 0x6ac   : > { %v3328_v4 = vpop.f32.mrf.mxu1 }
 0x6ad   : > { %v11766_v26 = vmul.f32 %v3441_v30, %v17104_v38  ;;  %v3394_v37 = vadd.f32 %v3328_v4, %v3150_v16  ;;  %v3346_v3 = vmul.f32 %v3328_v4, %v3150_v16  ;;  %v3864_v4 = vmax.f32 %v11731_v35, %v11761_v29 }
 0x6af   : > { %3519 = vrot.lane.b32.xlu2 %v11766_v26, %s7980_s14  ;;  %3487 = vrot.lane.b32.xlu1 %v11766_v26, %s7981_s26  ;;  %v3410_v46 = vmul.f32 %v3394_v37, %v3394_v37  ;;  %v3378_v63 = vsub.f32 %v3346_v3, %v3362_v14  ;;  %v3865_v38 = vmax.f32 %v11736_v49, %v11766_v26 }
 0x6b0   : > { %v3863_v37 = vmax.f32 %v11724_v17, %v11756_v24 }
 0x6b1   : > { %v3492_v56 = vpop.permute.xlu0 %3491  ;;  %v3426_v45 = vmul.f32 0.05, %v3410_v46  ;;  %v3466_v0 = vpop.permute.xlu2 %3465 }
 0x6b2   : > { %v3523_v41 = vmax.f32 %v3460_v47, %v3492_v56  ;;  %v3867_v46 = vmax.f32 %v3863_v37, %v3864_v4 }
 0x6b3   : > { %v3442_v42 = vsub.f32 %v3378_v63, %v3426_v45 }
 0x6b4   : > { %v11773_v19 = vmax.f32 %v11668_v61, %v3523_v41 }
 0x6b5   : > { %3509 = vrot.lane.b32.xlu0 %v11731_v35, %s7980_s14  ;;  %v11782_v39 = vmul.f32 %v3442_v42, %v17105_v40 }
 0x6b7   : > { %3587 = vrot.lane.b32.xlu2 %v11773_v19, %s7982_s18  ;;  %3555 = vrot.lane.b32.xlu1 %v11773_v19, %s7983_s2  ;;  %v3866_v16 = vmax.f32 %v11741_v44, %v11782_v39 }
 0x6b9   : > { %v3494_v9 = vpop.permute.xlu1 %3493  ;;  %v3462_v58 = vpop.permute.xlu0 %3461  ;;  %v3868_v47 = vmax.f32 %v3865_v38, %v3866_v16 }
 0x6ba   : > { %v3524_v2 = vmax.f32 %v3462_v58, %v3494_v9 }
 0x6bb   : > { %v3869_v53 = vmax.f32 %v3867_v46, %v3868_v47 }
 0x6bc   : > { %v11789_v36 = vmax.f32 %v11675_v28, %v3524_v2 }
 0x6bd   : > { %3479 = vrot.lane.b32.xlu0 %v11736_v49, %s7981_s26 }
 0x6bf   : > { %3489 = vrot.lane.b32.xlu2 %v11782_v39, %s7981_s26 }
 0x6c1   : > { %v3464_v62 = vpop.permute.xlu1 %3463  ;;  %v3502_v30 = vpop.permute.xlu2 %3501 }
 0x6c2   : > { %v3525_v56 = vmax.f32 %v3464_v62, %v3496_v32 }
 0x6c4   : > { %v11820_v63 = vmax.f32 %v11682_v33, %v3525_v56 }
 0x6c5   : > { %3515 = vrot.lane.b32.xlu0 %v11756_v24, %s7980_s14 }
 0x6c7   : > { %3557 = vrot.lane.b32.xlu2 %v11789_v36, %s7983_s2 }
 0x6c9   : > { %v3498_v1 = vpop.permute.xlu0 %3497  ;;  %v3472_v41 = vpop.permute.xlu2 %3471 }
 0x6ca   : > { %v3526_v52 = vmax.f32 %v3466_v0, %v3498_v1 }
 0x6cc   : > { %v11796_v48 = vmax.f32 %v11689_v59, %v3526_v52 }
 0x6cd   : > { %3485 = vrot.lane.b32.xlu0 %v11761_v29, %s7981_s26 }
 0x6cf   : > { %3593 = vrot.lane.b32.xlu2 %v11796_v48, %s7982_s18 }
 0x6d1   : > { %v3500_v25 = vpop.permute.xlu1 %3499  ;;  %v3468_v6 = vpop.permute.xlu0 %3467 }
 0x6d2   : > { %v3527_v20 = vmax.f32 %v3468_v6, %v3500_v25 }
 0x6d4   : > { %v11803_v23 = vmax.f32 %v11696_v22, %v3527_v20 }
 0x6d5   : > { %3521 = vrot.lane.b32.xlu0 %v11782_v39, %s7980_s14 }
 0x6d7   : > { %3563 = vrot.lane.b32.xlu2 %v11803_v23, %s7983_s2 }
 0x6d9   : > { %v3470_v3 = vpop.permute.xlu1 %3469  ;;  %v3508_v1 = vpop.permute.xlu2 %3507 }
 0x6da   : > { %v3528_v2 = vmax.f32 %v3470_v3, %v3502_v30 }
 0x6dc   : > { %v11837_v0 = vmax.f32 %v11703_v21, %v3528_v2 }
 0x6dd   : > { %3589 = vrot.lane.b32.xlu0 %v11789_v36, %s7982_s18 }
 0x6e1   : > { %v3504_v14 = vpop.permute.xlu0 %3503  ;;  %3870 = vmax.xlane.f32.xlu1 %v3869_v53  ;;  %v3478_v16 = vpop.permute.xlu2 %3477 }
 0x6e2   : > { %v3529_v45 = vmax.f32 %v3472_v41, %v3504_v14 }
 0x6e4   : > { %v11823_v42 = vmax.f32 %v11710_v18, %v3529_v45 }
 0x6e5   : > { %3559 = vrot.lane.b32.xlu0 %v11820_v63, %s7983_s2 }
 0x6e6   : > { %3599 = vrot.lane.b32.xlu2 %v11823_v42, %s7982_s18 }
 0x6e9   : > { %v3506_v40 = vpop.permute.xlu1 %3505  ;;  %v3474_v32 = vpop.permute.xlu0 %3473 }
 0x6ea   : > { %v3530_v9 = vmax.f32 %v3474_v32, %v3506_v40 }
 0x6ec   : > { %v11830_v58 = vmax.f32 %v11717_v54, %v3530_v9 }
 0x6ed   : > { %3595 = vrot.lane.b32.xlu0 %v11803_v23, %s7982_s18 }
 0x6ee   : > { %3569 = vrot.lane.b32.xlu2 %v11830_v58, %s7983_s2 }
 0x6f1   : > { %v3476_v62 = vpop.permute.xlu1 %3475  ;;  %v3514_v56 = vpop.permute.xlu2 %3513 }
 0x6f2   : > { %v3531_v52 = vmax.f32 %v3476_v62, %v3508_v1 }
 0x6f4   : > { %v11848_v25 = vmax.f32 %v11724_v17, %v3531_v52 }
 0x6f5   : > { %3565 = vrot.lane.b32.xlu0 %v11837_v0, %s7983_s2 }
 0x6f9   : > { %v3484_v45 = vpop.permute.xlu2 %3483 }
 0x6fa   : > { %3591 = vrot.lane.b32.xlu1 %v11820_v63, %s7982_s18 }
 0x6fd   : > { %3601 = vrot.lane.b32.xlu0 %v11830_v58, %s7982_s18 }
 0x701   : > { %v3512_v46 = vpop.permute.xlu1 %3511 }
 0x702   : > { %3561 = vrot.lane.b32.xlu1 %v11796_v48, %s7983_s2 }
 0x705   : > { %3571 = vrot.lane.b32.xlu0 %v11848_v25, %s7983_s2 }
 0x709   : > { %v3482_v3 = vpop.permute.xlu1 %3481  ;;  %v3520_v52 = vpop.permute.xlu2 %3519 }
 0x70a   : > { %3597 = vrot.lane.b32.xlu1 %v11837_v0, %s7982_s18  ;;  %v3534_v40 = vmax.f32 %v3482_v3, %v3514_v56 }
 0x70c   : > { %v11869_v1 = vmax.f32 %v11741_v44, %v3534_v40 }
 0x712   : > { %3567 = vrot.lane.b32.xlu1 %v11823_v42, %s7983_s2 }
 0x714   : > { %v3853_v6 = vpop.xlane.xlu0 %3852 }
 0x715   : > { %v3854_v20 = vrot.slane %v3853_v6, 4 }
 0x717   : > { %v3855_v30 = vmax.f32 %v3853_v6, %v3854_v20 }
 0x719   : > { %v3856_v4 = vrot.slane %v3855_v30, 2  ;;  %v3518_v2 = vpop.permute.xlu1 %3517 }
 0x71a   : > { %3603 = vrot.lane.b32.xlu1 %v11848_v25, %s7982_s18 }
 0x71b   : > { %v3857_v38 = vmax.f32 %v3855_v30, %v3856_v4  ;;  %v3588_v4 = vpop.permute.xlu2 %3587 }
 0x71d   : > { %v3858_v37 = vrot.slane %v3857_v38, 1 }
 0x71f   : > { %v3859_v47 = vmax.f32 %v3857_v38, %v3858_v37 }
 0x721   : > { %6825 = vpush %v3859_v47 }
 0x727   : > { %v3510_v53 = vpop.permute.xlu0 %3509 }
 0x728   : > { %v3532_v41 = vmax.f32 %v3478_v16, %v3510_v53  ;;  %v3488_v16 = vpop.permute.xlu1 %3487  ;;  %v3490_v53 = vpop.permute.xlu2 %3489 }
 0x729   : > { %v3537_v38 = vmax.f32 %v3488_v16, %v3520_v52 }
 0x72a   : > { %v11859_v14 = vmax.f32 %v11731_v35, %v3532_v41 }
 0x72b   : > { %v11890_v56 = vmax.f32 %v11766_v26, %v3537_v38 }
 0x72c   : > { %3605 = vrot.lane.b32.xlu2 %v11859_v14, %s7982_s18  ;;  %3573 = vrot.lane.b32.xlu1 %v11859_v14, %s7983_s2 }
 0x72f   : > { %v3480_v32 = vpop.permute.xlu0 %3479 }
 0x730   : > { %v3533_v9 = vmax.f32 %v3480_v32, %v3512_v46  ;;  %v3556_v40 = vpop.permute.xlu1 %3555 }
 0x731   : > { %v3619_v57 = vmax.f32 %v3556_v40, %v3588_v4 }
 0x732   : > { %v11866_v62 = vmax.f32 %v11736_v49, %v3533_v9 }
 0x734   : > { %3607 = vrot.lane.b32.xlu0 %v11866_v62, %s7982_s18  ;;  %3575 = vrot.lane.b32.xlu2 %v11866_v62, %s7983_s2 }
 0x735   : > { %3609 = vrot.lane.b32.xlu1 %v11869_v1, %s7982_s18 }
 0x737   : > { %v3516_v6 = vpop.permute.xlu0 %3515 }
 0x738   : > { %v3535_v20 = vmax.f32 %v3484_v45, %v3516_v6 }
 0x73a   : > { %v11878_v30 = vmax.f32 %v11756_v24, %v3535_v20  ;;  %v3558_v20 = vpop.permute.xlu2 %3557 }
 0x73c   : > { %3577 = vrot.lane.b32.xlu0 %v11869_v1, %s7983_s2  ;;  %3611 = vrot.lane.b32.xlu2 %v11878_v30, %s7982_s18 }
 0x73d   : > { %3579 = vrot.lane.b32.xlu1 %v11878_v30, %s7983_s2 }
 0x73f   : > { %v3486_v37 = vpop.permute.xlu0 %3485 }
 0x740   : > { %v3536_v47 = vmax.f32 %v3486_v37, %v3518_v2 }
 0x742   : > { %v11887_v46 = vmax.f32 %v11761_v29, %v3536_v47 }
 0x744   : > { %3613 = vrot.lane.b32.xlu0 %v11887_v46, %s7982_s18  ;;  %3581 = vrot.lane.b32.xlu2 %v11887_v46, %s7983_s2 }
 0x745   : > { %3615 = vrot.lane.b32.xlu1 %v11890_v56, %s7982_s18 }
 0x747   : > { %v3522_v41 = vpop.permute.xlu0 %3521 }
 0x748   : > { %v3538_v3 = vmax.f32 %v3490_v53, %v3522_v41  ;;  %v3594_v53 = vpop.permute.xlu2 %3593 }
 0x74a   : > { %v11899_v45 = vmax.f32 %v11782_v39, %v3538_v3 }
 0x74c   : > { %3583 = vrot.lane.b32.xlu0 %v11890_v56, %s7983_s2  ;;  %3617 = vrot.lane.b32.xlu2 %v11899_v45, %s7982_s18 }
 0x74d   : > { %3585 = vrot.lane.b32.xlu1 %v11899_v45, %s7983_s2 }
 0x74f   : > { %v3590_v2 = vpop.permute.xlu0 %3589 }
 0x750   : > { %v3620_v3 = vmax.f32 %v3558_v20, %v3590_v2  ;;  %v3564_v15 = vpop.permute.xlu2 %3563 }
 0x752   : > { %v11908_v12 = vmax.f32 %v11789_v36, %v3620_v3  ;;  %s6826_s3 = spop %6825 }
 0x754   : > { %v3871_v32 = vpop.xlane.xlu1 %3870 }
 0x755   : > { %v3872_v9 = vrot.slane %v3871_v32, 4 }
 0x757   : > { %v3873_v52 = vmax.f32 %v3871_v32, %v3872_v9  ;;  %v3560_v47 = vpop.permute.xlu0 %3559  ;;  %v11912_v32 = vmax.f32 %v11773_v19, %v3619_v57 }
 0x758   : > { %v3600_v57 = vpop.permute.xlu2 %3599 }
 0x759   : > { %v3874_v6 = vrot.slane %v3873_v52, 2  ;;  %v16247_v4 = vrot.slane %v11912_v32, 7 }
 0x75b   : > { %v3875_v16 = vmax.f32 %v3873_v52, %v3874_v6  ;;  %v16249_v6 = vrot.slane %v11908_v12, 1 }
 0x75d   : > { %v3876_v38 = vrot.slane %v3875_v16, 1 }
 0x75f   : > { %v3877_v37 = vmax.f32 %v3875_v16, %v3876_v38  ;;  %v3596_v41 = vpop.permute.xlu0 %3595  ;;  %v3684_v16 = vrot.slane %v11908_v12, 7 }
 0x760   : > { %v3623_v9 = vmax.f32 %v3564_v15, %v3596_v41 }
 0x761   : > { %6827 = vpush %v3877_v37  ;;  %v3713_v15 = vsel %vm17106_vm1, %v16247_v4, %v3684_v16  ;;  %vm3933_vm1 = vcmp.gt.f32.partialorder %v11682_v33, 0.0 }
 0x767   : > { %v3566_v38 = vpop.permute.xlu0 %3565 }
 0x76c   : > { %v3592_v60 = vpop.permute.xlu1 %3591 }
 0x76d   : > { %v3621_v51 = vmax.f32 %v3560_v47, %v3592_v60  ;;  %v3639_v60 = vmax.f32 %v11803_v23, %v3623_v9 }
 0x76f   : > { %v3637_v5 = vmax.f32 %v11820_v63, %v3621_v51  ;;  %v3655_v20 = vrot.slane %v3639_v60, 1 }
 0x771   : > { %v3653_v52 = vrot.slane %v3637_v5, 1  ;;  %v3685_v19 = vrot.slane %v3637_v5, 7 }
 0x773   : > { %v3680_v51 = vsel %vm17060_vm3, %v16249_v6, %v3653_v52  ;;  %v3712_v23 = vsel %vm17107_vm10, %v3684_v16, %v3685_v19 }
 0x774   : > { %v3562_v2 = vpop.permute.xlu1 %3561  ;;  %v3716_v40 = vmax.f32 %v3680_v51, %v3713_v15  ;;  %v3602_v15 = vpop.permute.xlu0 %3601 }
 0x775   : > { %v3622_v36 = vmax.f32 %v3562_v2, %v3594_v53 }
 0x776   : > { %v11936_v9 = vmax.f32 %v11908_v12, %v3716_v40 }
 0x777   : > { %v3638_v63 = vmax.f32 %v11796_v48, %v3622_v36 }
 0x779   : > { %v3654_v37 = vrot.slane %v3638_v63, 1  ;;  %v3686_v47 = vrot.slane %v3638_v63, 7 }
 0x77b   : > { %v3678_v41 = vsel %vm17108_vm2, %v3654_v37, %v3655_v20  ;;  %v3679_v53 = vsel %vm17109_vm6, %v3653_v52, %v3654_v37  ;;  %v3711_v3 = vsel %vm17065_vm0, %v3685_v19, %v3686_v47  ;;  %v3570_v37 = vpop.permute.xlu2 %3569  ;;  %v16252_v19 = vrot.slane %v11936_v9, 6 }
 0x77c   : > { %v3717_v48 = vmax.f32 %v3679_v53, %v3712_v23  ;;  %v3718_v2 = vmax.f32 %v3678_v41, %v3711_v3  ;;  %v3598_v51 = vpop.permute.xlu1 %3597  ;;  %v3687_v41 = vrot.slane %v3639_v60, 7 }
 0x77d   : > { %v3624_v36 = vmax.f32 %v3566_v38, %v3598_v51 }
 0x77e   : > { %v11938_v4 = vmax.f32 %v3637_v5, %v3717_v48  ;;  %v11940_v16 = vmax.f32 %v3638_v63, %v3718_v2  ;;  %v3626_v5 = vmax.f32 %v3570_v37, %v3602_v15  ;;  %v3710_v3 = vsel %vm17110_vm5, %v3686_v47, %v3687_v41 }
 0x77f   : > { %v3640_v52 = vmax.f32 %v11837_v0, %v3624_v36  ;;  %vm3934_vm5 = vcmp.gt.f32.partialorder %v11689_v59, 0.0 }
 0x780   : > { %v16248_v40 = vrot.slane %v11938_v4, 2  ;;  %v3750_v23 = vrot.slane %v11940_v16, 2  ;;  %v3782_v38 = vrot.slane %v11938_v4, 6  ;;  %v11962_v15 = vmax.f32 %v11830_v58, %v3626_v5 }
 0x781   : > { %v3656_v53 = vrot.slane %v3640_v52, 1  ;;  %v3783_v6 = vrot.slane %v11940_v16, 6  ;;  %v3688_v27 = vrot.slane %v3640_v52, 7 }
 0x782   : > { %v3776_v63 = vsel %vm3763_vm7, %v16248_v40, %v3750_v23  ;;  %v3810_v0 = vsel %vm3796_vm9, %v16252_v19, %v3782_v38  ;;  %v3861_v40 = vstv %s6826_s3 }
 0x783   : > { %v3815_v48 = vmax.f32 %v3776_v63, %v3810_v0  ;;  %v3677_v2 = vsel %vm17111_vm4, %v3655_v20, %v3656_v53  ;;  %v11967_v63 = vmul.f32 0.1, %v3861_v40  ;;  %v3658_v20 = vrot.slane %v11962_v15, 1  ;;  %vm17116_vm4 = vmmov %vm17112_vm14 }
 0x784   : > { %v3719_v51 = vmax.f32 %v3677_v2, %v3710_v3  ;;  %v3568_v36 = vpop.permute.xlu1 %3567  ;;  %v3809_v58 = vsel %vm3796_vm9, %v3782_v38, %v3783_v6 }
 0x785   : > { %v3625_v37 = vmax.f32 %v3568_v36, %v3600_v57  ;;  %v3831_v55 = vmax.f32 %v11938_v4, %v3815_v48  ;;  %v3709_v57 = vsel %vm17112_vm14, %v3687_v41, %v3688_v27  ;;  %v3572_v48 = vpop.permute.xlu0 %3571  ;;  %vm3901_vm11 = vcmp.gt.f32.partialorder %v11682_v33, %v11967_v63  ;;  %vm17117_vm14 = vmmov %vm17113_vm8 }
 0x786   : > { %v3735_v7 = vmax.f32 %v3639_v60, %v3719_v51  ;;  %vm3902_vm10 = vcmp.gt.f32.partialorder %v11689_v59, %v11967_v63 }
 0x787   : > { %v3641_v19 = vmax.f32 %v11823_v42, %v3625_v37  ;;  %vm3883_vm12 = vcmp.ge.f32.partialorder %v11682_v33, %v3831_v55 }
 0x788   : > { %v3751_v47 = vrot.slane %v3735_v7, 2  ;;  %vm3917_vm3 = vmand %vm3883_vm12, %vm3901_vm11  ;;  %vm3903_vm11 = vcmp.gt.f32.partialorder %v11696_v22, %v11967_v63 }
 0x789   : > { %v3657_v0 = vrot.slane %v3641_v19, 1  ;;  %v3689_v3 = vrot.slane %v3641_v19, 7  ;;  %vm3949_vm6 = vmand %vm3917_vm3, %vm3933_vm1 }
 0x78a   : > { %v3775_v60 = vsel %vm3763_vm7, %v3750_v23, %v3751_v47 }
 0x78b   : > { %v3675_v42 = vsel %vm17113_vm8, %v3657_v0, %v3658_v20  ;;  %v3676_v40 = vsel %vm17114_vm13, %v3656_v53, %v3657_v0  ;;  %v3708_v5 = vsel %vm17115_vm15, %v3688_v27, %v3689_v3  ;;  %v3816_v36 = vmax.f32 %v3775_v60, %v3809_v58 }
 0x78c   : > { %v3720_v2 = vmax.f32 %v3676_v40, %v3709_v57  ;;  %v3721_v38 = vmax.f32 %v3675_v42, %v3708_v5  ;;  %v3604_v51 = vpop.permute.xlu1 %3603  ;;  %v3784_v53 = vrot.slane %v3735_v7, 6  ;;  %v7984_v5 = vmov 0.0  }
 0x78d   : > { %v3627_v41 = vmax.f32 %v3572_v48, %v3604_v51  ;;  %v3832_v8 = vmax.f32 %v11940_v16, %v3816_v36  ;;  %v12012_v48 = vsel %vm3949_vm6, 1.0, %v7984_v5  ;;  %v3606_v51 = vpop.permute.xlu2 %3605  ;;  %vm3904_vm15 = vcmp.gt.f32.partialorder %v11703_v21, %v11967_v63 }
 0x78e   : > { %v3736_v23 = vmax.f32 %v3640_v52, %v3720_v2  ;;  %v11985_v37 = vmax.f32 %v3641_v19, %v3721_v38  ;;  %v3690_v52 = vrot.slane %v11962_v15, 7  ;;  %v3808_v42 = vsel %vm3796_vm9, %v3783_v6, %v3784_v53  ;;  %17118 = vst [vmem:[#allocation23_spill] sm:$0xff] %v12012_v48 }
 0x78f   : > { %v11989_v27 = vmax.f32 %v11848_v25, %v3627_v41  ;;  %vm3884_vm2 = vcmp.ge.f32.partialorder %v11689_v59, %v3832_v8 }
 0x790   : > { %v3752_v55 = vrot.slane %v3736_v23, 2  ;;  %v3753_v0 = vrot.slane %v11985_v37, 2  ;;  %v3785_v58 = vrot.slane %v3736_v23, 6  ;;  %vm3918_vm0 = vmand %vm3884_vm2, %vm3902_vm10  ;;  %v3707_v57 = vsel %vm17116_vm4, %v3689_v3, %v3690_v52 }
 0x791   : > { %v3659_v19 = vrot.slane %v11989_v27, 1  ;;  %vm3950_vm8 = vmand %vm3918_vm0, %vm3934_vm5  ;;  %vm3935_vm10 = vcmp.gt.f32.partialorder %v11696_v22, 0.0  ;;  %vm3936_vm2 = vcmp.gt.f32.partialorder %v11703_v21, 0.0  ;;  %v3786_v36 = vrot.slane %v11985_v37, 6 }
 0x792   : > { %v3773_v25 = vsel %vm3763_vm7, %v3752_v55, %v3753_v0  ;;  %v3807_v33 = vsel %vm3796_vm9, %v3784_v53, %v3785_v58  ;;  %v3774_v16 = vsel %vm3763_vm7, %v3751_v47, %v3752_v55  ;;  %v12015_v59 = vsel %vm3950_vm8, 1.0, %v7984_v5  ;;  %vm17122_vm5 = vmmov %vm17116_vm4  ;;  %s12078_s23 = spop %6827 }
 0x793   : > { %v3818_v60 = vmax.f32 %v3773_v25, %v3807_v33  ;;  %v3674_v8 = vsel %vm17117_vm14, %v3658_v20, %v3659_v19  ;;  %17119 = vst [vmem:[#allocation24_spill] sm:$0xff] %v12015_v59  ;;  %v3817_v47 = vmax.f32 %v3774_v16, %v3808_v42  ;;  %v7235_v3 = vpack.i.bf16 %v12015_v59, %v12012_v48  ;;  %vm17123_vm4 = vmmov %vm17117_vm14 }
 0x794   : > { %v3722_v40 = vmax.f32 %v3674_v8, %v3707_v57  ;;  %v3806_v53 = vsel %vm3796_vm9, %v3785_v58, %v3786_v36  ;;  %v3691_v55 = vrot.slane %v11989_v27, 7  ;;  %vm3905_vm8 = vcmp.gt.f32.partialorder %v11710_v18, %v11967_v63 }
 0x795   : > { %v3834_v2 = vmax.f32 %v3736_v23, %v3818_v60  ;;  %v3833_v38 = vmax.f32 %v3735_v7, %v3817_v47  ;;  %7236 = vrot.lane.b32.xlu0 %v7235_v3, %s7982_s18  ;;  %7221 = vrot.lane.b32.xlu2 %v7235_v3, %s7981_s26  ;;  %v3576_v25 = vpop.permute.xlu2 %3575 }
 0x796   : > { %v12020_v20 = vmax.f32 %v11962_v15, %v3722_v40  ;;  %v3706_v60 = vsel %vm17122_vm5, %v3690_v52, %v3691_v55 }
 0x797   : > { %vm3886_vm13 = vcmp.ge.f32.partialorder %v11703_v21, %v3834_v2  ;;  %vm3885_vm12 = vcmp.ge.f32.partialorder %v11696_v22, %v3833_v38 }
 0x798   : > { %vm3920_vm3 = vmand %vm3886_vm13, %vm3904_vm15  ;;  %v3754_v7 = vrot.slane %v12020_v20, 2  ;;  %v3787_v2 = vrot.slane %v12020_v20, 6 }
 0x799   : > { %vm3919_vm1 = vmand %vm3885_vm12, %vm3903_vm11  ;;  %vm3937_vm11 = vcmp.gt.f32.partialorder %v11710_v18, 0.0 }
 0x79a   : > { %vm3951_vm6 = vmand %vm3919_vm1, %vm3935_vm10  ;;  %v3772_v21 = vsel %vm3763_vm7, %v3753_v0, %v3754_v7  ;;  %vm3906_vm10 = vcmp.gt.f32.partialorder %v11717_v54, %v11967_v63 }
 0x79b   : > { %vm3952_vm0 = vmand %vm3920_vm3, %vm3936_vm2  ;;  %v12034_v6 = vsel %vm3951_vm6, 1.0, %v7984_v5  ;;  %v3819_v16 = vmax.f32 %v3772_v21, %v3806_v53  ;;  %vm3938_vm2 = vcmp.gt.f32.partialorder %v11717_v54, 0.0 }
 0x79c   : > { %17120 = vst [vmem:[#allocation25_spill] sm:$0xff] %v12034_v6  ;;  %v12037_v15 = vsel %vm3952_vm0, 1.0, %v7984_v5  ;;  %vm17124_vm13 = vmmov %vm17122_vm5 }
 0x79d   : > { %17121 = vst [vmem:[#allocation26_spill] sm:$0xff] %v12037_v15  ;;  %v12042_v41 = vpack.i.bf16 %v12037_v15, %v12034_v6  ;;  %7226 = vrot.lane.b32.xlu2 %v7235_v3, %s7980_s14  ;;  %v3835_v40 = vmax.f32 %v11985_v37, %v3819_v16  ;;  %vm17125_vm15 = vmmov %vm17123_vm4 }
 0x79e   : > { %v3574_v23 = vpop.permute.xlu1 %3573 }
 0x79f   : > { %7251 = vrot.lane.b32.xlu1 %v12042_v41, %s7983_s2  ;;  %v3628_v22 = vmax.f32 %v3574_v23, %v3606_v51  ;;  %7246 = vrot.lane.b32.xlu0 %v12042_v41, %s7980_s14  ;;  %vm3887_vm14 = vcmp.ge.f32.partialorder %v11710_v18, %v3835_v40 }
 0x7a0   : > { %vm3921_vm12 = vmand %vm3887_vm14, %vm3905_vm8 }
 0x7a1   : > { %v3644_v33 = vmax.f32 %v11859_v14, %v3628_v22  ;;  %vm3953_vm3 = vmand %vm3921_vm12, %vm3937_vm11 }
 0x7a2   : > { %vm17128_vm14 = vmmov %vm17122_vm5 }
 0x7a3   : > { %v3660_v57 = vrot.slane %v3644_v33, 1  ;;  %v3692_v38 = vrot.slane %v3644_v33, 7  ;;  %vm17129_vm8 = vmmov %vm17123_vm4 }
 0x7a4   : > { %vm17130_vm12 = vmmov %vm17122_vm5 }
 0x7a5   : > { %v3673_v8 = vsel %vm17123_vm4, %v3659_v19, %v3660_v57  ;;  %7231 = vrot.lane.b32.xlu2 %v7235_v3, %s7983_s2  ;;  %v3612_v19 = vpop.permute.xlu2 %3611  ;;  %v3805_v3 = vsel %vm3796_vm9, %v3786_v36, %v3787_v2 }
 0x7a6   : > { %v3723_v0 = vmax.f32 %v3673_v8, %v3706_v60  ;;  %v3608_v42 = vpop.permute.xlu0 %3607  ;;  %v3879_v8 = vstv %s12078_s23 }
 0x7a7   : > { %v3629_v58 = vmax.f32 %v3576_v25, %v3608_v42  ;;  %v3610_v47 = vpop.permute.xlu1 %3609 }
 0x7a8   : > { %v12063_v14 = vmax.f32 %v11989_v27, %v3723_v0  ;;  %v3705_v27 = vsel %vm17124_vm13, %v3691_v55, %v3692_v38  ;;  %vm3939_vm13 = vcmp.gt.f32.partialorder %v11724_v17, 0.0 }
 0x7a9   : > { %v3645_v51 = vmax.f32 %v11866_v62, %v3629_v58 }
 0x7aa   : > { %v3755_v52 = vrot.slane %v12063_v14, 2  ;;  %v3788_v18 = vrot.slane %v12063_v14, 6 }
 0x7ab   : > { %v3661_v23 = vrot.slane %v3645_v51, 1  ;;  %v3693_v55 = vrot.slane %v3645_v51, 7 }
 0x7ac   : > { %v3771_v37 = vsel %vm3763_vm7, %v3754_v7, %v3755_v52 }
 0x7ad   : > { %v3672_v62 = vsel %vm17125_vm15, %v3660_v57, %v3661_v23  ;;  %v3820_v22 = vmax.f32 %v3771_v37, %v3805_v3  ;;  %7241 = vrot.lane.b32.xlu2 %v12042_v41, %s7981_s26  ;;  %v3704_v40 = vsel %vm17122_vm5, %v3692_v38, %v3693_v55  ;;  %v12116_v38 = vmul.f32 0.1, %v3879_v8 }
 0x7ae   : > { %v3724_v21 = vmax.f32 %v3672_v62, %v3705_v27  ;;  %v3578_v53 = vpop.permute.xlu0 %3577  ;;  %vm3940_vm15 = vcmp.gt.f32.partialorder %v11731_v35, 0.0 }
 0x7af   : > { %v3630_v7 = vmax.f32 %v3578_v53, %v3610_v47  ;;  %v3580_v36 = vpop.permute.xlu1 %3579  ;;  %v3836_v25 = vmax.f32 %v12020_v20, %v3820_v22  ;;  %v3582_v47 = vpop.permute.xlu2 %3581  ;;  %vm3907_vm11 = vcmp.gt.f32.partialorder %v11724_v17, %v12116_v38 }
 0x7b0   : > { %v12084_v16 = vmax.f32 %v3644_v33, %v3724_v21  ;;  %v3631_v57 = vmax.f32 %v3580_v36, %v3612_v19 }
 0x7b1   : > { %v3646_v60 = vmax.f32 %v11869_v1, %v3630_v7  ;;  %vm3888_vm1 = vcmp.ge.f32.partialorder %v11717_v54, %v3836_v25  ;;  %v12098_v1 = vsel %vm3953_vm3, 1.0, %v7984_v5  ;;  %v3804_v7 = vsel %vm3796_vm9, %v3787_v2, %v3788_v18 }
 0x7b2   : > { %v3756_v0 = vrot.slane %v12084_v16, 2  ;;  %v12094_v20 = vmax.f32 %v11878_v30, %v3631_v57  ;;  %vm3922_vm6 = vmand %vm3888_vm1, %vm3906_vm10  ;;  %17126 = vst [vmem:[#allocation27_spill] sm:$0xff] %v12098_v1  ;;  %v3789_v36 = vrot.slane %v12084_v16, 6  ;;  %v3651_v57 = vrot.slane %v11912_v32, 1 }
 0x7b3   : > { %v3662_v33 = vrot.slane %v3646_v60, 1  ;;  %v3694_v42 = vrot.slane %v3646_v60, 7  ;;  %vm3954_vm0 = vmand %vm3922_vm6, %vm3938_vm2  ;;  %vm3941_vm2 = vcmp.gt.f32.partialorder %v11736_v49, 0.0 }
 0x7b4   : > { %v3663_v54 = vrot.slane %v12094_v20, 1  ;;  %v12104_v58 = vsel %vm3954_vm0, 1.0, %v7984_v5  ;;  %v3770_v30 = vsel %vm3763_vm7, %v3755_v52, %v3756_v0  ;;  %v3695_v52 = vrot.slane %v12094_v20, 7  ;;  %vm17131_vm1 = vmmov %vm17123_vm4 }
 0x7b5   : > { %17127 = vst [vmem:[#allocation28_spill] sm:$0xff] %v12104_v58  ;;  %v3671_v19 = vsel %vm17123_vm4, %v3661_v23, %v3662_v33  ;;  %v3703_v37 = vsel %vm17128_vm14, %v3693_v55, %v3694_v42  ;;  %v12114_v3 = vpack.i.bf16 %v12104_v58, %v12098_v1  ;;  %7256 = vrot.lane.b32.xlu2 %v12042_v41, %s7982_s18  ;;  %vm17135_vm6 = vmmov %vm17131_vm1 }
 0x7b6   : > { %v3725_v27 = vmax.f32 %v3671_v19, %v3704_v40  ;;  %v3670_v62 = vsel %vm17129_vm8, %v3662_v33, %v3663_v54  ;;  %v3614_v22 = vpop.permute.xlu0 %3613  ;;  %v3821_v55 = vmax.f32 %v3770_v30, %v3804_v7  ;;  %v3748_v33 = vrot.slane %v11936_v9, 2  ;;  %vm17137_vm8 = vmmov %vm17130_vm12 }
 0x7b7   : > { %v3726_v21 = vmax.f32 %v3670_v62, %v3703_v37  ;;  %v3632_v23 = vmax.f32 %v3582_v47, %v3614_v22  ;;  %v3616_v53 = vpop.permute.xlu1 %3615  ;;  %7276 = vrot.lane.b32.xlu1 %v12114_v3, %s7982_s18  ;;  %7271 = vrot.lane.b32.xlu0 %v12114_v3, %s7983_s2  ;;  %v3803_v19 = vsel %vm3796_vm9, %v3788_v18, %v3789_v36  ;;  %v3618_v7 = vpop.permute.xlu2 %3617 }
 0x7b8   : > { %v3741_v25 = vmax.f32 %v3645_v51, %v3725_v27  ;;  %v3837_v47 = vmax.f32 %v12063_v14, %v3821_v55  ;;  %v3702_v51 = vsel %vm17130_vm12, %v3694_v42, %v3695_v52  ;;  %vm3908_vm0 = vcmp.gt.f32.partialorder %v11731_v35, %v12116_v38 }
 0x7b9   : > { %v12131_v8 = vmax.f32 %v3646_v60, %v3726_v21  ;;  %v12134_v41 = vmax.f32 %v11887_v46, %v3632_v23  ;;  %vm3909_vm14 = vcmp.gt.f32.partialorder %v11736_v49, %v12116_v38 }
 0x7ba   : > { %v3757_v40 = vrot.slane %v3741_v25, 2  ;;  %v3790_v2 = vrot.slane %v3741_v25, 6  ;;  %vm3889_vm3 = vcmp.ge.f32.partialorder %v11724_v17, %v3837_v47  ;;  %v17136_v47 = vrot.slane %v11938_v4, 2 }
 0x7bb   : > { %v3758_v30 = vrot.slane %v12131_v8, 2  ;;  %v3664_v60 = vrot.slane %v12134_v41, 1  ;;  %vm12155_vm10 = vmand %vm3889_vm3, %vm3907_vm11  ;;  %v3696_v22 = vrot.slane %v12134_v41, 7  ;;  %vm3910_vm3 = vcmp.gt.f32.partialorder %v11741_v44, %v12116_v38 }
 0x7bc   : > { %v3769_v46 = vsel %vm3763_vm7, %v3756_v0, %v3757_v40  ;;  %v3802_v14 = vsel %vm3796_vm9, %v3789_v36, %v3790_v2  ;;  %v17134_v0 = vrot.slane %v11908_v12, 1  ;;  %v3791_v36 = vrot.slane %v12131_v8, 6  ;;  %vm3955_vm5 = vmand %vm12155_vm10, %vm3939_vm13 }
 0x7bd   : > { %v3669_v42 = vsel %vm17131_vm1, %v3663_v54, %v3664_v60  ;;  %v3822_v37 = vmax.f32 %v3769_v46, %v3803_v19  ;;  %v3768_v62 = vsel %vm3763_vm7, %v3757_v40, %v3758_v30  ;;  %7261 = vrot.lane.b32.xlu2 %v12114_v3, %s7981_s26  ;;  %v12179_v46 = vsel %vm3763_vm7, %v3748_v33, %v17136_v47  ;;  %vm17140_vm10 = vmmov %vm17137_vm8 }
 0x7be   : > { %v3681_v18 = vsel %vm17135_vm6, %v3651_v57, %v17134_v0  ;;  %v3727_v54 = vmax.f32 %v3669_v42, %v3702_v51  ;;  %v3584_v21 = vpop.permute.xlu0 %3583  ;;  %v3823_v23 = vmax.f32 %v3768_v62, %v3802_v14  ;;  %vm17141_vm6 = vmmov %vm17131_vm1 }
 0x7bf   : > { %v3633_v55 = vmax.f32 %v3584_v21, %v3616_v53  ;;  %v3586_v40 = vpop.permute.xlu1 %3585  ;;  %v3838_v12 = vmax.f32 %v12084_v16, %v3822_v37 }
 0x7c0   : > { %v12182_v51 = vmax.f32 %v12094_v20, %v3727_v54  ;;  %v3634_v19 = vmax.f32 %v3586_v40, %v3618_v7  ;;  %v3839_v16 = vmax.f32 %v3741_v25, %v3823_v23  ;;  %v3701_v20 = vsel %vm17137_vm8, %v3695_v52, %v3696_v22 }
 0x7c1   : > { %v3649_v4 = vmax.f32 %v11890_v56, %v3633_v55  ;;  %vm3890_vm4 = vcmp.ge.f32.partialorder %v11731_v35, %v3838_v12  ;;  %v12202_v56 = vsel %vm3955_vm5, 1.0, %v7984_v5  ;;  %v3801_v52 = vsel %vm3796_vm9, %v3790_v2, %v3791_v36  ;;  %vm17143_vm5 = vmmov %vm17137_vm8 }
 0x7c2   : > { %v3759_v53 = vrot.slane %v12182_v51, 2  ;;  %v3650_v14 = vmax.f32 %v11899_v45, %v3634_v19  ;;  %vm3924_vm12 = vmand %vm3890_vm4, %vm3908_vm0  ;;  %vm3891_vm11 = vcmp.ge.f32.partialorder %v11736_v49, %v3839_v16  ;;  %17138 = vst [vmem:[#allocation29_spill] sm:$0xff] %v12202_v56  ;;  %vm3942_vm8 = vcmp.gt.f32.partialorder %v11741_v44, 0.0 }
 0x7c3   : > { %v3665_v17 = vrot.slane %v3649_v4, 1  ;;  %v3697_v42 = vrot.slane %v3649_v4, 7  ;;  %vm3956_vm13 = vmand %vm3924_vm12, %vm3940_vm15 }
 0x7c4   : > { %v3666_v25 = vrot.slane %v3650_v14, 1  ;;  %v3698_v37 = vrot.slane %v3650_v14, 7  ;;  %v12209_v45 = vsel %vm3956_vm13, 1.0, %v7984_v5  ;;  %v3767_v27 = vsel %vm3763_vm7, %v3758_v30, %v3759_v53  ;;  %vm3925_vm15 = vmand %vm3891_vm11, %vm3909_vm14 }
 0x7c5   : > { %17139 = vst [vmem:[#allocation30_spill] sm:$0xff] %v12209_v45  ;;  %v3668_v35 = vsel %vm17131_vm1, %v3664_v60, %v3665_v17  ;;  %v3700_v2 = vsel %vm17140_vm10, %v3696_v22, %v3697_v42  ;;  %v12224_v62 = vpack.i.bf16 %v12209_v45, %v12202_v56  ;;  %vm17142_vm0 = vmmov %vm17131_vm1  ;;  %v17144_v60 = vrot.slane %v11912_v32, 7  ;;  %7266 = vrot.lane.b32.xlu2 %v12114_v3, %s7980_s14 }
 0x7c6   : > { %v3728_v0 = vmax.f32 %v3668_v35, %v3701_v20  ;;  %v3667_v30 = vsel %vm17141_vm6, %v3665_v17, %v3666_v25  ;;  %v3682_v54 = vsel %vm17142_vm0, %v3666_v25, %v3651_v57  ;;  %v3699_v21 = vsel %vm17143_vm5, %v3697_v42, %v3698_v37  ;;  %vm3957_vm4 = vmand %vm3925_vm15, %vm3941_vm2 }
 0x7c7   : > { %vm17145_vm14 = vmmov %vm17143_vm5  ;;  %v3729_v23 = vmax.f32 %v3667_v30, %v3700_v2  ;;  %v3730_v7 = vmax.f32 %v3682_v54, %v3699_v21  ;;  %7296 = vrot.lane.b32.xlu0 %v12224_v62, %s7982_s18  ;;  %v3792_v57 = vrot.slane %v12182_v51, 6  ;;  %7286 = vrot.lane.b32.xlu1 %v12224_v62, %s7980_s14  ;;  %v3824_v40 = vmax.f32 %v3767_v27, %v3801_v52 }
 0x7c8   : > { %v3714_v22 = vsel %vm17145_vm14, %v3698_v37, %v17144_v60  ;;  %v3744_v49 = vmax.f32 %v12134_v41, %v3728_v0  ;;  %v12250_v19 = vsel %vm3957_vm4, 1.0, %v7984_v5  ;;  %vm3911_vm10 = vcmp.gt.f32.partialorder %v11756_v24, %v12116_v38 }
 0x7c9   : > { %v3715_v55 = vmax.f32 %v3681_v18, %v3714_v22  ;;  %v3745_v12 = vmax.f32 %v3649_v4, %v3729_v23  ;;  %v3746_v47 = vmax.f32 %v3650_v14, %v3730_v7  ;;  %17146 = vst [vmem:[#allocation31_spill] sm:$0xff] %v12250_v19  ;;  %v3840_v17 = vmax.f32 %v12131_v8, %v3824_v40 }
 0x7ca   : > { %v3760_v3 = vrot.slane %v3744_v49, 2  ;;  %v3793_v16 = vrot.slane %v3744_v49, 6  ;;  %v3800_v60 = vsel %vm3796_vm9, %v3791_v36, %v3792_v57  ;;  %vm3912_vm0 = vcmp.gt.f32.partialorder %v11761_v29, %v12116_v38 }
 0x7cb   : > { %v3731_v20 = vmax.f32 %v11912_v32, %v3715_v55  ;;  %v3761_v42 = vrot.slane %v3745_v12, 2  ;;  %v3762_v25 = vrot.slane %v3746_v47, 2  ;;  %v3794_v37 = vrot.slane %v3745_v12, 6 }
 0x7cc   : > { %v3795_v41 = vrot.slane %v3746_v47, 6  ;;  %vm3892_vm2 = vcmp.ge.f32.partialorder %v11741_v44, %v3840_v17  ;;  %v3766_v4 = vsel %vm3763_vm7, %v3759_v53, %v3760_v3  ;;  %vm3943_vm14 = vcmp.gt.f32.partialorder %v11756_v24, 0.0 }
 0x7cd   : > { %v3747_v18 = vrot.slane %v3731_v20, 2  ;;  %v3780_v35 = vrot.slane %v3731_v20, 6  ;;  %v3764_v14 = vsel %vm3763_vm7, %v3761_v42, %v3762_v25  ;;  %v3798_v32 = vsel %vm3796_vm9, %v3793_v16, %v3794_v37  ;;  %vm3926_vm12 = vmand %vm3892_vm2, %vm3910_vm3  ;;  %7281 = vrot.lane.b32.xlu2 %v12224_v62, %s7981_s26 }
 0x7ce   : > { %v3797_v52 = vsel %vm3796_vm9, %v3794_v37, %v3795_v41  ;;  %v3765_v27 = vsel %vm3763_vm7, %v3760_v3, %v3761_v42  ;;  %v3827_v30 = vmax.f32 %v3764_v14, %v3798_v32  ;;  %vm3958_vm11 = vmand %vm3926_vm12, %vm3942_vm8  ;;  %v3825_v44 = vmax.f32 %v3766_v4, %v3800_v60 }
 0x7cf   : > { %v3778_v53 = vsel %vm3763_vm7, %v3747_v18, %v3748_v33  ;;  %v3779_v2 = vsel %vm3763_vm7, %v3762_v25, %v3747_v18  ;;  %v3812_v0 = vsel %vm3796_vm9, %v3795_v41, %v3780_v35  ;;  %v12281_v21 = vsel %vm3958_vm11, 1.0, %v7984_v5 }
 0x7d0   : > { %v3828_v54 = vmax.f32 %v3779_v2, %v3797_v52  ;;  %17147 = vst [vmem:[#allocation32_spill] sm:$0xff] %v12281_v21  ;;  %v3799_v33 = vsel %vm3796_vm9, %v3792_v57, %v3793_v16  ;;  %v12291_v22 = vpack.i.bf16 %v12281_v21, %v12250_v19  ;;  %v3813_v7 = vmax.f32 %v3778_v53, %v3812_v0 }
 0x7d1   : > { %v3826_v23 = vmax.f32 %v3765_v27, %v3799_v33  ;;  %v3843_v40 = vmax.f32 %v3745_v12, %v3827_v30  ;;  %v17148_v3 = vrot.slane %v11936_v9, 6  ;;  %v3841_v8 = vmax.f32 %v12182_v51, %v3825_v44 }
 0x7d2   : > { %v3844_v55 = vmax.f32 %v3746_v47, %v3828_v54  ;;  %7311 = vrot.lane.b32.xlu1 %v12291_v22, %s7983_s2  ;;  %7306 = vrot.lane.b32.xlu0 %v12291_v22, %s7980_s14  ;;  %vm3913_vm3 = vcmp.gt.f32.partialorder %v11766_v26, %v12116_v38  ;;  %vm3944_vm2 = vcmp.gt.f32.partialorder %v11761_v29, 0.0 }
 0x7d3   : > { %v3811_v17 = vsel %vm3796_vm9, %v3780_v35, %v17148_v3  ;;  %v3842_v36 = vmax.f32 %v3744_v49, %v3826_v23  ;;  %vm3895_vm13 = vcmp.ge.f32.partialorder %v11766_v26, %v3843_v40  ;;  %vm3893_vm15 = vcmp.ge.f32.partialorder %v11756_v24, %v3841_v8 }
 0x7d4   : > { %v3814_v57 = vmax.f32 %v12179_v46, %v3811_v17  ;;  %vm12310_vm6 = vmand %vm3895_vm13, %vm3913_vm3  ;;  %v3829_v46 = vmax.f32 %v3731_v20, %v3813_v7  ;;  %vm3896_vm8 = vcmp.ge.f32.partialorder %v11782_v39, %v3844_v55  ;;  %vm3914_vm13 = vcmp.gt.f32.partialorder %v11782_v39, %v12116_v38 }
 0x7d5   : > { %vm3894_vm1 = vcmp.ge.f32.partialorder %v11761_v29, %v3842_v36  ;;  %vm3927_vm5 = vmand %vm3893_vm15, %vm3911_vm10  ;;  %7291 = vrot.lane.b32.xlu2 %v12224_v62, %s7983_s2  ;;  %vm3945_vm15 = vcmp.gt.f32.partialorder %v11766_v26, 0.0  ;;  %vm3946_vm10 = vcmp.gt.f32.partialorder %v11782_v39, 0.0 }
 0x7d6   : > { %vm3928_vm4 = vmand %vm3894_vm1, %vm3912_vm0  ;;  %v3830_v51 = vmax.f32 %v11936_v9, %v3814_v57  ;;  %vm3881_vm1 = vcmp.ge.f32.partialorder %v11668_v61, %v3829_v46 }
 0x7d7   : > { %vm3959_vm12 = vmand %vm3927_vm5, %vm3943_vm14  ;;  %vm3899_vm14 = vcmp.gt.f32.partialorder %v11668_v61, %v11967_v63 }
 0x7d8   : > { %vm3960_vm11 = vmand %vm3928_vm4, %vm3944_vm2  ;;  %v12323_v49 = vsel %vm3959_vm12, 1.0, %v7984_v5  ;;  %vm3882_vm5 = vcmp.ge.f32.partialorder %v11675_v28, %v3830_v51  ;;  %vm3931_vm12 = vcmp.gt.f32.partialorder %v11668_v61, 0.0 }
 0x7d9   : > { %17151 = vst [vmem:[#allocation33_spill] sm:$0xff] %v12323_v49  ;;  %v12328_v47 = vsel %vm3960_vm11, 1.0, %v7984_v5  ;;  %vm3930_vm3 = vmand %vm3896_vm8, %vm3914_vm13  ;;  %vm3900_vm8 = vcmp.gt.f32.partialorder %v11675_v28, %v11967_v63  ;;  %vm3932_vm11 = vcmp.gt.f32.partialorder %v11675_v28, 0.0 }
 0x7da   : > { %17152 = vst [vmem:[#allocation34_spill] sm:$0xff] %v12328_v47  ;;  %v7320_v24 = vpack.i.bf16 %v12328_v47, %v12323_v49  ;;  %vm3961_vm0 = vmand %vm12310_vm6, %vm3945_vm15  ;;  %vm17157_vm15 = vcmp.lt.s32.totalorder %v17059_v43, 7 }
 0x7db   : > { %vm3962_vm4 = vmand %vm3930_vm3, %vm3946_vm10  ;;  %v12339_v29 = vsel %vm3961_vm0, 1.0, %v7984_v5 }
 0x7dc   : > { %17153 = vst [vmem:[#allocation35_spill] sm:$0xff] %v12339_v29  ;;  %7321 = vrot.lane.b32.xlu0 %v7320_v24, %s7981_s26  ;;  %v12345_v26 = vsel %vm3962_vm4, 1.0, %v7984_v5  ;;  %vm3915_vm2 = vmand %vm3881_vm1, %vm3899_vm14  ;;  %vm17158_vm1 = vcmp.lt.s32.totalorder %v17059_v43, 1 }
 0x7dd   : > { %17154 = vst [vmem:[#allocation36_spill] sm:$0xff] %v12345_v26  ;;  %v7325_v39 = vpack.i.bf16 %v12345_v26, %v12339_v29  ;;  %vm3916_vm6 = vmand %vm3882_vm5, %vm3900_vm8  ;;  %7301 = vrot.lane.b32.xlu2 %v12291_v22, %s7981_s26 }
 0x7de   : > { %vm3947_vm13 = vmand %vm3915_vm2, %vm3931_vm12 }
 0x7df   : > { %7326 = vrot.lane.b32.xlu1 %v7325_v39, %s7981_s26  ;;  %vm3948_vm3 = vmand %vm3916_vm6, %vm3932_vm11  ;;  %v12357_v9 = vsel %vm3947_vm13, 1.0, %v7984_v5 }
 0x7e0   : > { %17155 = vst [vmem:[#allocation37_spill] sm:$0xff] %v12357_v9  ;;  %v12360_v63 = vsel %vm3948_vm3, 1.0, %v7984_v5  ;;  %vm17159_vm10 = vmmov %vm17157_vm15 }
 0x7e1   : > { %17156 = vst [vmem:[#allocation38_spill] sm:$0xff] %v12360_v63  ;;  %v7345_v38 = vpack.i.bf16 %v12360_v63, %v12357_v9  ;;  %vm17160_vm0 = vmmov %vm17159_vm10 }
 0x7e2   : > { %vm17161_vm5 = vmmov %vm17158_vm1 }
 0x7e3   : > { %vm17162_vm4 = vmmov %vm17158_vm1 }
 0x7e4   : > { %7346 = vrot.lane.b32.xlu0 %v7345_v38, %s7983_s2  ;;  %vm17164_vm2 = vmmov %vm17160_vm0 }
 0x7e5   : > { %7316 = vrot.lane.b32.xlu2 %v7345_v38, %s7981_s26  ;;  %vm17165_vm6 = vmmov %vm17160_vm0 }
 0x7e6   : > { %vm17166_vm12 = vmmov %vm17158_vm1 }
 0x7e7   : > { %7341 = vrot.lane.b32.xlu1 %v7325_v39, %s7980_s14  ;;  %vm17167_vm3 = vmmov %vm17158_vm1 }
 0x7ec   : > { %7351 = vrot.lane.b32.xlu0 %v7320_v24, %s7983_s2 }
 0x7ed   : > { %7331 = vrot.lane.b32.xlu2 %v7345_v38, %s7980_s14 }
 0x7ef   : > { %7361 = vrot.lane.b32.xlu1 %v7345_v38, %s7982_s18  ;;  %v7222_v61 = vpop.permute.xlu2 %7221 }
 0x7f0   : > { %v7224_v5 = vunpack.i.h.bf16 %v7222_v61  ;;  %v7223_v62 = vunpack.i.l.bf16 %v7222_v61 }
 0x7f4   : > { %7376 = vrot.lane.b32.xlu0 %v7325_v39, %s7982_s18 }
 0x7f5   : > { %7336 = vrot.lane.b32.xlu2 %v7320_v24, %s7980_s14 }
 0x7f7   : > { %7371 = vrot.lane.b32.xlu1 %v7320_v24, %s7982_s18  ;;  %v7227_v28 = vpop.permute.xlu2 %7226 }
 0x7f8   : > { %v7229_v16 = vunpack.i.h.bf16 %v7227_v28  ;;  %v7228_v20 = vunpack.i.l.bf16 %v7227_v28 }
 0x7fa   : > { %v4061_v42 = vmax.f32 %v7223_v62, %v7228_v20  ;;  %v4062_v25 = vmax.f32 %v7224_v5, %v7229_v16 }
 0x7fc   : > { %v4077_v32 = vmax.f32 %v12012_v48, %v4061_v42  ;;  %v4078_v27 = vmax.f32 %v12015_v59, %v4062_v25 }
 0x7fd   : > { %7356 = vrot.lane.b32.xlu2 %v7325_v39, %s7983_s2 }
 0x7ff   : > { %v7232_v37 = vpop.permute.xlu2 %7231 }
 0x800   : > { %v7234_v35 = vunpack.i.h.bf16 %v7232_v37  ;;  %v7233_v4 = vunpack.i.l.bf16 %v7232_v37 }
 0x805   : > { %7366 = vrot.lane.b32.xlu2 %v12291_v22, %s7982_s18 }
 0x807   : > { %v7237_v41 = vpop.permute.xlu0 %7236  ;;  %v7242_v18 = vpop.permute.xlu2 %7241 }
 0x808   : > { %v7239_v14 = vunpack.i.h.bf16 %v7237_v41  ;;  %v7238_v52 = vunpack.i.l.bf16 %v7237_v41  ;;  %v7244_v54 = vunpack.i.h.bf16 %v7242_v18  ;;  %v7243_v33 = vunpack.i.l.bf16 %v7242_v18 }
 0x80a   : > { %v4157_v53 = vmax.f32 %v7233_v4, %v7238_v52  ;;  %v4158_v2 = vmax.f32 %v7234_v35, %v7239_v14 }
 0x80c   : > { %v12378_v0 = vmax.f32 %v4077_v32, %v4157_v53  ;;  %v4174_v30 = vmax.f32 %v4078_v27, %v4158_v2 }
 0x80e   : > { %v16260_v60 = vrot.slane %v12378_v0, 1  ;;  %v4190_v22 = vrot.slane %v4174_v30, 1  ;;  %v16259_v44 = vrot.slane %v12378_v0, 7  ;;  %v4222_v23 = vrot.slane %v4174_v30, 7 }
 0x80f   : > { %v16255_v7 = vrot.slane %v12378_v0, 2  ;;  %v4286_v55 = vrot.slane %v4174_v30, 2  ;;  %v16256_v40 = vrot.slane %v12378_v0, 6  ;;  %v4318_v3 = vrot.slane %v4174_v30, 6  ;;  %v7257_v17 = vpop.permute.xlu2 %7256 }
 0x810   : > { %v12388_v36 = vsel %vm17157_vm15, %v16260_v60, %v4190_v22  ;;  %v4247_v57 = vsel %vm17158_vm1, %v16259_v44, %v4222_v23  ;;  %v7259_v46 = vunpack.i.h.bf16 %v7257_v17  ;;  %v7258_v51 = vunpack.i.l.bf16 %v7257_v17  ;;  %vm17168_vm15 = vmmov %vm17160_vm0  ;;  %v4434_v44 = vld [vmem:[#allocation7 + $0x38] sm:$0xff]  ;;  %v4435_v60 = vld [vmem:[#allocation7 + $0x40] sm:$0xff] }
 0x811   : > { %v7252_v8 = vpop.permute.xlu1 %7251  ;;  %v7247_v12 = vpop.permute.xlu0 %7246  ;;  %v12398_v24 = vsel %vm3763_vm7, %v16255_v7, %v4286_v55  ;;  %v4343_v39 = vsel %vm3796_vm9, %v16256_v40, %v4318_v3  ;;  %vm17169_vm1 = vmmov %vm17160_vm0 }
 0x812   : > { %v7249_v38 = vunpack.i.h.bf16 %v7247_v12  ;;  %v7248_v61 = vunpack.i.l.bf16 %v7247_v12  ;;  %v7254_v28 = vunpack.i.h.bf16 %v7252_v8  ;;  %v7253_v5 = vunpack.i.l.bf16 %v7252_v8 }
 0x814   : > { %v4063_v62 = vmax.f32 %v7243_v33, %v7248_v61  ;;  %v4064_v16 = vmax.f32 %v7244_v54, %v7249_v38  ;;  %v4160_v25 = vmax.f32 %v7254_v28, %v7259_v46  ;;  %v4159_v37 = vmax.f32 %v7253_v5, %v7258_v51 }
 0x816   : > { %v4079_v20 = vmax.f32 %v12034_v6, %v4063_v62  ;;  %v4080_v42 = vmax.f32 %v12037_v15, %v4064_v16 }
 0x817   : > { %v7262_v35 = vpop.permute.xlu2 %7261 }
 0x818   : > { %v12406_v41 = vmax.f32 %v4080_v42, %v4160_v25  ;;  %v4175_v18 = vmax.f32 %v4079_v20, %v4159_v37 }
 0x81a   : > { %v4192_v4 = vrot.slane %v12406_v41, 1  ;;  %v4224_v14 = vrot.slane %v12406_v41, 7  ;;  %v4288_v52 = vrot.slane %v12406_v41, 2  ;;  %v4320_v32 = vrot.slane %v12406_v41, 6 }
 0x81b   : > { %v4191_v27 = vrot.slane %v4175_v18, 1  ;;  %v4223_v53 = vrot.slane %v4175_v18, 7  ;;  %v4287_v2 = vrot.slane %v4175_v18, 2  ;;  %v4319_v54 = vrot.slane %v4175_v18, 6 }
 0x81d   : > { %v4213_v33 = vsel %vm17159_vm10, %v4191_v27, %v4192_v4  ;;  %v4214_v17 = vsel %vm17160_vm0, %v4190_v22, %v4191_v27  ;;  %v4245_v8 = vsel %vm17161_vm5, %v4223_v53, %v4224_v14  ;;  %v4246_v12 = vsel %vm17162_vm4, %v4222_v23, %v4223_v53  ;;  %vm17170_vm10 = vmmov %vm17167_vm3 }
 0x81e   : > { %v4254_v46 = vmax.f32 %v4214_v17, %v4247_v57  ;;  %v4255_v51 = vmax.f32 %v4213_v33, %v4246_v12  ;;  %v4309_v38 = vsel %vm3763_vm7, %v4287_v2, %v4288_v52  ;;  %v4310_v61 = vsel %vm3763_vm7, %v4286_v55, %v4287_v2  ;;  %v4430_v55 = vld [vmem:[#allocation7 + $0x18] sm:$0xff]  ;;  %v4431_v2 = vld [vmem:[#allocation7 + $0x20] sm:$0xff]  ;;  %vm17171_vm4 = vmmov %vm17167_vm3 }
 0x81f   : > { %v4341_v22 = vsel %vm3796_vm9, %v4319_v54, %v4320_v32  ;;  %v4342_v28 = vsel %vm3796_vm9, %v4318_v3, %v4319_v54  ;;  %v4350_v5 = vmax.f32 %v4310_v61, %v4343_v39  ;;  %v7267_v16 = vpop.permute.xlu2 %7266  ;;  %v7264_v3 = vunpack.i.h.bf16 %v7262_v35 }
 0x820   : > { %v4270_v23 = vmax.f32 %v4174_v30, %v4254_v46  ;;  %v4271_v57 = vmax.f32 %v4175_v18, %v4255_v51  ;;  %v4351_v62 = vmax.f32 %v4309_v38, %v4342_v28  ;;  %v7269_v27 = vunpack.i.h.bf16 %v7267_v16 }
 0x821   : > { %v7268_v53 = vunpack.i.l.bf16 %v7267_v16  ;;  %v7263_v39 = vunpack.i.l.bf16 %v7262_v35 }
 0x822   : > { %v4366_v20 = vmax.f32 %v4270_v23, %v4350_v5  ;;  %v4367_v42 = vmax.f32 %v4271_v57, %v4351_v62  ;;  %v4066_v18 = vmax.f32 %v7264_v3, %v7269_v27 }
 0x823   : > { %v4065_v30 = vmax.f32 %v7263_v39, %v7268_v53 }
 0x824   : > { %v4382_v25 = vsub.f32 1.0, %v4366_v20  ;;  %v4383_v37 = vsub.f32 1.0, %v4367_v42  ;;  %v4082_v57 = vmax.f32 %v12104_v58, %v4066_v18 }
 0x825   : > { %v4081_v23 = vmax.f32 %v12098_v1, %v4065_v30 }
 0x826   : > { %v12437_v33 = vmul.f32 %v4382_v25, %v11089_v31  ;;  %v12440_v17 = vmul.f32 %v4383_v37, %v16957_v50 }
 0x827   : > { %v7282_v54 = vpop.permute.xlu2 %7281 }
 0x828   : > { %17163 = vst [vmem:[#allocation148_spill] sm:$0xff] %v12440_v17  ;;  %vm4414_vm14 = vcmp.gt.f32.partialorder %v12437_v33, 0.5  ;;  %vm4415_vm8 = vcmp.gt.f32.partialorder %v12440_v17, 0.5 }
 0x829   : > { %v7277_v12 = vpop.permute.xlu1 %7276  ;;  %v12446_v46 = vsel %vm4414_vm14, %v4430_v55, 1e+09   ;;  %v12450_v51 = vsel %vm4415_vm8, %v4431_v2, 1e+09   ;;  %v7272_v38 = vpop.permute.xlu0 %7271 }
 0x82a   : > { %v7274_v61 = vunpack.i.h.bf16 %v7272_v38  ;;  %v7273_v28 = vunpack.i.l.bf16 %v7272_v38  ;;  %v7279_v35 = vunpack.i.h.bf16 %v7277_v12  ;;  %v7278_v5 = vunpack.i.l.bf16 %v7277_v12 }
 0x82c   : > { %v4162_v62 = vmax.f32 %v7274_v61, %v7279_v35  ;;  %v4161_v16 = vmax.f32 %v7273_v28, %v7278_v5 }
 0x82e   : > { %v12454_v20 = vmax.f32 %v4082_v57, %v4162_v62  ;;  %v12456_v42 = vmax.f32 %v4081_v23, %v4161_v16 }
 0x82f   : > { %v7292_v27 = vpop.permute.xlu2 %7291 }
 0x830   : > { %v4194_v25 = vrot.slane %v12454_v20, 1  ;;  %v4290_v37 = vrot.slane %v12454_v20, 2  ;;  %v4193_v53 = vrot.slane %v12456_v42, 1  ;;  %v4225_v55 = vrot.slane %v12456_v42, 7 }
 0x831   : > { %v4289_v2 = vrot.slane %v12456_v42, 2  ;;  %v4321_v3 = vrot.slane %v12456_v42, 6 }
 0x832   : > { %v4211_v39 = vsel %vm17164_vm2, %v4193_v53, %v4194_v25  ;;  %v4212_v30 = vsel %vm17165_vm6, %v4192_v4, %v4193_v53  ;;  %v4244_v18 = vsel %vm17166_vm12, %v4224_v14, %v4225_v55  ;;  %v7284_v53 = vunpack.i.h.bf16 %v7282_v54  ;;  %vm17173_vm2 = vmmov %vm17169_vm1 }
 0x833   : > { %v4256_v12 = vmax.f32 %v4212_v30, %v4245_v8  ;;  %v4257_v38 = vmax.f32 %v4211_v39, %v4244_v18  ;;  %v4307_v61 = vsel %vm3763_vm7, %v4289_v2, %v4290_v37  ;;  %v4308_v28 = vsel %vm3763_vm7, %v4288_v52, %v4289_v2  ;;  %vm17175_vm6 = vmmov %vm17167_vm3 }
 0x834   : > { %v4340_v4 = vsel %vm3796_vm9, %v4320_v32, %v4321_v3  ;;  %v4352_v14 = vmax.f32 %v4308_v28, %v4341_v22  ;;  %v7283_v52 = vunpack.i.l.bf16 %v7282_v54  ;;  %v7294_v22 = vunpack.i.h.bf16 %v7292_v27  ;;  %vm17178_vm12 = vmmov %vm17167_vm3 }
 0x835   : > { %v4272_v8 = vmax.f32 %v12406_v41, %v4256_v12  ;;  %v4273_v35 = vmax.f32 %v12456_v42, %v4257_v38  ;;  %v4353_v5 = vmax.f32 %v4307_v61, %v4340_v4  ;;  %v7293_v28 = vunpack.i.l.bf16 %v7292_v27  ;;  %v4432_v41 = vld [vmem:[#allocation7 + $0x28] sm:$0xff]  ;;  %v4433_v12 = vld [vmem:[#allocation7 + $0x30] sm:$0xff] }
 0x837   : > { %v4368_v23 = vmax.f32 %v4272_v8, %v4352_v14  ;;  %v4369_v57 = vmax.f32 %v4273_v35, %v4353_v5  ;;  %v12492_v62 = vpop.permute.xlu2 %7301 }
 0x839   : > { %v7297_v16 = vpop.permute.xlu0 %7296  ;;  %v7287_v30 = vpop.permute.xlu1 %7286  ;;  %v4384_v18 = vsub.f32 1.0, %v4368_v23  ;;  %v4385_v7 = vsub.f32 1.0, %v4369_v57 }
 0x83a   : > { %v7299_v2 = vunpack.i.h.bf16 %v7297_v16  ;;  %v7298_v39 = vunpack.i.l.bf16 %v7297_v16  ;;  %v7289_v40 = vunpack.i.h.bf16 %v7287_v30  ;;  %v7288_v32 = vunpack.i.l.bf16 %v7287_v30 }
 0x83b   : > { %v12495_v38 = vmul.f32 %v4384_v18, %v11152_v13  ;;  %v12498_v61 = vmul.f32 %v4385_v7, %v11100_v34 }
 0x83c   : > { %v4068_v4 = vmax.f32 %v7284_v53, %v7289_v40  ;;  %v4067_v14 = vmax.f32 %v7283_v52, %v7288_v32  ;;  %v4163_v54 = vmax.f32 %v7293_v28, %v7298_v39  ;;  %v4164_v8 = vmax.f32 %v7294_v22, %v7299_v2 }
 0x83d   : > { %vm4416_vm11 = vcmp.gt.f32.partialorder %v12495_v38, 0.5  ;;  %vm4417_vm13 = vcmp.gt.f32.partialorder %v12498_v61, 0.5  ;;  %v4226_v40 = vrot.slane %v12454_v20, 7  ;;  %v4322_v53 = vrot.slane %v12454_v20, 6 }
 0x83e   : > { %v4084_v35 = vmax.f32 %v12209_v45, %v4068_v4  ;;  %v4083_v27 = vmax.f32 %v12202_v56, %v4067_v14  ;;  %v12506_v5 = vsel %vm4416_vm11, %v4432_v41, 1e+09   ;;  %v12510_v7 = vsel %vm4417_vm13, %v4433_v12, 1e+09  }
 0x83f   : > { %v7317_v16 = vpop.permute.xlu2 %7316  ;;  %v4243_v28 = vsel %vm17167_vm3, %v4225_v55, %v4226_v40  ;;  %vm17180_vm3 = vmmov %vm17169_vm1 }
 0x840   : > { %v12513_v23 = vmax.f32 %v4084_v35, %v4164_v8  ;;  %v12515_v57 = vmax.f32 %v4083_v27, %v4163_v54 }
 0x842   : > { %v16258_v52 = vrot.slane %v12513_v23, 1  ;;  %v16257_v2 = vrot.slane %v12513_v23, 2  ;;  %v4195_v39 = vrot.slane %v12515_v57, 1  ;;  %v4227_v30 = vrot.slane %v12515_v57, 7 }
 0x843   : > { %v4291_v18 = vrot.slane %v12515_v57, 2  ;;  %v4323_v32 = vrot.slane %v12515_v57, 6 }
 0x844   : > { %v7307_v22 = vpop.permute.xlu0 %7306  ;;  %v4209_v41 = vsel %vm17168_vm15, %v4195_v39, %v16258_v52  ;;  %v4210_v12 = vsel %vm17169_vm1, %v4194_v25, %v4195_v39  ;;  %v4242_v4 = vsel %vm17170_vm10, %v4226_v40, %v4227_v30  ;;  %v12546_v27 = vpop.permute.xlu1 %7311  ;;  %v4339_v25 = vsel %vm3796_vm9, %v4321_v3, %v4322_v53  ;;  %vm17181_vm15 = vmmov %vm17169_vm1 }
 0x845   : > { %v4305_v14 = vsel %vm3763_vm7, %v4291_v18, %v16257_v2  ;;  %v4258_v54 = vmax.f32 %v4210_v12, %v4243_v28  ;;  %v4259_v55 = vmax.f32 %v4209_v41, %v4242_v4  ;;  %v4306_v8 = vsel %vm3763_vm7, %v4290_v37, %v4291_v18  ;;  %vm17183_vm1 = vmmov %vm17171_vm4 }
 0x846   : > { %v4338_v35 = vsel %vm3796_vm9, %v4322_v53, %v4323_v32  ;;  %v4354_v28 = vmax.f32 %v4306_v8, %v4339_v25  ;;  %v7308_v8 = vunpack.i.l.bf16 %v7307_v22  ;;  %v7314_v56 = vunpack.i.h.bf16 %v12546_v27  ;;  %vm17187_vm10 = vmmov %vm17173_vm2 }
 0x847   : > { %v4274_v40 = vmax.f32 %v12454_v20, %v4258_v54  ;;  %v4275_v39 = vmax.f32 %v12515_v57, %v4259_v55  ;;  %v4355_v41 = vmax.f32 %v4305_v14, %v4338_v35  ;;  %v7332_v12 = vpop.permute.xlu2 %7331  ;;  %v7309_v55 = vunpack.i.h.bf16 %v7307_v22 }
 0x848   : > { %v7334_v35 = vunpack.i.h.bf16 %v7332_v12  ;;  %v7333_v25 = vunpack.i.l.bf16 %v7332_v12  ;;  %v7313_v58 = vunpack.i.l.bf16 %v12546_v27 }
 0x849   : > { %v4370_v4 = vmax.f32 %v4274_v40, %v4354_v28  ;;  %v4371_v2 = vmax.f32 %v4275_v39, %v4355_v41  ;;  %v7304_v40 = vunpack.i.h.bf16 %v12492_v62  ;;  %v7303_v39 = vunpack.i.l.bf16 %v12492_v62 }
 0x84a   : > { %v16269_v28 = vrot.slane %v12513_v23, 7  ;;  %v7319_v41 = vunpack.i.h.bf16 %v7317_v16 }
 0x84b   : > { %v4386_v37 = vsub.f32 1.0, %v4370_v4  ;;  %v4387_v18 = vsub.f32 1.0, %v4371_v2  ;;  %v7318_v4 = vunpack.i.l.bf16 %v7317_v16 }
 0x84c   : > { %v4060_v1 = vmax.f32 %v7319_v41, %v7334_v35  ;;  %v12584_v16 = vsel %vm17171_vm4, %v4227_v30, %v16269_v28 }
 0x84d   : > { %v12555_v45 = vmul.f32 %v4386_v37, %v16975_v10  ;;  %v12558_v42 = vmul.f32 %v4387_v18, %v11200_v11  ;;  %v4069_v37 = vmax.f32 %v7303_v39, %v7308_v8  ;;  %v4070_v18 = vmax.f32 %v7304_v40, %v7309_v55 }
 0x84e   : > { %v7322_v52 = vpop.permute.xlu0 %7321  ;;  %v4059_v12 = vmax.f32 %v7318_v4, %v7333_v25  ;;  %v4076_v28 = vmax.f32 %v12360_v63, %v4060_v1 }
 0x84f   : > { %vm4418_vm0 = vcmp.gt.f32.partialorder %v12555_v45, 0.5  ;;  %vm16282_vm5 = vcmp.gt.f32.partialorder %v12558_v42, 0.5  ;;  %v7337_v3 = vpop.permute.xlu2 %7336  ;;  %v7324_v15 = vunpack.i.h.bf16 %v7322_v52 }
 0x850   : > { %v12564_v57 = vsel %vm4418_vm0, %v4434_v44, 1e+09   ;;  %v12568_v53 = vsel %vm16282_vm5, %v4435_v60, 1e+09   ;;  %v16272_v44 = vrot.slane %v12513_v23, 6  ;;  %v7339_v60 = vunpack.i.h.bf16 %v7337_v3 }
 0x851   : > { %v7327_v20 = vpop.permute.xlu1 %7326  ;;  %v7338_v59 = vunpack.i.l.bf16 %v7337_v3  ;;  %v4075_v30 = vmax.f32 %v12357_v9, %v4059_v12 }
 0x852   : > { %v7328_v62 = vunpack.i.l.bf16 %v7327_v20  ;;  %v12590_v55 = vsel %vm3796_vm9, %v4323_v32, %v16272_v44  ;;  %v12592_v27 = vmax.f32 %v7324_v15, %v7339_v60  ;;  %v7329_v11 = vunpack.i.h.bf16 %v7327_v20 }
 0x853   : > { %v7323_v32 = vunpack.i.l.bf16 %v7322_v52 }
 0x855   : > { %v12602_v13 = vmax.f32 %v7323_v32, %v7338_v59 }
 0x856   : > { %v7347_v2 = vpop.permute.xlu0 %7346 }
 0x857   : > { %v12570_v54 = vpop.permute.xlu2 %7356  ;;  %v7349_v8 = vunpack.i.h.bf16 %v7347_v2  ;;  %v7348_v35 = vunpack.i.l.bf16 %v7347_v2  ;;  %v4085_v2 = vmax.f32 %v12250_v19, %v4069_v37 }
 0x859   : > { %v7342_v14 = vpop.permute.xlu1 %7341 }
 0x85a   : > { %v7343_v6 = vunpack.i.l.bf16 %v7342_v14  ;;  %v7344_v25 = vunpack.i.h.bf16 %v7342_v14  ;;  %v4086_v14 = vmax.f32 %v12281_v21, %v4070_v18 }
 0x85c   : > { %v12596_v10 = vmax.f32 %v7328_v62, %v7343_v6  ;;  %v12600_v34 = vmax.f32 %v7329_v11, %v7344_v25 }
 0x85e   : > { %v12578_v22 = vpop.permute.xlu0 %7351  ;;  %v4089_v52 = vmax.f32 %v12339_v29, %v12596_v10 }
 0x85f   : > { %v7367_v39 = vpop.permute.xlu2 %7366 }
 0x860   : > { %v7369_v4 = vunpack.i.h.bf16 %v7367_v39  ;;  %v7368_v48 = vunpack.i.l.bf16 %v7367_v39  ;;  %v17176_v39 = vrot.slane %v12378_v0, 6 }
 0x861   : > { %v7362_v40 = vpop.permute.xlu1 %7361 }
 0x862   : > { %v7364_v3 = vunpack.i.h.bf16 %v7362_v40  ;;  %v7363_v41 = vunpack.i.l.bf16 %v7362_v40  ;;  %v4165_v60 = vmax.f32 %v7313_v58, %v7368_v48  ;;  %v4166_v40 = vmax.f32 %v7314_v56, %v7369_v4 }
 0x863   : > { %v7359_v48 = vunpack.i.h.bf16 %v12570_v54  ;;  %v7358_v58 = vunpack.i.l.bf16 %v12570_v54  ;;  %v17172_v54 = vrot.slane %v12378_v0, 1  ;;  %v17177_v4 = vrot.slane %v12378_v0, 2 }
 0x864   : > { %v4156_v44 = vmax.f32 %v7349_v8, %v7364_v3  ;;  %v4155_v15 = vmax.f32 %v7348_v35, %v7363_v41  ;;  %v12614_v20 = vmax.f32 %v4085_v2, %v4165_v60  ;;  %v12624_v62 = vmax.f32 %v4086_v14, %v4166_v40 }
 0x865   : > { %v17174_v35 = vrot.slane %v12378_v0, 7 }
 0x866   : > { %v12606_v1 = vmax.f32 %v4076_v28, %v4156_v44  ;;  %v12608_v6 = vmax.f32 %v4075_v30, %v4155_v15  ;;  %v7377_v11 = vpop.permute.xlu0 %7376  ;;  %v4090_v44 = vmax.f32 %v12345_v26, %v12600_v34 }
 0x867   : > { %v7379_v3 = vunpack.i.h.bf16 %v7377_v11  ;;  %v7378_v14 = vunpack.i.l.bf16 %v7377_v11  ;;  %v17182_v11 = vrot.slane %v12513_v23, 7 }
 0x868   : > { %v4188_v59 = vrot.slane %v12606_v1, 1  ;;  %v4220_v56 = vrot.slane %v12606_v1, 7  ;;  %v4284_v37 = vrot.slane %v12606_v1, 2  ;;  %v4316_v28 = vrot.slane %v12606_v1, 6 }
 0x869   : > { %v4219_v10 = vrot.slane %v12608_v6, 7  ;;  %v4315_v18 = vrot.slane %v12608_v6, 6 }
 0x86a   : > { %v4216_v8 = vsel %vm17173_vm2, %v4188_v59, %v17172_v54  ;;  %v4248_v25 = vsel %vm17175_vm6, %v4220_v56, %v17174_v35  ;;  %v4344_v34 = vsel %vm3796_vm9, %v4316_v28, %v17176_v39  ;;  %v4312_v30 = vsel %vm3763_vm7, %v4284_v37, %v17177_v4  ;;  %vm17191_vm6 = vmmov %vm17180_vm3 }
 0x86b   : > { %v4253_v41 = vmax.f32 %v12388_v36, %v4248_v25  ;;  %v4349_v32 = vmax.f32 %v12398_v24, %v4344_v34  ;;  %v4249_v15 = vsel %vm17178_vm12, %v4219_v10, %v4220_v56  ;;  %v4345_v2 = vsel %vm3796_vm9, %v4315_v18, %v4316_v28  ;;  %vm17192_vm12 = vmmov %vm17183_vm1 }
 0x86c   : > { %v4252_v60 = vmax.f32 %v4216_v8, %v4249_v15  ;;  %v4197_v36 = vrot.slane %v12614_v20, 1  ;;  %v4187_v54 = vrot.slane %v12608_v6, 1  ;;  %v16275_v24 = vrot.slane %v12624_v62, 1 }
 0x86d   : > { %v4269_v40 = vmax.f32 %v12378_v0, %v4253_v41  ;;  %v16276_v35 = vrot.slane %v12614_v20, 7  ;;  %v4348_v56 = vmax.f32 %v4312_v30, %v4345_v2  ;;  %v17179_v8 = vrot.slane %v12513_v23, 1 }
 0x86e   : > { %v4268_v25 = vmax.f32 %v12606_v1, %v4252_v60  ;;  %v4293_v28 = vrot.slane %v12614_v20, 2  ;;  %v4207_v0 = vsel %vm17181_vm15, %v4197_v36, %v16275_v24  ;;  %v4283_v4 = vrot.slane %v12608_v6, 2  ;;  %vm17193_vm15 = vmmov %vm17183_vm1 }
 0x86f   : > { %v4208_v39 = vsel %vm17180_vm3, %v17179_v8, %v4197_v36  ;;  %v4365_v34 = vmax.f32 %v4269_v40, %v4349_v32  ;;  %v4240_v1 = vsel %vm17183_vm1, %v17182_v11, %v16276_v35  ;;  %v16277_v32 = vrot.slane %v12624_v62, 2  ;;  %v17188_v35 = vld [vmem:[#allocation132_spill] sm:$0xff] }
 0x870   : > { %v4260_v41 = vmax.f32 %v4208_v39, %v12584_v16  ;;  %v4364_v30 = vmax.f32 %v4268_v25, %v4348_v56  ;;  %v4261_v15 = vmax.f32 %v4207_v0, %v4240_v1  ;;  %v17184_v36 = vrot.slane %v12513_v23, 2  ;;  %v4429_v56 = vld [vmem:[#allocation7 + $0x10] sm:$0xff]  ;;  %v17185_v39 = vld [vmem:[#allocation138_spill] sm:$0xff] }
 0x871   : > { %v4381_v60 = vsub.f32 1.0, %v4365_v34  ;;  %v16278_v8 = vrot.slane %v12614_v20, 6  ;;  %v7354_v11 = vunpack.i.h.bf16 %v12578_v22  ;;  %v4303_v25 = vsel %vm3763_vm7, %v4293_v28, %v16277_v32 }
 0x872   : > { %v4276_v2 = vmax.f32 %v12513_v23, %v4260_v41  ;;  %v4304_v40 = vsel %vm3763_vm7, %v17184_v36, %v4293_v28  ;;  %v4380_v24 = vsub.f32 1.0, %v4364_v30  ;;  %v4277_v16 = vmax.f32 %v12614_v20, %v4261_v15  ;;  %v4428_v15 = vld [vmem:[#allocation7 + $0x8] sm:$0xff] }
 0x873   : > { %v12689_v34 = vmul.f32 %v4381_v60, %v17185_v39  ;;  %v17186_v0 = vrot.slane %v12513_v23, 6  ;;  %v4356_v41 = vmax.f32 %v4304_v40, %v12590_v55  ;;  %v4169_v30 = vmax.f32 %v7358_v58, %v7378_v14 }
 0x874   : > { %v4217_v36 = vsel %vm17187_vm10, %v4187_v54, %v4188_v59  ;;  %v12701_v28 = vmul.f32 %v4380_v24, %v17188_v35  ;;  %v4170_v60 = vmax.f32 %v7359_v48, %v7379_v3  ;;  %v4313_v23 = vsel %vm3763_vm7, %v4283_v4, %v4284_v37  ;;  %v7372_v24 = vpop.permute.xlu1 %7371  ;;  %vm17197_vm10 = vmmov %vm17192_vm12 }
 0x875   : > { %v4336_v1 = vsel %vm3796_vm9, %v17186_v0, %v16278_v8  ;;  %vm4413_vm4 = vcmp.gt.f32.partialorder %v12689_v34, 0.5  ;;  %v4372_v39 = vmax.f32 %v4276_v2, %v4356_v41  ;;  %v12706_v12 = vmax.f32 %v4089_v52, %v4169_v30  ;;  %v17190_v41 = vld [vmem:[#allocation146_spill] sm:$0xff] }
 0x876   : > { %v4357_v32 = vmax.f32 %v4303_v25, %v4336_v1  ;;  %v12710_v55 = vsel %vm4413_vm4, %v4429_v56, 1e+09   ;;  %vm4412_vm2 = vcmp.gt.f32.partialorder %v12701_v28, 0.5  ;;  %v4186_v59 = vmax.f32 %v4090_v44, %v4170_v60  ;;  %v4436_v25 = vld [vmem:[#allocation7 + $0x48] sm:$0xff]  ;;  %v17189_v56 = vld [vmem:[#allocation139_spill] sm:$0xff]  ;;  %v4437_v1 = vld [vmem:[#allocation7 + $0x50] sm:$0xff] }
 0x877   : > { %v12715_v14 = vsel %vm4412_vm2, %v4428_v15, 1e+09   ;;  %v4388_v3 = vsub.f32 1.0, %v4372_v39  ;;  %v4233_v37 = vrot.slane %v12706_v12, 7  ;;  %v7374_v39 = vunpack.i.h.bf16 %v7372_v24 }
 0x878   : > { %v4373_v58 = vmax.f32 %v4277_v16, %v4357_v32  ;;  %v4202_v2 = vrot.slane %v4186_v59, 1  ;;  %v4234_v40 = vrot.slane %v4186_v59, 7  ;;  %v4298_v44 = vrot.slane %v4186_v59, 2 }
 0x879   : > { %v12721_v0 = vmul.f32 %v4388_v3, %v17189_v56  ;;  %v16279_v32 = vrot.slane %v12706_v12, 6  ;;  %v4330_v16 = vrot.slane %v4186_v59, 6  ;;  %v17194_v48 = vmax.f32 %v12328_v47, %v12592_v27 }
 0x87a   : > { %v4389_v35 = vsub.f32 1.0, %v4373_v58  ;;  %v4218_v15 = vsel %vm17191_vm6, %v4202_v2, %v4187_v54  ;;  %v4235_v60 = vsel %vm17192_vm12, %v4233_v37, %v4234_v40  ;;  %v4201_v58 = vrot.slane %v12706_v12, 1  ;;  %vm17203_vm12 = vmmov %vm17191_vm6 }
 0x87b   : > { %vm16341_vm3 = vcmp.gt.f32.partialorder %v12721_v0, 0.5  ;;  %v4250_v3 = vsel %vm17193_vm15, %v4234_v40, %v4219_v10  ;;  %v4266_v56 = vmax.f32 %v4218_v15, %v4235_v60  ;;  %v4331_v10 = vsel %vm3796_vm9, %v16279_v32, %v4330_v16  ;;  %vm17204_vm15 = vmmov %vm17197_vm10 }
 0x87c   : > { %v12725_v30 = vmul.f32 %v4389_v35, %v17190_v41  ;;  %v12740_v35 = vsel %vm16341_vm3, %v4436_v25, 1e+09   ;;  %v4251_v54 = vmax.f32 %v4217_v36, %v4250_v3  ;;  %v4314_v41 = vsel %vm3763_vm7, %v4298_v44, %v4283_v4 }
 0x87d   : > { %v4282_v52 = vmax.f32 %v4186_v59, %v4266_v56  ;;  %v4346_v40 = vsel %vm3796_vm9, %v4330_v16, %v4315_v18  ;;  %v4362_v15 = vmax.f32 %v4314_v41, %v4331_v10  ;;  %v4168_v4 = vmax.f32 %v7354_v11, %v7374_v39 }
 0x87e   : > { %vm16281_vm1 = vcmp.gt.f32.partialorder %v12725_v30, 0.5  ;;  %v4267_v36 = vmax.f32 %v12608_v6, %v4251_v54  ;;  %v4347_v25 = vmax.f32 %v4313_v23, %v4346_v40  ;;  %v7353_v60 = vunpack.i.l.bf16 %v12578_v22 }
 0x87f   : > { %v12746_v8 = vsel %vm16281_vm1, %v4437_v1, 1e+09   ;;  %v4297_v1 = vrot.slane %v12706_v12, 2  ;;  %v7373_v59 = vunpack.i.l.bf16 %v7372_v24  ;;  %v4087_v3 = vmax.f32 %v12323_v49, %v12602_v13  ;;  %v4439_v49 = vld [vmem:[#allocation7 + $0x60] sm:$0xff] }
 0x880   : > { %v4363_v56 = vmax.f32 %v4267_v36, %v4347_v25  ;;  %v4378_v32 = vmax.f32 %v4282_v52, %v4362_v15  ;;  %v4184_v26 = vmax.f32 %v17194_v48, %v4168_v4  ;;  %v17195_v18 = vrot.slane %v12624_v62, 7  ;;  %v4427_v36 = vld [vmem:[#allocation7] sm:$0xff]  ;;  %v4442_v25 = vld [vmem:[#allocation7 + $0x78] sm:$0xff]  ;;  %v17202_v4 = vld [vmem:[#allocation144_spill] sm:$0xff] }
 0x881   : > { %v17196_v6 = vrot.slane %v12614_v20, 7  ;;  %v17198_v22 = vrot.slane %v12624_v62, 6  ;;  %v17199_v23 = vrot.slane %v12614_v20, 6  ;;  %v4203_v24 = vsel %vm17191_vm6, %v4201_v58, %v4202_v2  ;;  %v17200_v20 = vld [vmem:[#allocation134_spill] sm:$0xff] }
 0x882   : > { %v4167_v52 = vmax.f32 %v7353_v60, %v7373_v59  ;;  %v4379_v27 = vsub.f32 1.0, %v4363_v56  ;;  %v4394_v48 = vsub.f32 1.0, %v4378_v32  ;;  %v4200_v16 = vrot.slane %v4184_v26, 1 }
 0x883   : > { %v4239_v11 = vsel %vm17197_vm10, %v17196_v6, %v17195_v18  ;;  %v4335_v13 = vsel %vm3796_vm9, %v17199_v23, %v17198_v22  ;;  %v4232_v39 = vrot.slane %v4184_v26, 7  ;;  %v4299_v54 = vsel %vm3763_vm7, %v4297_v1, %v4298_v44 }
 0x884   : > { %v4296_v41 = vrot.slane %v4184_v26, 2  ;;  %v4328_v10 = vrot.slane %v4184_v26, 6  ;;  %v4183_v40 = vmax.f32 %v4087_v3, %v4167_v52  ;;  %v12781_v15 = vmul.f32 %v4379_v27, %v17200_v20 }
 0x885   : > { %v12784_v18 = vmul.f32 %v4394_v48, %v17202_v4  ;;  %v4204_v2 = vsel %vm17203_vm12, %v4200_v16, %v4201_v58  ;;  %v4236_v32 = vsel %vm17204_vm15, %v4232_v39, %v4233_v37  ;;  %v17205_v23 = vrot.slane %v12624_v62, 1  ;;  %vm17206_vm15 = vmmov %vm17203_vm12 }
 0x886   : > { %17201 = vst [vmem:[#allocation149_spill] sm:$0xff] %v12781_v15  ;;  %v4199_v60 = vrot.slane %v4183_v40, 1  ;;  %v4231_v59 = vrot.slane %v4183_v40, 7  ;;  %v4265_v44 = vmax.f32 %v4203_v24, %v4236_v32  ;;  %v4295_v56 = vrot.slane %v4183_v40, 2 }
 0x887   : > { %vm4411_vm10 = vcmp.gt.f32.partialorder %v12781_v15, 0.5  ;;  %vm16289_vm6 = vcmp.gt.f32.partialorder %v12784_v18, 0.5  ;;  %v4300_v3 = vsel %vm3763_vm7, %v4296_v41, %v4297_v1  ;;  %v4327_v6 = vrot.slane %v4183_v40, 6 }
 0x888   : > { %v4443_v22 = vsel %vm4411_vm10, %v4427_v36, 1e+09   ;;  %v4458_v58 = vsel %vm16289_vm6, %v4442_v25, 1e+09   ;;  %v4205_v37 = vsel %vm17203_vm12, %v4199_v60, %v4200_v16  ;;  %v4206_v24 = vsel %vm17206_vm15, %v17205_v23, %v4199_v60 }
 0x889   : > { %vm17207_vm1 = vcmp.lt.s32.totalorder %v17059_v43, 1  ;;  %v17208_v1 = vrot.slane %v12624_v62, 7  ;;  %v4262_v48 = vmax.f32 %v4206_v24, %v4239_v11  ;;  %v4281_v36 = vmax.f32 %v12706_v12, %v4265_v44  ;;  %v17215_v43 = vld [vmem:[#allocation142_spill] sm:$0xff] }
 0x88a   : > { %v4237_v52 = vsel %vm17207_vm1, %v4231_v59, %v4232_v39  ;;  %vm17209_vm5 = vmmov %vm17207_vm1  ;;  %v4301_v16 = vsel %vm3763_vm7, %v4295_v56, %v4296_v41  ;;  %v17210_v4 = vrot.slane %v12624_v62, 2  ;;  %v17211_v60 = vrot.slane %v12706_v12, 6 }
 0x88b   : > { %v4238_v27 = vsel %vm17209_vm5, %v17208_v1, %v4231_v59  ;;  %v4264_v20 = vmax.f32 %v4204_v2, %v4237_v52  ;;  %v4278_v39 = vmax.f32 %v12624_v62, %v4262_v48  ;;  %v4333_v11 = vsel %vm3796_vm9, %v4327_v6, %v4328_v10 }
 0x88c   : > { %v4263_v25 = vmax.f32 %v4205_v37, %v4238_v27  ;;  %v4302_v32 = vsel %vm3763_vm7, %v17210_v4, %v4295_v56  ;;  %v4332_v59 = vsel %vm3796_vm9, %v4328_v10, %v17211_v60  ;;  %v17212_v2 = vrot.slane %v12624_v62, 6  ;;  %v4438_v10 = vld [vmem:[#allocation7 + $0x58] sm:$0xff]  ;;  %v17213_v62 = vld [vmem:[#allocation143_spill] sm:$0xff] }
 0x88d   : > { %v4280_v37 = vmax.f32 %v4184_v26, %v4264_v20  ;;  %v4358_v23 = vmax.f32 %v4302_v32, %v4335_v13  ;;  %v4360_v56 = vmax.f32 %v4300_v3, %v4333_v11  ;;  %v4361_v52 = vmax.f32 %v4299_v54, %v4332_v59  ;;  %v4440_v26 = vld [vmem:[#allocation7 + $0x68] sm:$0xff]  ;;  %v4441_v13 = vld [vmem:[#allocation7 + $0x70] sm:$0xff]  ;;  %v17217_v3 = vld [vmem:[#allocation147_spill] sm:$0xff] }
 0x88e   : > { %v4334_v41 = vsel %vm3796_vm9, %v17212_v2, %v4327_v6  ;;  %v4279_v44 = vmax.f32 %v4183_v40, %v4263_v25  ;;  %v17219_v6 = vld [vmem:[#allocation145_spill] sm:$0xff] }
 0x88f   : > { %v4359_v24 = vmax.f32 %v4301_v16, %v4334_v41  ;;  %v4374_v1 = vmax.f32 %v4278_v39, %v4358_v23  ;;  %v4376_v12 = vmax.f32 %v4280_v37, %v4360_v56  ;;  %v4377_v48 = vmax.f32 %v4281_v36, %v4361_v52 }
 0x891   : > { %v4375_v27 = vmax.f32 %v4279_v44, %v4359_v24  ;;  %v4390_v4 = vsub.f32 1.0, %v4374_v1  ;;  %v4392_v29 = vsub.f32 1.0, %v4376_v12  ;;  %v4393_v47 = vsub.f32 1.0, %v4377_v48 }
 0x893   : > { %v4391_v60 = vsub.f32 1.0, %v4375_v27  ;;  %v12829_v21 = vmul.f32 %v4390_v4, %v17213_v62  ;;  %v12835_v54 = vmul.f32 %v4392_v29, %v17217_v3  ;;  %v12838_v25 = vmul.f32 %v4393_v47, %v17219_v6 }
 0x895   : > { %17214 = vst [vmem:[#allocation150_spill] sm:$0xff] %v12829_v21  ;;  %v12832_v40 = vmul.f32 %v4391_v60, %v17215_v43  ;;  %vm16290_vm7 = vcmp.gt.f32.partialorder %v12829_v21, 0.5  ;;  %vm16288_vm5 = vcmp.gt.f32.partialorder %v12835_v54, 0.5  ;;  %vm16287_vm1 = vcmp.gt.f32.partialorder %v12838_v25, 0.5 }
 0x896   : > { %17218 = vst [vmem:[#allocation152_spill] sm:$0xff] %v12835_v54  ;;  %v4454_v36 = vsel %vm16290_vm7, %v4438_v10, 1e+09   ;;  %v4456_v29 = vsel %vm16288_vm5, %v4440_v26, 1e+09  }
 0x897   : > { %17216 = vst [vmem:[#allocation151_spill] sm:$0xff] %v12832_v40  ;;  %vm4423_vm9 = vcmp.gt.f32.partialorder %v12832_v40, 0.5  ;;  %v4457_v47 = vsel %vm16287_vm1, %v4441_v13, 1e+09  }
 0x898   : > { %17220 = vst [vmem:[#allocation153_spill] sm:$0xff] %v12838_v25  ;;  %v4455_v20 = vsel %vm4423_vm9, %v4439_v49, 1e+09  }
 0x899 LB: >> { %17227 = vst [vmem:[#allocation154_spill] sm:$0xff] %v7904_v58  ;;  %v4485_v49 = vrot.slane %v7960_v14, 7  ;;  %v4486_v16 = vrot.slane %v7956_v55, 7  ;;  %v4518_v32 = vrot.slane %v7956_v55, 1  ;;  %v4519_v39 = vrot.slane %v7952_v46, 1  ;;  %v17243_v11 = vld [vmem:[#allocation55_spill] sm:$0xff]  ;;  %v7924_v8 = vphi %v12746_v8, %v17593_v8   ;;  %v7920_v36 = vphi %v4454_v36, %v17592_v36   ;;  %v7916_v20 = vphi %v4455_v20, %v17591_v20   ;;  %v7912_v29 = vphi %v4456_v29, %v17590_v29   ;;  %v7908_v47 = vphi %v4457_v47, %v17589_v47   ;;  %v7904_v58 = vphi %v4458_v58, %v17588_v58   ;;  %s7968_s22 = sphi %s12894_s22, %s6190_s22   ;;  %v7964_v22 = vphi %v4443_v22, %v17603_v22   ;;  %v7960_v14 = vphi %v12715_v14, %v17602_v14   ;;  %v7956_v55 = vphi %v12710_v55, %v17601_v55   ;;  %v7952_v46 = vphi %v12446_v46, %v17600_v46   ;;  %v7948_v51 = vphi %v12450_v51, %v17599_v51   ;;  %v7944_v5 = vphi %v12506_v5, %v17598_v5   ;;  %v7940_v7 = vphi %v12510_v7, %v17597_v7   ;;  %v7936_v57 = vphi %v12564_v57, %v17596_v57   ;;  %v7932_v53 = vphi %v12568_v53, %v17595_v53   ;;  %v7928_v35 = vphi %v12740_v35, %v17594_v35  }
 0x89a   : >> { %17228 = vst [vmem:[#allocation155_spill] sm:$0xff] %v7908_v47  ;;  %v4487_v59 = vrot.slane %v7952_v46, 7  ;;  %vm17244_vm12 = vcmp.lt.s32.totalorder %v17243_v11, 1  ;;  %vm17245_vm15 = vcmp.lt.s32.totalorder %v17243_v11, 7  ;;  %v4488_v44 = vrot.slane %v7948_v51, 7  ;;  %s7985_s10 = smov 1  }
 0x89b   : >> { %17229 = vst [vmem:[#allocation156_spill] sm:$0xff] %v7912_v29  ;;  %v4513_v2 = vsel %vm17244_vm12, %v4485_v49, %v4486_v16  ;;  %v4544_v41 = vsel %vm17245_vm15, %v4518_v32, %v4519_v39  ;;  %v4520_v37 = vrot.slane %v7948_v51, 1  ;;  %v4521_v24 = vrot.slane %v7944_v5, 1  ;;  %vm17246_vm1 = vmmov %vm17244_vm12  ;;  %s7986_s15 = smov 127   ;;  %s6190_s22 = sadd.s32 1, %s7968_s22  }
 0x89c   : >> { %v17225_v21 = vld [vmem:[#allocation150_spill] sm:$0xff]  ;;  %17230 = vst [vmem:[#allocation157_spill] sm:$0xff] %v7916_v20  ;;  %v4550_v23 = vmin.f32 %v4513_v2, %v4544_v41  ;;  %v4511_v56 = vsel %vm17246_vm1, %v4487_v59, %v4488_v44  ;;  %v16292_v52 = vrot.slane %v7904_v58, 7  ;;  %v4517_v1 = vrot.slane %v7960_v14, 1  ;;  %vm17247_vm12 = vmmov %vm17245_vm15  ;;  %p4478_p2 = scmp.lt.s32.totalorder %s6190_s22, 32 }
 0x89d   : >> { %v17223_v54 = vld [vmem:[#allocation152_spill] sm:$0xff]  ;;  %17231 = vst [vmem:[#allocation158_spill] sm:$0xff] %v7920_v36  ;;  %v4542_v12 = vsel %vm17247_vm12, %v4520_v37, %v4521_v24  ;;  %v4484_v48 = vrot.slane %v7964_v22, 7  ;;  %v16291_v4 = vrot.slane %v7964_v22, 1  ;;  %vm17248_vm15 = vmmov %vm17246_vm1  ;;  %v4531_v63 = vrot.slane %v7904_v58, 1 }
 0x89e   : >> { %17232 = vst [vmem:[#allocation159_spill] sm:$0xff] %v7924_v8  ;;  %v12964_v27 = vmin.f32 %v7956_v55, %v4550_v23  ;;  %v4552_v60 = vmin.f32 %v4511_v56, %v4542_v12  ;;  %v4512_v10 = vsel %vm17248_vm15, %v4486_v16, %v4487_v59  ;;  %vm17249_vm1 = vmmov %vm17247_vm12  ;;  %v4489_v16 = vrot.slane %v7944_v5, 7 }
 0x89f   : >> { %v17226_v25 = vld [vmem:[#allocation153_spill] sm:$0xff]  ;;  %17233 = vst [vmem:[#allocation160_spill] sm:$0xff] %v7928_v35  ;;  %v4543_v62 = vsel %vm17249_vm1, %v4519_v39, %v4520_v37  ;;  %vm17250_vm5 = vmmov %vm17248_vm15  ;;  %v4522_v39 = vrot.slane %v7940_v7, 1  ;;  %vm17277_vm3 = vcmp.gt.f32.partialorder %v12721_v0, 0.5 }
 0x8a0   : >> { %17234 = vst [vmem:[#allocation161_spill] sm:$0xff] %v7932_v53  ;;  %4584 = vrot.lane.b32.xlu1 %v12964_v27, %s7985_s10  ;;  %v4515_v43 = vsel %vm17250_vm5, %v16292_v52, %v4484_v48  ;;  %vm17251_vm12 = vmmov %vm17249_vm1  ;;  %v4551_v13 = vmin.f32 %v4512_v10, %v4543_v62  ;;  %v12985_v3 = vmin.f32 %v7948_v51, %v4552_v60  ;;  %v4490_v10 = vrot.slane %v7940_v7, 7 }
 0x8a1   : >> { %17235 = vst [vmem:[#allocation162_spill] sm:$0xff] %v7936_v57  ;;  %v4546_v26 = vsel %vm17251_vm12, %v16291_v4, %v4517_v1  ;;  %vm17252_vm15 = vmmov %vm17250_vm5  ;;  %v4496_v4 = vrot.slane %v7916_v20, 7  ;;  %v4497_v52 = vrot.slane %v7912_v29, 7 }
 0x8a2   : >> { %17236 = vst [vmem:[#allocation163_spill] sm:$0xff] %v7940_v7  ;;  %v4548_v6 = vmin.f32 %v4515_v43, %v4546_v26  ;;  %v12990_v59 = vmin.f32 %v7952_v46, %v4551_v13  ;;  %v4514_v2 = vsel %vm17252_vm15, %v4484_v48, %v4485_v49  ;;  %vm17253_vm5 = vmmov %vm17249_vm1  ;;  %4588 = vrot.lane.b32.xlu2 %v12985_v3, %s7985_s10  ;;  %v4524_v49 = vrot.slane %v7932_v53, 1 }
 0x8a3   : >> { %17237 = vst [vmem:[#allocation164_spill] sm:$0xff] %v7944_v5  ;;  %v4545_v41 = vsel %vm17253_vm5, %v4517_v1, %v4518_v32  ;;  %vm17254_vm1 = vmmov %vm17252_vm15  ;;  %v4491_v32 = vrot.slane %v7936_v57, 7  ;;  %v4523_v1 = vrot.slane %v7936_v57, 1 }
 0x8a4   : >> { %17238 = vst [vmem:[#allocation165_spill] sm:$0xff] %v7948_v51  ;;  %v12999_v37 = vmin.f32 %v7964_v22, %v4548_v6  ;;  %v4510_v23 = vsel %vm17254_vm1, %v4488_v44, %v4489_v16  ;;  %vm17255_vm12 = vmmov %vm17253_vm5  ;;  %v4549_v12 = vmin.f32 %v4514_v2, %v4545_v41  ;;  %v4492_v44 = vrot.slane %v7932_v53, 7 }
 0x8a5   : >> { %17239 = vst [vmem:[#allocation166_spill] sm:$0xff] %v7952_v46  ;;  %v4541_v56 = vsel %vm17255_vm12, %v4521_v24, %v4522_v39  ;;  %v4525_v24 = vrot.slane %v7928_v35, 1  ;;  %vm17256_vm15 = vmmov %vm17254_vm1  ;;  %v4539_v26 = vsel %vm17253_vm5, %v4523_v1, %v4524_v49 }
 0x8a6   : >> { %17240 = vst [vmem:[#allocation167_spill] sm:$0xff] %v7956_v55  ;;  %v4553_v60 = vmin.f32 %v4510_v23, %v4541_v56  ;;  %4580 = vrot.lane.b32.xlu0 %v12999_v37, %s7985_s10  ;;  %v13019_v62 = vmin.f32 %v7960_v14, %v4549_v12  ;;  %v4508_v43 = vsel %vm17256_vm15, %v4490_v10, %v4491_v32  ;;  %vm17257_vm12 = vmmov %vm17253_vm5  ;;  %v4493_v56 = vrot.slane %v7928_v35, 7 }
 0x8a7   : >> { %17241 = vst [vmem:[#allocation168_spill] sm:$0xff] %v7960_v14  ;;  %v4555_v13 = vmin.f32 %v4508_v43, %v4539_v26  ;;  %v4507_v6 = vsel %vm17254_vm1, %v4491_v32, %v4492_v44  ;;  %v4538_v2 = vsel %vm17257_vm12, %v4524_v49, %v4525_v24  ;;  %vm17258_vm6 = vmmov %vm17254_vm1  ;;  %v4526_v43 = vrot.slane %v7924_v8, 1 }
 0x8a8   : >> { %17242 = vst [vmem:[#allocation169_spill] sm:$0xff] %v7964_v22  ;;  %v13012_v48 = vmin.f32 %v7944_v5, %v4553_v60  ;;  %4586 = vrot.lane.b32.xlu1 %v12990_v59, %s7985_s10  ;;  %v4509_v41 = vsel %vm17258_vm6, %v4489_v16, %v4490_v10  ;;  %vm17259_vm7 = vmmov %vm17253_vm5  ;;  %v4556_v12 = vmin.f32 %v4507_v6, %v4538_v2  ;;  %v4494_v60 = vrot.slane %v7924_v8, 7 }
 0x8a9   : >> { %v4540_v23 = vsel %vm17259_vm7, %v4522_v39, %v4523_v1  ;;  %v13039_v32 = vmin.f32 %v7936_v57, %v4555_v13  ;;  %v4527_v49 = vrot.slane %v7920_v36, 1  ;;  %v4495_v16 = vrot.slane %v7920_v36, 7  ;;  %vm17260_vm6 = vmmov %vm17254_vm1 }
 0x8aa   : >> { %4590 = vrot.lane.b32.xlu2 %v13012_v48, %s7985_s10  ;;  %v4554_v39 = vmin.f32 %v4509_v41, %v4540_v23  ;;  %v4505_v10 = vsel %vm17260_vm6, %v4493_v56, %v4494_v60  ;;  %vm17261_vm7 = vmmov %vm17253_vm5  ;;  %v4528_v26 = vrot.slane %v7916_v20, 1  ;;  %v13051_v6 = vmin.f32 %v7932_v53, %v4556_v12 }
 0x8ab   : >> { %v4536_v1 = vsel %vm17261_vm7, %v4526_v43, %v4527_v49  ;;  %vm17262_vm15 = vmmov %vm17254_vm1  ;;  %v4529_v12 = vrot.slane %v7912_v29, 1  ;;  %v4506_v19 = vsel %vm17254_vm1, %v4492_v44, %v4493_v56 }
 0x8ac   : >> { %v4504_v13 = vsel %vm17262_vm15, %v4494_v60, %v4495_v16  ;;  %v4558_v2 = vmin.f32 %v4505_v10, %v4536_v1  ;;  %v4535_v41 = vsel %vm17253_vm5, %v4527_v49, %v4528_v26  ;;  %v13060_v23 = vmin.f32 %v7940_v7, %v4554_v39  ;;  %vm17263_vm12 = vmmov %vm17253_vm5 }
 0x8ad   : >> { %v4537_v60 = vsel %vm17263_vm12, %v4525_v24, %v4526_v43  ;;  %v4530_v10 = vrot.slane %v7908_v47, 1  ;;  %v4559_v49 = vmin.f32 %v4504_v13, %v4535_v41  ;;  %v4498_v1 = vrot.slane %v7908_v47, 7  ;;  %vm17264_vm6 = vmmov %vm17254_vm1 }
 0x8ae   : >> { %4582 = vrot.lane.b32.xlu0 %v13019_v62, %s7985_s10  ;;  %v13073_v39 = vmin.f32 %v7924_v8, %v4558_v2  ;;  %v4557_v44 = vmin.f32 %v4506_v19, %v4537_v60  ;;  %v4502_v24 = vsel %vm17264_vm6, %v4496_v4, %v4497_v52  ;;  %vm17265_vm7 = vmmov %vm17253_vm5  ;;  %v4503_v60 = vsel %vm17254_vm1, %v4495_v16, %v4496_v4 }
 0x8af   : >> { %v4533_v56 = vsel %vm17265_vm7, %v4529_v12, %v4530_v10  ;;  %v13084_v43 = vmin.f32 %v7920_v36, %v4559_v49  ;;  %vm17266_vm15 = vmmov %vm17254_vm1  ;;  %v4532_v41 = vsel %vm17253_vm5, %v4530_v10, %v4531_v63  ;;  %v17268_v16 = vrot.slane %v7904_v58, 7 }
 0x8b0   : >> { %4594 = vrot.lane.b32.xlu1 %v13039_v32, %s7985_s10  ;;  %v4561_v13 = vmin.f32 %v4502_v24, %v4533_v56  ;;  %v4501_v2 = vsel %vm17266_vm15, %v4497_v52, %v4498_v1  ;;  %v13093_v19 = vmin.f32 %v7928_v35, %v4557_v44  ;;  %vm17267_vm12 = vmmov %vm17253_vm5 }
 0x8b1   : >> { %v4534_v49 = vsel %vm17267_vm12, %v4528_v26, %v4529_v12  ;;  %v4562_v9 = vmin.f32 %v4501_v2, %v4532_v41  ;;  %vm17269_vm6 = vmmov %vm17254_vm1  ;;  %v17270_v12 = vrot.slane %v7964_v22, 1 }
 0x8b2   : >> { %4596 = vrot.lane.b32.xlu2 %v13051_v6, %s7985_s10  ;;  %v13102_v24 = vmin.f32 %v7912_v29, %v4561_v13  ;;  %v4560_v52 = vmin.f32 %v4503_v60, %v4534_v49  ;;  %v4500_v26 = vsel %vm17269_vm6, %v4498_v1, %v17268_v16  ;;  %vm17271_vm7 = vmmov %vm17253_vm5 }
 0x8b3   : >> { %v13107_v10 = vmin.f32 %v7908_v47, %v4562_v9  ;;  %v4547_v44 = vsel %vm17271_vm7, %v4531_v63, %v17270_v12  ;;  %vm17272_vm15 = vmmov %vm17254_vm1 }
 0x8b4   : >> { %v13112_v4 = vmin.f32 %v7916_v20, %v4560_v52  ;;  %v4563_v9 = vmin.f32 %v4500_v26, %v4547_v44  ;;  %vm17273_vm12 = vmmov %vm17253_vm5 }
 0x8b5   : >> { %vm17274_vm6 = vmmov %vm17254_vm1 }
 0x8b6   : >> { %4592 = vrot.lane.b32.xlu0 %v13060_v23, %s7985_s10  ;;  %v13129_v56 = vmin.f32 %v7904_v58, %v4563_v9  ;;  %vm17275_vm7 = vmmov %vm17253_vm5 }
 0x8b8   : >> { %4600 = vrot.lane.b32.xlu1 %v13073_v39, %s7985_s10 }
 0x8ba   : >> { %4602 = vrot.lane.b32.xlu2 %v13084_v43, %s7985_s10 }
 0x8be   : >> { %4598 = vrot.lane.b32.xlu0 %v13093_v19, %s7985_s10 }
 0x8c0   : >> { %4606 = vrot.lane.b32.xlu1 %v13102_v24, %s7985_s10 }
 0x8c2   : >> { %4608 = vrot.lane.b32.xlu2 %v13107_v10, %s7985_s10 }
 0x8c6   : >> { %4604 = vrot.lane.b32.xlu0 %v13112_v4, %s7985_s10 }
 0x8c8   : >> { %4612 = vrot.lane.b32.xlu1 %v12999_v37, %s7986_s15 }
 0x8ca   : >> { %4614 = vrot.lane.b32.xlu2 %v13019_v62, %s7986_s15 }
 0x8ce   : >> { %4610 = vrot.lane.b32.xlu0 %v13129_v56, %s7985_s10 }
 0x8d0   : >> { %4618 = vrot.lane.b32.xlu1 %v12990_v59, %s7986_s15 }
 0x8d2   : >> { %4620 = vrot.lane.b32.xlu2 %v12985_v3, %s7986_s15 }
 0x8d6   : >> { %4616 = vrot.lane.b32.xlu0 %v12964_v27, %s7986_s15 }
 0x8d8   : >> { %4624 = vrot.lane.b32.xlu1 %v13060_v23, %s7986_s15 }
 0x8da   : >> { %4626 = vrot.lane.b32.xlu2 %v13039_v32, %s7986_s15 }
 0x8de   : >> { %4622 = vrot.lane.b32.xlu0 %v13012_v48, %s7986_s15 }
 0x8e0   : >> { %4630 = vrot.lane.b32.xlu1 %v13093_v19, %s7986_s15 }
 0x8e2   : >> { %4632 = vrot.lane.b32.xlu2 %v13073_v39, %s7986_s15 }
 0x8e6   : >> { %4628 = vrot.lane.b32.xlu0 %v13051_v6, %s7986_s15 }
 0x8e8   : >> { %4636 = vrot.lane.b32.xlu1 %v13112_v4, %s7986_s15 }
 0x8ea   : >> { %4638 = vrot.lane.b32.xlu2 %v13102_v24, %s7986_s15 }
 0x8ee   : >> { %4634 = vrot.lane.b32.xlu0 %v13084_v43, %s7986_s15 }
 0x8f0   : >> { %4642 = vrot.lane.b32.xlu1 %v13129_v56, %s7986_s15 }
 0x8f6   : >> { %4640 = vrot.lane.b32.xlu0 %v13107_v10, %s7986_s15 }
 0x8fc   : >> { %v4589_v63 = vpop.permute.xlu2 %4588 }
 0x904   : >> { %v4591_v1 = vpop.permute.xlu2 %4590 }
 0x90c   : >> { %v13163_v41 = vpop.permute.xlu2 %4596 }
 0x912   : >> { %v4585_v13 = vpop.permute.xlu1 %4584 }
 0x914   : >> { %v13165_v52 = vpop.permute.xlu2 %4602 }
 0x918   : >> { %v4581_v2 = vpop.permute.xlu0 %4580 }
 0x91a   : >> { %v4587_v60 = vpop.permute.xlu1 %4586 }
 0x91c   : >> { %v13169_v44 = vpop.permute.xlu2 %4608 }
 0x920   : >> { %v4583_v49 = vpop.permute.xlu0 %4582 }
 0x922   : >> { %v4595_v16 = vpop.permute.xlu1 %4594 }
 0x924   : >> { %v4615_v31 = vpop.permute.xlu2 %4614 }
 0x925   : >> { %v4645_v57 = vmin.f32 %v4583_v49, %v4615_v31 }
 0x927   : >> { %v4661_v29 = vmin.f32 %v13019_v62, %v4645_v57 }
 0x928   : >> { %v4593_v26 = vpop.permute.xlu0 %4592 }
 0x929   : >> { %v13190_v31 = vsel %vm4412_vm2, %v4661_v29, 1e+09 }
 0x92a   : >> { %v13167_v12 = vpop.permute.xlu1 %4600 }
 0x92c   : >> { %v4621_v36 = vpop.permute.xlu2 %4620 }
 0x930   : >> { %v4599_v9 = vpop.permute.xlu0 %4598 }
 0x932   : >> { %v13171_v50 = vpop.permute.xlu1 %4606 }
 0x938   : >> { %v13173_v58 = vpop.permute.xlu0 %4604 }
 0x93a   : >> { %v4613_v47 = vpop.permute.xlu1 %4612 }
 0x93b   : >> { %v4644_v55 = vmin.f32 %v4581_v2, %v4613_v47 }
 0x93d   : >> { %v4660_v20 = vmin.f32 %v12999_v37, %v4644_v55  ;;  %v4627_v55 = vpop.permute.xlu2 %4626  ;;  %v4693_v37 = vrot.slane %v13190_v31, 7 }
 0x93f   : >> { %v13182_v14 = vsel %vm4411_vm10, %v4660_v20, 1e+09 }
 0x940   : >> { %v13175_v8 = vpop.permute.xlu0 %4610 }
 0x942   : >> { %v4619_v7 = vpop.permute.xlu1 %4618 }
 0x943   : >> { %v4647_v46 = vmin.f32 %v4587_v60, %v4619_v7  ;;  %v4648_v7 = vmin.f32 %v4589_v63, %v4621_v36 }
 0x945   : >> { %v4663_v53 = vmin.f32 %v12990_v59, %v4647_v46  ;;  %v4692_v46 = vrot.slane %v13182_v14, 7  ;;  %v4664_v29 = vmin.f32 %v12985_v3, %v4648_v7  ;;  %v4651_v7 = vmin.f32 %v4595_v16, %v4627_v55  ;;  %v4633_v16 = vpop.permute.xlu2 %4632 }
 0x947   : >> { %v13186_v5 = vsel %vm4414_vm14, %v4663_v53, 1e+09  ;;  %v4725_v53 = vrot.slane %v13190_v31, 1  ;;  %v4722_v63 = vsel %vm17272_vm15, %v4692_v46, %v4693_v37  ;;  %v4667_v55 = vmin.f32 %v13039_v32, %v4651_v7  ;;  %vm17276_vm15 = vmmov %vm17254_vm1 }
 0x948   : >> { %v4617_v35 = vpop.permute.xlu0 %4616  ;;  %v16313_v59 = vrot.slane %v13186_v5, 1 }
 0x949   : >> { %v4646_v22 = vmin.f32 %v4585_v13, %v4617_v35 }
 0x94a   : >> { %v4625_v47 = vpop.permute.xlu1 %4624 }
 0x94b   : >> { %v4662_v57 = vmin.f32 %v12964_v27, %v4646_v22  ;;  %v4650_v20 = vmin.f32 %v4593_v26, %v4625_v47  ;;  %v13227_v26 = vsel %vm4415_vm8, %v4664_v29, 1e+09 }
 0x94c   : >> { %v4728_v29 = vrot.slane %v13227_v26, 1 }
 0x94d   : >> { %v13199_v35 = vsel %vm4413_vm4, %v4662_v57, 1e+09  ;;  %v4666_v27 = vmin.f32 %v13060_v23, %v4650_v20 }
 0x94e   : >> { %v4694_v36 = vrot.slane %v13199_v35, 7  ;;  %v4726_v22 = vrot.slane %v13199_v35, 1 }
 0x94f   : >> { %v13223_v2 = vsel %vm4417_vm13, %v4666_v27, 1e+09 }
 0x950   : >> { %v4623_v62 = vpop.permute.xlu0 %4622  ;;  %v4753_v13 = vsel %vm17253_vm5, %v4725_v53, %v4726_v22  ;;  %v4721_v3 = vsel %vm17254_vm1, %v4693_v37, %v4694_v36  ;;  %v4752_v23 = vsel %vm17273_vm12, %v4726_v22, %v16313_v59  ;;  %v4695_v22 = vrot.slane %v13186_v5, 7  ;;  %vm17279_vm12 = vmmov %vm17274_vm6 }
 0x951   : >> { %v4649_v60 = vmin.f32 %v4591_v1, %v4623_v62  ;;  %v4757_v49 = vmin.f32 %v4722_v63, %v4753_v13  ;;  %v4758_v57 = vmin.f32 %v4721_v3, %v4752_v23  ;;  %v16315_v59 = vrot.slane %v13223_v2, 1 }
 0x952   : >> { %v4631_v37 = vpop.permute.xlu1 %4630  ;;  %v4696_v62 = vrot.slane %v13227_v26, 7  ;;  %vm17278_vm1 = vcmp.gt.f32.partialorder %v12558_v42, 0.5 }
 0x953   : >> { %v4665_v47 = vmin.f32 %v13012_v48, %v4649_v60  ;;  %v13231_v20 = vmin.f32 %v13190_v31, %v4757_v49  ;;  %v13236_v27 = vmin.f32 %v13199_v35, %v4758_v57  ;;  %v4653_v1 = vmin.f32 %v4599_v9, %v4631_v37 }
 0x954   : >> { %v4719_v23 = vsel %vm17274_vm6, %v4695_v22, %v4696_v62  ;;  %v4654_v37 = vmin.f32 %v13167_v12, %v4633_v16  ;;  %vm17280_vm6 = vmmov %vm17253_vm5 }
 0x955   : >> { %v13242_v48 = vsel %vm4416_vm11, %v4665_v47, 1e+09  ;;  %4790 = vrot.lane.b32.xlu0 %v13231_v20, %s7985_s10  ;;  %4792 = vrot.lane.b32.xlu1 %v13236_v27, %s7985_s10  ;;  %v4669_v9 = vmin.f32 %v13093_v19, %v4653_v1  ;;  %v13275_v47 = vsel %vm4418_vm0, %v4667_v55, 1e+09 }
 0x956   : >> { %v16314_v63 = vrot.slane %v13242_v48, 7  ;;  %v4729_v13 = vrot.slane %v13242_v48, 1  ;;  %v4699_v55 = vrot.slane %v13275_v47, 7  ;;  %v16316_v12 = vrot.slane %v13275_v47, 1 }
 0x957   : >> { %v13270_v49 = vsel %vm17277_vm3, %v4669_v9, 1e+09  ;;  %v4670_v16 = vmin.f32 %v13073_v39, %v4654_v37 }
 0x958   : >> { %v4629_v3 = vpop.permute.xlu0 %4628  ;;  %v4750_v32 = vsel %vm17275_vm7, %v4728_v29, %v4729_v13  ;;  %v4718_v60 = vsel %vm17276_vm15, %v4696_v62, %v16314_v63  ;;  %v4749_v19 = vsel %vm17253_vm5, %v4729_v13, %v16315_v59  ;;  %v16320_v59 = vrot.slane %v13223_v2, 7  ;;  %vm17281_vm7 = vmmov %vm17279_vm12 }
 0x959   : >> { %v4652_v7 = vmin.f32 %v13163_v41, %v4629_v3  ;;  %v4760_v57 = vmin.f32 %v4719_v23, %v4750_v32  ;;  %v4761_v1 = vmin.f32 %v4718_v60, %v4749_v19  ;;  %v16318_v9 = vrot.slane %v13270_v49, 1  ;;  %v4639_v60 = vpop.permute.xlu2 %4638  ;;  %vm17282_vm15 = vmmov %vm17253_vm5 }
 0x95a   : >> { %v4637_v13 = vpop.permute.xlu1 %4636  ;;  %vm17283_vm5 = vcmp.gt.f32.partialorder %v12725_v30, 0.5 }
 0x95b   : >> { %v4668_v62 = vmin.f32 %v13051_v6, %v4652_v7  ;;  %v13280_v63 = vmin.f32 %v13227_v26, %v4760_v57  ;;  %v13285_v41 = vmin.f32 %v13242_v48, %v4761_v1  ;;  %v4656_v3 = vmin.f32 %v13173_v58, %v4637_v13 }
 0x95c   : >> { %v4716_v7 = vsel %vm17279_vm12, %v16320_v59, %v4699_v55  ;;  %v13325_v13 = vsel %vm17283_vm5, %v4670_v16, 1e+09  ;;  %vm17285_vm12 = vmmov %vm17281_vm7 }
 0x95d   : >> { %v13292_v6 = vsel %vm17278_vm1, %v4668_v62, 1e+09  ;;  %4796 = vrot.lane.b32.xlu0 %v13280_v63, %s7985_s10  ;;  %4798 = vrot.lane.b32.xlu1 %v13285_v41, %s7985_s10  ;;  %v4672_v58 = vmin.f32 %v13112_v4, %v4656_v3  ;;  %v4657_v3 = vmin.f32 %v13171_v50, %v4639_v60  ;;  %v4702_v16 = vrot.slane %v13325_v13, 7 }
 0x95e   : >> { %v16317_v23 = vrot.slane %v13292_v6, 7  ;;  %v4732_v32 = vrot.slane %v13292_v6, 1  ;;  %v4734_v50 = vrot.slane %v13325_v13, 1  ;;  %vm17284_vm1 = vcmp.gt.f32.partialorder %v17225_v21, 0.5 }
 0x95f   : >> { %v13320_v37 = vsel %vm4423_vm9, %v4672_v58, 1e+09 }
 0x960   : >> { %v4635_v19 = vpop.permute.xlu0 %4634  ;;  %v4747_v39 = vsel %vm17280_vm6, %v16316_v12, %v4732_v32  ;;  %v4715_v57 = vsel %vm17281_vm7, %v4699_v55, %v16317_v23  ;;  %v4746_v4 = vsel %vm17282_vm15, %v4732_v32, %v16318_v9  ;;  %v16319_v55 = vrot.slane %v13270_v49, 7  ;;  %vm17287_vm7 = vmmov %vm17282_vm15 }
 0x961   : >> { %v4655_v1 = vmin.f32 %v13165_v52, %v4635_v19  ;;  %v4763_v62 = vmin.f32 %v4716_v7, %v4747_v39  ;;  %v4764_v12 = vmin.f32 %v4715_v57, %v4746_v4  ;;  %v4736_v58 = vrot.slane %v13320_v37, 1  ;;  %vm17288_vm15 = vmmov %vm17285_vm12 }
 0x962   : >> { %v4643_v9 = vpop.permute.xlu1 %4642  ;;  %vm17286_vm6 = vcmp.gt.f32.partialorder %v12784_v18, 0.5  ;;  %vm17289_vm5 = vmmov %vm17287_vm7 }
 0x963   : >> { %v4671_v23 = vmin.f32 %v13084_v43, %v4655_v1  ;;  %v13331_v32 = vmin.f32 %v13275_v47, %v4763_v62  ;;  %v13335_v52 = vmin.f32 %v13292_v6, %v4764_v12  ;;  %v4659_v19 = vmin.f32 %v13175_v8, %v4643_v9 }
 0x964   : >> { %v4673_v43 = vmin.f32 %v13102_v24, %v4657_v3  ;;  %v4724_v9 = vrot.slane %v13182_v14, 1 }
 0x965   : >> { %v13342_v60 = vsel %vm17284_vm1, %v4671_v23, 1e+09  ;;  %4802 = vrot.lane.b32.xlu0 %v13331_v32, %s7985_s10  ;;  %4804 = vrot.lane.b32.xlu1 %v13335_v52, %s7985_s10  ;;  %v4675_v8 = vmin.f32 %v13129_v56, %v4659_v19  ;;  %v4713_v23 = vsel %vm17285_vm12, %v16319_v55, %v4702_v16  ;;  %vm17290_vm1 = vcmp.gt.f32.partialorder %v17223_v54, 0.5 }
 0x966   : >> { %v4703_v7 = vrot.slane %v13342_v60, 7  ;;  %v4735_v12 = vrot.slane %v13342_v60, 1  ;;  %v4689_v19 = vsel %vm17290_vm1, %v4673_v43, 1e+09  ;;  %v4704_v43 = vrot.slane %v13320_v37, 7  ;;  %vm17295_vm1 = vmmov %vm17285_vm12 }
 0x967   : >> { %v13359_v39 = vsel %vm17286_vm6, %v4675_v8, 1e+09  ;;  %vm17291_vm6 = vmmov %vm17289_vm5  ;;  %v4737_v31 = vrot.slane %v4689_v19, 1 }
 0x968   : >> { %v4641_v24 = vpop.permute.xlu0 %4640  ;;  %v4744_v57 = vsel %vm17287_vm7, %v4734_v50, %v4735_v12  ;;  %v4712_v4 = vsel %vm17288_vm15, %v4702_v16, %v4703_v7  ;;  %v4743_v56 = vsel %vm17289_vm5, %v4735_v12, %v4736_v58  ;;  %v4707_v1 = vrot.slane %v13359_v39, 7  ;;  %vm17293_vm15 = vmmov %vm17285_vm12 }
 0x969   : >> { %v4658_v62 = vmin.f32 %v13169_v44, %v4641_v24  ;;  %v4766_v3 = vmin.f32 %v4713_v23, %v4744_v57  ;;  %v4767_v8 = vmin.f32 %v4712_v4, %v4743_v56  ;;  %v4754_v44 = vsel %vm17291_vm6, %v4724_v9, %v4725_v53  ;;  %vm17297_vm6 = vmmov %vm17295_vm1 }
 0x96a   : >> { %v4723_v16 = vsel %vm17285_vm12, %v4707_v1, %v4692_v46  ;;  %v4739_v12 = vrot.slane %v13359_v39, 1  ;;  %v4705_v23 = vrot.slane %v4689_v19, 7  ;;  %vm17292_vm7 = vcmp.gt.f32.partialorder %v17226_v25, 0.5  ;;  %vm17296_vm12 = vmmov %vm17289_vm5 }
 0x96b   : >> { %v4674_v55 = vmin.f32 %v13107_v10, %v4658_v62  ;;  %v13375_v59 = vmin.f32 %v13325_v13, %v4766_v3  ;;  %v13390_v10 = vmin.f32 %v13342_v60, %v4767_v8  ;;  %v4756_v13 = vmin.f32 %v4723_v16, %v4754_v44 }
 0x96c   : >> { %v4720_v60 = vsel %vm17293_vm15, %v4694_v36, %v4695_v22  ;;  %v4710_v56 = vsel %vm17295_vm1, %v4704_v43, %v4705_v23  ;;  %v17299_v44 = vrot.slane %v13223_v2, 7  ;;  %vm17301_vm15 = vmmov %vm17295_vm1 }
 0x96d   : >> { %v4690_v24 = vsel %vm17292_vm7, %v4674_v55, 1e+09  ;;  %4808 = vrot.lane.b32.xlu0 %v13375_v59, %s7985_s10  ;;  %4810 = vrot.lane.b32.xlu1 %v13390_v10, %s7985_s10  ;;  %v13399_v53 = vmin.f32 %v13182_v14, %v4756_v13  ;;  %v17294_v55 = vrot.slane %v13186_v5, 1  ;;  %vm17298_vm7 = vmmov %vm17289_vm5  ;;  %v17300_v13 = vrot.slane %v13242_v48, 7 }
 0x96e   : >> { %v4706_v46 = vrot.slane %v4690_v24, 7  ;;  %v4738_v57 = vrot.slane %v4690_v24, 1  ;;  %v17304_v48 = vrot.slane %v13270_v49, 7 }
 0x96f   : >> { %v4751_v4 = vsel %vm17289_vm5, %v17294_v55, %v4728_v29  ;;  %4788 = vrot.lane.b32.xlu2 %v13399_v53, %s7985_s10 }
 0x970   : >> { %v4741_v62 = vsel %vm17296_vm12, %v4737_v31, %v4738_v57  ;;  %v4709_v35 = vsel %vm17297_vm6, %v4705_v23, %v4706_v46  ;;  %v4740_v36 = vsel %vm17298_vm7, %v4738_v57, %v4739_v12  ;;  %v4759_v3 = vmin.f32 %v4720_v60, %v4751_v4  ;;  %vm17307_vm12 = vmmov %vm17289_vm5 }
 0x971   : >> { %v4769_v26 = vmin.f32 %v4710_v56, %v4741_v62  ;;  %v4770_v22 = vmin.f32 %v4709_v35, %v4740_v36  ;;  %v4717_v23 = vsel %vm17301_vm15, %v17300_v13, %v17299_v44  ;;  %v17306_v4 = vrot.slane %v13270_v49, 1  ;;  %vm17308_vm6 = vmmov %vm17295_vm1 }
 0x972   : >> { %v13432_v16 = vmin.f32 %v13186_v5, %v4759_v3  ;;  %vm17309_vm7 = vmmov %vm17289_vm5 }
 0x973   : >> { %v13423_v8 = vmin.f32 %v4689_v19, %v4769_v26  ;;  %v13425_v29 = vmin.f32 %v4690_v24, %v4770_v22  ;;  %v17302_v19 = vrot.slane %v13275_v47, 1  ;;  %v17303_v24 = vrot.slane %v13223_v2, 1  ;;  %vm17310_vm15 = vmmov %vm17295_vm1 }
 0x974   : >> { %v17305_v47 = vrot.slane %v13292_v6, 7  ;;  %v4745_v56 = vsel %vm17307_vm12, %v17306_v4, %v4734_v50  ;;  %v4711_v6 = vsel %vm17308_vm6, %v4703_v7, %v4704_v43  ;;  %v4742_v50 = vsel %vm17309_vm7, %v4736_v58, %v4737_v31  ;;  %vm17311_vm12 = vmmov %vm17289_vm5 }
 0x975   : >> { %4814 = vrot.lane.b32.xlu0 %v13423_v8, %s7985_s10  ;;  %4816 = vrot.lane.b32.xlu1 %v13425_v29, %s7985_s10  ;;  %v4748_v57 = vsel %vm17289_vm5, %v17303_v24, %v17302_v19  ;;  %v4768_v35 = vmin.f32 %v4711_v6, %v4742_v50  ;;  %v4708_v7 = vsel %vm17310_vm15, %v4706_v46, %v4707_v1  ;;  %vm17312_vm6 = vmmov %vm17295_vm1 }
 0x976   : >> { %v4762_v60 = vmin.f32 %v4717_v23, %v4748_v57  ;;  %v4714_v55 = vsel %vm17295_vm1, %v17305_v47, %v17304_v48  ;;  %v4755_v58 = vsel %vm17289_vm5, %v4739_v12, %v4724_v9  ;;  %vm17313_vm7 = vmmov %vm17289_vm5 }
 0x977   : >> { %4794 = vrot.lane.b32.xlu2 %v13432_v16, %s7985_s10  ;;  %v4765_v62 = vmin.f32 %v4714_v55, %v4745_v56  ;;  %v4771_v43 = vmin.f32 %v4708_v7, %v4755_v58  ;;  %vm17314_vm15 = vmmov %vm17295_vm1 }
 0x978   : >> { %v13453_v5 = vmin.f32 %v13223_v2, %v4762_v60 }
 0x979   : >> { %v13472_v2 = vmin.f32 %v13270_v49, %v4765_v62  ;;  %v13487_v49 = vmin.f32 %v13320_v37, %v4768_v35  ;;  %v13502_v37 = vmin.f32 %v13359_v39, %v4771_v43 }
 0x97d   : >> { %4820 = vrot.lane.b32.xlu0 %v13399_v53, %s7986_s15  ;;  %4822 = vrot.lane.b32.xlu1 %v13231_v20, %s7986_s15 }
 0x97f   : >> { %4800 = vrot.lane.b32.xlu2 %v13453_v5, %s7985_s10 }
 0x985   : >> { %4826 = vrot.lane.b32.xlu0 %v13432_v16, %s7986_s15  ;;  %4828 = vrot.lane.b32.xlu1 %v13280_v63, %s7986_s15 }
 0x987   : >> { %4806 = vrot.lane.b32.xlu2 %v13472_v2, %s7985_s10 }
 0x98d   : >> { %4832 = vrot.lane.b32.xlu0 %v13453_v5, %s7986_s15  ;;  %4834 = vrot.lane.b32.xlu1 %v13331_v32, %s7986_s15 }
 0x98f   : >> { %4812 = vrot.lane.b32.xlu2 %v13487_v49, %s7985_s10 }
 0x995   : >> { %4838 = vrot.lane.b32.xlu0 %v13472_v2, %s7986_s15  ;;  %4840 = vrot.lane.b32.xlu1 %v13375_v59, %s7986_s15 }
 0x997   : >> { %4818 = vrot.lane.b32.xlu2 %v13502_v37, %s7985_s10 }
 0x99d   : >> { %4844 = vrot.lane.b32.xlu0 %v13487_v49, %s7986_s15  ;;  %4846 = vrot.lane.b32.xlu1 %v13423_v8, %s7986_s15 }
 0x99f   : >> { %4824 = vrot.lane.b32.xlu2 %v13236_v27, %s7986_s15 }
 0x9a5   : >> { %4850 = vrot.lane.b32.xlu0 %v13502_v37, %s7986_s15 }
 0x9a7   : >> { %4830 = vrot.lane.b32.xlu2 %v13285_v41, %s7986_s15 }
 0x9af   : >> { %4836 = vrot.lane.b32.xlu2 %v13335_v52, %s7986_s15 }
 0x9b7   : >> { %4842 = vrot.lane.b32.xlu2 %v13390_v10, %s7986_s15 }
 0x9bf   : >> { %4848 = vrot.lane.b32.xlu2 %v13425_v29, %s7986_s15 }
 0x9c7   : >> { %v4791_v14 = vpop.permute.xlu0 %4790  ;;  %v4793_v9 = vpop.permute.xlu1 %4792 }
 0x9c9   : >> { %v4789_v39 = vpop.permute.xlu2 %4788 }
 0x9cf   : >> { %v4797_v1 = vpop.permute.xlu0 %4796  ;;  %v4799_v12 = vpop.permute.xlu1 %4798 }
 0x9d1   : >> { %v4795_v31 = vpop.permute.xlu2 %4794 }
 0x9d7   : >> { %v4803_v46 = vpop.permute.xlu0 %4802  ;;  %v13522_v36 = vpop.permute.xlu1 %4804 }
 0x9d9   : >> { %v4801_v26 = vpop.permute.xlu2 %4800 }
 0x9df   : >> { %v13524_v22 = vpop.permute.xlu0 %4808  ;;  %v13526_v3 = vpop.permute.xlu1 %4810 }
 0x9e1   : >> { %v13528_v44 = vpop.permute.xlu2 %4806 }
 0x9e7   : >> { %v13530_v13 = vpop.permute.xlu0 %4814  ;;  %v13532_v23 = vpop.permute.xlu1 %4816 }
 0x9e9   : >> { %v13534_v19 = vpop.permute.xlu2 %4812 }
 0x9ef   : >> { %v4821_v24 = vpop.permute.xlu0 %4820  ;;  %v4823_v57 = vpop.permute.xlu1 %4822 }
 0x9f0   : >> { %v4852_v60 = vmin.f32 %v4789_v39, %v4821_v24  ;;  %v4853_v48 = vmin.f32 %v4791_v14, %v4823_v57 }
 0x9f1   : >> { %v13536_v47 = vpop.permute.xlu2 %4818 }
 0x9f2   : >> { %v4868_v55 = vmin.f32 %v13399_v53, %v4852_v60  ;;  %v4869_v4 = vmin.f32 %v13231_v20, %v4853_v48 }
 0x9f4   : >> { %v13542_v50 = vsel %vm4411_vm10, %v4868_v55, 1e+09  ;;  %v13546_v7 = vsel %vm4412_vm2, %v4869_v4, 1e+09 }
 0x9f5   : >> { %v4900_v53 = vrot.slane %v13542_v50, 7  ;;  %v4901_v20 = vrot.slane %v13546_v7, 7  ;;  %v4933_v24 = vrot.slane %v13546_v7, 1 }
 0x9f7   : >> { %v4827_v56 = vpop.permute.xlu0 %4826  ;;  %v4829_v62 = vpop.permute.xlu1 %4828 }
 0x9f8   : >> { %v4855_v6 = vmin.f32 %v4795_v31, %v4827_v56  ;;  %v4856_v35 = vmin.f32 %v4797_v1, %v4829_v62  ;;  %v4930_v56 = vsel %vm17295_vm1, %v4900_v53, %v4901_v20 }
 0x9f9   : >> { %v4825_v43 = vpop.permute.xlu2 %4824 }
 0x9fa   : >> { %v4871_v58 = vmin.f32 %v13432_v16, %v4855_v6  ;;  %v4854_v14 = vmin.f32 %v4793_v9, %v4825_v43  ;;  %v4872_v39 = vmin.f32 %v13280_v63, %v4856_v35 }
 0x9fc   : >> { %v13554_v31 = vsel %vm4414_vm14, %v4871_v58, 1e+09  ;;  %v4870_v1 = vmin.f32 %v13236_v27, %v4854_v14  ;;  %v13567_v4 = vsel %vm4415_vm8, %v4872_v39, 1e+09 }
 0x9fd   : >> { %v16321_v9 = vrot.slane %v13554_v31, 1  ;;  %v4904_v39 = vrot.slane %v13567_v4, 7 }
 0x9fe   : >> { %v13560_v57 = vsel %vm4413_vm4, %v4870_v1, 1e+09 }
 0x9ff   : >> { %v4833_v16 = vpop.permute.xlu0 %4832  ;;  %v4835_v60 = vpop.permute.xlu1 %4834  ;;  %v4902_v48 = vrot.slane %v13560_v57, 7  ;;  %v4934_v63 = vrot.slane %v13560_v57, 1 }
 0xa00   : >> { %v4858_v55 = vmin.f32 %v4801_v26, %v4833_v16  ;;  %v4859_v27 = vmin.f32 %v4803_v46, %v4835_v60 }
 0xa01   : >> { %v4831_v6 = vpop.permute.xlu2 %4830  ;;  %v4961_v35 = vsel %vm17311_vm12, %v4933_v24, %v4934_v63  ;;  %v4929_v26 = vsel %vm17312_vm6, %v4901_v20, %v4902_v48  ;;  %v4960_v46 = vsel %vm17313_vm7, %v4934_v63, %v16321_v9  ;;  %vm17315_vm12 = vmmov %vm17289_vm5  ;;  %vm17316_vm6 = vcmp.gt.f32.partialorder %v12558_v42, 0.5 }
 0xa02   : >> { %v4874_v62 = vmin.f32 %v13453_v5, %v4858_v55  ;;  %v4857_v58 = vmin.f32 %v4799_v12, %v4831_v6  ;;  %v4965_v43 = vmin.f32 %v4930_v56, %v4961_v35  ;;  %v4966_v14 = vmin.f32 %v4929_v26, %v4960_v46 }
 0xa03   : >> { %v4903_v5 = vrot.slane %v13554_v31, 7  ;;  %v4875_v1 = vmin.f32 %v13331_v32, %v4859_v27  ;;  %v4936_v12 = vrot.slane %v13567_v4, 1  ;;  %vm17317_vm7 = vcmp.gt.f32.partialorder %v12725_v30, 0.5 }
 0xa04   : >> { %v13591_v16 = vsel %vm4417_vm13, %v4874_v62, 1e+09  ;;  %v4873_v20 = vmin.f32 %v13285_v41, %v4857_v58  ;;  %v13595_v60 = vmin.f32 %v13546_v7, %v4965_v43  ;;  %v13598_v63 = vmin.f32 %v13560_v57, %v4966_v14 }
 0xa05   : >> { %v16323_v32 = vrot.slane %v13591_v16, 1  ;;  %v13615_v35 = vsel %vm4418_vm0, %v4875_v1, 1e+09  ;;  %v4927_v46 = vsel %vm17314_vm15, %v4903_v5, %v4904_v39  ;;  %vm17318_vm15 = vmmov %vm17295_vm1 }
 0xa06   : >> { %v13603_v55 = vsel %vm4416_vm11, %v4873_v20, 1e+09  ;;  %4998 = vrot.lane.b32.xlu2 %v13595_v60, %s7985_s10  ;;  %5000 = vrot.lane.b32.xlu0 %v13598_v63, %s7985_s10 }
 0xa07   : >> { %v4839_v56 = vpop.permute.xlu0 %4838  ;;  %v4841_v27 = vpop.permute.xlu1 %4840  ;;  %v16322_v62 = vrot.slane %v13603_v55, 7  ;;  %v4937_v41 = vrot.slane %v13603_v55, 1 }
 0xa08   : >> { %v4861_v6 = vmin.f32 %v13528_v44, %v4839_v56  ;;  %v4862_v26 = vmin.f32 %v13524_v22, %v4841_v27  ;;  %v4906_v56 = vrot.slane %v13591_v16, 7  ;;  %v4907_v27 = vrot.slane %v13615_v35, 7 }
 0xa09   : >> { %v4837_v44 = vpop.permute.xlu2 %4836  ;;  %v4958_v43 = vsel %vm17289_vm5, %v4936_v12, %v4937_v41  ;;  %v4926_v14 = vsel %vm17295_vm1, %v4904_v39, %v16322_v62  ;;  %v4957_v22 = vsel %vm17315_vm12, %v4937_v41, %v16323_v32  ;;  %vm17319_vm12 = vmmov %vm17289_vm5 }
 0xa0a   : >> { %v4877_v58 = vmin.f32 %v13472_v2, %v4861_v6  ;;  %v4860_v1 = vmin.f32 %v13522_v36, %v4837_v44  ;;  %v4968_v20 = vmin.f32 %v4927_v46, %v4958_v43  ;;  %v4969_v2 = vmin.f32 %v4926_v14, %v4957_v22 }
 0xa0b   : >> { %v4878_v6 = vmin.f32 %v13375_v59, %v4862_v26  ;;  %v16324_v36 = vrot.slane %v13615_v35, 1 }
 0xa0c   : >> { %v13641_v9 = vsel %vm17277_vm3, %v4877_v58, 1e+09  ;;  %v4876_v39 = vmin.f32 %v13335_v52, %v4860_v1  ;;  %v13645_v62 = vmin.f32 %v13567_v4, %v4968_v20  ;;  %v13648_v41 = vmin.f32 %v13603_v55, %v4969_v2 }
 0xa0d   : >> { %v16326_v59 = vrot.slane %v13641_v9, 1  ;;  %v13665_v14 = vsel %vm17317_vm7, %v4878_v6, 1e+09  ;;  %v4924_v1 = vsel %vm17318_vm15, %v4906_v56, %v4907_v27  ;;  %vm17321_vm7 = vcmp.gt.f32.partialorder %v17223_v54, 0.5  ;;  %vm17322_vm15 = vmmov %vm17295_vm1 }
 0xa0e   : >> { %v13653_v46 = vsel %vm17316_vm6, %v4876_v39, 1e+09  ;;  %5004 = vrot.lane.b32.xlu2 %v13645_v62, %s7985_s10  ;;  %5006 = vrot.lane.b32.xlu0 %v13648_v41, %s7985_s10  ;;  %vm17320_vm6 = vcmp.gt.f32.partialorder %v17225_v21, 0.5 }
 0xa0f   : >> { %v4845_v44 = vpop.permute.xlu0 %4844  ;;  %v4847_v26 = vpop.permute.xlu1 %4846  ;;  %v16325_v58 = vrot.slane %v13653_v46, 7  ;;  %v4940_v52 = vrot.slane %v13653_v46, 1 }
 0xa10   : >> { %v4864_v43 = vmin.f32 %v13534_v19, %v4845_v44  ;;  %v4865_v22 = vmin.f32 %v13530_v13, %v4847_v26  ;;  %v16328_v26 = vrot.slane %v13641_v9, 7 }
 0xa11   : >> { %v4843_v19 = vpop.permute.xlu2 %4842  ;;  %v4955_v2 = vsel %vm17289_vm5, %v16324_v36, %v4940_v52  ;;  %v4923_v6 = vsel %vm17295_vm1, %v4907_v27, %v16325_v58  ;;  %v4954_v13 = vsel %vm17319_vm12, %v4940_v52, %v16326_v59  ;;  %vm17323_vm12 = vmmov %vm17289_vm5 }
 0xa12   : >> { %v4880_v20 = vmin.f32 %v13487_v49, %v4864_v43  ;;  %v4863_v39 = vmin.f32 %v13526_v3, %v4843_v19  ;;  %v4971_v44 = vmin.f32 %v4924_v1, %v4955_v2  ;;  %v4972_v49 = vmin.f32 %v4923_v6, %v4954_v13 }
 0xa13   : >> { %v4910_v43 = vrot.slane %v13665_v14, 7  ;;  %v4881_v32 = vmin.f32 %v13423_v8, %v4865_v22  ;;  %v16327_v3 = vrot.slane %v13665_v14, 1 }
 0xa14   : >> { %v13691_v36 = vsel %vm4423_vm9, %v4880_v20, 1e+09  ;;  %v4879_v27 = vmin.f32 %v13390_v10, %v4863_v39  ;;  %v13695_v58 = vmin.f32 %v13615_v35, %v4971_v44  ;;  %v13698_v52 = vmin.f32 %v13653_v46, %v4972_v49 }
 0xa15   : >> { %v16330_v8 = vrot.slane %v13691_v36, 1  ;;  %v4897_v2 = vsel %vm17321_vm7, %v4881_v32, 1e+09  ;;  %v4921_v6 = vsel %vm17322_vm15, %v16328_v26, %v4910_v43  ;;  %v4932_v49 = vrot.slane %v13542_v50, 1  ;;  %vm17326_vm15 = vmmov %vm17295_vm1 }
 0xa16   : >> { %v13703_v1 = vsel %vm17320_vm6, %v4879_v27, 1e+09  ;;  %5010 = vrot.lane.b32.xlu2 %v13695_v58, %s7985_s10  ;;  %5012 = vrot.lane.b32.xlu0 %v13698_v52, %s7985_s10  ;;  %vm17324_vm6 = vcmp.gt.f32.partialorder %v12784_v18, 0.5  ;;  %vm17325_vm7 = vcmp.gt.f32.partialorder %v17226_v25, 0.5 }
 0xa17   : >> { %v4851_v19 = vpop.permute.xlu0 %4850  ;;  %v16329_v22 = vrot.slane %v13703_v1, 7  ;;  %v4943_v20 = vrot.slane %v13703_v1, 1 }
 0xa18   : >> { %v4867_v10 = vmin.f32 %v13536_v47, %v4851_v19 }
 0xa19   : >> { %v4849_v39 = vpop.permute.xlu2 %4848  ;;  %v4952_v47 = vsel %vm17289_vm5, %v16327_v3, %v4943_v20  ;;  %v4920_v44 = vsel %vm17295_vm1, %v4910_v43, %v16329_v22  ;;  %v4951_v32 = vsel %vm17323_vm12, %v4943_v20, %v16330_v8  ;;  %v4913_v3 = vrot.slane %v4897_v2, 7  ;;  %vm17327_vm12 = vmmov %vm17289_vm5 }
 0xa1a   : >> { %v4883_v13 = vmin.f32 %v13502_v37, %v4867_v10  ;;  %v4866_v37 = vmin.f32 %v13532_v23, %v4849_v39  ;;  %v4974_v27 = vmin.f32 %v4921_v6, %v4952_v47  ;;  %v4975_v19 = vmin.f32 %v4920_v44, %v4951_v32 }
 0xa1b   : >> { %v4912_v10 = vrot.slane %v13691_v36, 7  ;;  %v4945_v8 = vrot.slane %v4897_v2, 1 }
 0xa1c   : >> { %v4899_v59 = vsel %vm17324_vm6, %v4883_v13, 1e+09  ;;  %v4882_v43 = vmin.f32 %v13425_v29, %v4866_v37  ;;  %v13739_v22 = vmin.f32 %v13665_v14, %v4974_v27  ;;  %v13742_v20 = vmin.f32 %v13703_v1, %v4975_v19  ;;  %vm17328_vm6 = vmmov %vm17295_vm1 }
 0xa1d   : >> { %v4915_v26 = vrot.slane %v4899_v59, 7  ;;  %v4962_v29 = vsel %vm17289_vm5, %v4932_v49, %v4933_v24  ;;  %v4947_v13 = vrot.slane %v4899_v59, 1  ;;  %v4918_v32 = vsel %vm17295_vm1, %v4912_v10, %v4913_v3 }
 0xa1e   : >> { %v4898_v23 = vsel %vm17325_vm7, %v4882_v43, 1e+09  ;;  %5016 = vrot.lane.b32.xlu2 %v13739_v22, %s7985_s10  ;;  %5018 = vrot.lane.b32.xlu0 %v13742_v20, %s7985_s10  ;;  %vm17329_vm7 = vmmov %vm17289_vm5 }
 0xa1f   : >> { %v4931_v6 = vsel %vm17326_vm15, %v4915_v26, %v4900_v53  ;;  %v4914_v39 = vrot.slane %v4898_v23, 7  ;;  %v4946_v47 = vrot.slane %v4898_v23, 1  ;;  %vm17330_vm15 = vmmov %vm17295_vm1 }
 0xa20   : >> { %v4964_v44 = vmin.f32 %v4931_v6, %v4962_v29  ;;  %v4928_v43 = vsel %vm17330_vm15, %v4902_v48, %v4903_v5  ;;  %v17333_v48 = vrot.slane %v13603_v55, 7  ;;  %v17334_v5 = vrot.slane %v13615_v35, 1  ;;  %vm17344_vm15 = vmmov %vm17295_vm1 }
 0xa21   : >> { %v4949_v7 = vsel %vm17327_vm12, %v4945_v8, %v4946_v47  ;;  %v4917_v24 = vsel %vm17328_vm6, %v4913_v3, %v4914_v39  ;;  %v4948_v37 = vsel %vm17329_vm7, %v4946_v47, %v4947_v13  ;;  %v17332_v3 = vrot.slane %v13554_v31, 1  ;;  %vm17336_vm12 = vmmov %vm17289_vm5 }
 0xa22   : >> { %v13761_v53 = vmin.f32 %v13542_v50, %v4964_v44  ;;  %v4977_v27 = vmin.f32 %v4918_v32, %v4949_v7  ;;  %v4978_v19 = vmin.f32 %v4917_v24, %v4948_v37  ;;  %v4925_v4 = vsel %vm17295_vm1, %v17333_v48, %v4906_v56  ;;  %vm17339_vm6 = vmmov %vm17295_vm1 }
 0xa23   : >> { %v4959_v29 = vsel %vm17289_vm5, %v17332_v3, %v4936_v12  ;;  %v17335_v12 = vrot.slane %v13591_v16, 1  ;;  %v17337_v55 = vrot.slane %v13641_v9, 7  ;;  %v17338_v56 = vrot.slane %v13653_v46, 7  ;;  %vm17342_vm7 = vmmov %vm17289_vm5 }
 0xa24   : >> { %4996 = vrot.lane.b32.xlu1 %v13761_v53, %s7985_s10  ;;  %v13777_v50 = vmin.f32 %v4897_v2, %v4977_v27  ;;  %v13779_v6 = vmin.f32 %v4898_v23, %v4978_v19  ;;  %v4967_v47 = vmin.f32 %v4928_v43, %v4959_v29  ;;  %v17340_v44 = vrot.slane %v13665_v14, 1 }
 0xa25   : >> { %v4956_v2 = vsel %vm17336_vm12, %v17335_v12, %v17334_v5  ;;  %v4922_v35 = vsel %vm17339_vm6, %v17338_v56, %v17337_v55  ;;  %v17341_v32 = vrot.slane %v13641_v9, 1  ;;  %v17343_v46 = vrot.slane %v13703_v1, 7  ;;  %vm17346_vm12 = vmmov %vm17289_vm5 }
 0xa26   : >> { %17331 = vst [vmem:[#allocation170_spill] sm:$0xff] %v13779_v6  ;;  %5022 = vrot.lane.b32.xlu2 %v13777_v50, %s7985_s10  ;;  %5024 = vrot.lane.b32.xlu0 %v13779_v6, %s7985_s10  ;;  %v13792_v57 = vmin.f32 %v13554_v31, %v4967_v47  ;;  %v4970_v23 = vmin.f32 %v4925_v4, %v4956_v2  ;;  %v17345_v37 = vrot.slane %v13691_v36, 1  ;;  %vm17348_vm6 = vcmp.gt.f32.partialorder %v12784_v18, 0.5 }
 0xa27   : >> { %v4953_v7 = vsel %vm17342_vm7, %v17341_v32, %v17340_v44  ;;  %v4919_v14 = vsel %vm17344_vm15, %v17343_v46, %v4912_v10  ;;  %v4916_v1 = vsel %vm17295_vm1, %v4914_v39, %v4915_v26  ;;  %v4963_v10 = vsel %vm17346_vm12, %v4947_v13, %v4932_v49  ;;  %vm17349_vm7 = vmmov %vm17295_vm1 }
 0xa28   : >> { %v13813_v31 = vmin.f32 %v13591_v16, %v4970_v23  ;;  %v4973_v24 = vmin.f32 %v4922_v35, %v4953_v7  ;;  %v4950_v27 = vsel %vm17289_vm5, %v17345_v37, %v4945_v8  ;;  %v4979_v8 = vmin.f32 %v4916_v1, %v4963_v10  ;;  %vm17350_vm15 = vmmov %vm17289_vm5 }
 0xa29   : >> { %v4976_v19 = vmin.f32 %v4919_v14, %v4950_v27  ;;  %vm17351_vm5 = vmmov %vm17295_vm1 }
 0xa2a   : >> { %v13834_v16 = vmin.f32 %v13641_v9, %v4973_v24  ;;  %v4995_v43 = vmin.f32 %v4899_v59, %v4979_v8  ;;  %vm17352_vm1 = vmmov %vm17346_vm12 }
 0xa2b   : >> { %v13851_v9 = vmin.f32 %v13691_v36, %v4976_v19  ;;  %vm17353_vm12 = vmmov %vm17352_vm1 }
 0xa2c   : >> { %5002 = vrot.lane.b32.xlu1 %v13792_v57, %s7985_s10 }
 0xa2e   : >> { %5030 = vrot.lane.b32.xlu0 %v13595_v60, %s7986_s15  ;;  %5028 = vrot.lane.b32.xlu2 %v13761_v53, %s7986_s15 }
 0xa34   : >> { %5008 = vrot.lane.b32.xlu1 %v13813_v31, %s7985_s10 }
 0xa36   : >> { %5036 = vrot.lane.b32.xlu0 %v13645_v62, %s7986_s15  ;;  %5034 = vrot.lane.b32.xlu2 %v13792_v57, %s7986_s15 }
 0xa3c   : >> { %5014 = vrot.lane.b32.xlu1 %v13834_v16, %s7985_s10 }
 0xa3e   : >> { %5042 = vrot.lane.b32.xlu0 %v13695_v58, %s7986_s15  ;;  %5040 = vrot.lane.b32.xlu2 %v13813_v31, %s7986_s15 }
 0xa44   : >> { %5020 = vrot.lane.b32.xlu1 %v13851_v9, %s7985_s10 }
 0xa46   : >> { %5048 = vrot.lane.b32.xlu0 %v13739_v22, %s7986_s15  ;;  %5046 = vrot.lane.b32.xlu2 %v13834_v16, %s7986_s15 }
 0xa4c   : >> { %5026 = vrot.lane.b32.xlu1 %v4995_v43, %s7985_s10 }
 0xa4e   : >> { %5054 = vrot.lane.b32.xlu0 %v13777_v50, %s7986_s15  ;;  %5052 = vrot.lane.b32.xlu2 %v13851_v9, %s7986_s15 }
 0xa54   : >> { %5032 = vrot.lane.b32.xlu1 %v13598_v63, %s7986_s15 }
 0xa56   : >> { %5058 = vrot.lane.b32.xlu2 %v4995_v43, %s7986_s15 }
 0xa5c   : >> { %5038 = vrot.lane.b32.xlu1 %v13648_v41, %s7986_s15 }
 0xa60   : >> { %v4999_v36 = vpop.permute.xlu2 %4998 }
 0xa64   : >> { %5044 = vrot.lane.b32.xlu1 %v13698_v52, %s7986_s15 }
 0xa68   : >> { %v5005_v59 = vpop.permute.xlu2 %5004 }
 0xa6c   : >> { %5050 = vrot.lane.b32.xlu1 %v13742_v20, %s7986_s15 }
 0xa70   : >> { %v5011_v26 = vpop.permute.xlu2 %5010 }
 0xa74   : >> { %5056 = vrot.lane.b32.xlu1 %v13779_v6, %s7986_s15 }
 0xa78   : >> { %v13879_v49 = vpop.permute.xlu2 %5016  ;;  %v5001_v13 = vpop.permute.xlu0 %5000 }
 0xa80   : >> { %v13881_v39 = vpop.permute.xlu2 %5022  ;;  %v13883_v3 = vpop.permute.xlu0 %5006 }
 0xa88   : >> { %v13885_v29 = vpop.permute.xlu0 %5012  ;;  %v5029_v47 = vpop.permute.xlu2 %5028 }
 0xa90   : >> { %v13887_v48 = vpop.permute.xlu0 %5018  ;;  %v5035_v4 = vpop.permute.xlu2 %5034 }
 0xa96   : >> { %v4997_v5 = vpop.permute.xlu1 %4996 }
 0xa97   : >> { %v5060_v14 = vmin.f32 %v4997_v5, %v5029_v47 }
 0xa98   : >> { %v13889_v2 = vpop.permute.xlu0 %5024  ;;  %v5041_v23 = vpop.permute.xlu2 %5040 }
 0xa99   : >> { %17347 = vst [vmem:[#allocation171_spill] sm:$0xff] %v13889_v2  ;;  %v5076_v27 = vmin.f32 %v13761_v53, %v5060_v14 }
 0xa9b   : >> { %v13903_v6 = vsel %vm4411_vm10, %v5076_v27, 1e+09 }
 0xa9e   : >> { %v5003_v12 = vpop.permute.xlu1 %5002 }
 0xa9f   : >> { %v5063_v2 = vmin.f32 %v5003_v12, %v5035_v4 }
 0xaa0   : >> { %v5031_v56 = vpop.permute.xlu0 %5030  ;;  %v13891_v35 = vpop.permute.xlu2 %5046 }
 0xaa1   : >> { %v5061_v46 = vmin.f32 %v4999_v36, %v5031_v56  ;;  %v5079_v5 = vmin.f32 %v13792_v57, %v5063_v2 }
 0xaa3   : >> { %v5077_v37 = vmin.f32 %v13595_v60, %v5061_v46  ;;  %v5108_v60 = vrot.slane %v13903_v6, 7 }
 0xaa5   : >> { %v5093_v51 = vsel %vm4412_vm2, %v5077_v37, 1e+09 }
 0xaa6   : >> { %v5009_v55 = vpop.permute.xlu1 %5008  ;;  %v5141_v36 = vrot.slane %v5093_v51, 1 }
 0xaa7   : >> { %v5066_v56 = vmin.f32 %v5009_v55, %v5041_v23  ;;  %v5109_v23 = vrot.slane %v5093_v51, 7 }
 0xaa8   : >> { %v5037_v32 = vpop.permute.xlu0 %5036  ;;  %v13893_v7 = vpop.permute.xlu2 %5052 }
 0xaa9   : >> { %v5064_v1 = vmin.f32 %v5005_v59, %v5037_v32  ;;  %v5140_v59 = vrot.slane %v13903_v6, 1  ;;  %v5082_v2 = vmin.f32 %v13813_v31, %v5066_v56 }
 0xaab   : >> { %v5080_v47 = vmin.f32 %v13645_v62, %v5064_v1 }
 0xaae   : >> { %v5015_v44 = vpop.permute.xlu1 %5014 }
 0xaaf   : >> { %v5069_v31 = vmin.f32 %v5015_v44, %v13891_v35 }
 0xab0   : >> { %v5043_v19 = vpop.permute.xlu0 %5042  ;;  %v5059_v10 = vpop.permute.xlu2 %5058 }
 0xab1   : >> { %v5067_v46 = vmin.f32 %v5011_v26, %v5043_v19  ;;  %v5095_v26 = vsel %vm4414_vm14, %v5079_v5, 1e+09  ;;  %v5138_v5 = vsel %vm17351_vm5, %v5108_v60, %v5109_v23 }
 0xab2   : >> { %v5111_v19 = vrot.slane %v5095_v26, 7  ;;  %v5143_v1 = vrot.slane %v5095_v26, 1 }
 0xab3   : >> { %v5083_v14 = vmin.f32 %v13695_v58, %v5067_v46 }
 0xab5   : >> { %v13947_v58 = vsel %vm4418_vm0, %v5083_v14, 1e+09 }
 0xab6   : >> { %v13895_v24 = vpop.permute.xlu1 %5020 }
 0xab8   : >> { %v5049_v57 = vpop.permute.xlu0 %5048 }
 0xabe   : >> { %v5027_v8 = vpop.permute.xlu1 %5026 }
 0xabf   : >> { %v5075_v25 = vmin.f32 %v5027_v8, %v5059_v10  ;;  %v5070_v10 = vmin.f32 %v13879_v49, %v5049_v57 }
 0xac1   : >> { %v5091_v21 = vmin.f32 %v4995_v43, %v5075_v25  ;;  %v13916_v25 = vsel %vm4415_vm8, %v5080_v47, 1e+09 }
 0xac2   : >> { %v5144_v55 = vrot.slane %v13916_v25, 1 }
 0xac3   : >> { %v13909_v53 = vsel %vm17348_vm6, %v5091_v21, 1e+09  ;;  %v5170_v21 = vsel %vm17350_vm15, %v5140_v59, %v5141_v36  ;;  %vm17354_vm6 = vmmov %vm17351_vm5 }
 0xac4   : >> { %v5123_v32 = vrot.slane %v13909_v53, 7  ;;  %v5167_v56 = vsel %vm17352_vm1, %v5143_v1, %v5144_v55  ;;  %vm17356_vm15 = vmmov %vm17351_vm5  ;;  %vm17357_vm5 = vcmp.gt.f32.partialorder %v12725_v30, 0.5 }
 0xac6   : >> { %v5033_v43 = vpop.permute.xlu1 %5032  ;;  %v5139_v62 = vsel %vm17349_vm7, %v5123_v32, %v5108_v60  ;;  %vm17355_vm7 = vmmov %vm17352_vm1 }
 0xac7   : >> { %v5062_v4 = vmin.f32 %v5001_v13, %v5033_v43  ;;  %v5172_v12 = vmin.f32 %v5139_v62, %v5170_v21  ;;  %vm17358_vm1 = vmmov %vm17354_vm6 }
 0xac9   : >> { %v5078_v37 = vmin.f32 %v13598_v63, %v5062_v4  ;;  %v13933_v27 = vmin.f32 %v13903_v6, %v5172_v12  ;;  %v13943_v63 = vsel %vm4417_vm13, %v5082_v2, 1e+09  ;;  %v5085_v4 = vmin.f32 %v13834_v16, %v5069_v31 }
 0xaca   : >> { %v5112_v12 = vrot.slane %v13916_v25, 7  ;;  %v5086_v2 = vmin.f32 %v13739_v22, %v5070_v10  ;;  %v5114_v22 = vrot.slane %v13943_v63, 7 }
 0xacb   : >> { %v5094_v13 = vsel %vm4413_vm4, %v5078_v37, 1e+09  ;;  %5204 = vrot.lane.b32.xlu0 %v13933_v27, %s7985_s10 }
 0xacc   : >> { %v5110_v8 = vrot.slane %v5094_v13, 7  ;;  %v5142_v47 = vrot.slane %v5094_v13, 1  ;;  %v13988_v31 = vsel %vm17357_vm5, %v5086_v2, 1e+09  ;;  %v5135_v10 = vsel %vm17358_vm1, %v5111_v19, %v5112_v12 }
 0xacd   : >> { %vm17365_vm5 = vcmp.gt.f32.partialorder %v17223_v54, 0.5 }
 0xace   : >> { %v5039_v46 = vpop.permute.xlu1 %5038  ;;  %v5169_v49 = vsel %vm17353_vm12, %v5141_v36, %v5142_v47  ;;  %v5137_v35 = vsel %vm17354_vm6, %v5109_v23, %v5110_v8  ;;  %v5168_v44 = vsel %vm17355_vm7, %v5142_v47, %v5143_v1  ;;  %v5136_v43 = vsel %vm17356_vm15, %v5110_v8, %v5111_v19  ;;  %v5055_v23 = vpop.permute.xlu0 %5054  ;;  %vm17359_vm12 = vmmov %vm17355_vm7 }
 0xacf   : >> { %v5065_v62 = vmin.f32 %v13883_v3, %v5039_v46  ;;  %v5173_v21 = vmin.f32 %v5138_v5, %v5169_v49  ;;  %v5174_v60 = vmin.f32 %v5137_v35, %v5168_v44  ;;  %v5175_v57 = vmin.f32 %v5136_v43, %v5167_v56  ;;  %vm17360_vm6 = vmmov %vm17355_vm7 }
 0xad0   : >> { %v5147_v36 = vrot.slane %v13947_v58, 1  ;;  %v5146_v3 = vrot.slane %v13943_v63, 1  ;;  %vm17361_vm7 = vmmov %vm17358_vm1 }
 0xad1   : >> { %v5081_v14 = vmin.f32 %v13648_v41, %v5065_v62  ;;  %v13967_v37 = vmin.f32 %v5093_v51, %v5173_v21  ;;  %v13969_v1 = vmin.f32 %v5094_v13, %v5174_v60  ;;  %v13971_v8 = vmin.f32 %v5095_v26, %v5175_v57  ;;  %vm17362_vm15 = vmmov %vm17360_vm6 }
 0xad2   : >> { %v5073_v51 = vmin.f32 %v13881_v39, %v5055_v23  ;;  %v5101_v26 = vsel %vm17277_vm3, %v5085_v4, 1e+09  ;;  %v5164_v47 = vsel %vm17359_vm12, %v5146_v3, %v5147_v36  ;;  %vm17363_vm3 = vmmov %vm17358_vm1  ;;  %v5072_v62 = vmin.f32 %v13895_v24, %v13893_v7 }
 0xad3   : >> { %v5097_v16 = vsel %vm4416_vm11, %v5081_v14, 1e+09  ;;  %5206 = vrot.lane.b32.xlu1 %v13967_v37, %s7985_s10  ;;  %5208 = vrot.lane.b32.xlu2 %v13969_v1, %s7985_s10  ;;  %v5115_v21 = vrot.slane %v13947_v58, 7  ;;  %v5149_v2 = vrot.slane %v5101_v26, 1  ;;  %vm17366_vm12 = vmmov %vm17360_vm6 }
 0xad4   : >> { %v5113_v41 = vrot.slane %v5097_v16, 7  ;;  %v5145_v13 = vrot.slane %v5097_v16, 1  ;;  %5210 = vrot.lane.b32.xlu0 %v13971_v8, %s7985_s10  ;;  %v5089_v60 = vmin.f32 %v13777_v50, %v5073_v51  ;;  %v5117_v50 = vrot.slane %v5101_v26, 7 }
 0xad5   : >> { %v5132_v23 = vsel %vm17358_vm1, %v5114_v22, %v5115_v21 }
 0xad6   : >> { %v5045_v5 = vpop.permute.xlu1 %5044  ;;  %v5166_v39 = vsel %vm17360_vm6, %v5144_v55, %v5145_v13  ;;  %v5134_v56 = vsel %vm17361_vm7, %v5112_v12, %v5113_v41  ;;  %v5165_v46 = vsel %vm17362_vm15, %v5145_v13, %v5146_v3  ;;  %v5133_v49 = vsel %vm17363_vm3, %v5113_v41, %v5114_v22  ;;  %vm17367_vm7 = vmmov %vm17358_vm1 }
 0xad7   : >> { %v5068_v35 = vmin.f32 %v13885_v29, %v5045_v5  ;;  %v5176_v44 = vmin.f32 %v5135_v10, %v5166_v39  ;;  %v5177_v19 = vmin.f32 %v5134_v56, %v5165_v46  ;;  %v5178_v43 = vmin.f32 %v5133_v49, %v5164_v47  ;;  %vm17368_vm15 = vmmov %vm17360_vm6 }
 0xad8   : >> { %v5150_v55 = vrot.slane %v13988_v31, 1  ;;  %vm17364_vm3 = vcmp.gt.f32.partialorder %v12558_v42, 0.5  ;;  %v5118_v39 = vrot.slane %v13988_v31, 7 }
 0xad9   : >> { %v5084_v57 = vmin.f32 %v13698_v52, %v5068_v35  ;;  %v14010_v4 = vmin.f32 %v13916_v25, %v5176_v44  ;;  %v14012_v12 = vmin.f32 %v5097_v16, %v5177_v19  ;;  %v14015_v29 = vmin.f32 %v13943_v63, %v5178_v43 }
 0xada   : >> { %v5088_v52 = vmin.f32 %v13851_v9, %v5072_v62  ;;  %v5105_v63 = vsel %vm17365_vm5, %v5089_v60, 1e+09  ;;  %v5161_v14 = vsel %vm17366_vm12, %v5149_v2, %v5150_v55  ;;  %vm17372_vm12 = vmmov %vm17360_vm6 }
 0xadb   : >> { %v5100_v7 = vsel %vm17364_vm3, %v5084_v57, 1e+09  ;;  %5212 = vrot.lane.b32.xlu1 %v14010_v4, %s7985_s10  ;;  %5214 = vrot.lane.b32.xlu2 %v14012_v12, %s7985_s10  ;;  %vm17369_vm3 = vmmov %vm17358_vm1 }
 0xadc   : >> { %v5116_v24 = vrot.slane %v5100_v7, 7  ;;  %v5148_v25 = vrot.slane %v5100_v7, 1  ;;  %5216 = vrot.lane.b32.xlu0 %v14015_v29, %s7985_s10  ;;  %v5104_v5 = vsel %vm4423_vm9, %v5088_v52, 1e+09  ;;  %v17376_v52 = vld [vmem:[#allocation171_spill] sm:$0xff] }
 0xadd   : >> { %v5152_v44 = vrot.slane %v5104_v5, 1  ;;  %v5120_v43 = vrot.slane %v5104_v5, 7 }
 0xade   : >> { %v5051_v3 = vpop.permute.xlu1 %5050  ;;  %v5163_v16 = vsel %vm17360_vm6, %v5147_v36, %v5148_v25  ;;  %v5131_v9 = vsel %vm17367_vm7, %v5115_v21, %v5116_v24  ;;  %v5162_v51 = vsel %vm17368_vm15, %v5148_v25, %v5149_v2  ;;  %v5130_v41 = vsel %vm17369_vm3, %v5116_v24, %v5117_v50  ;;  %vm17373_vm7 = vmmov %vm17358_vm1 }
 0xadf   : >> { %v5071_v13 = vmin.f32 %v13887_v48, %v5051_v3  ;;  %v5179_v10 = vmin.f32 %v5132_v23, %v5163_v16  ;;  %v5180_v22 = vmin.f32 %v5131_v9, %v5162_v51  ;;  %v5181_v47 = vmin.f32 %v5130_v41, %v5161_v14  ;;  %v17370_v48 = vld [vmem:[#allocation150_spill] sm:$0xff]  ;;  %vm17374_vm15 = vmmov %vm17360_vm6  ;;  %v17377_v16 = vld [vmem:[#allocation170_spill] sm:$0xff] }
 0xae0   : >> { %v5153_v36 = vrot.slane %v5105_v63, 1  ;;  %vm17371_vm5 = vcmp.gt.f32.partialorder %v17370_v48, 0.5  ;;  %vm17375_vm3 = vmmov %vm17358_vm1  ;;  %v5155_v14 = vrot.slane %v13909_v53, 1  ;;  %v5121_v3 = vrot.slane %v5105_v63, 7 }
 0xae1   : >> { %v5087_v56 = vmin.f32 %v13742_v20, %v5071_v13  ;;  %v14046_v46 = vmin.f32 %v13947_v58, %v5179_v10  ;;  %v14048_v49 = vmin.f32 %v5100_v7, %v5180_v22  ;;  %v14050_v35 = vmin.f32 %v5101_v26, %v5181_v47  ;;  %v17378_v13 = vld [vmem:[#allocation153_spill] sm:$0xff] }
 0xae2   : >> { %v5129_v58 = vsel %vm17358_vm1, %v5117_v50, %v5118_v39  ;;  %v5158_v26 = vsel %vm17372_vm12, %v5152_v44, %v5153_v36  ;;  %vm17380_vm1 = vmmov %vm17360_vm6 }
 0xae3   : >> { %v5103_v19 = vsel %vm17371_vm5, %v5087_v56, 1e+09  ;;  %5218 = vrot.lane.b32.xlu1 %v14046_v46, %s7985_s10  ;;  %5220 = vrot.lane.b32.xlu2 %v14048_v49, %s7985_s10  ;;  %vm17379_vm5 = vcmp.gt.f32.partialorder %v17378_v13, 0.5  ;;  %vm17381_vm12 = vmmov %vm17375_vm3 }
 0xae4   : >> { %v5119_v62 = vrot.slane %v5103_v19, 7  ;;  %v5151_v20 = vrot.slane %v5103_v19, 1  ;;  %5222 = vrot.lane.b32.xlu0 %v14050_v35, %s7985_s10 }
 0xae6   : >> { %v5057_v21 = vpop.permute.xlu1 %5056  ;;  %v5160_v60 = vsel %vm17360_vm6, %v5150_v55, %v5151_v20  ;;  %v5128_v57 = vsel %vm17373_vm7, %v5118_v39, %v5119_v62  ;;  %v5159_v2 = vsel %vm17374_vm15, %v5151_v20, %v5152_v44  ;;  %v5127_v7 = vsel %vm17375_vm3, %v5119_v62, %v5120_v43  ;;  %vm17382_vm6 = vmmov %vm17375_vm3 }
 0xae7   : >> { %v5074_v24 = vmin.f32 %v17376_v52, %v5057_v21  ;;  %v5182_v25 = vmin.f32 %v5129_v58, %v5160_v60  ;;  %v5183_v50 = vmin.f32 %v5128_v57, %v5159_v2  ;;  %v5184_v23 = vmin.f32 %v5127_v7, %v5158_v26  ;;  %vm17383_vm7 = vmmov %vm17380_vm1 }
 0xae8   : >> { %vm17384_vm15 = vmmov %vm17375_vm3 }
 0xae9   : >> { %v5090_v9 = vmin.f32 %v17377_v16, %v5074_v24  ;;  %v14076_v55 = vmin.f32 %v13988_v31, %v5182_v25  ;;  %v14078_v51 = vmin.f32 %v5103_v19, %v5183_v50  ;;  %v14080_v41 = vmin.f32 %v5104_v5, %v5184_v23  ;;  %vm17385_vm3 = vmmov %vm17380_vm1 }
 0xaea   : >> { %v5171_v31 = vsel %vm17380_vm1, %v5155_v14, %v5140_v59  ;;  %v5126_v5 = vsel %vm17381_vm12, %v5120_v43, %v5121_v3 }
 0xaeb   : >> { %v5106_v10 = vsel %vm17379_vm5, %v5090_v9, 1e+09  ;;  %5224 = vrot.lane.b32.xlu1 %v14076_v55, %s7985_s10  ;;  %5226 = vrot.lane.b32.xlu2 %v14078_v51, %s7985_s10  ;;  %vm17386_vm5 = vmmov %vm17382_vm6 }
 0xaec   : >> { %v5122_v22 = vrot.slane %v5106_v10, 7  ;;  %v5154_v47 = vrot.slane %v5106_v10, 1  ;;  %5228 = vrot.lane.b32.xlu0 %v14080_v41, %s7985_s10  ;;  %vm17387_vm12 = vmmov %vm17386_vm5 }
 0xaee   : >> { %v5124_v39 = vsel %vm17382_vm6, %v5122_v22, %v5123_v32  ;;  %v5157_v56 = vsel %vm17383_vm7, %v5153_v36, %v5154_v47  ;;  %v5125_v44 = vsel %vm17384_vm15, %v5121_v3, %v5122_v22  ;;  %v5156_v6 = vsel %vm17385_vm3, %v5154_v47, %v5155_v14  ;;  %vm17388_vm6 = vmmov %vm17380_vm1 }
 0xaef   : >> { %v5187_v19 = vmin.f32 %v5124_v39, %v5171_v31  ;;  %v5185_v62 = vmin.f32 %v5126_v5, %v5157_v56  ;;  %v5186_v59 = vmin.f32 %v5125_v44, %v5156_v6  ;;  %vm17389_vm7 = vmmov %vm17386_vm5  ;;  %vm17391_vm3 = vcmp.gt.f32.partialorder %v12558_v42, 0.5 }
 0xaf0   : >> { %vm17390_vm15 = vmmov %vm17380_vm1 }
 0xaf1   : >> { %v14107_v20 = vmin.f32 %v13909_v53, %v5187_v19  ;;  %v14109_v43 = vmin.f32 %v5105_v63, %v5185_v62  ;;  %v14111_v58 = vmin.f32 %v5106_v10, %v5186_v59 }
 0xaf3   : >> { %5230 = vrot.lane.b32.xlu1 %v14109_v43, %s7985_s10  ;;  %5232 = vrot.lane.b32.xlu2 %v14111_v58, %s7985_s10 }
 0xaf4   : >> { %5234 = vrot.lane.b32.xlu0 %v14107_v20, %s7985_s10 }
 0xafb   : >> { %5236 = vrot.lane.b32.xlu1 %v13933_v27, %s7986_s15  ;;  %5238 = vrot.lane.b32.xlu2 %v13967_v37, %s7986_s15 }
 0xafc   : >> { %5240 = vrot.lane.b32.xlu0 %v13969_v1, %s7986_s15 }
 0xb03   : >> { %5242 = vrot.lane.b32.xlu1 %v13971_v8, %s7986_s15  ;;  %5244 = vrot.lane.b32.xlu2 %v14010_v4, %s7986_s15 }
 0xb04   : >> { %5246 = vrot.lane.b32.xlu0 %v14012_v12, %s7986_s15 }
 0xb0b   : >> { %5248 = vrot.lane.b32.xlu1 %v14015_v29, %s7986_s15  ;;  %5250 = vrot.lane.b32.xlu2 %v14046_v46, %s7986_s15 }
 0xb0c   : >> { %5252 = vrot.lane.b32.xlu0 %v14048_v49, %s7986_s15 }
 0xb13   : >> { %5254 = vrot.lane.b32.xlu1 %v14050_v35, %s7986_s15  ;;  %5256 = vrot.lane.b32.xlu2 %v14076_v55, %s7986_s15 }
 0xb14   : >> { %5258 = vrot.lane.b32.xlu0 %v14078_v51, %s7986_s15 }
 0xb1b   : >> { %5260 = vrot.lane.b32.xlu1 %v14080_v41, %s7986_s15  ;;  %5262 = vrot.lane.b32.xlu2 %v14109_v43, %s7986_s15 }
 0xb1c   : >> { %5264 = vrot.lane.b32.xlu0 %v14111_v58, %s7986_s15 }
 0xb23   : >> { %5266 = vrot.lane.b32.xlu1 %v14107_v20, %s7986_s15 }
 0xb2d   : >> { %v5209_v53 = vpop.permute.xlu2 %5208 }
 0xb35   : >> { %v5215_v32 = vpop.permute.xlu2 %5214 }
 0xb3d   : >> { %v5205_v63 = vpop.permute.xlu0 %5204  ;;  %v14151_v36 = vpop.permute.xlu2 %5220 }
 0xb45   : >> { %v5207_v26 = vpop.permute.xlu1 %5206  ;;  %v14153_v60 = vpop.permute.xlu2 %5226 }
 0xb46   : >> { %v5211_v21 = vpop.permute.xlu0 %5210 }
 0xb4d   : >> { %v5213_v57 = vpop.permute.xlu1 %5212  ;;  %v14157_v7 = vpop.permute.xlu2 %5232 }
 0xb4e   : >> { %v14155_v2 = vpop.permute.xlu0 %5216 }
 0xb55   : >> { %v5219_v52 = vpop.permute.xlu1 %5218  ;;  %v5239_v25 = vpop.permute.xlu2 %5238 }
 0xb56   : >> { %v14159_v24 = vpop.permute.xlu0 %5222  ;;  %v5269_v9 = vmin.f32 %v5207_v26, %v5239_v25 }
 0xb58   : >> { %v5285_v10 = vmin.f32 %v13967_v37, %v5269_v9 }
 0xb5a   : >> { %v14172_v39 = vsel %vm4412_vm2, %v5285_v10, 1e+09 }
 0xb5b   : >> { %v5317_v37 = vrot.slane %v14172_v39, 7  ;;  %v5349_v26 = vrot.slane %v14172_v39, 1 }
 0xb5d   : >> { %v14161_v50 = vpop.permute.xlu1 %5224  ;;  %v5245_v16 = vpop.permute.xlu2 %5244 }
 0xb5e   : >> { %v14163_v23 = vpop.permute.xlu0 %5228  ;;  %v5272_v56 = vmin.f32 %v5213_v57, %v5245_v16 }
 0xb65   : >> { %v14165_v14 = vpop.permute.xlu1 %5230  ;;  %v5251_v6 = vpop.permute.xlu2 %5250 }
 0xb66   : >> { %v14167_v3 = vpop.permute.xlu0 %5234  ;;  %v5275_v9 = vmin.f32 %v5219_v52, %v5251_v6 }
 0xb6d   : >> { %v5237_v22 = vpop.permute.xlu1 %5236  ;;  %v5257_v6 = vpop.permute.xlu2 %5256 }
 0xb6e   : >> { %v5268_v47 = vmin.f32 %v5205_v63, %v5237_v22  ;;  %v5241_v31 = vpop.permute.xlu0 %5240 }
 0xb6f   : >> { %v5270_v5 = vmin.f32 %v5209_v53, %v5241_v31  ;;  %v5288_v53 = vmin.f32 %v14010_v4, %v5272_v56 }
 0xb70   : >> { %v5284_v44 = vmin.f32 %v13933_v27, %v5268_v47 }
 0xb71   : >> { %v5286_v19 = vmin.f32 %v13969_v1, %v5270_v5  ;;  %v14199_v22 = vsel %vm4415_vm8, %v5288_v53, 1e+09 }
 0xb72   : >> { %v14178_v62 = vsel %vm4411_vm10, %v5284_v44, 1e+09  ;;  %v5320_v52 = vrot.slane %v14199_v22, 7  ;;  %v5291_v44 = vmin.f32 %v14046_v46, %v5275_v9  ;;  %v16351_v53 = vrot.slane %v14199_v22, 1 }
 0xb73   : >> { %v5316_v59 = vrot.slane %v14178_v62, 7  ;;  %v14185_v63 = vsel %vm4413_vm4, %v5286_v19, 1e+09 }
 0xb74   : >> { %v5350_v27 = vrot.slane %v14185_v63, 1  ;;  %v16352_v5 = vrot.slane %v14185_v63, 7 }
 0xb75   : >> { %v5243_v57 = vpop.permute.xlu1 %5242  ;;  %v5346_v1 = vsel %vm17386_vm5, %v5316_v59, %v5317_v37 }
 0xb76   : >> { %v5271_v25 = vmin.f32 %v5211_v21, %v5243_v57  ;;  %v5247_v16 = vpop.permute.xlu0 %5246  ;;  %v5377_v4 = vsel %vm17380_vm1, %v5349_v26, %v5350_v27  ;;  %v5345_v46 = vsel %vm17387_vm12, %v5317_v37, %v16352_v5  ;;  %vm17392_vm12 = vmmov %vm17386_vm5 }
 0xb77   : >> { %v5273_v10 = vmin.f32 %v5215_v32, %v5247_v16  ;;  %v5381_v31 = vmin.f32 %v5346_v1, %v5377_v4 }
 0xb78   : >> { %v5287_v47 = vmin.f32 %v13971_v8, %v5271_v25 }
 0xb79   : >> { %v5289_v56 = vmin.f32 %v14012_v12, %v5273_v10  ;;  %v14209_v32 = vmin.f32 %v14172_v39, %v5381_v31  ;;  %v5278_v31 = vmin.f32 %v14161_v50, %v5257_v6  ;;  %v17409_v39 = vrot.slane %v14185_v63, 7 }
 0xb7a   : >> { %v14206_v21 = vsel %vm4414_vm14, %v5287_v47, 1e+09  ;;  %v14238_v47 = vsel %vm4418_vm0, %v5291_v44, 1e+09 }
 0xb7b   : >> { %v5319_v19 = vrot.slane %v14206_v21, 7  ;;  %v16342_v8 = vrot.slane %v14206_v21, 1  ;;  %v14218_v12 = vsel %vm4416_vm11, %v5289_v56, 1e+09  ;;  %5414 = vrot.lane.b32.xlu0 %v14209_v32, %s7985_s10 }
 0xb7c   : >> { %v5353_v57 = vrot.slane %v14218_v12, 1 }
 0xb7d   : >> { %v5249_v1 = vpop.permute.xlu1 %5248  ;;  %v5376_v25 = vsel %vm17388_vm6, %v5350_v27, %v16342_v8  ;;  %v5343_v16 = vsel %vm17389_vm7, %v5319_v19, %v5320_v52  ;;  %vm17393_vm6 = vmmov %vm17380_vm1  ;;  %vm17394_vm7 = vcmp.gt.f32.partialorder %v12725_v30, 0.5 }
 0xb7e   : >> { %v5274_v9 = vmin.f32 %v14155_v2, %v5249_v1  ;;  %v5253_v10 = vpop.permute.xlu0 %5252  ;;  %v5382_v4 = vmin.f32 %v5345_v46, %v5376_v25  ;;  %v5374_v27 = vsel %vm17390_vm15, %v16351_v53, %v5353_v57  ;;  %v16343_v1 = vrot.slane %v14218_v12, 7 }
 0xb7f   : >> { %v5276_v37 = vmin.f32 %v14151_v36, %v5253_v10  ;;  %v5384_v2 = vmin.f32 %v5343_v16, %v5374_v27  ;;  %v5294_v16 = vmin.f32 %v14076_v55, %v5278_v31  ;;  %v5263_v10 = vpop.permute.xlu2 %5262  ;;  %vm17395_vm15 = vcmp.gt.f32.partialorder %v12721_v0, 0.5 }
 0xb80   : >> { %v5290_v56 = vmin.f32 %v14015_v29, %v5274_v9  ;;  %v14248_v8 = vmin.f32 %v14185_v63, %v5382_v4  ;;  %v5323_v29 = vrot.slane %v14238_v47, 7 }
 0xb81   : >> { %v5292_v44 = vmin.f32 %v14048_v49, %v5276_v37  ;;  %v14259_v46 = vmin.f32 %v14199_v22, %v5384_v2  ;;  %v16350_v49 = vrot.slane %v14238_v47, 1  ;;  %v5342_v37 = vsel %vm17386_vm5, %v5320_v52, %v16343_v1 }
 0xb82   : >> { %v14254_v36 = vsel %vm4417_vm13, %v5290_v56, 1e+09  ;;  %5416 = vrot.lane.b32.xlu1 %v14248_v8, %s7985_s10 }
 0xb83   : >> { %v16345_v50 = vrot.slane %v14254_v36, 7  ;;  %v16344_v6 = vrot.slane %v14254_v36, 1  ;;  %v14266_v25 = vsel %vm17391_vm3, %v5292_v44, 1e+09  ;;  %5420 = vrot.lane.b32.xlu0 %v14259_v46, %s7985_s10  ;;  %vm17396_vm3 = vcmp.gt.f32.partialorder %v17370_v48, 0.5 }
 0xb84   : >> { %v5356_v9 = vrot.slane %v14266_v25, 1 }
 0xb85   : >> { %v5255_v4 = vpop.permute.xlu1 %5254  ;;  %v5373_v27 = vsel %vm17380_vm1, %v5353_v57, %v16344_v6  ;;  %v5340_v55 = vsel %vm17392_vm12, %v16345_v50, %v5323_v29  ;;  %v14293_v57 = vsel %vm17394_vm7, %v5294_v16, 1e+09  ;;  %v5281_v6 = vmin.f32 %v14165_v14, %v5263_v10  ;;  %vm17397_vm12 = vmmov %vm17386_vm5 }
 0xb86   : >> { %v5277_v31 = vmin.f32 %v14159_v24, %v5255_v4  ;;  %v5259_v56 = vpop.permute.xlu0 %5258  ;;  %v5385_v2 = vmin.f32 %v5342_v37, %v5373_v27  ;;  %v5371_v44 = vsel %vm17393_vm6, %v16350_v49, %v5356_v9  ;;  %v16347_v4 = vrot.slane %v14266_v25, 7  ;;  %vm17398_vm6 = vmmov %vm17380_vm1 }
 0xb87   : >> { %v5279_v52 = vmin.f32 %v14153_v60, %v5259_v56  ;;  %v5387_v1 = vmin.f32 %v5340_v55, %v5371_v44  ;;  %v5326_v14 = vrot.slane %v14293_v57, 7  ;;  %vm17399_vm7 = vcmp.gt.f32.partialorder %v17223_v54, 0.5 }
 0xb88   : >> { %v5293_v50 = vmin.f32 %v14050_v35, %v5277_v31  ;;  %v14298_v24 = vmin.f32 %v14218_v12, %v5385_v2  ;;  %v5339_v31 = vsel %vm17386_vm5, %v5323_v29, %v16347_v4 }
 0xb89   : >> { %v5295_v37 = vmin.f32 %v14078_v51, %v5279_v52  ;;  %v14303_v27 = vmin.f32 %v14238_v47, %v5387_v1  ;;  %v16348_v51 = vrot.slane %v14293_v57, 1  ;;  %v5297_v1 = vmin.f32 %v14109_v43, %v5281_v6 }
 0xb8a   : >> { %v14307_v60 = vsel %vm17395_vm15, %v5293_v50, 1e+09  ;;  %5422 = vrot.lane.b32.xlu1 %v14298_v24, %s7985_s10  ;;  %vm17400_vm15 = vcmp.gt.f32.partialorder %v17378_v13, 0.5 }
 0xb8b   : >> { %v16349_v35 = vrot.slane %v14307_v60, 7  ;;  %v16346_v16 = vrot.slane %v14307_v60, 1  ;;  %v14316_v10 = vsel %vm17396_vm3, %v5295_v37, 1e+09  ;;  %5426 = vrot.lane.b32.xlu0 %v14303_v27, %s7985_s10  ;;  %vm17401_vm3 = vmmov %vm17386_vm5 }
 0xb8c   : >> { %v5359_v50 = vrot.slane %v14316_v10, 1  ;;  %vm17402_vm5 = vmmov %vm17380_vm1 }
 0xb8d   : >> { %v5261_v55 = vpop.permute.xlu1 %5260  ;;  %v5370_v56 = vsel %vm17380_vm1, %v5356_v9, %v16346_v16  ;;  %v5337_v43 = vsel %vm17397_vm12, %v16349_v35, %v5326_v14  ;;  %v14343_v9 = vsel %vm17399_vm7, %v5297_v1, 1e+09  ;;  %vm17403_vm1 = vmmov %vm17401_vm3 }
 0xb8e   : >> { %v5280_v6 = vmin.f32 %v14163_v23, %v5261_v55  ;;  %v5265_v2 = vpop.permute.xlu0 %5264  ;;  %v5388_v44 = vmin.f32 %v5339_v31, %v5370_v56  ;;  %v5368_v52 = vsel %vm17398_vm6, %v16348_v51, %v5359_v50  ;;  %v5327_v23 = vrot.slane %v14316_v10, 7  ;;  %vm17404_vm12 = vmmov %vm17402_vm5 }
 0xb8f   : >> { %v5282_v29 = vmin.f32 %v14157_v7, %v5265_v2  ;;  %v5390_v37 = vmin.f32 %v5337_v43, %v5368_v52  ;;  %v5329_v1 = vrot.slane %v14343_v9, 7  ;;  %vm17405_vm6 = vcmp.gt.f32.partialorder %v12784_v18, 0.5  ;;  %vm17406_vm7 = vmmov %vm17403_vm1 }
 0xb90   : >> { %v5296_v16 = vmin.f32 %v14080_v41, %v5280_v6  ;;  %v14347_v4 = vmin.f32 %v14266_v25, %v5388_v44  ;;  %v5361_v6 = vrot.slane %v14343_v9, 1 }
 0xb91   : >> { %v5298_v55 = vmin.f32 %v14111_v58, %v5282_v29  ;;  %v14352_v31 = vmin.f32 %v14293_v57, %v5390_v37 }
 0xb92   : >> { %v5312_v7 = vsel %vm4423_vm9, %v5296_v16, 1e+09  ;;  %5428 = vrot.lane.b32.xlu1 %v14347_v4, %s7985_s10  ;;  %v5336_v16 = vsel %vm17401_vm3, %v5326_v14, %v5327_v23  ;;  %v5348_v14 = vrot.slane %v14178_v62, 1  ;;  %vm17408_vm3 = vmmov %vm17403_vm1 }
 0xb93   : >> { %v5328_v56 = vrot.slane %v5312_v7, 7  ;;  %v5360_v41 = vrot.slane %v5312_v7, 1  ;;  %v5314_v43 = vsel %vm17400_vm15, %v5298_v55, 1e+09  ;;  %5432 = vrot.lane.b32.xlu0 %v14352_v31, %s7985_s10  ;;  %vm17407_vm15 = vmmov %vm17402_vm5 }
 0xb94   : >> { %v5362_v2 = vrot.slane %v5314_v43, 1  ;;  %v5330_v53 = vrot.slane %v5314_v43, 7 }
 0xb95   : >> { %v5267_v58 = vpop.permute.xlu1 %5266  ;;  %v5367_v44 = vsel %vm17402_vm5, %v5359_v50, %v5360_v41  ;;  %v5334_v52 = vsel %vm17403_vm1, %v5328_v56, %v5329_v1 }
 0xb96   : >> { %v5283_v29 = vmin.f32 %v14167_v3, %v5267_v58  ;;  %v5391_v37 = vmin.f32 %v5336_v16, %v5367_v44  ;;  %v5365_v55 = vsel %vm17404_vm12, %v5361_v6, %v5362_v2  ;;  %vm17412_vm12 = vmmov %vm17402_vm5 }
 0xb97   : >> { %v5393_v51 = vmin.f32 %v5334_v52, %v5365_v55 }
 0xb98   : >> { %v5299_v35 = vmin.f32 %v14107_v20, %v5283_v29  ;;  %v14375_v49 = vmin.f32 %v14316_v10, %v5391_v37  ;;  %v5378_v10 = vsel %vm17407_vm15, %v5348_v14, %v5349_v26  ;;  %v17410_v26 = vrot.slane %v14199_v22, 1  ;;  %vm17421_vm15 = vmmov %vm17403_vm1 }
 0xb99   : >> { %v14379_v50 = vmin.f32 %v14343_v9, %v5393_v51  ;;  %v17413_v22 = vrot.slane %v14254_v36, 7  ;;  %v17416_v29 = vrot.slane %v14238_v47, 1  ;;  %v17417_v37 = vrot.slane %v14254_v36, 1 }
 0xb9a   : >> { %v5315_v5 = vsel %vm17405_vm6, %v5299_v35, 1e+09  ;;  %5434 = vrot.lane.b32.xlu1 %v14375_v49, %s7985_s10  ;;  %v5333_v35 = vsel %vm17408_vm3, %v5329_v1, %v5330_v53  ;;  %v17411_v1 = vrot.slane %v14206_v21, 1  ;;  %vm17415_vm6 = vmmov %vm17403_vm1  ;;  %v17419_v47 = vrot.slane %v14307_v60, 7 }
 0xb9b   : >> { %v5331_v3 = vrot.slane %v5315_v5, 7  ;;  %v5363_v58 = vrot.slane %v5315_v5, 1  ;;  %5438 = vrot.lane.b32.xlu0 %v14379_v50, %s7985_s10  ;;  %vm17424_vm3 = vmmov %vm17402_vm5 }
 0xb9d   : >> { %v5347_v20 = vsel %vm17406_vm7, %v5331_v3, %v5316_v59  ;;  %v5364_v51 = vsel %vm17402_vm5, %v5362_v2, %v5363_v58  ;;  %v5344_v59 = vsel %vm17403_vm1, %v17409_v39, %v5319_v19  ;;  %v5375_v2 = vsel %vm17412_vm12, %v17411_v1, %v17410_v26  ;;  %vm17418_vm7 = vmmov %vm17402_vm5 }
 0xb9e   : >> { %v5380_v9 = vmin.f32 %v5347_v20, %v5378_v10  ;;  %v5394_v16 = vmin.f32 %v5333_v35, %v5364_v51  ;;  %v17414_v19 = vrot.slane %v14218_v12, 7  ;;  %v5372_v55 = vsel %vm17418_vm7, %v17417_v37, %v17416_v29  ;;  %vm17425_vm5 = vmmov %vm17403_vm1 }
 0xb9f   : >> { %v17420_v20 = vrot.slane %v14266_v25, 7  ;;  %v17422_v35 = vrot.slane %v14293_v57, 1  ;;  %v17423_v51 = vrot.slane %v14307_v60, 1  ;;  %v5335_v57 = vsel %vm17425_vm5, %v5327_v23, %v5328_v56  ;;  %vm17426_vm1 = vmmov %vm17424_vm3 }
 0xba0   : >> { %v14400_v44 = vmin.f32 %v14178_v62, %v5380_v9  ;;  %v14402_v52 = vmin.f32 %v5314_v43, %v5394_v16  ;;  %v5383_v62 = vmin.f32 %v5344_v59, %v5375_v2  ;;  %v5341_v43 = vsel %vm17415_vm6, %v17414_v19, %v17413_v22  ;;  %vm17427_vm12 = vmmov %vm17425_vm5 }
 0xba1   : >> { %v5338_v10 = vsel %vm17421_vm15, %v17420_v20, %v17419_v47  ;;  %v5369_v9 = vsel %vm17424_vm3, %v17423_v51, %v17422_v35  ;;  %v5366_v16 = vsel %vm17426_vm1, %v5360_v41, %v5361_v6  ;;  %vm17428_vm6 = vmmov %vm17426_vm1 }
 0xba2   : >> { %5412 = vrot.lane.b32.xlu2 %v14400_v44, %s7985_s10  ;;  %5440 = vrot.lane.b32.xlu1 %v14402_v52, %s7985_s10  ;;  %v14423_v63 = vmin.f32 %v14206_v21, %v5383_v62  ;;  %v5386_v21 = vmin.f32 %v5341_v43, %v5372_v55  ;;  %v5392_v39 = vmin.f32 %v5335_v57, %v5366_v16  ;;  %vm17429_vm7 = vmmov %vm17425_vm5 }
 0xba3   : >> { %5444 = vrot.lane.b32.xlu0 %v14400_v44, %s7986_s15  ;;  %v5379_v23 = vsel %vm17428_vm6, %v5363_v58, %v5348_v14  ;;  %vm17430_vm15 = vmmov %vm17425_vm5 }
 0xba4   : >> { %v14444_v12 = vmin.f32 %v14254_v36, %v5386_v21  ;;  %v5389_v36 = vmin.f32 %v5338_v10, %v5369_v9  ;;  %v14477_v59 = vmin.f32 %v5312_v7, %v5392_v39  ;;  %vm17431_vm3 = vmmov %vm17426_vm1 }
 0xba5   : >> { %vm17432_vm5 = vmmov %vm17426_vm1 }
 0xba6   : >> { %v14465_v25 = vmin.f32 %v14307_v60, %v5389_v36  ;;  %v5332_v60 = vsel %vm17427_vm12, %v5330_v53, %v5331_v3  ;;  %vm17433_vm1 = vmmov %vm17429_vm7 }
 0xba7   : >> { %v5395_v56 = vmin.f32 %v5332_v60, %v5379_v23  ;;  %vm17434_vm12 = vmmov %vm17433_vm1 }
 0xba8   : >> { %vm17435_vm6 = vmmov %vm17431_vm3 }
 0xba9   : >> { %v14489_v41 = vmin.f32 %v5315_v5, %v5395_v56 }
 0xbaa   : >> { %5418 = vrot.lane.b32.xlu2 %v14423_v63, %s7985_s10  ;;  %5446 = vrot.lane.b32.xlu1 %v14209_v32, %s7986_s15 }
 0xbab   : >> { %5450 = vrot.lane.b32.xlu0 %v14423_v63, %s7986_s15 }
 0xbb2   : >> { %5424 = vrot.lane.b32.xlu2 %v14444_v12, %s7985_s10  ;;  %5452 = vrot.lane.b32.xlu1 %v14259_v46, %s7986_s15 }
 0xbb3   : >> { %5456 = vrot.lane.b32.xlu0 %v14444_v12, %s7986_s15 }
 0xbba   : >> { %5430 = vrot.lane.b32.xlu2 %v14465_v25, %s7985_s10  ;;  %5458 = vrot.lane.b32.xlu1 %v14303_v27, %s7986_s15 }
 0xbbb   : >> { %5462 = vrot.lane.b32.xlu0 %v14465_v25, %s7986_s15 }
 0xbc2   : >> { %5436 = vrot.lane.b32.xlu2 %v14477_v59, %s7985_s10  ;;  %5464 = vrot.lane.b32.xlu1 %v14352_v31, %s7986_s15 }
 0xbc3   : >> { %5468 = vrot.lane.b32.xlu0 %v14477_v59, %s7986_s15 }
 0xbca   : >> { %5470 = vrot.lane.b32.xlu1 %v14379_v50, %s7986_s15  ;;  %5442 = vrot.lane.b32.xlu2 %v14489_v41, %s7985_s10 }
 0xbcb   : >> { %5474 = vrot.lane.b32.xlu0 %v14489_v41, %s7986_s15 }
 0xbd2   : >> { %5448 = vrot.lane.b32.xlu2 %v14248_v8, %s7986_s15 }
 0xbda   : >> { %5454 = vrot.lane.b32.xlu2 %v14298_v24, %s7986_s15 }
 0xbe2   : >> { %5460 = vrot.lane.b32.xlu2 %v14347_v4, %s7986_s15 }
 0xbea   : >> { %5466 = vrot.lane.b32.xlu2 %v14375_v49, %s7986_s15 }
 0xbed   : >> { %v5415_v5 = vpop.permute.xlu0 %5414 }
 0xbf2   : >> { %5472 = vrot.lane.b32.xlu2 %v14402_v52, %s7986_s15 }
 0xbf4   : >> { %v5417_v53 = vpop.permute.xlu1 %5416 }
 0xbf5   : >> { %v5421_v7 = vpop.permute.xlu0 %5420 }
 0xbfc   : >> { %v5413_v6 = vpop.permute.xlu2 %5412  ;;  %v5423_v14 = vpop.permute.xlu1 %5422 }
 0xbfd   : >> { %v5427_v3 = vpop.permute.xlu0 %5426 }
 0xc04   : >> { %v5419_v58 = vpop.permute.xlu2 %5418  ;;  %v14507_v26 = vpop.permute.xlu1 %5428 }
 0xc05   : >> { %v14509_v1 = vpop.permute.xlu0 %5432 }
 0xc0c   : >> { %v5425_v2 = vpop.permute.xlu2 %5424  ;;  %v14511_v62 = vpop.permute.xlu1 %5434 }
 0xc0d   : >> { %v14513_v22 = vpop.permute.xlu0 %5438 }
 0xc14   : >> { %v5431_v19 = vpop.permute.xlu2 %5430  ;;  %v14515_v43 = vpop.permute.xlu1 %5440 }
 0xc15   : >> { %v5445_v29 = vpop.permute.xlu0 %5444 }
 0xc16   : >> { %v5476_v51 = vmin.f32 %v5413_v6, %v5445_v29 }
 0xc18   : >> { %v5492_v57 = vmin.f32 %v14400_v44, %v5476_v51 }
 0xc1c   : >> { %v14517_v37 = vpop.permute.xlu2 %5436  ;;  %v5447_v55 = vpop.permute.xlu1 %5446 }
 0xc1d   : >> { %v5451_v21 = vpop.permute.xlu0 %5450  ;;  %v5477_v10 = vmin.f32 %v5415_v5, %v5447_v55  ;;  %v14530_v5 = vsel %vm4411_vm10, %v5492_v57, 1e+09 }
 0xc1e   : >> { %v5479_v9 = vmin.f32 %v5419_v58, %v5451_v21  ;;  %v5524_v29 = vrot.slane %v14530_v5, 7 }
 0xc1f   : >> { %v5493_v36 = vmin.f32 %v14209_v32, %v5477_v10 }
 0xc20   : >> { %v5495_v16 = vmin.f32 %v14423_v63, %v5479_v9 }
 0xc21   : >> { %v14526_v23 = vsel %vm4412_vm2, %v5493_v36, 1e+09 }
 0xc22   : >> { %v14535_v44 = vsel %vm4414_vm14, %v5495_v16, 1e+09  ;;  %v5525_v63 = vrot.slane %v14526_v23, 7 }
 0xc24   : >> { %v5453_v47 = vpop.permute.xlu1 %5452  ;;  %v14519_v20 = vpop.permute.xlu2 %5442  ;;  %v5554_v9 = vsel %vm17430_vm15, %v5524_v29, %v5525_v63  ;;  %vm17437_vm15 = vcmp.gt.f32.partialorder %v12721_v0, 0.5 }
 0xc25   : >> { %v5457_v35 = vpop.permute.xlu0 %5456  ;;  %v5480_v6 = vmin.f32 %v5421_v7, %v5453_v47  ;;  %v5557_v7 = vrot.slane %v14526_v23, 1 }
 0xc26   : >> { %v5482_v58 = vmin.f32 %v5425_v2, %v5457_v35 }
 0xc27   : >> { %v5496_v2 = vmin.f32 %v14259_v46, %v5480_v6 }
 0xc28   : >> { %v5498_v47 = vmin.f32 %v14444_v12, %v5482_v58 }
 0xc29   : >> { %v14567_v16 = vsel %vm4415_vm8, %v5496_v2, 1e+09 }
 0xc2a   : >> { %v5528_v2 = vrot.slane %v14567_v16, 7 }
 0xc2c   : >> { %v5449_v39 = vpop.permute.xlu2 %5448  ;;  %v5459_v56 = vpop.permute.xlu1 %5458 }
 0xc2d   : >> { %v5478_v60 = vmin.f32 %v5417_v53, %v5449_v39  ;;  %v5463_v13 = vpop.permute.xlu0 %5462  ;;  %v5483_v10 = vmin.f32 %v5427_v3, %v5459_v56  ;;  %v14571_v39 = vsel %vm4417_vm13, %v5498_v47, 1e+09 }
 0xc2e   : >> { %v5485_v58 = vmin.f32 %v5431_v19, %v5463_v13  ;;  %v16354_v13 = vrot.slane %v14571_v39, 1 }
 0xc2f   : >> { %v5494_v32 = vmin.f32 %v14248_v8, %v5478_v60  ;;  %v5559_v8 = vrot.slane %v14535_v44, 1  ;;  %v5499_v56 = vmin.f32 %v14303_v27, %v5483_v10  ;;  %v5527_v27 = vrot.slane %v14535_v44, 7 }
 0xc30   : >> { %v5501_v47 = vmin.f32 %v14465_v25, %v5485_v58 }
 0xc31   : >> { %v14540_v53 = vsel %vm4413_vm4, %v5494_v32, 1e+09 }
 0xc32   : >> { %v5526_v55 = vrot.slane %v14540_v53, 7  ;;  %v5558_v21 = vrot.slane %v14540_v53, 1 }
 0xc34   : >> { %v5553_v35 = vsel %vm17429_vm7, %v5525_v63, %v5526_v55  ;;  %v5455_v51 = vpop.permute.xlu2 %5454  ;;  %v5584_v36 = vsel %vm17431_vm3, %v5558_v21, %v5559_v8  ;;  %v5585_v46 = vsel %vm17432_vm5, %v5557_v7, %v5558_v21  ;;  %v5465_v32 = vpop.permute.xlu1 %5464  ;;  %vm17436_vm7 = vmmov %vm17431_vm3  ;;  %vm17438_vm3 = vcmp.gt.f32.partialorder %v12558_v42, 0.5 }
 0xc35   : >> { %v5589_v12 = vmin.f32 %v5554_v9, %v5585_v46  ;;  %v5590_v3 = vmin.f32 %v5553_v35, %v5584_v36  ;;  %v5469_v57 = vpop.permute.xlu0 %5468  ;;  %v5481_v60 = vmin.f32 %v5423_v14, %v5455_v51  ;;  %v5560_v14 = vrot.slane %v14567_v16, 1  ;;  %vm17439_vm5 = vmmov %vm17433_vm1 }
 0xc36   : >> { %v5551_v36 = vsel %vm17433_vm1, %v5527_v27, %v5528_v2  ;;  %vm17440_vm1 = vcmp.gt.f32.partialorder %v12784_v18, 0.5 }
 0xc37   : >> { %v14575_v6 = vmin.f32 %v14540_v53, %v5590_v3  ;;  %v14578_v63 = vmin.f32 %v14526_v23, %v5589_v12  ;;  %v5497_v21 = vmin.f32 %v14298_v24, %v5481_v60  ;;  %v14595_v24 = vsel %vm4418_vm0, %v5499_v56, 1e+09 }
 0xc38   : >> { %v5486_v60 = vmin.f32 %v14509_v1, %v5465_v32  ;;  %v5530_v1 = vrot.slane %v14571_v39, 7  ;;  %v5563_v32 = vrot.slane %v14595_v24, 1 }
 0xc39   : >> { %5622 = vrot.lane.b32.xlu2 %v14578_v63, %s7985_s10  ;;  %5624 = vrot.lane.b32.xlu0 %v14575_v6, %s7985_s10  ;;  %v14591_v19 = vsel %vm4416_vm11, %v5497_v21, 1e+09  ;;  %v14619_v21 = vsel %vm17437_vm15, %v5501_v47, 1e+09  ;;  %vm17443_vm15 = vcmp.gt.f32.partialorder %v12725_v30, 0.5 }
 0xc3a   : >> { %v16355_v10 = vrot.slane %v14591_v19, 7  ;;  %v5561_v35 = vrot.slane %v14591_v19, 1 }
 0xc3c   : >> { %v5461_v51 = vpop.permute.xlu2 %5460  ;;  %v5550_v46 = vsel %vm17434_vm12, %v5528_v2, %v16355_v10  ;;  %v5581_v25 = vsel %vm17435_vm6, %v5561_v35, %v16354_v13  ;;  %v5582_v12 = vsel %vm17436_vm7, %v5560_v14, %v5561_v35  ;;  %v5488_v2 = vmin.f32 %v14517_v37, %v5469_v57  ;;  %vm17441_vm12 = vmmov %vm17439_vm5 }
 0xc3d   : >> { %v5484_v9 = vmin.f32 %v14507_v26, %v5461_v51  ;;  %v5475_v3 = vpop.permute.xlu0 %5474  ;;  %v5531_v26 = vrot.slane %v14595_v24, 7  ;;  %v5592_v56 = vmin.f32 %v5551_v36, %v5582_v12  ;;  %v5593_v58 = vmin.f32 %v5550_v46, %v5581_v25  ;;  %v5471_v36 = vpop.permute.xlu1 %5470  ;;  %vm17442_vm7 = vmmov %vm17435_vm6 }
 0xc3e   : >> { %v5491_v13 = vmin.f32 %v14519_v20, %v5475_v3  ;;  %v5502_v20 = vmin.f32 %v14352_v31, %v5486_v60  ;;  %v5489_v25 = vmin.f32 %v14513_v22, %v5471_v36  ;;  %v16356_v60 = vrot.slane %v14530_v5, 1 }
 0xc3f   : >> { %v5500_v51 = vmin.f32 %v14347_v4, %v5484_v9  ;;  %v14625_v10 = vmin.f32 %v14591_v19, %v5593_v58  ;;  %v14628_v35 = vmin.f32 %v14567_v16, %v5592_v56  ;;  %v5565_v4 = vrot.slane %v14619_v21, 1 }
 0xc40   : >> { %v5507_v37 = vmin.f32 %v14489_v41, %v5491_v13  ;;  %v5548_v46 = vsel %vm17439_vm5, %v5530_v1, %v5531_v26  ;;  %v5504_v41 = vmin.f32 %v14477_v59, %v5488_v2  ;;  %v14671_v2 = vsel %vm17443_vm15, %v5502_v20, 1e+09 }
 0xc41   : >> { %v14634_v47 = vsel %vm17438_vm3, %v5500_v51, 1e+09  ;;  %5628 = vrot.lane.b32.xlu2 %v14628_v35, %s7985_s10  ;;  %5630 = vrot.lane.b32.xlu0 %v14625_v10, %s7985_s10  ;;  %vm17444_vm3 = vmmov %vm17435_vm6  ;;  %v5505_v23 = vmin.f32 %v14379_v50, %v5489_v25  ;;  %v5566_v50 = vrot.slane %v14671_v2, 1 }
 0xc42   : >> { %v5532_v57 = vrot.slane %v14634_v47, 7  ;;  %v5564_v9 = vrot.slane %v14634_v47, 1  ;;  %v14652_v31 = vsel %vm17440_vm1, %v5507_v37, 1e+09  ;;  %v5586_v51 = vsel %vm17444_vm3, %v16356_v60, %v5557_v7  ;;  %vm17445_vm1 = vmmov %vm17439_vm5 }
 0xc43   : >> { %v16357_v22 = vrot.slane %v14652_v31, 7  ;;  %vm17449_vm15 = vmmov %vm17445_vm1 }
 0xc44   : >> { %v5467_v13 = vpop.permute.xlu2 %5466  ;;  %v5547_v12 = vsel %vm17441_vm12, %v5531_v26, %v5532_v57  ;;  %v5578_v3 = vsel %vm17435_vm6, %v5564_v9, %v5565_v4  ;;  %v5579_v59 = vsel %vm17442_vm7, %v5563_v32, %v5564_v9  ;;  %vm17446_vm12 = vcmp.gt.f32.partialorder %v17370_v48, 0.5  ;;  %vm17447_vm6 = vmmov %vm17444_vm3 }
 0xc45   : >> { %v5595_v56 = vmin.f32 %v5548_v46, %v5579_v59  ;;  %v5596_v58 = vmin.f32 %v5547_v12, %v5578_v3  ;;  %v5487_v26 = vmin.f32 %v14511_v62, %v5467_v13  ;;  %v5555_v37 = vsel %vm17439_vm5, %v16357_v22, %v5524_v29  ;;  %vm17450_vm3 = vmmov %vm17445_vm1 }
 0xc46   : >> { %v14694_v62 = vsel %vm4423_vm9, %v5504_v41, 1e+09  ;;  %v5588_v7 = vmin.f32 %v5555_v37, %v5586_v51  ;;  %v5534_v46 = vrot.slane %v14671_v2, 7  ;;  %v5552_v13 = vsel %vm17445_vm1, %v5526_v55, %v5527_v27  ;;  %vm17451_vm5 = vmmov %vm17447_vm6 }
 0xc47   : >> { %v14681_v36 = vmin.f32 %v14634_v47, %v5596_v58  ;;  %v14690_v20 = vmin.f32 %v14595_v24, %v5595_v56  ;;  %v5503_v9 = vmin.f32 %v14375_v49, %v5487_v26  ;;  %v5533_v29 = vrot.slane %v14619_v21, 7  ;;  %vm17452_vm1 = vmmov %vm17451_vm5 }
 0xc48   : >> { %v14711_v49 = vmin.f32 %v14530_v5, %v5588_v7  ;;  %v5568_v53 = vrot.slane %v14694_v62, 1  ;;  %v5583_v25 = vsel %vm17447_vm6, %v5559_v8, %v5560_v14  ;;  %vm17448_vm7 = vcmp.gt.f32.partialorder %v17223_v54, 0.5  ;;  %vm17456_vm6 = vmmov %vm17450_vm3 }
 0xc49   : >> { %v5519_v12 = vsel %vm17446_vm12, %v5503_v9, 1e+09  ;;  %5634 = vrot.lane.b32.xlu2 %v14690_v20, %s7985_s10  ;;  %5636 = vrot.lane.b32.xlu0 %v14681_v36, %s7985_s10  ;;  %v5521_v3 = vsel %vm17448_vm7, %v5505_v23, 1e+09  ;;  %v5545_v56 = vsel %vm17449_vm15, %v5533_v29, %v5534_v46  ;;  %v5591_v14 = vmin.f32 %v5552_v13, %v5583_v25  ;;  %v17453_v9 = vld [vmem:[#allocation153_spill] sm:$0xff]  ;;  %vm17457_vm7 = vmmov %vm17450_vm3 }
 0xc4a   : >> { %v5535_v41 = vrot.slane %v5519_v12, 7  ;;  %v5567_v55 = vrot.slane %v5519_v12, 1  ;;  %5620 = vrot.lane.b32.xlu1 %v14711_v49, %s7985_s10  ;;  %v5537_v23 = vrot.slane %v5521_v3, 7  ;;  %vm17454_vm12 = vcmp.gt.f32.partialorder %v17453_v9, 0.5  ;;  %vm17458_vm15 = vmmov %vm17450_vm3 }
 0xc4b   : >> { %v5569_v60 = vrot.slane %v5521_v3, 1  ;;  %v5571_v22 = vrot.slane %v14652_v31, 1 }
 0xc4c   : >> { %v5473_v27 = vpop.permute.xlu2 %5472  ;;  %v5544_v58 = vsel %vm17450_vm3, %v5534_v46, %v5535_v41  ;;  %v5575_v16 = vsel %vm17451_vm5, %v5567_v55, %v5568_v53  ;;  %v5576_v8 = vsel %vm17452_vm1, %v5566_v50, %v5567_v55  ;;  %vm17459_vm3 = vmmov %vm17452_vm1 }
 0xc4d   : >> { %v5490_v59 = vmin.f32 %v14515_v43, %v5473_v27  ;;  %v5598_v26 = vmin.f32 %v5545_v56, %v5576_v8  ;;  %v5599_v51 = vmin.f32 %v5544_v58, %v5575_v16  ;;  %v5536_v43 = vrot.slane %v14694_v62, 7  ;;  %vm17460_vm5 = vmmov %vm17452_vm1 }
 0xc4f   : >> { %v5506_v37 = vmin.f32 %v14402_v52, %v5490_v59  ;;  %v14736_v7 = vmin.f32 %v5519_v12, %v5599_v51  ;;  %v14741_v46 = vmin.f32 %v14671_v2, %v5598_v26  ;;  %v17455_v52 = vrot.slane %v14591_v19, 7 }
 0xc50   : >> { %v14755_v2 = vmin.f32 %v14535_v44, %v5591_v14  ;;  %v5542_v12 = vsel %vm17457_vm7, %v5536_v43, %v5537_v23  ;;  %v17461_v44 = vrot.slane %v14571_v39, 1  ;;  %v5543_v47 = vsel %vm17457_vm7, %v5535_v41, %v5536_v43 }
 0xc51   : >> { %v5522_v27 = vsel %vm17454_vm12, %v5506_v37, 1e+09  ;;  %v5549_v25 = vsel %vm17456_vm6, %v17455_v52, %v5530_v1  ;;  %5640 = vrot.lane.b32.xlu2 %v14741_v46, %s7985_s10  ;;  %5642 = vrot.lane.b32.xlu0 %v14736_v7, %s7985_s10  ;;  %vm17462_vm12 = vmmov %vm17456_vm6 }
 0xc52   : >> { %v5538_v55 = vrot.slane %v5522_v27, 7  ;;  %v5570_v13 = vrot.slane %v5522_v27, 1  ;;  %5626 = vrot.lane.b32.xlu1 %v14755_v2, %s7985_s10  ;;  %v5580_v16 = vsel %vm17452_vm1, %v17461_v44, %v5563_v32  ;;  %v5546_v24 = vsel %vm17462_vm12, %v5532_v57, %v5533_v29  ;;  %vm17463_vm6 = vmmov %vm17452_vm1 }
 0xc53   : >> { %v5594_v8 = vmin.f32 %v5549_v25, %v5580_v16  ;;  %v5577_v32 = vsel %vm17463_vm6, %v5565_v4, %v5566_v50  ;;  %vm17473_vm6 = vcmp.gt.f32.partialorder %v12725_v30, 0.5 }
 0xc54   : >> { %v5541_v59 = vsel %vm17458_vm15, %v5537_v23, %v5538_v55  ;;  %v5572_v19 = vsel %vm17459_vm3, %v5570_v13, %v5571_v22  ;;  %v5573_v1 = vsel %vm17460_vm5, %v5569_v60, %v5570_v13  ;;  %vm17464_vm15 = vmmov %vm17452_vm1 }
 0xc55   : >> { %v5601_v56 = vmin.f32 %v5542_v12, %v5573_v1  ;;  %v5602_v58 = vmin.f32 %v5541_v59, %v5572_v19  ;;  %v14782_v51 = vmin.f32 %v14571_v39, %v5594_v8  ;;  %v5574_v57 = vsel %vm17464_vm15, %v5568_v53, %v5569_v60  ;;  %vm17467_vm3 = vmmov %vm17457_vm7 }
 0xc56   : >> { %v5600_v4 = vmin.f32 %v5543_v47, %v5574_v57  ;;  %v17468_v60 = vrot.slane %v14530_v5, 1  ;;  %vm17469_vm5 = vmmov %vm17452_vm1  ;;  %vm17471_vm1 = vcmp.gt.f32.partialorder %v12721_v0, 0.5 }
 0xc57   : >> { %v14773_v14 = vmin.f32 %v5522_v27, %v5602_v58  ;;  %v14775_v26 = vmin.f32 %v5521_v3, %v5601_v56  ;;  %v5597_v3 = vmin.f32 %v5546_v24, %v5577_v32  ;;  %vm17472_vm12 = vmmov %vm17467_vm3 }
 0xc58   : >> { %v14812_v29 = vmin.f32 %v14694_v62, %v5600_v4  ;;  %v5587_v53 = vsel %vm17469_vm5, %v5571_v22, %v17468_v60  ;;  %vm17474_vm7 = vmmov %vm17467_vm3 }
 0xc59   : >> { %5646 = vrot.lane.b32.xlu2 %v14775_v26, %s7985_s10  ;;  %5648 = vrot.lane.b32.xlu0 %v14773_v14, %s7985_s10  ;;  %v14799_v39 = vmin.f32 %v14619_v21, %v5597_v3  ;;  %v17466_v21 = vrot.slane %v14652_v31, 7  ;;  %vm17475_vm15 = vmmov %vm17469_vm5 }
 0xc5a   : >> { %5632 = vrot.lane.b32.xlu1 %v14782_v51, %s7985_s10  ;;  %17465 = vst [vmem:[#allocation171_spill] sm:$0xff] %v14812_v29 }
 0xc5b   : >> { %v5540_v50 = vsel %vm17467_vm3, %v5538_v55, %v17466_v21  ;;  %vm17476_vm3 = vmmov %vm17469_vm5  ;;  %vm17477_vm5 = vcmp.gt.f32.partialorder %v17370_v48, 0.5 }
 0xc5c   : >> { %v5603_v41 = vmin.f32 %v5540_v50, %v5587_v53 }
 0xc5e   : >> { %v14829_v62 = vmin.f32 %v14652_v31, %v5603_v41 }
 0xc61   : >> { %5654 = vrot.lane.b32.xlu0 %v14578_v63, %s7986_s15  ;;  %5652 = vrot.lane.b32.xlu2 %v14711_v49, %s7986_s15 }
 0xc62   : >> { %5638 = vrot.lane.b32.xlu1 %v14799_v39, %s7985_s10 }
 0xc69   : >> { %5660 = vrot.lane.b32.xlu0 %v14628_v35, %s7986_s15  ;;  %5658 = vrot.lane.b32.xlu2 %v14755_v2, %s7986_s15 }
 0xc6a   : >> { %5644 = vrot.lane.b32.xlu1 %v14812_v29, %s7985_s10 }
 0xc71   : >> { %5666 = vrot.lane.b32.xlu0 %v14690_v20, %s7986_s15  ;;  %5664 = vrot.lane.b32.xlu2 %v14782_v51, %s7986_s15 }
 0xc72   : >> { %5650 = vrot.lane.b32.xlu1 %v14829_v62, %s7985_s10 }
 0xc79   : >> { %5680 = vrot.lane.b32.xlu0 %v14773_v14, %s7986_s15  ;;  %5670 = vrot.lane.b32.xlu2 %v14799_v39, %s7986_s15 }
 0xc7a   : >> { %5656 = vrot.lane.b32.xlu1 %v14575_v6, %s7986_s15 }
 0xc81   : >> { %5674 = vrot.lane.b32.xlu0 %v14736_v7, %s7986_s15  ;;  %5672 = vrot.lane.b32.xlu2 %v14741_v46, %s7986_s15 }
 0xc82   : >> { %5662 = vrot.lane.b32.xlu1 %v14625_v10, %s7986_s15 }
 0xc89   : >> { %5678 = vrot.lane.b32.xlu2 %v14775_v26, %s7986_s15 }
 0xc8a   : >> { %5668 = vrot.lane.b32.xlu1 %v14681_v36, %s7986_s15 }
 0xc92   : >> { %5682 = vrot.lane.b32.xlu1 %v14829_v62, %s7986_s15 }
 0xc93   : >> { %v5623_v5 = vpop.permute.xlu2 %5622 }
 0xc9a   : >> { %5676 = vrot.lane.b32.xlu1 %v14812_v29, %s7986_s15 }
 0xc9b   : >> { %v5629_v31 = vpop.permute.xlu2 %5628 }
 0xca3   : >> { %v14853_v22 = vpop.permute.xlu2 %5634 }
 0xcab   : >> { %v5625_v37 = vpop.permute.xlu0 %5624  ;;  %v5641_v23 = vpop.permute.xlu2 %5640 }
 0xcb3   : >> { %v14855_v43 = vpop.permute.xlu0 %5630  ;;  %v14857_v27 = vpop.permute.xlu2 %5646 }
 0xcbb   : >> { %v14859_v55 = vpop.permute.xlu0 %5636  ;;  %v5653_v52 = vpop.permute.xlu2 %5652 }
 0xcbc   : >> { %v5621_v13 = vpop.permute.xlu1 %5620 }
 0xcbd   : >> { %v5684_v57 = vmin.f32 %v5621_v13, %v5653_v52 }
 0xcbf   : >> { %v5700_v60 = vmin.f32 %v14711_v49, %v5684_v57 }
 0xcc1   : >> { %v14878_v13 = vsel %vm4411_vm10, %v5700_v60, 1e+09 }
 0xcc3   : >> { %v5643_v25 = vpop.permute.xlu0 %5642  ;;  %v5659_v59 = vpop.permute.xlu2 %5658 }
 0xcc4   : >> { %v5627_v12 = vpop.permute.xlu1 %5626 }
 0xcc5   : >> { %v5687_v4 = vmin.f32 %v5627_v12, %v5659_v59 }
 0xcc7   : >> { %v5703_v53 = vmin.f32 %v14755_v2, %v5687_v4 }
 0xccb   : >> { %v14861_v19 = vpop.permute.xlu0 %5648  ;;  %v5665_v58 = vpop.permute.xlu2 %5664 }
 0xccc   : >> { %v5633_v1 = vpop.permute.xlu1 %5632 }
 0xccd   : >> { %v5690_v49 = vmin.f32 %v5633_v1, %v5665_v58 }
 0xccf   : >> { %v5706_v1 = vmin.f32 %v14782_v51, %v5690_v49 }
 0xcd3   : >> { %v5655_v56 = vpop.permute.xlu0 %5654  ;;  %v5671_v24 = vpop.permute.xlu2 %5670 }
 0xcd4   : >> { %v5639_v44 = vpop.permute.xlu1 %5638  ;;  %v5685_v3 = vmin.f32 %v5623_v5, %v5655_v56 }
 0xcd5   : >> { %v5693_v40 = vmin.f32 %v5639_v44, %v5671_v24 }
 0xcd6   : >> { %v5701_v21 = vmin.f32 %v14578_v63, %v5685_v3  ;;  %v14882_v63 = vsel %vm4414_vm14, %v5703_v53, 1e+09  ;;  %v14932_v53 = vsel %vm4417_vm13, %v5706_v1, 1e+09 }
 0xcd7   : >> { %v5709_v2 = vmin.f32 %v14799_v39, %v5693_v40  ;;  %v5767_v59 = vrot.slane %v14882_v63, 1  ;;  %v5735_v60 = vrot.slane %v14882_v63, 7  ;;  %v16369_v1 = vrot.slane %v14932_v53, 1 }
 0xcd8   : >> { %v14874_v54 = vsel %vm4412_vm2, %v5701_v21, 1e+09 }
 0xcd9   : >> { %v5765_v40 = vrot.slane %v14874_v54, 1 }
 0xcdb   : >> { %v5661_v16 = vpop.permute.xlu0 %5660  ;;  %v5673_v50 = vpop.permute.xlu2 %5672 }
 0xcdc   : >> { %v14863_v8 = vpop.permute.xlu1 %5644  ;;  %v5694_v29 = vmin.f32 %v5641_v23, %v5673_v50  ;;  %v5688_v5 = vmin.f32 %v5629_v31, %v5661_v16  ;;  %v5733_v23 = vrot.slane %v14874_v54, 7 }
 0xcdd   : >> { %17470 = vst [vmem:[#allocation170_spill] sm:$0xff] %v14863_v8 }
 0xcde   : >> { %v5710_v52 = vmin.f32 %v14741_v46, %v5694_v29  ;;  %v5704_v31 = vmin.f32 %v14628_v35, %v5688_v5 }
 0xce0   : >> { %v14909_v58 = vsel %vm17473_vm6, %v5710_v52, 1e+09  ;;  %v14913_v16 = vsel %vm4415_vm8, %v5704_v31, 1e+09  ;;  %vm17480_vm6 = vmmov %vm17476_vm3 }
 0xce3   : >> { %v5667_v32 = vpop.permute.xlu0 %5666 }
 0xce4   : >> { %v14865_v47 = vpop.permute.xlu1 %5650  ;;  %v5691_v57 = vmin.f32 %v14853_v22, %v5667_v32  ;;  %v16367_v32 = vrot.slane %v14909_v58, 1 }
 0xceb   : >> { %v14870_v41 = vpop.permute.xlu0 %5680 }
 0xcec   : >> { %v5657_v56 = vpop.permute.xlu1 %5656 }
 0xced   : >> { %v5686_v8 = vmin.f32 %v5625_v37, %v5657_v56  ;;  %v5732_v37 = vrot.slane %v14878_v13, 7  ;;  %v5742_v56 = vrot.slane %v14909_v58, 7 }
 0xcef   : >> { %v5702_v12 = vmin.f32 %v14575_v6, %v5686_v8  ;;  %v14901_v6 = vsel %vm17471_vm1, %v5709_v2, 1e+09  ;;  %v5762_v35 = vsel %vm17472_vm12, %v5732_v37, %v5733_v23  ;;  %vm17478_vm1 = vmmov %vm17474_vm7 }
 0xcf0   : >> { %vm17479_vm12 = vmmov %vm17478_vm1 }
 0xcf1   : >> { %v14893_v44 = vsel %vm4413_vm4, %v5702_v12, 1e+09 }
 0xcf2   : >> { %v5734_v39 = vrot.slane %v14893_v44, 7  ;;  %v5766_v46 = vrot.slane %v14893_v44, 1 }
 0xcf3   : >> { %v5675_v29 = vpop.permute.xlu0 %5674 }
 0xcf4   : >> { %v5695_v51 = vmin.f32 %v5643_v25, %v5675_v29  ;;  %v5761_v8 = vsel %vm17474_vm7, %v5733_v23, %v5734_v39  ;;  %v5792_v24 = vsel %vm17475_vm15, %v5766_v46, %v5767_v59  ;;  %v5793_v3 = vsel %vm17476_vm3, %v5765_v40, %v5766_v46  ;;  %v5663_v25 = vpop.permute.xlu1 %5662  ;;  %vm17481_vm7 = vmmov %vm17478_vm1 }
 0xcf5   : >> { %v5797_v4 = vmin.f32 %v5762_v35, %v5793_v3  ;;  %v5798_v21 = vmin.f32 %v5761_v8, %v5792_v24  ;;  %v5689_v50 = vmin.f32 %v14855_v43, %v5663_v25  ;;  %v16368_v43 = vrot.slane %v14901_v6, 7  ;;  %vm17482_vm15 = vmmov %vm17478_vm1 }
 0xcf6   : >> { %v5711_v5 = vmin.f32 %v14736_v7, %v5695_v51  ;;  %v5736_v23 = vrot.slane %v14913_v16, 7  ;;  %v5707_v7 = vmin.f32 %v14690_v20, %v5691_v57  ;;  %v5768_v46 = vrot.slane %v14913_v16, 1 }
 0xcf7   : >> { %v14937_v49 = vmin.f32 %v14893_v44, %v5798_v21  ;;  %v5705_v2 = vmin.f32 %v14625_v10, %v5689_v50  ;;  %v14941_v22 = vmin.f32 %v14874_v54, %v5797_v4  ;;  %v5753_v35 = vsel %vm17478_vm1, %v16368_v43, %v5742_v56 }
 0xcf8   : >> { %v14948_v52 = vsel %vm17477_vm5, %v5711_v5, 1e+09  ;;  %v5759_v24 = vsel %vm17481_vm7, %v5735_v60, %v5736_v23  ;;  %vm17483_vm5 = vmmov %vm17476_vm3  ;;  %v14999_v21 = vsel %vm4418_vm0, %v5707_v7, 1e+09  ;;  %vm17484_vm1 = vcmp.gt.f32.partialorder %v12558_v42, 0.5 }
 0xcf9   : >> { %v14953_v12 = vsel %vm4416_vm11, %v5705_v2, 1e+09  ;;  %v5743_v10 = vrot.slane %v14948_v52, 7  ;;  %v16371_v31 = vrot.slane %v14948_v52, 1  ;;  %5830 = vrot.lane.b32.xlu1 %v14941_v22, %s7985_s10  ;;  %5832 = vrot.lane.b32.xlu2 %v14937_v49, %s7985_s10 }
 0xcfa   : >> { %v16370_v20 = vrot.slane %v14953_v12, 7  ;;  %v5769_v29 = vrot.slane %v14953_v12, 1 }
 0xcfb   : >> { %v14973_v51 = vsel %vm17479_vm12, %v5742_v56, %v5743_v10  ;;  %v5784_v8 = vsel %vm17480_vm6, %v16367_v32, %v16371_v31  ;;  %vm17485_vm12 = vmmov %vm17481_vm7 }
 0xcfc   : >> { %v5758_v3 = vsel %vm17482_vm15, %v5736_v23, %v16370_v20  ;;  %v5789_v25 = vsel %vm17476_vm3, %v5769_v29, %v16369_v1  ;;  %v5790_v57 = vsel %vm17483_vm5, %v5768_v46, %v5769_v29  ;;  %v5669_v4 = vpop.permute.xlu1 %5668  ;;  %v5806_v56 = vmin.f32 %v5753_v35, %v5784_v8  ;;  %vm17486_vm6 = vmmov %vm17481_vm7 }
 0xcfd   : >> { %v5800_v50 = vmin.f32 %v5759_v24, %v5790_v57  ;;  %v5801_v5 = vmin.f32 %v5758_v3, %v5789_v25  ;;  %v5692_v2 = vmin.f32 %v14859_v55, %v5669_v4  ;;  %v5739_v29 = vrot.slane %v14999_v21, 7  ;;  %v5679_v3 = vpop.permute.xlu2 %5678  ;;  %vm17487_vm7 = vmmov %vm17476_vm3 }
 0xcfe   : >> { %v15009_v43 = vmin.f32 %v14909_v58, %v5806_v56  ;;  %v5738_v55 = vrot.slane %v14932_v53, 7  ;;  %v16373_v35 = vrot.slane %v14901_v6, 1  ;;  %v5771_v8 = vrot.slane %v14999_v21, 1  ;;  %vm17488_vm15 = vmmov %vm17476_vm3 }
 0xcff   : >> { %v15003_v23 = vmin.f32 %v14953_v12, %v5801_v5  ;;  %v15006_v32 = vmin.f32 %v14913_v16, %v5800_v50  ;;  %v5708_v1 = vmin.f32 %v14681_v36, %v5692_v2  ;;  %v5698_v4 = vmin.f32 %v14861_v19, %v14870_v41 }
 0xd00   : >> { %v5756_v25 = vsel %vm17485_vm12, %v5738_v55, %v5739_v29  ;;  %v5697_v31 = vmin.f32 %v14857_v27, %v5679_v3  ;;  %vm17489_vm3 = vcmp.gt.f32.partialorder %v12784_v18, 0.5  ;;  %v5764_v27 = vrot.slane %v14878_v13, 1  ;;  %vm17491_vm12 = vmmov %vm17486_vm6 }
 0xd01   : >> { %5836 = vrot.lane.b32.xlu1 %v15006_v32, %s7985_s10  ;;  %5838 = vrot.lane.b32.xlu2 %v15003_v23, %s7985_s10  ;;  %v15020_v7 = vsel %vm17484_vm1, %v5708_v1, 1e+09  ;;  %vm17490_vm1 = vcmp.gt.f32.partialorder %v17453_v9, 0.5 }
 0xd02   : >> { %v16372_v24 = vrot.slane %v15020_v7, 7  ;;  %v5772_v36 = vrot.slane %v15020_v7, 1 }
 0xd04   : >> { %v5683_v57 = vpop.permute.xlu1 %5682  ;;  %v5755_v1 = vsel %vm17486_vm6, %v5739_v29, %v16372_v24  ;;  %v5786_v50 = vsel %vm17487_vm7, %v5772_v36, %v16373_v35  ;;  %v5787_v5 = vsel %vm17488_vm15, %v5771_v8, %v5772_v36  ;;  %v5714_v24 = vmin.f32 %v14773_v14, %v5698_v4  ;;  %v17495_v4 = vld [vmem:[#allocation171_spill] sm:$0xff]  ;;  %vm17496_vm7 = vmmov %vm17491_vm12 }
 0xd05   : >> { %v5803_v56 = vmin.f32 %v5756_v25, %v5787_v5  ;;  %v5804_v2 = vmin.f32 %v5755_v1, %v5786_v50  ;;  %v5699_v20 = vmin.f32 %v14865_v47, %v5683_v57  ;;  %v5713_v47 = vmin.f32 %v14775_v26, %v5697_v31  ;;  %v17492_v25 = vld [vmem:[#allocation170_spill] sm:$0xff]  ;;  %vm17498_vm15 = vmmov %vm17483_vm5 }
 0xd06   : >> { %v5794_v14 = vsel %vm17483_vm5, %v5764_v27, %v5765_v40  ;;  %v17493_v31 = vld [vmem:[#allocation152_spill] sm:$0xff] }
 0xd07   : >> { %v15043_v19 = vmin.f32 %v15020_v7, %v5804_v2  ;;  %v5715_v41 = vmin.f32 %v14829_v62, %v5699_v20  ;;  %v15047_v29 = vmin.f32 %v14999_v21, %v5803_v56  ;;  %v15067_v21 = vsel %vm17490_vm1, %v5714_v24, 1e+09 }
 0xd08   : >> { %vm17494_vm6 = vcmp.gt.f32.partialorder %v17493_v31, 0.5  ;;  %v5778_v54 = vrot.slane %v15067_v21, 1 }
 0xd09   : >> { %v15052_v35 = vsel %vm17489_vm3, %v5715_v41, 1e+09  ;;  %5842 = vrot.lane.b32.xlu1 %v15047_v29, %s7985_s10  ;;  %5844 = vrot.lane.b32.xlu2 %v15043_v19, %s7985_s10  ;;  %v5729_v57 = vsel %vm17494_vm6, %v5713_v47, 1e+09  ;;  %vm17499_vm3 = vmmov %vm17483_vm5 }
 0xd0a   : >> { %v5747_v62 = vrot.slane %v15052_v35, 7  ;;  %v5777_v24 = vrot.slane %v5729_v57, 1  ;;  %v5745_v44 = vrot.slane %v5729_v57, 7  ;;  %vm17500_vm5 = vmmov %vm17496_vm7 }
 0xd0b   : >> { %vm17501_vm1 = vmmov %vm17500_vm5 }
 0xd0c   : >> { %v5677_v20 = vpop.permute.xlu1 %5676  ;;  %v5763_v36 = vsel %vm17491_vm12, %v5747_v62, %v5732_v37  ;;  %v5760_v37 = vsel %vm17496_vm7, %v5734_v39, %v5735_v60  ;;  %v5781_v2 = vsel %vm17499_vm3, %v5777_v24, %v5778_v54  ;;  %vm17502_vm12 = vmmov %vm17499_vm3 }
 0xd0d   : >> { %v5796_v3 = vmin.f32 %v5763_v36, %v5794_v14  ;;  %v5696_v26 = vmin.f32 %v17492_v25, %v5677_v20  ;;  %vm17504_vm6 = vmmov %vm17499_vm3 }
 0xd0e   : >> { %vm17506_vm7 = vmmov %vm17501_vm1 }
 0xd0f   : >> { %v5712_v1 = vmin.f32 %v17495_v4, %v5696_v26  ;;  %v15079_v40 = vmin.f32 %v14878_v13, %v5796_v3  ;;  %v5791_v13 = vsel %vm17498_vm15, %v5767_v59, %v5768_v46  ;;  %v17503_v46 = vrot.slane %v14948_v52, 1  ;;  %vm17508_vm15 = vmmov %vm17499_vm3 }
 0xd10   : >> { %v5799_v60 = vmin.f32 %v5760_v37, %v5791_v13  ;;  %v17505_v4 = vrot.slane %v14953_v12, 7  ;;  %v5779_v12 = vrot.slane %v15052_v35, 1  ;;  %vm17509_vm3 = vmmov %vm17501_vm1 }
 0xd11   : >> { %v5728_v5 = vsel %vm4423_vm9, %v5712_v1, 1e+09  ;;  %5828 = vrot.lane.b32.xlu0 %v15079_v40, %s7985_s10  ;;  %5860 = vrot.lane.b32.xlu1 %v15079_v40, %s7986_s15 }
 0xd12   : >> { %v5744_v56 = vrot.slane %v5728_v5, 7  ;;  %v5776_v39 = vrot.slane %v5728_v5, 1  ;;  %5862 = vrot.lane.b32.xlu2 %v14941_v22, %s7986_s15  ;;  %v15119_v25 = vmin.f32 %v14882_v63, %v5799_v60  ;;  %v5757_v1 = vsel %vm17506_vm7, %v17505_v4, %v5738_v55  ;;  %vm17517_vm7 = vmmov %vm17501_vm1 }
 0xd14   : >> { %v5750_v41 = vsel %vm17500_vm5, %v5744_v56, %v5745_v44  ;;  %v5751_v16 = vsel %vm17501_vm1, %v5743_v10, %v5744_v56  ;;  %v5782_v59 = vsel %vm17502_vm12, %v5776_v39, %v5777_v24  ;;  %v5783_v47 = vsel %vm17504_vm6, %v17503_v46, %v5776_v39  ;;  %vm17510_vm5 = vmmov %vm17504_vm6 }
 0xd15   : >> { %v5807_v20 = vmin.f32 %v14973_v51, %v5783_v47  ;;  %v5808_v14 = vmin.f32 %v5751_v16, %v5782_v59  ;;  %v5809_v36 = vmin.f32 %v5750_v41, %v5781_v2  ;;  %v17507_v51 = vrot.slane %v14932_v53, 1  ;;  %vm17515_vm12 = vmmov %vm17510_vm5 }
 0xd16   : >> { %v5795_v24 = vsel %vm17510_vm5, %v5779_v12, %v5764_v27  ;;  %v17514_v27 = vrot.slane %v14901_v6, 1  ;;  %vm17516_vm6 = vmmov %vm17510_vm5 }
 0xd17   : >> { %v15116_v3 = vmin.f32 %v5728_v5, %v5808_v14  ;;  %v15122_v26 = vmin.f32 %v14948_v52, %v5807_v20  ;;  %v15124_v10 = vmin.f32 %v5729_v57, %v5809_v36  ;;  %v5788_v63 = vsel %vm17508_vm15, %v17507_v51, %v5771_v8 }
 0xd18   : >> { %v5802_v52 = vmin.f32 %v5757_v1, %v5788_v63  ;;  %v5746_v57 = vrot.slane %v15067_v21, 7  ;;  %v17511_v5 = vrot.slane %v14901_v6, 7  ;;  %v17512_v8 = vrot.slane %v15020_v7, 7 }
 0xd19   : >> { %5834 = vrot.lane.b32.xlu0 %v15119_v25, %s7985_s10  ;;  %5866 = vrot.lane.b32.xlu1 %v15119_v25, %s7986_s15  ;;  %vm17518_vm15 = vcmp.gt.f32.partialorder %v12784_v18, 0.5 }
 0xd1a   : >> { %5868 = vrot.lane.b32.xlu2 %v15006_v32, %s7986_s15  ;;  %v15143_v55 = vmin.f32 %v14932_v53, %v5802_v52  ;;  %v5748_v37 = vsel %vm17509_vm3, %v5746_v57, %v5747_v62  ;;  %v5754_v13 = vsel %vm17501_vm1, %v17512_v8, %v17511_v5  ;;  %v17513_v53 = vrot.slane %v14909_v58, 1  ;;  %vm17519_vm3 = vmmov %vm17510_vm5 }
 0xd1b   : >> { %v5811_v7 = vmin.f32 %v5748_v37, %v5795_v24  ;;  %v5749_v58 = vsel %vm17517_vm7, %v5745_v44, %v5746_v57  ;;  %vm17520_vm5 = vmmov %vm17501_vm1 }
 0xd1c   : >> { %v5785_v62 = vsel %vm17515_vm12, %v17514_v27, %v17513_v53  ;;  %vm17521_vm1 = vmmov %vm17519_vm3 }
 0xd1d   : >> { %v5805_v56 = vmin.f32 %v5754_v13, %v5785_v62  ;;  %v5827_v39 = vmin.f32 %v15052_v35, %v5811_v7  ;;  %vm17522_vm12 = vmmov %vm17520_vm5 }
 0xd1e   : >> { %vm17524_vm7 = vmmov %vm17520_vm5 }
 0xd1f   : >> { %v15169_v60 = vmin.f32 %v14901_v6, %v5805_v56  ;;  %v5780_v6 = vsel %vm17516_vm6, %v5778_v54, %v5779_v12  ;;  %vm17523_vm6 = vmmov %vm17521_vm1 }
 0xd20   : >> { %v5810_v35 = vmin.f32 %v5749_v58, %v5780_v6 }
 0xd21   : >> { %5840 = vrot.lane.b32.xlu0 %v15143_v55, %s7985_s10  ;;  %5872 = vrot.lane.b32.xlu1 %v15143_v55, %s7986_s15 }
 0xd22   : >> { %5874 = vrot.lane.b32.xlu2 %v15047_v29, %s7986_s15  ;;  %v15192_v2 = vmin.f32 %v15067_v21, %v5810_v35 }
 0xd29   : >> { %5890 = vrot.lane.b32.xlu1 %v5827_v39, %s7986_s15  ;;  %5858 = vrot.lane.b32.xlu0 %v5827_v39, %s7985_s10 }
 0xd2a   : >> { %5846 = vrot.lane.b32.xlu2 %v15169_v60, %s7985_s10 }
 0xd31   : >> { %5864 = vrot.lane.b32.xlu0 %v14937_v49, %s7986_s15  ;;  %5850 = vrot.lane.b32.xlu1 %v15122_v26, %s7985_s10 }
 0xd32   : >> { %5852 = vrot.lane.b32.xlu2 %v15116_v3, %s7985_s10 }
 0xd39   : >> { %5870 = vrot.lane.b32.xlu0 %v15003_v23, %s7986_s15  ;;  %5880 = vrot.lane.b32.xlu1 %v15009_v43, %s7986_s15 }
 0xd3a   : >> { %5882 = vrot.lane.b32.xlu2 %v15122_v26, %s7986_s15 }
 0xd41   : >> { %5876 = vrot.lane.b32.xlu0 %v15043_v19, %s7986_s15  ;;  %5854 = vrot.lane.b32.xlu1 %v15124_v10, %s7985_s10 }
 0xd42   : >> { %5856 = vrot.lane.b32.xlu2 %v15192_v2, %s7985_s10 }
 0xd49   : >> { %5848 = vrot.lane.b32.xlu0 %v15009_v43, %s7985_s10  ;;  %5888 = vrot.lane.b32.xlu1 %v15192_v2, %s7986_s15 }
 0xd51   : >> { %5878 = vrot.lane.b32.xlu0 %v15169_v60, %s7986_s15 }
 0xd53   : >> { %v5833_v21 = vpop.permute.xlu2 %5832 }
 0xd59   : >> { %5884 = vrot.lane.b32.xlu0 %v15116_v3, %s7986_s15 }
 0xd5b   : >> { %v15210_v54 = vpop.permute.xlu2 %5838 }
 0xd61   : >> { %5886 = vrot.lane.b32.xlu0 %v15124_v10, %s7986_s15 }
 0xd63   : >> { %v15212_v16 = vpop.permute.xlu2 %5844 }
 0xd6b   : >> { %v5831_v44 = vpop.permute.xlu1 %5830 }
 0xd6c   : >> { %v5863_v46 = vpop.permute.xlu2 %5862 }
 0xd6d   : >> { %v5893_v12 = vmin.f32 %v5831_v44, %v5863_v46 }
 0xd6f   : >> { %v5909_v37 = vmin.f32 %v14941_v22, %v5893_v12 }
 0xd71   : >> { %v5925_v62 = vsel %vm4412_vm2, %v5909_v37, 1e+09 }
 0xd73   : >> { %v5837_v41 = vpop.permute.xlu1 %5836 }
 0xd74   : >> { %v5869_v14 = vpop.permute.xlu2 %5868 }
 0xd75   : >> { %v5896_v7 = vmin.f32 %v5837_v41, %v5869_v14 }
 0xd77   : >> { %v5912_v35 = vmin.f32 %v15006_v32, %v5896_v7 }
 0xd7b   : >> { %v5843_v59 = vpop.permute.xlu1 %5842 }
 0xd7c   : >> { %v5875_v1 = vpop.permute.xlu2 %5874 }
 0xd83   : >> { %v5861_v47 = vpop.permute.xlu1 %5860  ;;  %v5829_v20 = vpop.permute.xlu0 %5828 }
 0xd84   : >> { %v5892_v52 = vmin.f32 %v5829_v20, %v5861_v47  ;;  %v15216_v13 = vpop.permute.xlu2 %5846 }
 0xd86   : >> { %v5908_v57 = vmin.f32 %v15079_v40, %v5892_v52  ;;  %v5973_v40 = vrot.slane %v5925_v62, 1  ;;  %v5899_v52 = vmin.f32 %v5843_v59, %v5875_v1 }
 0xd88   : >> { %v5924_v53 = vsel %vm4411_vm10, %v5908_v57, 1e+09 }
 0xd89   : >> { %v5972_v6 = vrot.slane %v5924_v53, 1  ;;  %v5940_v44 = vrot.slane %v5924_v53, 7 }
 0xd8b   : >> { %v5867_v36 = vpop.permute.xlu1 %5866  ;;  %v5835_v4 = vpop.permute.xlu0 %5834  ;;  %v6002_v41 = vsel %vm17519_vm3, %v5972_v6, %v5973_v40  ;;  %vm17526_vm3 = vmmov %vm17521_vm1 }
 0xd8c   : >> { %v5895_v24 = vmin.f32 %v5835_v4, %v5867_v36  ;;  %v15248_v12 = vpop.permute.xlu2 %5852 }
 0xd8e   : >> { %v5911_v58 = vmin.f32 %v15119_v25, %v5895_v24 }
 0xd93   : >> { %v5873_v51 = vpop.permute.xlu1 %5872  ;;  %v5841_v63 = vpop.permute.xlu0 %5840 }
 0xd94   : >> { %v5898_v20 = vmin.f32 %v5841_v63, %v5873_v51  ;;  %v5928_v63 = vsel %vm4415_vm8, %v5912_v35, 1e+09 }
 0xd96   : >> { %v5914_v37 = vmin.f32 %v15143_v55, %v5898_v20 }
 0xd9b   : >> { %v5891_v5 = vpop.permute.xlu1 %5890  ;;  %v5859_v8 = vpop.permute.xlu0 %5858 }
 0xd9c   : >> { %v5907_v27 = vmin.f32 %v5859_v8, %v5891_v5  ;;  %v5941_v8 = vrot.slane %v5925_v62, 7 }
 0xd9e   : >> { %v5923_v56 = vmin.f32 %v5827_v39, %v5907_v27  ;;  %v5927_v39 = vsel %vm4414_vm14, %v5911_v58, 1e+09  ;;  %v5976_v27 = vrot.slane %v5928_v63, 1  ;;  %v5970_v55 = vsel %vm17522_vm12, %v5940_v44, %v5941_v8  ;;  %vm17529_vm12 = vmmov %vm17526_vm3 }
 0xd9f   : >> { %v5975_v57 = vrot.slane %v5927_v39, 1  ;;  %v5943_v59 = vrot.slane %v5927_v39, 7 }
 0xda0   : >> { %v15225_v22 = vsel %vm17518_vm15, %v5923_v56, 1e+09  ;;  %vm17525_vm15 = vmmov %vm17520_vm5 }
 0xda1   : >> { %v5955_v46 = vrot.slane %v15225_v22, 7  ;;  %v5987_v47 = vrot.slane %v15225_v22, 1 }
 0xda3   : >> { %v5971_v25 = vsel %vm17520_vm5, %v5955_v46, %v5940_v44  ;;  %v15242_v32 = vsel %vm17521_vm1, %v5987_v47, %v5972_v6  ;;  %v15244_v14 = vpop.permute.xlu1 %5850  ;;  %v5865_v36 = vpop.permute.xlu0 %5864  ;;  %vm17527_vm5 = vmmov %vm17521_vm1 }
 0xda4   : >> { %v6004_v4 = vmin.f32 %v5971_v25, %v6002_v41  ;;  %v5894_v51 = vmin.f32 %v5833_v21, %v5865_v36  ;;  %v5915_v21 = vmin.f32 %v15047_v29, %v5899_v52  ;;  %vm17528_vm1 = vmmov %vm17524_vm7 }
 0xda6   : >> { %v5910_v24 = vmin.f32 %v14937_v49, %v5894_v51  ;;  %v15252_v5 = vmin.f32 %v5924_v53, %v6004_v4  ;;  %v5999_v49 = vsel %vm17523_vm6, %v5975_v57, %v5976_v27  ;;  %v5930_v53 = vsel %vm4417_vm13, %v5914_v37, 1e+09  ;;  %vm17530_vm6 = vmmov %vm17528_vm1 }
 0xda7   : >> { %v15278_v51 = vsel %vm4418_vm0, %v5915_v21, 1e+09  ;;  %v5978_v52 = vrot.slane %v5930_v53, 1 }
 0xda8   : >> { %v5926_v7 = vsel %vm4413_vm4, %v5910_v24, 1e+09  ;;  %6036 = vrot.lane.b32.xlu2 %v15252_v5, %s7985_s10 }
 0xda9   : >> { %v5942_v1 = vrot.slane %v5926_v7, 7  ;;  %v5974_v56 = vrot.slane %v5926_v7, 1 }
 0xdab   : >> { %v5968_v6 = vsel %vm17524_vm7, %v5942_v1, %v5943_v59  ;;  %v5969_v58 = vsel %vm17525_vm15, %v5941_v8, %v5942_v1  ;;  %v6000_v29 = vsel %vm17526_vm3, %v5974_v56, %v5975_v57  ;;  %v6001_v35 = vsel %vm17527_vm5, %v5973_v40, %v5974_v56  ;;  %v15273_v20 = vpop.permute.xlu1 %5880  ;;  %v5871_v44 = vpop.permute.xlu0 %5870  ;;  %vm17531_vm7 = vmmov %vm17528_vm1 }
 0xdac   : >> { %v6005_v41 = vmin.f32 %v5970_v55, %v6001_v35  ;;  %v6006_v25 = vmin.f32 %v5969_v58, %v6000_v29  ;;  %v6007_v36 = vmin.f32 %v5968_v6, %v5999_v49  ;;  %v5897_v4 = vmin.f32 %v15210_v54, %v5871_v44  ;;  %v5883_v56 = vpop.permute.xlu2 %5882  ;;  %vm17532_vm15 = vmmov %vm17526_vm3 }
 0xdad   : >> { %v5944_v8 = vrot.slane %v5928_v63, 7  ;;  %v5979_v1 = vrot.slane %v15278_v51, 1  ;;  %vm17533_vm5 = vcmp.gt.f32.partialorder %v12558_v42, 0.5 }
 0xdae   : >> { %v15280_v37 = vmin.f32 %v5926_v7, %v6006_v25  ;;  %v5913_v57 = vmin.f32 %v15003_v23, %v5897_v4  ;;  %v15283_v24 = vmin.f32 %v5925_v62, %v6005_v41  ;;  %v15285_v40 = vmin.f32 %v5927_v39, %v6007_v36 }
 0xdaf   : >> { %v5946_v7 = vrot.slane %v5930_v53, 7  ;;  %v5967_v62 = vsel %vm17528_vm1, %v5943_v59, %v5944_v8  ;;  %v5996_v39 = vsel %vm17529_vm12, %v5978_v52, %v5979_v1  ;;  %vm17534_vm12 = vmmov %vm17526_vm3 }
 0xdb0   : >> { %v5929_v54 = vsel %vm4416_vm11, %v5913_v57, 1e+09  ;;  %6038 = vrot.lane.b32.xlu0 %v15283_v24, %s7985_s10  ;;  %6040 = vrot.lane.b32.xlu1 %v15280_v37, %s7985_s10 }
 0xdb1   : >> { %v5945_v21 = vrot.slane %v5929_v54, 7  ;;  %v5977_v23 = vrot.slane %v5929_v54, 1  ;;  %6042 = vrot.lane.b32.xlu2 %v15285_v40, %s7985_s10 }
 0xdb3   : >> { %v5965_v55 = vsel %vm17530_vm6, %v5945_v21, %v5946_v7  ;;  %v5966_v49 = vsel %vm17531_vm7, %v5944_v8, %v5945_v21  ;;  %v5997_v6 = vsel %vm17532_vm15, %v5977_v23, %v5978_v52  ;;  %v5998_v58 = vsel %vm17526_vm3, %v5976_v27, %v5977_v23  ;;  %v15308_v29 = vpop.permute.xlu1 %5854  ;;  %v5877_v35 = vpop.permute.xlu0 %5876  ;;  %vm17536_vm7 = vmmov %vm17528_vm1 }
 0xdb4   : >> { %v6008_v44 = vmin.f32 %v5967_v62, %v5998_v58  ;;  %v6009_v59 = vmin.f32 %v5966_v49, %v5997_v6  ;;  %v6010_v41 = vmin.f32 %v5965_v55, %v5996_v39  ;;  %v5900_v25 = vmin.f32 %v15212_v16, %v5877_v35 }
 0xdb5   : >> { %v5947_v16 = vrot.slane %v15278_v51, 7  ;;  %vm17535_vm6 = vcmp.gt.f32.partialorder %v17453_v9, 0.5  ;;  %v5903_v35 = vmin.f32 %v15244_v14, %v5883_v56  ;;  %vm17537_vm15 = vcmp.gt.f32.partialorder %v12721_v0, 0.5 }
 0xdb6   : >> { %v15311_v36 = vmin.f32 %v5929_v54, %v6009_v59  ;;  %v5916_v4 = vmin.f32 %v15043_v19, %v5900_v25  ;;  %v15314_v57 = vmin.f32 %v5928_v63, %v6008_v44  ;;  %v15316_v8 = vmin.f32 %v5930_v53, %v6010_v41  ;;  %v5857_v19 = vpop.permute.xlu2 %5856 }
 0xdb7   : >> { %v5964_v63 = vsel %vm17528_vm1, %v5946_v7, %v5947_v16  ;;  %vm17538_vm3 = vcmp.gt.f32.partialorder %v12725_v30, 0.5 }
 0xdb8   : >> { %v15320_v52 = vsel %vm17533_vm5, %v5916_v4, 1e+09  ;;  %6044 = vrot.lane.b32.xlu0 %v15314_v57, %s7985_s10  ;;  %6046 = vrot.lane.b32.xlu1 %v15311_v36, %s7985_s10  ;;  %vm17539_vm5 = vcmp.gt.f32.partialorder %v17370_v48, 0.5 }
 0xdb9   : >> { %v5980_v27 = vrot.slane %v15320_v52, 1  ;;  %6048 = vrot.lane.b32.xlu2 %v15316_v8, %s7985_s10  ;;  %v5948_v25 = vrot.slane %v15320_v52, 7 }
 0xdbb   : >> { %v5995_v53 = vsel %vm17534_vm12, %v5979_v1, %v5980_v27  ;;  %v5889_v54 = vpop.permute.xlu1 %5888  ;;  %v5849_v21 = vpop.permute.xlu0 %5848 }
 0xdbc   : >> { %v6011_v23 = vmin.f32 %v5964_v63, %v5995_v53  ;;  %v5906_v62 = vmin.f32 %v5857_v19, %v5889_v54 }
 0xdbe   : >> { %v5922_v39 = vmin.f32 %v15192_v2, %v5906_v62  ;;  %v15336_v55 = vmin.f32 %v15278_v51, %v6011_v23  ;;  %v5902_v2 = vmin.f32 %v5849_v21, %v15273_v20 }
 0xdc0   : >> { %v15340_v49 = vsel %vm17535_vm6, %v5922_v39, 1e+09  ;;  %6068 = vrot.lane.b32.xlu1 %v15252_v5, %s7986_s15  ;;  %6050 = vrot.lane.b32.xlu0 %v15336_v55, %s7985_s10  ;;  %v5918_v44 = vmin.f32 %v15009_v43, %v5902_v2  ;;  %vm17540_vm6 = vmmov %vm17534_vm12 }
 0xdc1   : >> { %v5954_v1 = vrot.slane %v15340_v49, 7  ;;  %6070 = vrot.lane.b32.xlu2 %v15283_v24, %s7986_s15 }
 0xdc2   : >> { %v5934_v43 = vsel %vm17538_vm3, %v5918_v44, 1e+09  ;;  %vm17543_vm3 = vmmov %vm17540_vm6 }
 0xdc3   : >> { %v5956_v51 = vsel %vm17536_vm7, %v5954_v1, %v5955_v46  ;;  %v5879_v7 = vpop.permute.xlu0 %5878  ;;  %v5982_v4 = vrot.slane %v5934_v43, 1  ;;  %v5950_v19 = vrot.slane %v5934_v43, 7  ;;  %vm17541_vm7 = vmmov %vm17528_vm1 }
 0xdc4   : >> { %v6019_v6 = vmin.f32 %v5956_v51, %v15242_v32  ;;  %v5901_v58 = vmin.f32 %v15216_v13, %v5879_v7  ;;  %v5919_v13 = vmin.f32 %v15122_v26, %v5903_v35 }
 0xdc6   : >> { %v5917_v59 = vmin.f32 %v15169_v60, %v5901_v58  ;;  %v15362_v20 = vmin.f32 %v15225_v22, %v6019_v6  ;;  %v5935_v56 = vsel %vm17539_vm5, %v5919_v13, 1e+09  ;;  %vm17544_vm5 = vmmov %vm17543_vm3 }
 0xdc7   : >> { %v5983_v21 = vrot.slane %v5935_v56, 1 }
 0xdc8   : >> { %v5933_v41 = vsel %vm17537_vm15, %v5917_v59, 1e+09  ;;  %6074 = vrot.lane.b32.xlu1 %v15285_v40, %s7986_s15  ;;  %6072 = vrot.lane.b32.xlu0 %v15280_v37, %s7986_s15  ;;  %vm17542_vm15 = vmmov %vm17528_vm1 }
 0xdc9   : >> { %6076 = vrot.lane.b32.xlu2 %v15314_v57, %s7986_s15  ;;  %v5949_v60 = vrot.slane %v5933_v41, 7  ;;  %v5981_v46 = vrot.slane %v5933_v41, 1 }
 0xdcb   : >> { %v5885_v32 = vpop.permute.xlu0 %5884  ;;  %v5962_v63 = vsel %vm17528_vm1, %v5948_v25, %v5949_v60  ;;  %v5993_v53 = vsel %vm17534_vm12, %v5981_v46, %v5982_v4  ;;  %v5994_v54 = vsel %vm17540_vm6, %v5980_v27, %v5981_v46  ;;  %v5992_v27 = vsel %vm17543_vm3, %v5982_v4, %v5983_v21  ;;  %vm17546_vm6 = vmmov %vm17543_vm3 }
 0xdcc   : >> { %v5904_v14 = vmin.f32 %v15248_v12, %v5885_v32  ;;  %v5961_v12 = vsel %vm17541_vm7, %v5949_v60, %v5950_v19  ;;  %v6013_v39 = vmin.f32 %v5962_v63, %v5993_v53  ;;  %vm17545_vm12 = vcmp.gt.f32.partialorder %v17493_v31, 0.5  ;;  %vm17547_vm7 = vmmov %vm17528_vm1 }
 0xdcd   : >> { %v6014_v2 = vmin.f32 %v5961_v12, %v5992_v27  ;;  %vm17549_vm3 = vmmov %vm17528_vm1 }
 0xdce   : >> { %v5920_v26 = vmin.f32 %v15116_v3, %v5904_v14  ;;  %v5963_v3 = vsel %vm17542_vm15, %v5947_v16, %v5948_v25  ;;  %v15401_v58 = vmin.f32 %v5933_v41, %v6013_v39  ;;  %v5951_v16 = vrot.slane %v5935_v56, 7  ;;  %vm17548_vm15 = vmmov %vm17528_vm1 }
 0xdcf   : >> { %v6012_v62 = vmin.f32 %v5963_v3, %v5994_v54  ;;  %v15409_v13 = vmin.f32 %v5934_v43, %v6014_v2 }
 0xdd0   : >> { %v5936_v23 = vsel %vm4423_vm9, %v5920_v26, 1e+09  ;;  %6080 = vrot.lane.b32.xlu1 %v15316_v8, %s7986_s15  ;;  %6078 = vrot.lane.b32.xlu0 %v15311_v36, %s7986_s15 }
 0xdd1   : >> { %6082 = vrot.lane.b32.xlu2 %v15336_v55, %s7986_s15  ;;  %v5984_v51 = vrot.slane %v5936_v23, 1  ;;  %v15405_v44 = vmin.f32 %v15320_v52, %v6012_v62  ;;  %v5952_v60 = vrot.slane %v5936_v23, 7 }
 0xdd3   : >> { %v5887_v7 = vpop.permute.xlu0 %5886  ;;  %v5991_v59 = vsel %vm17544_vm5, %v5983_v21, %v5984_v51  ;;  %v5959_v32 = vsel %vm17547_vm7, %v5951_v16, %v5952_v60  ;;  %vm17567_vm7 = vcmp.gt.f32.partialorder %v17493_v31, 0.5 }
 0xdd4   : >> { %v5905_v6 = vmin.f32 %v15308_v29, %v5887_v7  ;;  %v5960_v29 = vsel %vm17528_vm1, %v5950_v19, %v5951_v16  ;;  %vm17550_vm1 = vmmov %vm17544_vm5 }
 0xdd5   : >> { %v6015_v52 = vmin.f32 %v5960_v29, %v5991_v59 }
 0xdd6   : >> { %v5921_v35 = vmin.f32 %v15124_v10, %v5905_v6 }
 0xdd7   : >> { %v15421_v43 = vmin.f32 %v5935_v56, %v6015_v52  ;;  %v5986_v56 = vrot.slane %v15340_v49, 1  ;;  %v17554_v52 = vld [vmem:[#allocation165_spill] sm:$0xff] }
 0xdd8   : >> { %6052 = vrot.lane.b32.xlu0 %v15405_v44, %s7985_s10  ;;  %6054 = vrot.lane.b32.xlu1 %v15401_v58, %s7985_s10  ;;  %v5937_v10 = vsel %vm17545_vm12, %v5921_v35, 1e+09  ;;  %vm17557_vm12 = vcmp.gt.f32.partialorder %v12721_v0, 0.5 }
 0xdd9   : >> { %6056 = vrot.lane.b32.xlu2 %v15409_v13, %s7985_s10  ;;  %v5985_v41 = vrot.slane %v5937_v10, 1  ;;  %v5953_v14 = vrot.slane %v5937_v10, 7  ;;  %v5988_v53 = vsel %vm17550_vm1, %v5986_v56, %v5987_v47  ;;  %vm17584_vm1 = vcmp.gt.f32.partialorder %v12784_v18, 0.5 }
 0xddb   : >> { %v5990_v46 = vsel %vm17546_vm6, %v5984_v51, %v5985_v41  ;;  %v5957_v4 = vsel %vm17548_vm15, %v5953_v14, %v5954_v1  ;;  %v5958_v19 = vsel %vm17549_vm3, %v5952_v60, %v5953_v14  ;;  %v5989_v26 = vsel %vm17544_vm5, %v5985_v41, %v5986_v56  ;;  %v17555_v60 = vld [vmem:[#allocation169_spill] sm:$0xff] }
 0xddc   : >> { %v6016_v25 = vmin.f32 %v5959_v32, %v5990_v46  ;;  %v6017_v1 = vmin.f32 %v5958_v19, %v5989_v26  ;;  %v6018_v54 = vmin.f32 %v5957_v4, %v5988_v53  ;;  %vm17559_vm6 = vcmp.gt.f32.partialorder %v12558_v42, 0.5 }
 0xddd   : >> { %vm17572_vm15 = vcmp.gt.f32.partialorder %v17370_v48, 0.5  ;;  %vm17574_vm3 = vcmp.gt.f32.partialorder %v12725_v30, 0.5  ;;  %vm17579_vm5 = vcmp.gt.f32.partialorder %v17453_v9, 0.5  ;;  %v17583_v9 = vld [vmem:[#allocation155_spill] sm:$0xff] }
 0xdde   : >> { %v15442_v63 = vmin.f32 %v5936_v23, %v6016_v25  ;;  %v15454_v21 = vmin.f32 %v5937_v10, %v6017_v1  ;;  %v15457_v12 = vmin.f32 %v15340_v49, %v6018_v54 }
 0xde0   : >> { %6084 = vrot.lane.b32.xlu1 %v15405_v44, %s7986_s15  ;;  %6058 = vrot.lane.b32.xlu0 %v15421_v43, %s7985_s10 }
 0xde1   : >> { %6086 = vrot.lane.b32.xlu2 %v15401_v58, %s7986_s15 }
 0xde8   : >> { %6090 = vrot.lane.b32.xlu1 %v15421_v43, %s7986_s15  ;;  %6088 = vrot.lane.b32.xlu0 %v15409_v13, %s7986_s15 }
 0xde9   : >> { %6060 = vrot.lane.b32.xlu2 %v15442_v63, %s7985_s10 }
 0xdf0   : >> { %6062 = vrot.lane.b32.xlu0 %v15454_v21, %s7985_s10  ;;  %6064 = vrot.lane.b32.xlu1 %v15457_v12, %s7985_s10 }
 0xdf1   : >> { %6066 = vrot.lane.b32.xlu2 %v15362_v20, %s7985_s10 }
 0xdf8   : >> { %6092 = vrot.lane.b32.xlu0 %v15442_v63, %s7986_s15  ;;  %6094 = vrot.lane.b32.xlu1 %v15454_v21, %s7986_s15 }
 0xdf9   : >> { %6096 = vrot.lane.b32.xlu2 %v15457_v12, %s7986_s15 }
 0xe00   : >> { %6098 = vrot.lane.b32.xlu0 %v15362_v20, %s7986_s15 }
 0xe02   : >> { %v6037_v11 = vpop.permute.xlu2 %6036 }
 0xe0b   : >> { %v6043_v22 = vpop.permute.xlu2 %6042 }
 0xe13   : >> { %v6049_v47 = vpop.permute.xlu2 %6048 }
 0xe1b   : >> { %v6071_v49 = vpop.permute.xlu2 %6070 }
 0xe22   : >> { %v15473_v23 = vpop.permute.xlu1 %6040  ;;  %v6039_v3 = vpop.permute.xlu0 %6038 }
 0xe23   : >> { %v6077_v39 = vpop.permute.xlu2 %6076 }
 0xe2a   : >> { %v6047_v27 = vpop.permute.xlu1 %6046  ;;  %v6045_v62 = vpop.permute.xlu0 %6044 }
 0xe2b   : >> { %v6104_v2 = vmin.f32 %v6045_v62, %v6077_v39  ;;  %v6083_v29 = vpop.permute.xlu2 %6082 }
 0xe2d   : >> { %v6120_v51 = vmin.f32 %v15314_v57, %v6104_v2 }
 0xe2f   : >> { %v15478_v51 = vsel %vm4415_vm8, %v6120_v51, 1e+09  }
 0xe30   : >> { %17551 = vst [vmem:[#allocation172_spill] sm:$0xff] %v15478_v51  ;;  %v17552_v16 = vmov %v15478_v51  ;;  %v6101_v51 = vmin.f32 %v6039_v3, %v6071_v49 }
 0xe31   : >> { %v6152_v41 = vsub.f32 %v17554_v52, %v17552_v16 }
 0xe32   : >> { %v6069_v7 = vpop.permute.xlu1 %6068  ;;  %v6051_v6 = vpop.permute.xlu0 %6050 }
 0xe33   : >> { %v6100_v35 = vmin.f32 %v6037_v11, %v6069_v7  ;;  %v6057_v25 = vpop.permute.xlu2 %6056  ;;  %v6107_v15 = vmin.f32 %v6051_v6, %v6083_v29  ;;  %v17561_v29 = vld [vmem:[#allocation164_spill] sm:$0xff] }
 0xe35   : >> { %v6116_v59 = vmin.f32 %v15252_v5, %v6100_v35 }
 0xe37   : >> { %v15483_v10 = vsel %vm4411_vm10, %v6116_v59, 1e+09  }
 0xe38   : >> { %17553 = vst [vmem:[#allocation173_spill] sm:$0xff] %v15483_v10  ;;  %v6148_v57 = vsub.f32 %v17555_v60, %v15483_v10  ;;  %v6117_v60 = vmin.f32 %v15283_v24, %v6101_v51  ;;  %v17569_v51 = vld [vmem:[#allocation156_spill] sm:$0xff] }
 0xe3a   : >> { %v6164_v46 = vmax.f32 %v6148_v57, %v6152_v41  ;;  %v6075_v32 = vpop.permute.xlu1 %6074  ;;  %v6073_v14 = vpop.permute.xlu0 %6072  ;;  %v15501_v49 = vsel %vm4412_vm2, %v6117_v60, 1e+09  }
 0xe3b   : >> { %v6087_v5 = vpop.permute.xlu2 %6086  ;;  %v6103_v10 = vmin.f32 %v6043_v22, %v6075_v32  ;;  %v6102_v3 = vmin.f32 %v15473_v23, %v6073_v14 }
 0xe3d   : >> { %v6119_v6 = vmin.f32 %v15285_v40, %v6103_v10  ;;  %v17564_v40 = vld [vmem:[#allocation161_spill] sm:$0xff] }
 0xe42   : >> { %v6081_v56 = vpop.permute.xlu1 %6080  ;;  %v6079_v4 = vpop.permute.xlu0 %6078 }
 0xe43   : >> { %v6061_v54 = vpop.permute.xlu2 %6060  ;;  %v6105_v39 = vmin.f32 %v6047_v27, %v6079_v4  ;;  %v6106_v16 = vmin.f32 %v6049_v47, %v6081_v56  ;;  %v6123_v47 = vmin.f32 %v15336_v55, %v6107_v15 }
 0xe45   : >> { %v6121_v41 = vmin.f32 %v15311_v36, %v6105_v39  ;;  %v6122_v14 = vmin.f32 %v15316_v8, %v6106_v16 }
 0xe4a   : >> { %v6055_v19 = vpop.permute.xlu1 %6054  ;;  %v6053_v26 = vpop.permute.xlu0 %6052 }
 0xe4b   : >> { %v15489_v2 = vpop.permute.xlu2 %6066  ;;  %v6109_v7 = vmin.f32 %v6055_v19, %v6087_v5  ;;  %v15497_v5 = vsel %vm4416_vm11, %v6121_v41, 1e+09   ;;  %v17577_v41 = vld [vmem:[#allocation163_spill] sm:$0xff] }
 0xe4c   : >> { %v17556_v27 = vmov %v15497_v5 }
 0xe4d   : >> { %v6125_v57 = vmin.f32 %v15401_v58, %v6109_v7  ;;  %v6153_v32 = vsub.f32 %v17561_v29, %v17556_v27  ;;  %v15538_v7 = vsel %vm4417_vm13, %v6122_v14, 1e+09  }
 0xe52   : >> { %v6085_v53 = vpop.permute.xlu1 %6084  ;;  %v6059_v1 = vpop.permute.xlu0 %6058 }
 0xe53   : >> { %v6108_v35 = vmin.f32 %v6053_v26, %v6085_v53  ;;  %v6097_v36 = vpop.permute.xlu2 %6096 }
 0xe55   : >> { %v6124_v17 = vmin.f32 %v15405_v44, %v6108_v35  ;;  %v15506_v35 = vsel %vm17557_vm12, %v6125_v57, 1e+09   ;;  %v15530_v57 = vsel %vm4418_vm0, %v6123_v47, 1e+09  }
 0xe56   : >> { %v17558_v24 = vmov %v15506_v35 }
 0xe57   : >> { %v15510_v53 = vsel %vm17559_vm6, %v6124_v17, 1e+09   ;;  %v17562_v17 = vld [vmem:[#allocation168_spill] sm:$0xff] }
 0xe58   : >> { %v17560_v44 = vmov %v15510_v53  ;;  %v6149_v5 = vsub.f32 %v17562_v17, %v15501_v49  ;;  %v6118_v53 = vmin.f32 %v15280_v37, %v6102_v3  ;;  %v15534_v37 = vsel %vm4414_vm14, %v6119_v6, 1e+09   ;;  %v17580_v6 = vld [vmem:[#allocation167_spill] sm:$0xff] }
 0xe59   : >> { %v6156_v55 = vsub.f32 %v17564_v40, %v17560_v44 }
 0xe5a   : >> { %v6091_v11 = vpop.permute.xlu1 %6090  ;;  %v6089_v62 = vpop.permute.xlu0 %6088 }
 0xe5b   : >> { %v6111_v58 = vmin.f32 %v6059_v1, %v6091_v11  ;;  %v6110_v22 = vmin.f32 %v6057_v25, %v6089_v62  ;;  %v17563_v25 = vld [vmem:[#allocation160_spill] sm:$0xff]  ;;  %v6165_v11 = vmax.f32 %v6149_v5, %v6153_v32  ;;  %v17566_v62 = vmov %v15538_v7  ;;  %v17581_v32 = vld [vmem:[#allocation158_spill] sm:$0xff] }
 0xe5c   : >> { %v6157_v15 = vsub.f32 %v17563_v25, %v17558_v24  ;;  %v6168_v39 = vmax.f32 %v6164_v46, %v6156_v55  ;;  %v15555_v55 = vsel %vm4413_vm4, %v6118_v53, 1e+09   ;;  %v17576_v46 = vld [vmem:[#allocation166_spill] sm:$0xff]  ;;  %v6154_v60 = vsub.f32 %v17577_v41, %v17566_v62 }
 0xe5d   : >> { %v6127_v10 = vmin.f32 %v15421_v43, %v6111_v58  ;;  %v6126_v1 = vmin.f32 %v15409_v13, %v6110_v22  ;;  %v6151_v7 = vsub.f32 %v17576_v46, %v15534_v37  ;;  %v17578_v22 = vld [vmem:[#allocation162_spill] sm:$0xff]  ;;  %v17600_v46 = vmov %v15534_v37 }
 0xe62   : >> { %v6065_v59 = vpop.permute.xlu1 %6064  ;;  %v6063_v52 = vpop.permute.xlu0 %6062 }
 0xe63   : >> { %v6114_v4 = vmin.f32 %v6065_v59, %v6097_v36  ;;  %v17570_v59 = vld [vmem:[#allocation157_spill] sm:$0xff]  ;;  %v15559_v36 = vsel %vm17572_vm15, %v6127_v10, 1e+09  }
 0xe64   : >> { %v17573_v31 = vmov %v15559_v36 }
 0xe65   : >> { %v6130_v43 = vmin.f32 %v15457_v12, %v6114_v4  ;;  %v17571_v12 = vmov %v15555_v55 }
 0xe67   : >> { %v15573_v48 = vsel %vm17579_vm5, %v6130_v43, 1e+09  }
 0xe68   : >> { %v6162_v5 = vsub.f32 %v17583_v9, %v15573_v48 }
 0xe6a   : >> { %v6095_v56 = vpop.permute.xlu1 %6094  ;;  %v6093_v23 = vpop.permute.xlu0 %6092 }
 0xe6b   : >> { %v6113_v19 = vmin.f32 %v6063_v52, %v6095_v56  ;;  %v6112_v26 = vmin.f32 %v6061_v54, %v6093_v23  ;;  %v17565_v54 = vmov %v15530_v57  ;;  %v6159_v56 = vsub.f32 %v17581_v32, %v17573_v31  ;;  %v17582_v23 = vld [vmem:[#allocation159_spill] sm:$0xff] }
 0xe6c   : >> { %v6155_v47 = vsub.f32 %v17578_v22, %v17565_v54  ;;  %v17603_v22 = vld [vmem:[#allocation173_spill] sm:$0xff] }
 0xe6d   : >> { %v6129_v8 = vmin.f32 %v15454_v21, %v6113_v19  ;;  %v6128_v16 = vmin.f32 %v15442_v63, %v6112_v26  ;;  %v6169_v21 = vmax.f32 %v6165_v11, %v6157_v15  ;;  %v17586_v15 = vld [vmem:[#allocation154_spill] sm:$0xff] }
 0xe6e   : >> { %v6167_v26 = vmax.f32 %v6151_v7, %v6155_v47  ;;  %v17589_v47 = vmov %v15573_v48  ;;  %v17597_v7 = vmov %v17566_v62 }
 0xe6f   : >> { %v15543_v29 = vsel %vm17567_vm7, %v6129_v8, 1e+09   ;;  %v15547_v63 = vsel %vm4423_vm9, %v6128_v16, 1e+09   ;;  %v15563_v8 = vsel %vm17574_vm3, %v6126_v1, 1e+09  }
 0xe70   : >> { %v17568_v13 = vmov %v15543_v29  ;;  %v6160_v52 = vsub.f32 %v17570_v59, %v15547_v63  ;;  %v17575_v50 = vmov %v15563_v8  ;;  %v6150_v29 = vsub.f32 %v17580_v6, %v17571_v12 }
 0xe71   : >> { %v6161_v35 = vsub.f32 %v17569_v51, %v17568_v13  ;;  %v6158_v14 = vsub.f32 %v17582_v23, %v17575_v50  ;;  %v6171_v53 = vmax.f32 %v6167_v26, %v6159_v56 }
 0xe72   : >> { %v6172_v3 = vmax.f32 %v6168_v39, %v6160_v52  ;;  %v6099_v58 = vpop.permute.xlu0 %6098  ;;  %v6166_v17 = vmax.f32 %v6150_v29, %v6154_v60  ;;  %v17590_v29 = vmov %v17568_v13 }
 0xe73   : >> { %v6173_v57 = vmax.f32 %v6169_v21, %v6161_v35  ;;  %v6115_v36 = vmin.f32 %v15489_v2, %v6099_v58  ;;  %v17594_v35 = vmov %v17558_v24 }
 0xe74   : >> { %v6170_v25 = vmax.f32 %v6166_v17, %v6158_v14  ;;  %v17602_v14 = vmov %v15501_v49 }
 0xe75   : >> { %v6176_v4 = vmax.f32 %v6172_v3, %v6173_v57  ;;  %v6131_v19 = vmin.f32 %v15362_v20, %v6115_v36  ;;  %v17592_v36 = vmov %v17573_v31  ;;  %v17596_v57 = vmov %v17565_v54 }
 0xe76   : >> { %v6174_v55 = vmax.f32 %v6170_v25, %v6162_v5  ;;  %v17598_v5 = vmov %v17556_v27 }
 0xe77   : >> { %v15587_v58 = vsel %vm17584_vm1, %v6131_v19, 1e+09  }
 0xe78   : >> { %v17585_v2 = vmov %v15587_v58 }
 0xe79   : >> { %v6163_v40 = vsub.f32 %v17586_v15, %v17585_v2  ;;  %v17588_v58 = vmov %v17585_v2 }
 0xe7b   : >> { %v6175_v10 = vmax.f32 %v6171_v53, %v6163_v40  ;;  %v17595_v53 = vmov %v17560_v44 }
 0xe7d   : >> { %v6177_v1 = vmax.f32 %v6174_v55, %v6175_v10  ;;  %v17601_v55 = vmov %v17571_v12 }
 0xe7f   : >> { %v6178_v8 = vmax.f32 %v6176_v4, %v6177_v1 }
 0xe81   : >> { %6179 = vmax.xlane.f32.xlu1 %v6178_v8  ;;  %v17593_v8 = vmov %v17575_v50 }
 0xef4   : >> { %v6180_v20 = vpop.xlane.xlu1 %6179 }
 0xef5   : >> { %v6181_v16 = vrot.slane %v6180_v20, 4 }
 0xef7   : >> { %v6182_v11 = vmax.f32 %v6180_v20, %v6181_v16  ;;  %v17591_v20 = vmov %v15547_v63 }
 0xef9   : >> { %v6183_v43 = vrot.slane %v6182_v11, 2 }
 0xefb   : >> { %v6184_v21 = vmax.f32 %v6182_v11, %v6183_v43 }
 0xefd   : >> { %v6185_v39 = vrot.slane %v6184_v21, 1 }
 0xeff   : >> { %v6186_v51 = vmax.f32 %v6184_v21, %v6185_v39 }
 0xf01   : >> { %6829 = vpush %v6186_v51  ;;  %v17599_v51 = vld [vmem:[#allocation172_spill] sm:$0xff] }
 0xf32   : >> { %s6830_s19 = spop %6829 }
 0xf33   : >> { %p6188_p11 = scmp.gt.f32.partialorder %s6830_s19, 0.0 }
 0xf35   : >> { %p15592_p9 = pnand %p6188_p11, %p4478_p2 }
 0xf36   : > { %v17604_v59 = vld [vmem:[#allocation149_spill] sm:$0xff] (%p15592_p9)  ;;  %6208 = vst [vmem:[%s8264_s11 + $0x8] sm:$0xff] (%p15592_p9), %v12701_v28  ;;  %v17605_v35 = vld [vmem:[#allocation148_spill] sm:$0xff] (%p15592_p9)  ;;  %v17606_v52 = vld [vmem:[#allocation150_spill] sm:$0xff] (%p15592_p9)  ;;  %v6240_v51 = vsel (%p15592_p9), %vm4412_vm2, %v15501_v49, 0.0  ;;  %s15754_s14 = sshll.u32 (%p15592_p9), %s8055_s9, 7 }
 0xf37   : > { %4483 = sbr.rel (!%p15592_p9) target bundleno = 2201 (0x899), region = 175  ;;  %6207 = vst [vmem:[%s8264_s11] sm:$0xff] (%p15592_p9), %v17604_v59  ;;  %v17607_v46 = vld [vmem:[#allocation151_spill] sm:$0xff] (%p15592_p9)  ;;  %v17608_v7 = vld [vmem:[#allocation152_spill] sm:$0xff] (%p15592_p9)  ;;  %v17609_v41 = vld [vmem:[#allocation153_spill] sm:$0xff] (%p15592_p9)  ;;  %v6242_v59 = vsel (%p15592_p9), %vm4414_vm14, %v15534_v37, 0.0  ;;  %s6276_s26 = sand.u32 (%p15592_p9), 1, %s8055_s9  }
 0xf38   : > { %6209 = vst [vmem:[%s8264_s11 + $0x10] sm:$0xff] (%p15592_p9), %v12689_v34  ;;  %v17610_v60 = vld [vmem:[#allocation134_spill] sm:$0xff] (%p15592_p9)  ;;  %v17611_v57 = vld [vmem:[#allocation132_spill] sm:$0xff] (%p15592_p9)  ;;  %v17614_v22 = vld [vmem:[#allocation133_spill] sm:$0xff] (%p15592_p9)  ;;  %v6244_v34 = vsel (%p15592_p9), %vm4416_vm11, %v17556_v27, 0.0  ;;  %s6315_s3 = scalar_lea.hbm (%p15592_p9), %s15958_s6, %s15754_s14  ;;  %v6246_v37 = vsel (%p15592_p9), %vm4418_vm0, %v17565_v54, 0.0  ;;  %s6332_s19 = scalar_lea.hbm (%p15592_p9), %s15959_s7, %s15754_s14 }
 0xf39   : > { %6210 = vst [vmem:[%s8264_s11 + $0x18] sm:$0xff] (%p15592_p9), %v12437_v33  ;;  %v17612_v3 = vld [vmem:[#allocation138_spill] sm:$0xff] (%p15592_p9)  ;;  %v17613_v58 = vld [vmem:[#allocation136_spill] sm:$0xff] (%p15592_p9)  ;;  %v17616_v36 = vld [vmem:[#allocation137_spill] sm:$0xff] (%p15592_p9)  ;;  %v6245_v33 = vsel (%p15592_p9), %vm4417_vm13, %v17566_v62, 0.0  ;;  %s6316_s23 = sshll.u32 (%p15592_p9), %s8264_s11, 4  ;;  %s6298_s18 = scalar_lea.hbm (%p15592_p9), %s15957_s5, %s15754_s14  ;;  %s15800_s23 = int_to_ptr.vmem [resolvable:$true] %s6316_s23 }
 0xf3a   : > { %6211 = vst [vmem:[%s8264_s11 + $0x20] sm:$0xff] (%p15592_p9), %v17605_v35  ;;  %v17615_v47 = vld [vmem:[#allocation140_spill] sm:$0xff] (%p15592_p9)  ;;  %v17617_v6 = vld [vmem:[#allocation135_spill] sm:$0xff] (%p15592_p9)  ;;  %v17618_v29 = vld [vmem:[#allocation141_spill] sm:$0xff] (%p15592_p9)  ;;  %vm17644_vm14 = vcmp.gt.f32.partialorder (%p15592_p9), %v12558_v42, 0.5  ;;  %s15786_s22 = sshll.u32 (%p15592_p9), %s6315_s3, 4  ;;  %s6349_s15 = scalar_lea.hbm (%p15592_p9), %s15960_s8, %s15754_s14  ;;  %s6319_s22 = int_to_ptr.hbm [resolvable:$true] %s15786_s22 }
 0xf3b   : > { %6212 = vst [vmem:[%s8264_s11 + $0x28] sm:$0xff] (%p15592_p9), %v12495_v38  ;;  %v17619_v32 = vld [vmem:[#allocation139_spill] sm:$0xff] (%p15592_p9)  ;;  %v17620_v56 = vld [vmem:[#allocation146_spill] sm:$0xff] (%p15592_p9)  ;;  %v17624_v19 = vld [vmem:[#allocation145_spill] sm:$0xff] (%p15592_p9)  ;;  %v6247_v38 = vsel (%p15592_p9), %vm17644_vm14, %v17560_v44, 0.0  ;;  %vm17646_vm11 = vcmp.gt.f32.partialorder (%p15592_p9), %v12725_v30, 0.5 }
 0xf3c   : > { %6213 = vst [vmem:[%s8264_s11 + $0x30] sm:$0xff] %v12498_v61  ;;  %v17621_v23 = vld [vmem:[#allocation143_spill] sm:$0xff]  ;;  %v17622_v14 = vld [vmem:[#allocation142_spill] sm:$0xff]  ;;  %v17625_v26 = vld [vmem:[#allocation144_spill] sm:$0xff]  ;;  %v6249_v61 = vsel %vm17646_vm11, %v17575_v50, 0.0  ;;  %vm17647_vm13 = vcmp.gt.f32.partialorder %v17606_v52, 0.5 }
 0xf3d   : > { %6214 = vst [vmem:[%s8264_s11 + $0x38] sm:$0xff] %v12555_v45  ;;  %v17623_v4 = vld [vmem:[#allocation147_spill] sm:$0xff]  ;;  %v17626_v17 = vld [vmem:[#allocation37_spill] sm:$0xff]  ;;  %v17627_v9 = vld [vmem:[#allocation38_spill] sm:$0xff]  ;;  %s15811_s2 = sshll.u32 %s6332_s19, 4  ;;  %vm17649_vm0 = vcmp.gt.f32.partialorder %v17608_v7, 0.5 }
 0xf3e   : > { %6215 = vst [vmem:[%s8264_s11 + $0x40] sm:$0xff] %v12558_v42  ;;  %v17628_v5 = vld [vmem:[#allocation23_spill] sm:$0xff]  ;;  %v17629_v53 = vld [vmem:[#allocation24_spill] sm:$0xff]  ;;  %v17630_v25 = vld [vmem:[#allocation25_spill] sm:$0xff]  ;;  %v6250_v42 = vsel %vm17647_vm13, %v17573_v31, 0.0  ;;  %17648 = sst [smem:[#allocation174_spill]] %s15811_s2 }
 0xf3f   : > { %6216 = vst [vmem:[%s8264_s11 + $0x48] sm:$0xff] %v12721_v0  ;;  %v17631_v15 = vld [vmem:[#allocation26_spill] sm:$0xff]  ;;  %v17632_v40 = vld [vmem:[#allocation27_spill] sm:$0xff]  ;;  %v17633_v55 = vld [vmem:[#allocation28_spill] sm:$0xff]  ;;  %s6299_s19 = sshll.u32 %s8261_s1, 4  ;;  %s6333_s14 = sshll.u32 %s8267_s16, 4  ;;  %s15842_s19 = int_to_ptr.vmem [resolvable:$true] %s6299_s19  ;;  %s15846_s14 = int_to_ptr.vmem [resolvable:$true] %s6333_s14 }
 0xf40   : > { %6217 = vst [vmem:[%s8264_s11 + $0x50] sm:$0xff] %v12725_v30  ;;  %v17634_v10 = vld [vmem:[#allocation29_spill] sm:$0xff]  ;;  %v17635_v1 = vld [vmem:[#allocation30_spill] sm:$0xff]  ;;  %v17636_v8 = vld [vmem:[#allocation31_spill] sm:$0xff]  ;;  %v6252_v30 = vsel %vm17649_vm0, %v17568_v13, 0.0  ;;  %vm17652_vm2 = vcmp.gt.f32.partialorder %v12784_v18, 0.5 }
 0xf41   : > { %6218 = vst [vmem:[%s8264_s11 + $0x58] sm:$0xff] %v17606_v52  ;;  %v17637_v20 = vld [vmem:[#allocation32_spill] sm:$0xff]  ;;  %v17638_v16 = vld [vmem:[#allocation33_spill] sm:$0xff]  ;;  %v17639_v11 = vld [vmem:[#allocation34_spill] sm:$0xff]  ;;  %s6350_s13 = sshll.u32 %s8270_s24, 4  ;;  %s7550_s2 = scalar_lea.hbm %s15958_s6, 256  ;;  %s15849_s13 = int_to_ptr.vmem [resolvable:$true] %s6350_s13 }
 0xf42   : > { %6219 = vst [vmem:[%s8264_s11 + $0x60] sm:$0xff] %v17607_v46  ;;  %v17640_v43 = vld [vmem:[#allocation173_spill] sm:$0xff]  ;;  %v17643_v28 = vld [vmem:[#allocation172_spill] sm:$0xff] }
 0xf43   : > { %6220 = vst [vmem:[%s8264_s11 + $0x68] sm:$0xff] %v17608_v7  ;;  %v6239_v21 = vsel %vm4411_vm10, %v17640_v43, 0.0  ;;  %v17641_v39 = vld [vmem:[#allocation35_spill] sm:$0xff]  ;;  %v6243_v49 = vsel %vm4415_vm8, %v17643_v28, 0.0  ;;  %vm17645_vm8 = vcmp.gt.f32.partialorder %v12721_v0, 0.5  ;;  %v6251_v0 = vsel %vm4423_vm9, %v15547_v63, 0.0 }
 0xf44   : > { %6221 = vst [vmem:[%s8264_s11 + $0x70] sm:$0xff] %v17609_v41  ;;  %v6248_v45 = vsel %vm17645_vm8, %v17558_v24, 0.0  ;;  %v6254_v24 = vsel %vm17652_vm2, %v17585_v2, 0.0 }
 0xf45   : > { %6222 = vst [vmem:[%s8264_s11 + $0x78] sm:$0xff] %v12784_v18  ;;  %s15826_s11 = sshll.u32 %s6298_s18, 4  ;;  %s7544_s18 = sshra.s32 %s6319_s22, 4  ;;  %s7545_s18 = int_to_ptr.hbm [resolvable:$true] %s7544_s18 }
 0xf46   : > { %6191 = vst [vmem:[%s8261_s1] sm:$0xff] %v17610_v60  ;;  %v17642_v60 = vld [vmem:[#allocation36_spill] sm:$0xff]  ;;  %17650 = sst [smem:[#allocation175_spill]] %s15826_s11  ;;  %s7546_s3 = scalar_lea.hbm %s7545_s18, 128 }
 0xf47   : > { %6192 = vst [vmem:[%s8261_s1 + $0x8] sm:$0xff] %v17611_v57  ;;  %v6241_v57 = vsel %vm4413_vm4, %v17571_v12, 0.0  ;;  %vm17651_vm4 = vcmp.gt.f32.partialorder %v17609_v41, 0.5  ;;  %p7547_p10 = scmp.ne.s32.totalorder %s7545_s18, %s7546_s3  ;;  %p7551_p0 = scmp.lt.s32.totalorder %s7545_s18, %s15958_s6 }
 0xf48   : > { %6193 = vst [vmem:[%s8261_s1 + $0x10] sm:$0xff] %v17612_v3  ;;  %v6253_v27 = vsel %vm17651_vm4, %v15573_v48, 0.0  ;;  %p7552_p5 = scmp.lt.s32.totalorder %s7550_s2, %s7546_s3 }
 0xf49   : > { %6194 = vst [vmem:[%s8261_s1 + $0x18] sm:$0xff] %v17613_v58  ;;  %p7548_p12 = pnand %p7547_p10, %p8126_p3 }
 0xf4a   : > { %6195 = vst [vmem:[%s8261_s1 + $0x20] sm:$0xff] %v17614_v22  ;;  %p7553_p7 = por %p7552_p5, %p7551_p0 }
 0xf4b   : > { %6196 = vst [vmem:[%s8261_s1 + $0x28] sm:$0xff] %v17615_v47  ;;  %p7549_p13 = pneg %p7548_p12 }
 0xf4c   : > { %6197 = vst [vmem:[%s8261_s1 + $0x30] sm:$0xff] %v17616_v36 }
 0xf4d   : > { %6198 = vst [vmem:[%s8261_s1 + $0x38] sm:$0xff] %v17617_v6  ;;  %p7554_p1 = pnand %p7553_p7, %p7549_p13 }
 0xf4e   : > { %6199 = vst [vmem:[%s8261_s1 + $0x40] sm:$0xff] %v17618_v29 }
 0xf4f   : > { %6200 = vst [vmem:[%s8261_s1 + $0x48] sm:$0xff] %v17619_v32 }
 0xf50   : > { %6201 = vst [vmem:[%s8261_s1 + $0x50] sm:$0xff] %v17620_v56 }
 0xf51   : > { %6202 = vst [vmem:[%s8261_s1 + $0x58] sm:$0xff] %v17621_v23 }
 0xf52   : > { %6203 = vst [vmem:[%s8261_s1 + $0x60] sm:$0xff] %v17622_v14 }
 0xf53   : > { %6204 = vst [vmem:[%s8261_s1 + $0x68] sm:$0xff] %v17623_v4 }
 0xf54   : > { %6205 = vst [vmem:[%s8261_s1 + $0x70] sm:$0xff] %v17624_v19 }
 0xf55   : > { %6206 = vst [vmem:[%s8261_s1 + $0x78] sm:$0xff] %v17625_v26  ;;  %s15839_s1 = sshll.u32 %s6349_s15, 4 }
 0xf56   : > { %6223 = vst [vmem:[%s8267_s16] sm:$0xff] %v17626_v17  ;;  %17653 = sst [smem:[#allocation176_spill]] %s15839_s1 }
 0xf57   : > { %6224 = vst [vmem:[%s8267_s16 + $0x8] sm:$0xff] %v17627_v9 }
 0xf58   : > { %6225 = vst [vmem:[%s8267_s16 + $0x10] sm:$0xff] %v17628_v5 }
 0xf59   : > { %6226 = vst [vmem:[%s8267_s16 + $0x18] sm:$0xff] %v17629_v53 }
 0xf5a   : > { %6227 = vst [vmem:[%s8267_s16 + $0x20] sm:$0xff] %v17630_v25 }
 0xf5b   : > { %6228 = vst [vmem:[%s8267_s16 + $0x28] sm:$0xff] %v17631_v15 }
 0xf5c   : > { %6229 = vst [vmem:[%s8267_s16 + $0x30] sm:$0xff] %v17632_v40 }
 0xf5d   : > { %6230 = vst [vmem:[%s8267_s16 + $0x38] sm:$0xff] %v17633_v55 }
 0xf5e   : > { %6231 = vst [vmem:[%s8267_s16 + $0x40] sm:$0xff] %v17634_v10 }
 0xf5f   : > { %6232 = vst [vmem:[%s8267_s16 + $0x48] sm:$0xff] %v17635_v1 }
 0xf60   : > { %6233 = vst [vmem:[%s8267_s16 + $0x50] sm:$0xff] %v17636_v8 }
 0xf61   : > { %6234 = vst [vmem:[%s8267_s16 + $0x58] sm:$0xff] %v17637_v20 }
 0xf62   : > { %6235 = vst [vmem:[%s8267_s16 + $0x60] sm:$0xff] %v17638_v16 }
 0xf63   : > { %6236 = vst [vmem:[%s8267_s16 + $0x68] sm:$0xff] %v17639_v11 }
 0xf64   : > { %6237 = vst [vmem:[%s8267_s16 + $0x70] sm:$0xff] %v17641_v39 }
 0xf65   : > { %6238 = vst [vmem:[%s8267_s16 + $0x78] sm:$0xff] %v17642_v60  ;;  %s15854_s16 = scalar_lea.sflag [#allocation13], %s6276_s26 }
 0xf66   : > { %6255 = vst [vmem:[%s8270_s24] sm:$0xff] %v6239_v21 }
 0xf67   : > { %6256 = vst [vmem:[%s8270_s24 + $0x8] sm:$0xff] %v6240_v51 }
 0xf68   : > { %6257 = vst [vmem:[%s8270_s24 + $0x10] sm:$0xff] %v6241_v57 }
 0xf69   : > { %6258 = vst [vmem:[%s8270_s24 + $0x18] sm:$0xff] %v6242_v59 }
 0xf6a   : > { %6259 = vst [vmem:[%s8270_s24 + $0x20] sm:$0xff] %v6243_v49 }
 0xf6b   : > { %6260 = vst [vmem:[%s8270_s24 + $0x28] sm:$0xff] %v6244_v34 }
 0xf6c   : > { %6261 = vst [vmem:[%s8270_s24 + $0x30] sm:$0xff] %v6245_v33 }
 0xf6d   : > { %6262 = vst [vmem:[%s8270_s24 + $0x38] sm:$0xff] %v6246_v37 }
 0xf6e   : > { %6263 = vst [vmem:[%s8270_s24 + $0x40] sm:$0xff] %v6247_v38 }
 0xf6f   : > { %6264 = vst [vmem:[%s8270_s24 + $0x48] sm:$0xff] %v6248_v45 }
 0xf70   : > { %6265 = vst [vmem:[%s8270_s24 + $0x50] sm:$0xff] %v6249_v61 }
 0xf71   : > { %6266 = vst [vmem:[%s8270_s24 + $0x58] sm:$0xff] %v6250_v42 }
 0xf72   : > { %6267 = vst [vmem:[%s8270_s24 + $0x60] sm:$0xff] %v6251_v0 }
 0xf73   : > { %6268 = vst [vmem:[%s8270_s24 + $0x68] sm:$0xff] %v6252_v30 }
 0xf74   : > { %6269 = vst [vmem:[%s8270_s24 + $0x70] sm:$0xff] %v6253_v27 }
 0xf75   : > { %6270 = vst [vmem:[%s8270_s24 + $0x78] sm:$0xff] %v6254_v24 }
 0xf76   : > { %7557 = shalt.err (!%p7554_p1)
}
 0xf77   : > { %s7987_s9 = smov 128   ;;  %s17654_s26 = sld [smem:[#allocation175_spill]] }
 0xf78   : > { %s7988_s1 = smov 8   ;;  %s6272_s11 = scalar_lea.sflag [#allocation4], %s8159_s17 }
 0xf79   : > { %6850 = dma.vmem_to_hbm [thread:$0]  (%p8126_p3), %s15800_s23, 2048, %s6319_s22, %s15854_s16, %s7987_s9, %s7987_s9, %s7988_s1  }
 0xf7a   : > { %s7578_s24 = scalar_lea.hbm %s15957_s5, 256 }
 0xf7d   : > { %s17655_s2 = int_to_ptr.hbm [resolvable:$true] %s17654_s26 }
 0xf7e   : > { %s7572_s18 = sshra.s32 %s17655_s2, 4  ;;  %s7573_s18 = int_to_ptr.hbm [resolvable:$true] %s7572_s18 }
 0xf7f   : > { %s7574_s3 = scalar_lea.hbm %s7573_s18, 128  ;;  %p7579_p2 = scmp.lt.s32.totalorder %s7573_s18, %s15957_s5 }
 0xf80   : > { %p7575_p4 = scmp.ne.s32.totalorder %s7573_s18, %s7574_s3  ;;  %p7580_p9 = scmp.lt.s32.totalorder %s7578_s24, %s7574_s3 }
 0xf82   : > { %p7576_p8 = pnand %p7575_p4, %p8126_p3  ;;  %p7581_p10 = por %p7580_p9, %p7579_p2 }
 0xf84   : > { %p7577_p11 = pneg %p7576_p8 }
 0xf86   : > { %p7582_p12 = pnand %p7581_p10, %p7577_p11 }
 0xf88   : > { %7585 = shalt.err (!%p7582_p12)
}
 0xf89   : > { %s17656_s23 = smov %s17655_s2  ;;  %s17657_s22 = sld [smem:[#allocation174_spill]] }
 0xf8a   : > { %6849 = dma.vmem_to_hbm [thread:$0]  (%p8126_p3), %s15842_s19, 2048, %s17656_s23, %s6272_s11, %s7987_s9, %s7987_s9, %s7988_s1  }
 0xf8b   : > { %s7606_s3 = scalar_lea.hbm %s15959_s7, 256 }
 0xf8f   : > { %s17658_s2 = int_to_ptr.hbm [resolvable:$true] %s17657_s22 }
 0xf90   : > { %s7600_s10 = sshra.s32 %s17658_s2, 4  ;;  %s7601_s10 = int_to_ptr.hbm [resolvable:$true] %s7600_s10 }
 0xf91   : > { %s7602_s0 = scalar_lea.hbm %s7601_s10, 128  ;;  %p7607_p7 = scmp.lt.s32.totalorder %s7601_s10, %s15959_s7 }
 0xf92   : > { %p7603_p13 = scmp.ne.s32.totalorder %s7601_s10, %s7602_s0  ;;  %p7608_p1 = scmp.lt.s32.totalorder %s7606_s3, %s7602_s0 }
 0xf94   : > { %p7604_p0 = pnand %p7603_p13, %p8126_p3  ;;  %p7609_p4 = por %p7608_p1, %p7607_p7 }
 0xf96   : > { %p7605_p5 = pneg %p7604_p0 }
 0xf98   : > { %p7610_p8 = pnand %p7609_p4, %p7605_p5 }
 0xf9a   : > { %7613 = shalt.err (!%p7610_p8)
}
 0xf9b   : > { %s17659_s19 = smov %s17658_s2  ;;  %s17660_s26 = sld [smem:[#allocation176_spill]] }
 0xf9c   : > { %6851 = dma.vmem_to_hbm [thread:$0]  (%p8126_p3), %s15846_s14, 2048, %s17659_s19, %s15854_s16, %s7987_s9, %s7987_s9, %s7988_s1  }
 0xf9d   : > { %s6287_s11 = scalar_lea.sflag [#allocation16], %s8159_s17  ;;  %s7634_s18 = scalar_lea.hbm %s15960_s8, 256 }
 0xfa1   : > { %s17661_s23 = int_to_ptr.hbm [resolvable:$true] %s17660_s26 }
 0xfa2   : > { %s7628_s2 = sshra.s32 %s17661_s23, 4  ;;  %s7629_s2 = int_to_ptr.hbm [resolvable:$true] %s7628_s2 }
 0xfa3   : > { %s7630_s10 = scalar_lea.hbm %s7629_s2, 128  ;;  %p7635_p10 = scmp.lt.s32.totalorder %s7629_s2, %s15960_s8 }
 0xfa4   : > { %p7631_p11 = scmp.ne.s32.totalorder %s7629_s2, %s7630_s10  ;;  %p7636_p12 = scmp.lt.s32.totalorder %s7634_s18, %s7630_s10 }
 0xfa6   : > { %p7632_p2 = pnand %p7631_p11, %p8126_p3  ;;  %p7637_p13 = por %p7636_p12, %p7635_p10 }
 0xfa8   : > { %p7633_p9 = pneg %p7632_p2 }
 0xfaa   : > { %p7638_p0 = pnand %p7637_p13, %p7633_p9 }
 0xfac   : > { %7641 = shalt.err (!%p7638_p0)
}
 0xfad   : > { %s17662_s17 = smov %s17661_s23 }
 0xfae   : > { %6852 = dma.vmem_to_hbm [thread:$0]  (%p8126_p3), %s15849_s13, 2048, %s17662_s17, %s6287_s11, %s7987_s9, %s7987_s9, %s7988_s1  }
 0xfaf PF: > { %s6367_s14 = sand.u32 1, %s7820_s27   ;;  %p17663_p5 = scmp.ge.s32.totalorder %s7832_s30, 2 }
 0xfb0   : > { %s6368_s16 = scalar_lea.sflag [#allocation4], %s6367_s14 }
 0xfb1   : > { %p6875_p7 = pnand %p17663_p5, %p8071_p6 }
 0xfb3   : > { %p6876_p1 = pneg %p6875_p7 }
 0xfb5   : > { %7807 = dma.done.wait (%p6876_p1), %s6368_s16, 2048  }
 0xfb6   : > { %7809 = vsyncadd (%p6876_p1), %s6368_s16, 4294965248  ;;  %s17664_s25 = sadd.s32 4294967294, %s7832_s30  }
 0xfb7   : > { %s6377_s15 = sand.u32 1, %s17664_s25  }
 0xfb8   : > { %s6378_s24 = scalar_lea.sflag [#allocation13], %s6377_s15 }
 0xfb9   : > { %7811 = dma.done.wait (%p6876_p1), %s6378_s24, 4096  }
 0xfba   : > { %7813 = vsyncadd (%p6876_p1), %s6378_s24, 4294963200  ;;  %s6398_s19 = scalar_lea.sflag [#allocation16], %s6367_s14 }
 0xfbb   : > { %7815 = dma.done.wait (%p6876_p1), %s6398_s19, 2048  }
 0xfbc   : > { %7817 = vsyncadd (%p6876_p1), %s6398_s19, 4294965248  ;;  %p30_p3 = scmp.ge.s32.totalorder %s8116_s20, 4   ;;  %s17665_s27 = smov %s7824_s28 }
 0xfbd   : > { %s17666_s28 = smov %s7828_s29  ;;  %s17667_s29 = smov %s8132_s21 }
 0xfbe   : > { %s17668_s30 = smov %s8116_s20  ;;  %32 = sbr.rel (!%p30_p3) target bundleno = 17 (0x11), region = 186 }
 0xfc3   :  { %6404 = vsyncpa [#allocation3], 1 }
 0xfc4   :  { %6406 = vsyncpa [#allocation3 + $0x1], 1 }
 0xfc5   :  { %6407 = vsyncpa [#allocation6], 1 }
 0xfc6   :  { %6408 = vsyncpa [#allocation9], 1 }
 0xfc7   :  { %6409 = vsyncpa [#allocation4], 1 }
 0xfc8   :  { %6411 = vsyncpa [#allocation4 + $0x1], 1 }
 0xfc9   :  { %6412 = vsyncpa [#allocation13], 1 }
 0xfca   :  { %6414 = vsyncpa [#allocation13 + $0x1], 1 }
 0xfcb   :  { %6415 = vsyncpa [#allocation16], 1 }
 0xfcc   :  { %6417 = vsyncpa [#allocation16 + $0x1], 1 }

</bundles_post_ra>
